<compile_context>
chip_gen: v7x
topology: tpu7x:2x2x1
jax: 0.10.0
libtpu: 0.0.40
codegen_flags: <defaults>
</compile_context>

<pallas_src>
import functools

import jax
import jax.numpy as jnp
from jax.experimental import pallas as pl
from jax.experimental.pallas import tpu as pltpu


def _round_up(a, b):
    return (a + b - 1) // b * b


def _pad_c(v, cp):
    """Pad a per-channel vector to the padded (128-multiple) channel count."""
    return jnp.pad(v, (0, cp - v.shape[0]))


def _choose_tk(K, max_tk=1024):
    """Largest 128-multiple tile <= max_tk that divides K (K % 128 == 0)."""
    m = K // 128
    best = 1
    for t in range(1, max_tk // 128 + 1):
        if m % t == 0:
            best = t
    return best * 128


# ----------------------------------------------------------------------------
# Pallas kernel: (TM,TK) x (VMEM-resident weight) matmul, f32 scratch
# accumulator, folded-BN scale/bias (+ReLU) epilogue, bf16/f32 store.
# ----------------------------------------------------------------------------
def _mm_kernel(x_ref, w_ref, s_ref, b_ref, o_ref, acc_ref, *, act, tk):
    k = pl.program_id(2)

    @pl.when(k == 0)
    def _():
        acc_ref[...] = jnp.zeros_like(acc_ref)

    k_off = pl.multiple_of(k * tk, 128)
    acc_ref[...] += jnp.dot(x_ref[...], w_ref[pl.ds(k_off, tk), :],
                            preferred_element_type=jnp.float32)

    @pl.when(k == pl.num_programs(2) - 1)
    def _():
        y = acc_ref[...] * s_ref[...] + b_ref[...]
        if act == "relu":
            y = jnp.maximum(y, 0.0)
        o_ref[...] = y.astype(o_ref.dtype)


def _matmul_bn_act(x_cols, w_mat, scale, bias, act, out_dtype):
    """x_cols: (M,K) bf16, w_mat: (K,Cout) bf16; K, Cout multiples of 128."""
    M, K = x_cols.shape
    Cout = w_mat.shape[1]
    assert K % 128 == 0 and Cout % 128 == 0, (K, Cout)

    TN = min(Cout, 256)                 # Cout axis: parallel work for v7x TCs
    TK = _choose_tk(K)                  # 128-aligned, divides K exactly
    TM = min(512, _round_up(M, 16))     # bf16 sublane packing; big lane-dense
    Mp = _round_up(M, TM)
    if Mp != M:
        x_cols = jnp.pad(x_cols, ((0, Mp - M), (0, 0)))

    s2 = scale.reshape(1, Cout).astype(jnp.float32)
    b2 = bias.reshape(1, Cout).astype(jnp.float32)

    kernel = functools.partial(_mm_kernel, act=act, tk=TK)
    out = pl.pallas_call(
        kernel,
        out_shape=jax.ShapeDtypeStruct((Mp, Cout), out_dtype),
        grid_spec=pltpu.PrefetchScalarGridSpec(
            num_scalar_prefetch=0,
            grid=(Cout // TN, Mp // TM, K // TK),
            in_specs=[
                pl.BlockSpec((TM, TK), lambda j, i, k: (i, k)),
                # Weight column-block stays VMEM-resident across all (i, k)
                # steps: fetched from HBM once per Cout tile (once total for
                # Cout <= 256). K is sliced inside the kernel.
                pl.BlockSpec((K, TN), lambda j, i, k: (0, j)),
                pl.BlockSpec((1, TN), lambda j, i, k: (0, j)),
                pl.BlockSpec((1, TN), lambda j, i, k: (0, j)),
            ],
            out_specs=pl.BlockSpec((TM, TN), lambda j, i, k: (i, j)),
            scratch_shapes=[pltpu.VMEM((TM, TN), jnp.float32)],
        ),
        compiler_params=pltpu.CompilerParams(
            dimension_semantics=("parallel", "parallel", "arbitrary"),
            vmem_limit_bytes=48 * 1024 * 1024),
    )(x_cols, w_mat, s2, b2)
    return out if Mp == M else out[:M]


# ----------------------------------------------------------------------------
# Conv wrapper: K-fused im2col (glue) + Pallas matmul kernel
# ----------------------------------------------------------------------------
def conv2d(x, w, scale, bias, *, stride=1, dilation=1, padding=0,
           act="none", out_dtype=jnp.bfloat16):
    """x: (N,H,W,Cin) NHWC (Cin pre-padded to 128-multiple),
    w: (kh,kw,Cin,Cout) HWIO (channel counts pre-padded)."""
    N, H, W, Cin = x.shape
    kh, kw, _, Cout = w.shape
    Hout = (H + 2 * padding - dilation * (kh - 1) - 1) // stride + 1
    Wout = (W + 2 * padding - dilation * (kw - 1) - 1) // stride + 1

    xb = x.astype(jnp.bfloat16)
    if kh == 1 and kw == 1 and stride == 1 and padding == 0:
        x_cols = xb.reshape(N * H * W, Cin)
    else:
        # TODO(synk): im2col tap gather is still plain-JAX glue (one HBM
        #             materialization of the K-fused (M, kh*kw*Cin) operand);
        #             a fully in-kernel tap gather needs manual windowed DMA.
        xp = jnp.pad(xb, ((0, 0), (padding, padding), (padding, padding), (0, 0)))
        cols = []
        for ky in range(kh):
            for kx in range(kw):
                y0 = ky * dilation
                x0 = kx * dilation
                cols.append(xp[:, y0:y0 + stride * (Hout - 1) + 1:stride,
                               x0:x0 + stride * (Wout - 1) + 1:stride, :])
        x_cols = jnp.concatenate(cols, axis=-1).reshape(
            N * Hout * Wout, kh * kw * Cin)

    w_mat = w.reshape(kh * kw * Cin, Cout).astype(jnp.bfloat16)
    out = _matmul_bn_act(x_cols, w_mat, scale, bias, act, out_dtype)
    return out.reshape(N, Hout, Wout, Cout)


def bn_fold(bn, eps=1e-5):
    """Fold eval-mode BatchNorm2d into per-channel (scale, bias)."""
    gamma, beta, mean, var = bn
    scale = gamma / jnp.sqrt(var + eps)
    return scale, beta - mean * scale


# ----------------------------------------------------------------------------
# Bilinear interpolation, align_corners=True (F.interpolate semantics).
# TODO(synk): bilinear resize is gather/lerp glue kept in plain JAX.
# ----------------------------------------------------------------------------
def _ac_coords(out_size, in_size):
    if out_size == 1 or in_size == 1:
        return jnp.zeros((out_size,), jnp.float32)
    return jnp.arange(out_size, dtype=jnp.float32) * ((in_size - 1) / (out_size - 1))


def bilinear_resize(x, out_h, out_w):
    N, H, W, C = x.shape
    if out_h == H and out_w == W:
        return x
    yc = _ac_coords(out_h, H)
    xc = _ac_coords(out_w, W)
    y0 = jnp.floor(yc).astype(jnp.int32)
    y1 = jnp.minimum(y0 + 1, H - 1)
    x0 = jnp.floor(xc).astype(jnp.int32)
    x1 = jnp.minimum(x0 + 1, W - 1)
    wy = (yc - y0.astype(jnp.float32)).reshape(1, out_h, 1, 1)
    wx = (xc - x0.astype(jnp.float32)).reshape(1, 1, out_w, 1)
    rows0 = x[:, y0]
    rows1 = x[:, y1]
    tl, tr = rows0[:, :, x0], rows0[:, :, x1]
    bl, br = rows1[:, :, x0], rows1[:, :, x1]
    top = tl * (1.0 - wx) + tr * wx
    bot = bl * (1.0 - wx) + br * wx
    return top * (1.0 - wy) + bot * wy


# ----------------------------------------------------------------------------
# Parameter construction (deterministic, synthetic); channel counts padded to
# 128-lane multiples ONCE here (padded rows/cols are zero, so padded
# activation channels stay exactly zero through the whole network).
# ----------------------------------------------------------------------------
def build_params(n_input_channels, n_classes, key):
    keys = iter(jax.random.split(key, 128))

    def conv_w(kh, kw, cin, cout, cin_p=None, cout_p=None):
        cin_p = _round_up(cin, 128) if cin_p is None else cin_p
        cout_p = _round_up(cout, 128) if cout_p is None else cout_p
        w = 0.05 * jax.random.normal(next(keys), (kh, kw, cin, cout), jnp.float32)
        return jnp.pad(w, ((0, 0), (0, 0), (0, cin_p - cin), (0, cout_p - cout)))

    def bn(c):
        gamma = 1.0 + 0.01 * jax.random.normal(next(keys), (c,), jnp.float32)
        beta = 0.01 * jax.random.normal(next(keys), (c,), jnp.float32)
        mean = 0.01 * jax.random.normal(next(keys), (c,), jnp.float32)
        var = 0.5 + jax.random.uniform(next(keys), (c,), jnp.float32)
        return (gamma, beta, mean, var)

    p = {}
    # Backbone (resnet34-like plan: low-level 64ch @ stride 4, high 512ch @ 16).
    # TODO(synk): ResNet34 residual-block internals are not given in the module;
    #             replaced by a stride/channel-matched conv+BN+ReLU stack.
    p['b1_w'], p['b1_bn'] = conv_w(3, 3, n_input_channels, 32), bn(32)
    p['b2_w'], p['b2_bn'] = conv_w(3, 3, 32, 64), bn(64)
    p['b3_w'], p['b3_bn'] = conv_w(3, 3, 64, 128), bn(128)
    p['b4_w'], p['b4_bn'] = conv_w(3, 3, 128, 512), bn(512)
    # ASPP (rates [1, 6, 12, 18] for os=16) + global-pool branch + projection
    p['aspp1_w'], p['aspp1_bn'] = conv_w(1, 1, 512, 256), bn(256)
    p['aspp2_w'], p['aspp2_bn'] = conv_w(3, 3, 512, 256), bn(256)
    p['aspp3_w'], p['aspp3_bn'] = conv_w(3, 3, 512, 256), bn(256)
    p['aspp4_w'], p['aspp4_bn'] = conv_w(3, 3, 512, 256), bn(256)
    p['aspp_gp_w'], p['aspp_gp_bn'] = conv_w(1, 1, 512, 256), bn(256)
    p['aspp_proj_w'], p['aspp_proj_bn'] = conv_w(1, 1, 256 * 5, 256), bn(256)
    # low-level projection (conv2 + bn2)
    p['conv2_w'], p['bn2'] = conv_w(1, 1, 64, 48), bn(48)
    # decoder concat layout = [aspp(256 real)] + [low(48 real + 80 zero pad)],
    # real cin rows 0..303 keep their order, so plain end-padding is exact.
    p['lc1_w'], p['lc1_bn'] = conv_w(3, 3, 256 + 48, 256, cin_p=384), bn(256)
    p['lc2_w'], p['lc2_bn'] = conv_w(3, 3, 256, 256), bn(256)
    p['lc3_w'] = conv_w(1, 1, 256, n_classes)
    p['lc3_b'] = 0.01 * jax.random.normal(next(keys), (n_classes,), jnp.float32)
    return p


# ----------------------------------------------------------------------------
# Forward pass (os=16, backbone_type='resnet34')
# TODO(synk): BatchNorm2d is applied in eval mode (running stats folded into
#             scale/bias inside the Pallas conv kernel).
# ----------------------------------------------------------------------------
def deeplabv3plus_forward(x_nchw, p):
    n_classes = p['lc3_b'].shape[0]
    x = jnp.transpose(x_nchw, (0, 2, 3, 1)).astype(jnp.float32)   # NCHW -> NHWC
    Hin, Win = x.shape[1], x.shape[2]
    cin_p = p['b1_w'].shape[2]
    x = jnp.pad(x, ((0, 0), (0, 0), (0, 0), (0, cin_p - x.shape[3])))
    x = x.astype(jnp.bfloat16)

    def cbnr(h, w, bnp, **kw):
        s, b = bn_fold(bnp)
        cp = w.shape[-1]
        return conv2d(h, w, _pad_c(s, cp), _pad_c(b, cp), act="relu", **kw)

    # ---- backbone ----
    f = cbnr(x, p['b1_w'], p['b1_bn'], stride=2, padding=1)              # stride 2
    low = cbnr(f, p['b2_w'], p['b2_bn'], stride=2, padding=1)            # stride 4
    f = cbnr(low, p['b3_w'], p['b3_bn'], stride=2, padding=1)            # stride 8
    hi = cbnr(f, p['b4_w'], p['b4_bn'], stride=2, padding=1)             # stride 16

    # os == 16 -> no scale_factor=4 pre-upsample

    # ---- ASPP ----
    # TODO(synk): ASPP branches still each re-read `hi` from HBM; a fully
    #             tile-resident fused ASPP needs the in-kernel tap gather.
    a1 = cbnr(hi, p['aspp1_w'], p['aspp1_bn'])                            # 1x1
    a2 = cbnr(hi, p['aspp2_w'], p['aspp2_bn'], dilation=6, padding=6)
    a3 = cbnr(hi, p['aspp3_w'], p['aspp3_bn'], dilation=12, padding=12)
    a4 = cbnr(hi, p['aspp4_w'], p['aspp4_bn'], dilation=18, padding=18)
    gp = jnp.mean(hi.astype(jnp.float32), axis=(1, 2), keepdims=True)
    gp = cbnr(gp, p['aspp_gp_w'], p['aspp_gp_bn'])
    gp = bilinear_resize(gp, hi.shape[1], hi.shape[2])
    aspp = jnp.concatenate([a1, a2, a3, a4, gp], axis=-1)                 # 1280ch
    aspp = cbnr(aspp, p['aspp_proj_w'], p['aspp_proj_bn'])                # -> 256ch

    # ---- low-level projection (conv2 + bn2, no ReLU) ----
    s2, b2 = bn_fold(p['bn2'])
    cp2 = p['conv2_w'].shape[-1]
    low = conv2d(low, p['conv2_w'], _pad_c(s2, cp2), _pad_c(b2, cp2), act="none")

    # ---- decoder ----
    up = bilinear_resize(aspp, low.shape[1], low.shape[2])
    cat = jnp.concatenate([up, low], axis=-1)                             # 384ch padded
    y = cbnr(cat, p['lc1_w'], p['lc1_bn'], padding=1)
    y = cbnr(y, p['lc2_w'], p['lc2_bn'], padding=1)
    cp3 = p['lc3_w'].shape[-1]
    y = conv2d(y, p['lc3_w'], jnp.ones((cp3,), jnp.float32),
               _pad_c(p['lc3_b'], cp3), act="none", out_dtype=jnp.float32)
    y = y[..., :n_classes]

    # ---- final upsample + sigmoid (sigmoid must follow the interpolation) ----
    # elementwise sigmoid is left to XLA so it fuses into the resize output
    # (a dedicated Pallas pass here would add a full extra HBM read+write).
    y = bilinear_resize(y, Hin, Win)
    y = jax.nn.sigmoid(y)
    return jnp.transpose(y, (0, 3, 1, 2))                                 # NCHW


# ----------------------------------------------------------------------------
if __name__ == "__main__":
    n_input_channels = 3
    n_classes = 2

    params = build_params(n_input_channels, n_classes, jax.random.PRNGKey(42))
    x = jax.random.normal(jax.random.PRNGKey(0),
                          (2, n_input_channels, 32, 32), jnp.float32)

    fwd = jax.jit(deeplabv3plus_forward)
    out = jax.block_until_ready(fwd(x, params))

    assert out.shape == (2, n_classes, 32, 32), out.shape
    assert bool(jnp.all(jnp.isfinite(out)))
    assert bool(jnp.all((out >= 0.0) & (out <= 1.0)))
    print("KERNEL_OK")
</pallas_src>

<mosaic_0001>
module attributes {stable_mosaic.version = 11 : i64} {
  func.func @_mm_kernel(%arg0: i32, %arg1: i32, %arg2: i32, %arg3: memref<512x384xbf16, #tpu.memory_space<vmem>>, %arg4: memref<1152x128xbf16, #tpu.memory_space<vmem>>, %arg5: memref<1x128xf32, #tpu.memory_space<vmem>>, %arg6: memref<1x128xf32, #tpu.memory_space<vmem>>, %arg7: memref<512x128xbf16, #tpu.memory_space<vmem>>, %arg8: memref<512x128xf32, #tpu.memory_space<vmem>>) attributes {dimension_semantics = [#tpu.dimension_semantics<parallel>, #tpu.dimension_semantics<parallel>, #tpu.dimension_semantics<arbitrary>], iteration_bounds = array<i64: 1, 1, 3>, scalar_prefetch = 0 : i64, scratch_operands = 1 : i64, tpu.core_type = #tpu.core_type<tc>, window_params = [{transform_indices = @transform_0, window_bounds = array<i64: 512, 384>}, {transform_indices = @transform_1, window_bounds = array<i64: 1152, 128>}, {transform_indices = @transform_2, window_bounds = array<i64: 1, 128>}, {transform_indices = @transform_3, window_bounds = array<i64: 1, 128>}, {transform_indices = @transform_4, window_bounds = array<i64: 512, 128>}]} {
    %c0_i32 = arith.constant 0 : i32
    %0 = arith.cmpi eq, %arg2, %c0_i32 : i32
    %1 = arith.extui %0 : i1 to i32
    %c0_i32_0 = arith.constant 0 : i32
    %2 = arith.cmpi ne, %1, %c0_i32_0 : i32
    scf.if %2 {
      %cst_8 = arith.constant 0.000000e+00 : f32
      %15 = vector.broadcast %cst_8 : f32 to vector<512x128xf32>
      %c0_9 = arith.constant 0 : index
      %c0_10 = arith.constant 0 : index
      %16 = vector.load %arg8[%c0_9, %c0_10] : memref<512x128xf32, #tpu.memory_space<vmem>>, vector<512x128xf32>
      tpu.vector_store %arg8[%c0_9, %c0_10], %15 {strides = array<i32>} : memref<512x128xf32, #tpu.memory_space<vmem>>, vector<512x128xf32>,
    } else {
    }
    %c384_i32 = arith.constant 384 : i32
    %3 = arith.muli %arg2, %c384_i32 : i32
    %4 = tpu.assume_multiple %3, 128 : i32
    %c0 = arith.constant 0 : index
    %c0_1 = arith.constant 0 : index
    %5 = vector.load %arg8[%c0, %c0_1] : memref<512x128xf32, #tpu.memory_space<vmem>>, vector<512x128xf32>
    %c0_2 = arith.constant 0 : index
    %c0_3 = arith.constant 0 : index
    %6 = vector.load %arg3[%c0_2, %c0_3] : memref<512x384xbf16, #tpu.memory_space<vmem>>, vector<512x384xbf16>
    %7 = arith.index_cast %4 : i32 to index
    %c0_4 = arith.constant 0 : index
    %8 = vector.load %arg4[%7, %c0_4] : memref<1152x128xbf16, #tpu.memory_space<vmem>>, vector<384x128xbf16>
    %cst = arith.constant dense<0.000000e+00> : vector<512x128xf32>
    %9 = tpu.matmul %6, %8, %cst {dimension_numbers = #tpu.dot_dimension_numbers<[1], [0], [0], [1], [0, 0, 1, 1], [], []>} : vector<512x384xbf16>, vector<384x128xbf16>, vector<512x128xf32> -> vector<512x128xf32>
    %10 = arith.addf %5, %9 : vector<512x128xf32>
    %c0_5 = arith.constant 0 : index
    %c0_6 = arith.constant 0 : index
    %11 = vector.load %arg8[%c0_5, %c0_6] : memref<512x128xf32, #tpu.memory_space<vmem>>, vector<512x128xf32>
    tpu.vector_store %arg8[%c0_5, %c0_6], %10 {strides = array<i32>} : memref<512x128xf32, #tpu.memory_space<vmem>>, vector<512x128xf32>,
    %c2_i32 = arith.constant 2 : i32
    %12 = arith.cmpi eq, %arg2, %c2_i32 : i32
    %13 = arith.extui %12 : i1 to i32
    %c0_i32_7 = arith.constant 0 : i32
    %14 = arith.cmpi ne, %13, %c0_i32_7 : i32
    scf.if %14 {
      %c0_8 = arith.constant 0 : index
      %c0_9 = arith.constant 0 : index
      %15 = vector.load %arg8[%c0_8, %c0_9] : memref<512x128xf32, #tpu.memory_space<vmem>>, vector<512x128xf32>
      %c0_10 = arith.constant 0 : index
      %c0_11 = arith.constant 0 : index
      %16 = vector.load %arg5[%c0_10, %c0_11] : memref<1x128xf32, #tpu.memory_space<vmem>>, vector<1x128xf32>
      %17 = vector.broadcast %16 : vector<1x128xf32> to vector<512x128xf32>
      %18 = arith.mulf %15, %17 : vector<512x128xf32>
      %c0_12 = arith.constant 0 : index
      %c0_13 = arith.constant 0 : index
      %19 = vector.load %arg6[%c0_12, %c0_13] : memref<1x128xf32, #tpu.memory_space<vmem>>, vector<1x128xf32>
      %20 = vector.broadcast %19 : vector<1x128xf32> to vector<512x128xf32>
      %21 = arith.addf %18, %20 : vector<512x128xf32>
      %cst_14 = arith.constant 0.000000e+00 : f32
      %22 = vector.broadcast %cst_14 : f32 to vector<512x128xf32>
      %23 = arith.maximumf %21, %22 : vector<512x128xf32>
      %24 = arith.truncf %23 : vector<512x128xf32> to vector<512x128xbf16>
      %c0_15 = arith.constant 0 : index
      %c0_16 = arith.constant 0 : index
      %25 = vector.load %arg7[%c0_15, %c0_16] : memref<512x128xbf16, #tpu.memory_space<vmem>>, vector<512x128xbf16>
      tpu.vector_store %arg7[%c0_15, %c0_16], %24 {strides = array<i32>} : memref<512x128xbf16, #tpu.memory_space<vmem>>, vector<512x128xbf16>,
    } else {
    }
    return
  }
  func.func @transform_0(%arg0: i32, %arg1: i32, %arg2: i32) -> (i32, i32) {
    %c0_i32 = arith.constant 0 : i32
    return %arg1, %arg2 : i32, i32
  }
  func.func @transform_1(%arg0: i32, %arg1: i32, %arg2: i32) -> (i32, i32) {
    %c0_i32 = arith.constant 0 : i32
    %c0_i32_0 = arith.constant 0 : i32
    return %c0_i32, %arg0 : i32, i32
  }
  func.func @transform_2(%arg0: i32, %arg1: i32, %arg2: i32) -> (i32, i32) {
    %c0_i32 = arith.constant 0 : i32
    %c0_i32_0 = arith.constant 0 : i32
    return %c0_i32, %arg0 : i32, i32
  }
  func.func @transform_3(%arg0: i32, %arg1: i32, %arg2: i32) -> (i32, i32) {
    %c0_i32 = arith.constant 0 : i32
    %c0_i32_0 = arith.constant 0 : i32
    return %c0_i32, %arg0 : i32, i32
  }
  func.func @transform_4(%arg0: i32, %arg1: i32, %arg2: i32) -> (i32, i32) {
    %c0_i32 = arith.constant 0 : i32
    return %arg1, %arg0 : i32, i32
  }
}

module attributes {stable_mosaic.version = 11 : i64} {
  func.func @_mm_kernel(%arg0: i32, %arg1: i32, %arg2: i32, %arg3: memref<128x384xbf16, #tpu.memory_space<vmem>>, %arg4: memref<1152x128xbf16, #tpu.memory_space<vmem>>, %arg5: memref<1x128xf32, #tpu.memory_space<vmem>>, %arg6: memref<1x128xf32, #tpu.memory_space<vmem>>, %arg7: memref<128x128xbf16, #tpu.memory_space<vmem>>, %arg8: memref<128x128xf32, #tpu.memory_space<vmem>>) attributes {dimension_semantics = [#tpu.dimension_semantics<parallel>, #tpu.dimension_semantics<parallel>, #tpu.dimension_semantics<arbitrary>], iteration_bounds = array<i64: 1, 1, 3>, scalar_prefetch = 0 : i64, scratch_operands = 1 : i64, tpu.core_type = #tpu.core_type<tc>, window_params = [{transform_indices = @transform_0, window_bounds = array<i64: 128, 384>}, {transform_indices = @transform_1, window_bounds = array<i64: 1152, 128>}, {transform_indices = @transform_2, window_bounds = array<i64: 1, 128>}, {transform_indices = @transform_3, window_bounds = array<i64: 1, 128>}, {transform_indices = @transform_4, window_bounds = array<i64: 128, 128>}]} {
    %c0_i32 = arith.constant 0 : i32
    %0 = arith.cmpi eq, %arg2, %c0_i32 : i32
    %1 = arith.extui %0 : i1 to i32
    %c0_i32_0 = arith.constant 0 : i32
    %2 = arith.cmpi ne, %1, %c0_i32_0 : i32
    scf.if %2 {
      %cst_8 = arith.constant 0.000000e+00 : f32
      %15 = vector.broadcast %cst_8 : f32 to vector<128x128xf32>
      %c0_9 = arith.constant 0 : index
      %c0_10 = arith.constant 0 : index
      %16 = vector.load %arg8[%c0_9, %c0_10] : memref<128x128xf32, #tpu.memory_space<vmem>>, vector<128x128xf32>
      tpu.vector_store %arg8[%c0_9, %c0_10], %15 {strides = array<i32>} : memref<128x128xf32, #tpu.memory_space<vmem>>, vector<128x128xf32>,
    } else {
    }
    %c384_i32 = arith.constant 384 : i32
    %3 = arith.muli %arg2, %c384_i32 : i32
    %4 = tpu.assume_multiple %3, 128 : i32
    %c0 = arith.constant 0 : index
    %c0_1 = arith.constant 0 : index
    %5 = vector.load %arg8[%c0, %c0_1] : memref<128x128xf32, #tpu.memory_space<vmem>>, vector<128x128xf32>
    %c0_2 = arith.constant 0 : index
    %c0_3 = arith.constant 0 : index
    %6 = vector.load %arg3[%c0_2, %c0_3] : memref<128x384xbf16, #tpu.memory_space<vmem>>, vector<128x384xbf16>
    %7 = arith.index_cast %4 : i32 to index
    %c0_4 = arith.constant 0 : index
    %8 = vector.load %arg4[%7, %c0_4] : memref<1152x128xbf16, #tpu.memory_space<vmem>>, vector<384x128xbf16>
    %cst = arith.constant dense<0.000000e+00> : vector<128x128xf32>
    %9 = tpu.matmul %6, %8, %cst {dimension_numbers = #tpu.dot_dimension_numbers<[1], [0], [0], [1], [0, 0, 1, 1], [], []>} : vector<128x384xbf16>, vector<384x128xbf16>, vector<128x128xf32> -> vector<128x128xf32>
    %10 = arith.addf %5, %9 : vector<128x128xf32>
    %c0_5 = arith.constant 0 : index
    %c0_6 = arith.constant 0 : index
    %11 = vector.load %arg8[%c0_5, %c0_6] : memref<128x128xf32, #tpu.memory_space<vmem>>, vector<128x128xf32>
    tpu.vector_store %arg8[%c0_5, %c0_6], %10 {strides = array<i32>} : memref<128x128xf32, #tpu.memory_space<vmem>>, vector<128x128xf32>,
    %c2_i32 = arith.constant 2 : i32
    %12 = arith.cmpi eq, %arg2, %c2_i32 : i32
    %13 = arith.extui %12 : i1 to i32
    %c0_i32_7 = arith.constant 0 : i32
    %14 = arith.cmpi ne, %13, %c0_i32_7 : i32
    scf.if %14 {
      %c0_8 = arith.constant 0 : index
      %c0_9 = arith.constant 0 : index
      %15 = vector.load %arg8[%c0_8, %c0_9] : memref<128x128xf32, #tpu.memory_space<vmem>>, vector<128x128xf32>
      %c0_10 = arith.constant 0 : index
      %c0_11 = arith.constant 0 : index
      %16 = vector.load %arg5[%c0_10, %c0_11] : memref<1x128xf32, #tpu.memory_space<vmem>>, vector<1x128xf32>
      %17 = vector.broadcast %16 : vector<1x128xf32> to vector<128x128xf32>
      %18 = arith.mulf %15, %17 : vector<128x128xf32>
      %c0_12 = arith.constant 0 : index
      %c0_13 = arith.constant 0 : index
      %19 = vector.load %arg6[%c0_12, %c0_13] : memref<1x128xf32, #tpu.memory_space<vmem>>, vector<1x128xf32>
      %20 = vector.broadcast %19 : vector<1x128xf32> to vector<128x128xf32>
      %21 = arith.addf %18, %20 : vector<128x128xf32>
      %cst_14 = arith.constant 0.000000e+00 : f32
      %22 = vector.broadcast %cst_14 : f32 to vector<128x128xf32>
      %23 = arith.maximumf %21, %22 : vector<128x128xf32>
      %24 = arith.truncf %23 : vector<128x128xf32> to vector<128x128xbf16>
      %c0_15 = arith.constant 0 : index
      %c0_16 = arith.constant 0 : index
      %25 = vector.load %arg7[%c0_15, %c0_16] : memref<128x128xbf16, #tpu.memory_space<vmem>>, vector<128x128xbf16>
      tpu.vector_store %arg7[%c0_15, %c0_16], %24 {strides = array<i32>} : memref<128x128xbf16, #tpu.memory_space<vmem>>, vector<128x128xbf16>,
    } else {
    }
    return
  }
  func.func @transform_0(%arg0: i32, %arg1: i32, %arg2: i32) -> (i32, i32) {
    %c0_i32 = arith.constant 0 : i32
    return %arg1, %arg2 : i32, i32
  }
  func.func @transform_1(%arg0: i32, %arg1: i32, %arg2: i32) -> (i32, i32) {
    %c0_i32 = arith.constant 0 : i32
    %c0_i32_0 = arith.constant 0 : i32
    return %c0_i32, %arg0 : i32, i32
  }
  func.func @transform_2(%arg0: i32, %arg1: i32, %arg2: i32) -> (i32, i32) {
    %c0_i32 = arith.constant 0 : i32
    %c0_i32_0 = arith.constant 0 : i32
    return %c0_i32, %arg0 : i32, i32
  }
  func.func @transform_3(%arg0: i32, %arg1: i32, %arg2: i32) -> (i32, i32) {
    %c0_i32 = arith.constant 0 : i32
    %c0_i32_0 = arith.constant 0 : i32
    return %c0_i32, %arg0 : i32, i32
  }
  func.func @transform_4(%arg0: i32, %arg1: i32, %arg2: i32) -> (i32, i32) {
    %c0_i32 = arith.constant 0 : i32
    return %arg1, %arg0 : i32, i32
  }
}

module attributes {stable_mosaic.version = 11 : i64} {
  func.func @_mm_kernel(%arg0: i32, %arg1: i32, %arg2: i32, %arg3: memref<32x384xbf16, #tpu.memory_space<vmem>>, %arg4: memref<1152x128xbf16, #tpu.memory_space<vmem>>, %arg5: memref<1x128xf32, #tpu.memory_space<vmem>>, %arg6: memref<1x128xf32, #tpu.memory_space<vmem>>, %arg7: memref<32x128xbf16, #tpu.memory_space<vmem>>, %arg8: memref<32x128xf32, #tpu.memory_space<vmem>>) attributes {dimension_semantics = [#tpu.dimension_semantics<parallel>, #tpu.dimension_semantics<parallel>, #tpu.dimension_semantics<arbitrary>], iteration_bounds = array<i64: 1, 1, 3>, scalar_prefetch = 0 : i64, scratch_operands = 1 : i64, tpu.core_type = #tpu.core_type<tc>, window_params = [{transform_indices = @transform_0, window_bounds = array<i64: 32, 384>}, {transform_indices = @transform_1, window_bounds = array<i64: 1152, 128>}, {transform_indices = @transform_2, window_bounds = array<i64: 1, 128>}, {transform_indices = @transform_3, window_bounds = array<i64: 1, 128>}, {transform_indices = @transform_4, window_bounds = array<i64: 32, 128>}]} {
    %c0_i32 = arith.constant 0 : i32
    %0 = arith.cmpi eq, %arg2, %c0_i32 : i32
    %1 = arith.extui %0 : i1 to i32
    %c0_i32_0 = arith.constant 0 : i32
    %2 = arith.cmpi ne, %1, %c0_i32_0 : i32
    scf.if %2 {
      %cst_8 = arith.constant 0.000000e+00 : f32
      %15 = vector.broadcast %cst_8 : f32 to vector<32x128xf32>
      %c0_9 = arith.constant 0 : index
      %c0_10 = arith.constant 0 : index
      %16 = vector.load %arg8[%c0_9, %c0_10] : memref<32x128xf32, #tpu.memory_space<vmem>>, vector<32x128xf32>
      tpu.vector_store %arg8[%c0_9, %c0_10], %15 {strides = array<i32>} : memref<32x128xf32, #tpu.memory_space<vmem>>, vector<32x128xf32>,
    } else {
    }
    %c384_i32 = arith.constant 384 : i32
    %3 = arith.muli %arg2, %c384_i32 : i32
    %4 = tpu.assume_multiple %3, 128 : i32
    %c0 = arith.constant 0 : index
    %c0_1 = arith.constant 0 : index
    %5 = vector.load %arg8[%c0, %c0_1] : memref<32x128xf32, #tpu.memory_space<vmem>>, vector<32x128xf32>
    %c0_2 = arith.constant 0 : index
    %c0_3 = arith.constant 0 : index
    %6 = vector.load %arg3[%c0_2, %c0_3] : memref<32x384xbf16, #tpu.memory_space<vmem>>, vector<32x384xbf16>
    %7 = arith.index_cast %4 : i32 to index
    %c0_4 = arith.constant 0 : index
    %8 = vector.load %arg4[%7, %c0_4] : memref<1152x128xbf16, #tpu.memory_space<vmem>>, vector<384x128xbf16>
    %cst = arith.constant dense<0.000000e+00> : vector<32x128xf32>
    %9 = tpu.matmul %6, %8, %cst {dimension_numbers = #tpu.dot_dimension_numbers<[1], [0], [0], [1], [0, 0, 1, 1], [], []>} : vector<32x384xbf16>, vector<384x128xbf16>, vector<32x128xf32> -> vector<32x128xf32>
    %10 = arith.addf %5, %9 : vector<32x128xf32>
    %c0_5 = arith.constant 0 : index
    %c0_6 = arith.constant 0 : index
    %11 = vector.load %arg8[%c0_5, %c0_6] : memref<32x128xf32, #tpu.memory_space<vmem>>, vector<32x128xf32>
    tpu.vector_store %arg8[%c0_5, %c0_6], %10 {strides = array<i32>} : memref<32x128xf32, #tpu.memory_space<vmem>>, vector<32x128xf32>,
    %c2_i32 = arith.constant 2 : i32
    %12 = arith.cmpi eq, %arg2, %c2_i32 : i32
    %13 = arith.extui %12 : i1 to i32
    %c0_i32_7 = arith.constant 0 : i32
    %14 = arith.cmpi ne, %13, %c0_i32_7 : i32
    scf.if %14 {
      %c0_8 = arith.constant 0 : index
      %c0_9 = arith.constant 0 : index
      %15 = vector.load %arg8[%c0_8, %c0_9] : memref<32x128xf32, #tpu.memory_space<vmem>>, vector<32x128xf32>
      %c0_10 = arith.constant 0 : index
      %c0_11 = arith.constant 0 : index
      %16 = vector.load %arg5[%c0_10, %c0_11] : memref<1x128xf32, #tpu.memory_space<vmem>>, vector<1x128xf32>
      %17 = vector.broadcast %16 : vector<1x128xf32> to vector<32x128xf32>
      %18 = arith.mulf %15, %17 : vector<32x128xf32>
      %c0_12 = arith.constant 0 : index
      %c0_13 = arith.constant 0 : index
      %19 = vector.load %arg6[%c0_12, %c0_13] : memref<1x128xf32, #tpu.memory_space<vmem>>, vector<1x128xf32>
      %20 = vector.broadcast %19 : vector<1x128xf32> to vector<32x128xf32>
      %21 = arith.addf %18, %20 : vector<32x128xf32>
      %cst_14 = arith.constant 0.000000e+00 : f32
      %22 = vector.broadcast %cst_14 : f32 to vector<32x128xf32>
      %23 = arith.maximumf %21, %22 : vector<32x128xf32>
      %24 = arith.truncf %23 : vector<32x128xf32> to vector<32x128xbf16>
      %c0_15 = arith.constant 0 : index
      %c0_16 = arith.constant 0 : index
      %25 = vector.load %arg7[%c0_15, %c0_16] : memref<32x128xbf16, #tpu.memory_space<vmem>>, vector<32x128xbf16>
      tpu.vector_store %arg7[%c0_15, %c0_16], %24 {strides = array<i32>} : memref<32x128xbf16, #tpu.memory_space<vmem>>, vector<32x128xbf16>,
    } else {
    }
    return
  }
  func.func @transform_0(%arg0: i32, %arg1: i32, %arg2: i32) -> (i32, i32) {
    %c0_i32 = arith.constant 0 : i32
    return %arg1, %arg2 : i32, i32
  }
  func.func @transform_1(%arg0: i32, %arg1: i32, %arg2: i32) -> (i32, i32) {
    %c0_i32 = arith.constant 0 : i32
    %c0_i32_0 = arith.constant 0 : i32
    return %c0_i32, %arg0 : i32, i32
  }
  func.func @transform_2(%arg0: i32, %arg1: i32, %arg2: i32) -> (i32, i32) {
    %c0_i32 = arith.constant 0 : i32
    %c0_i32_0 = arith.constant 0 : i32
    return %c0_i32, %arg0 : i32, i32
  }
  func.func @transform_3(%arg0: i32, %arg1: i32, %arg2: i32) -> (i32, i32) {
    %c0_i32 = arith.constant 0 : i32
    %c0_i32_0 = arith.constant 0 : i32
    return %c0_i32, %arg0 : i32, i32
  }
  func.func @transform_4(%arg0: i32, %arg1: i32, %arg2: i32) -> (i32, i32) {
    %c0_i32 = arith.constant 0 : i32
    return %arg1, %arg0 : i32, i32
  }
}

module attributes {stable_mosaic.version = 11 : i64} {
  func.func @_mm_kernel(%arg0: i32, %arg1: i32, %arg2: i32, %arg3: memref<16x384xbf16, #tpu.memory_space<vmem>>, %arg4: memref<1152x256xbf16, #tpu.memory_space<vmem>>, %arg5: memref<1x256xf32, #tpu.memory_space<vmem>>, %arg6: memref<1x256xf32, #tpu.memory_space<vmem>>, %arg7: memref<16x256xbf16, #tpu.memory_space<vmem>>, %arg8: memref<16x256xf32, #tpu.memory_space<vmem>>) attributes {dimension_semantics = [#tpu.dimension_semantics<parallel>, #tpu.dimension_semantics<parallel>, #tpu.dimension_semantics<arbitrary>], iteration_bounds = array<i64: 2, 1, 3>, scalar_prefetch = 0 : i64, scratch_operands = 1 : i64, tpu.core_type = #tpu.core_type<tc>, window_params = [{transform_indices = @transform_0, window_bounds = array<i64: 16, 384>}, {transform_indices = @transform_1, window_bounds = array<i64: 1152, 256>}, {transform_indices = @transform_2, window_bounds = array<i64: 1, 256>}, {transform_indices = @transform_3, window_bounds = array<i64: 1, 256>}, {transform_indices = @transform_4, window_bounds = array<i64: 16, 256>}]} {
    %c0_i32 = arith.constant 0 : i32
    %0 = arith.cmpi eq, %arg2, %c0_i32 : i32
    %1 = arith.extui %0 : i1 to i32
    %c0_i32_0 = arith.constant 0 : i32
    %2 = arith.cmpi ne, %1, %c0_i32_0 : i32
    scf.if %2 {
      %cst_8 = arith.constant 0.000000e+00 : f32
      %15 = vector.broadcast %cst_8 : f32 to vector<16x256xf32>
      %c0_9 = arith.constant 0 : index
      %c0_10 = arith.constant 0 : index
      %16 = vector.load %arg8[%c0_9, %c0_10] : memref<16x256xf32, #tpu.memory_space<vmem>>, vector<16x256xf32>
      tpu.vector_store %arg8[%c0_9, %c0_10], %15 {strides = array<i32>} : memref<16x256xf32, #tpu.memory_space<vmem>>, vector<16x256xf32>,
    } else {
    }
    %c384_i32 = arith.constant 384 : i32
    %3 = arith.muli %arg2, %c384_i32 : i32
    %4 = tpu.assume_multiple %3, 128 : i32
    %c0 = arith.constant 0 : index
    %c0_1 = arith.constant 0 : index
    %5 = vector.load %arg8[%c0, %c0_1] : memref<16x256xf32, #tpu.memory_space<vmem>>, vector<16x256xf32>
    %c0_2 = arith.constant 0 : index
    %c0_3 = arith.constant 0 : index
    %6 = vector.load %arg3[%c0_2, %c0_3] : memref<16x384xbf16, #tpu.memory_space<vmem>>, vector<16x384xbf16>
    %7 = arith.index_cast %4 : i32 to index
    %c0_4 = arith.constant 0 : index
    %8 = vector.load %arg4[%7, %c0_4] : memref<1152x256xbf16, #tpu.memory_space<vmem>>, vector<384x256xbf16>
    %cst = arith.constant dense<0.000000e+00> : vector<16x256xf32>
    %9 = tpu.matmul %6, %8, %cst {dimension_numbers = #tpu.dot_dimension_numbers<[1], [0], [0], [1], [0, 0, 1, 1], [], []>} : vector<16x384xbf16>, vector<384x256xbf16>, vector<16x256xf32> -> vector<16x256xf32>
    %10 = arith.addf %5, %9 : vector<16x256xf32>
    %c0_5 = arith.constant 0 : index
    %c0_6 = arith.constant 0 : index
    %11 = vector.load %arg8[%c0_5, %c0_6] : memref<16x256xf32, #tpu.memory_space<vmem>>, vector<16x256xf32>
    tpu.vector_store %arg8[%c0_5, %c0_6], %10 {strides = array<i32>} : memref<16x256xf32, #tpu.memory_space<vmem>>, vector<16x256xf32>,
    %c2_i32 = arith.constant 2 : i32
    %12 = arith.cmpi eq, %arg2, %c2_i32 : i32
    %13 = arith.extui %12 : i1 to i32
    %c0_i32_7 = arith.constant 0 : i32
    %14 = arith.cmpi ne, %13, %c0_i32_7 : i32
    scf.if %14 {
      %c0_8 = arith.constant 0 : index
      %c0_9 = arith.constant 0 : index
      %15 = vector.load %arg8[%c0_8, %c0_9] : memref<16x256xf32, #tpu.memory_space<vmem>>, vector<16x256xf32>
      %c0_10 = arith.constant 0 : index
      %c0_11 = arith.constant 0 : index
      %16 = vector.load %arg5[%c0_10, %c0_11] : memref<1x256xf32, #tpu.memory_space<vmem>>, vector<1x256xf32>
      %17 = vector.broadcast %16 : vector<1x256xf32> to vector<16x256xf32>
      %18 = arith.mulf %15, %17 : vector<16x256xf32>
      %c0_12 = arith.constant 0 : index
      %c0_13 = arith.constant 0 : index
      %19 = vector.load %arg6[%c0_12, %c0_13] : memref<1x256xf32, #tpu.memory_space<vmem>>, vector<1x256xf32>
      %20 = vector.broadcast %19 : vector<1x256xf32> to vector<16x256xf32>
      %21 = arith.addf %18, %20 : vector<16x256xf32>
      %cst_14 = arith.constant 0.000000e+00 : f32
      %22 = vector.broadcast %cst_14 : f32 to vector<16x256xf32>
      %23 = arith.maximumf %21, %22 : vector<16x256xf32>
      %24 = arith.truncf %23 : vector<16x256xf32> to vector<16x256xbf16>
      %c0_15 = arith.constant 0 : index
      %c0_16 = arith.constant 0 : index
      %25 = vector.load %arg7[%c0_15, %c0_16] : memref<16x256xbf16, #tpu.memory_space<vmem>>, vector<16x256xbf16>
      tpu.vector_store %arg7[%c0_15, %c0_16], %24 {strides = array<i32>} : memref<16x256xbf16, #tpu.memory_space<vmem>>, vector<16x256xbf16>,
    } else {
    }
    return
  }
  func.func @transform_0(%arg0: i32, %arg1: i32, %arg2: i32) -> (i32, i32) {
    %c0_i32 = arith.constant 0 : i32
    return %arg1, %arg2 : i32, i32
  }
  func.func @transform_1(%arg0: i32, %arg1: i32, %arg2: i32) -> (i32, i32) {
    %c0_i32 = arith.constant 0 : i32
    %c0_i32_0 = arith.constant 0 : i32
    return %c0_i32, %arg0 : i32, i32
  }
  func.func @transform_2(%arg0: i32, %arg1: i32, %arg2: i32) -> (i32, i32) {
    %c0_i32 = arith.constant 0 : i32
    %c0_i32_0 = arith.constant 0 : i32
    return %c0_i32, %arg0 : i32, i32
  }
  func.func @transform_3(%arg0: i32, %arg1: i32, %arg2: i32) -> (i32, i32) {
    %c0_i32 = arith.constant 0 : i32
    %c0_i32_0 = arith.constant 0 : i32
    return %c0_i32, %arg0 : i32, i32
  }
  func.func @transform_4(%arg0: i32, %arg1: i32, %arg2: i32) -> (i32, i32) {
    %c0_i32 = arith.constant 0 : i32
    return %arg1, %arg0 : i32, i32
  }
}

module attributes {stable_mosaic.version = 11 : i64} {
  func.func @_mm_kernel(%arg0: i32, %arg1: i32, %arg2: i32, %arg3: memref<16x768xbf16, #tpu.memory_space<vmem>>, %arg4: memref<4608x256xbf16, #tpu.memory_space<vmem>>, %arg5: memref<1x256xf32, #tpu.memory_space<vmem>>, %arg6: memref<1x256xf32, #tpu.memory_space<vmem>>, %arg7: memref<16x256xbf16, #tpu.memory_space<vmem>>, %arg8: memref<16x256xf32, #tpu.memory_space<vmem>>) attributes {dimension_semantics = [#tpu.dimension_semantics<parallel>, #tpu.dimension_semantics<parallel>, #tpu.dimension_semantics<arbitrary>], iteration_bounds = array<i64: 1, 1, 6>, scalar_prefetch = 0 : i64, scratch_operands = 1 : i64, tpu.core_type = #tpu.core_type<tc>, window_params = [{transform_indices = @transform_0, window_bounds = array<i64: 16, 768>}, {transform_indices = @transform_1, window_bounds = array<i64: 4608, 256>}, {transform_indices = @transform_2, window_bounds = array<i64: 1, 256>}, {transform_indices = @transform_3, window_bounds = array<i64: 1, 256>}, {transform_indices = @transform_4, window_bounds = array<i64: 16, 256>}]} {
    %c0_i32 = arith.constant 0 : i32
    %0 = arith.cmpi eq, %arg2, %c0_i32 : i32
    %1 = arith.extui %0 : i1 to i32
    %c0_i32_0 = arith.constant 0 : i32
    %2 = arith.cmpi ne, %1, %c0_i32_0 : i32
    scf.if %2 {
      %cst_8 = arith.constant 0.000000e+00 : f32
      %15 = vector.broadcast %cst_8 : f32 to vector<16x256xf32>
      %c0_9 = arith.constant 0 : index
      %c0_10 = arith.constant 0 : index
      %16 = vector.load %arg8[%c0_9, %c0_10] : memref<16x256xf32, #tpu.memory_space<vmem>>, vector<16x256xf32>
      tpu.vector_store %arg8[%c0_9, %c0_10], %15 {strides = array<i32>} : memref<16x256xf32, #tpu.memory_space<vmem>>, vector<16x256xf32>,
    } else {
    }
    %c768_i32 = arith.constant 768 : i32
    %3 = arith.muli %arg2, %c768_i32 : i32
    %4 = tpu.assume_multiple %3, 128 : i32
    %c0 = arith.constant 0 : index
    %c0_1 = arith.constant 0 : index
    %5 = vector.load %arg8[%c0, %c0_1] : memref<16x256xf32, #tpu.memory_space<vmem>>, vector<16x256xf32>
    %c0_2 = arith.constant 0 : index
    %c0_3 = arith.constant 0 : index
    %6 = vector.load %arg3[%c0_2, %c0_3] : memref<16x768xbf16, #tpu.memory_space<vmem>>, vector<16x768xbf16>
    %7 = arith.index_cast %4 : i32 to index
    %c0_4 = arith.constant 0 : index
    %8 = vector.load %arg4[%7, %c0_4] : memref<4608x256xbf16, #tpu.memory_space<vmem>>, vector<768x256xbf16>
    %cst = arith.constant dense<0.000000e+00> : vector<16x256xf32>
    %9 = tpu.matmul %6, %8, %cst {dimension_numbers = #tpu.dot_dimension_numbers<[1], [0], [0], [1], [0, 0, 1, 1], [], []>} : vector<16x768xbf16>, vector<768x256xbf16>, vector<16x256xf32> -> vector<16x256xf32>
    %10 = arith.addf %5, %9 : vector<16x256xf32>
    %c0_5 = arith.constant 0 : index
    %c0_6 = arith.constant 0 : index
    %11 = vector.load %arg8[%c0_5, %c0_6] : memref<16x256xf32, #tpu.memory_space<vmem>>, vector<16x256xf32>
    tpu.vector_store %arg8[%c0_5, %c0_6], %10 {strides = array<i32>} : memref<16x256xf32, #tpu.memory_space<vmem>>, vector<16x256xf32>,
    %c5_i32 = arith.constant 5 : i32
    %12 = arith.cmpi eq, %arg2, %c5_i32 : i32
    %13 = arith.extui %12 : i1 to i32
    %c0_i32_7 = arith.constant 0 : i32
    %14 = arith.cmpi ne, %13, %c0_i32_7 : i32
    scf.if %14 {
      %c0_8 = arith.constant 0 : index
      %c0_9 = arith.constant 0 : index
      %15 = vector.load %arg8[%c0_8, %c0_9] : memref<16x256xf32, #tpu.memory_space<vmem>>, vector<16x256xf32>
      %c0_10 = arith.constant 0 : index
      %c0_11 = arith.constant 0 : index
      %16 = vector.load %arg5[%c0_10, %c0_11] : memref<1x256xf32, #tpu.memory_space<vmem>>, vector<1x256xf32>
      %17 = vector.broadcast %16 : vector<1x256xf32> to vector<16x256xf32>
      %18 = arith.mulf %15, %17 : vector<16x256xf32>
      %c0_12 = arith.constant 0 : index
      %c0_13 = arith.constant 0 : index
      %19 = vector.load %arg6[%c0_12, %c0_13] : memref<1x256xf32, #tpu.memory_space<vmem>>, vector<1x256xf32>
      %20 = vector.broadcast %19 : vector<1x256xf32> to vector<16x256xf32>
      %21 = arith.addf %18, %20 : vector<16x256xf32>
      %cst_14 = arith.constant 0.000000e+00 : f32
      %22 = vector.broadcast %cst_14 : f32 to vector<16x256xf32>
      %23 = arith.maximumf %21, %22 : vector<16x256xf32>
      %24 = arith.truncf %23 : vector<16x256xf32> to vector<16x256xbf16>
      %c0_15 = arith.constant 0 : index
      %c0_16 = arith.constant 0 : index
      %25 = vector.load %arg7[%c0_15, %c0_16] : memref<16x256xbf16, #tpu.memory_space<vmem>>, vector<16x256xbf16>
      tpu.vector_store %arg7[%c0_15, %c0_16], %24 {strides = array<i32>} : memref<16x256xbf16, #tpu.memory_space<vmem>>, vector<16x256xbf16>,
    } else {
    }
    return
  }
  func.func @transform_0(%arg0: i32, %arg1: i32, %arg2: i32) -> (i32, i32) {
    %c0_i32 = arith.constant 0 : i32
    return %arg1, %arg2 : i32, i32
  }
  func.func @transform_1(%arg0: i32, %arg1: i32, %arg2: i32) -> (i32, i32) {
    %c0_i32 = arith.constant 0 : i32
    %c0_i32_0 = arith.constant 0 : i32
    return %c0_i32, %arg0 : i32, i32
  }
  func.func @transform_2(%arg0: i32, %arg1: i32, %arg2: i32) -> (i32, i32) {
    %c0_i32 = arith.constant 0 : i32
    %c0_i32_0 = arith.constant 0 : i32
    return %c0_i32, %arg0 : i32, i32
  }
  func.func @transform_3(%arg0: i32, %arg1: i32, %arg2: i32) -> (i32, i32) {
    %c0_i32 = arith.constant 0 : i32
    %c0_i32_0 = arith.constant 0 : i32
    return %c0_i32, %arg0 : i32, i32
  }
  func.func @transform_4(%arg0: i32, %arg1: i32, %arg2: i32) -> (i32, i32) {
    %c0_i32 = arith.constant 0 : i32
    return %arg1, %arg0 : i32, i32
  }
}

module attributes {stable_mosaic.version = 11 : i64} {
  func.func @_mm_kernel(%arg0: i32, %arg1: i32, %arg2: i32, %arg3: memref<16x512xbf16, #tpu.memory_space<vmem>>, %arg4: memref<512x256xbf16, #tpu.memory_space<vmem>>, %arg5: memref<1x256xf32, #tpu.memory_space<vmem>>, %arg6: memref<1x256xf32, #tpu.memory_space<vmem>>, %arg7: memref<16x256xbf16, #tpu.memory_space<vmem>>, %arg8: memref<16x256xf32, #tpu.memory_space<vmem>>) attributes {dimension_semantics = [#tpu.dimension_semantics<parallel>, #tpu.dimension_semantics<parallel>, #tpu.dimension_semantics<arbitrary>], iteration_bounds = array<i64: 1, 1, 1>, scalar_prefetch = 0 : i64, scratch_operands = 1 : i64, tpu.core_type = #tpu.core_type<tc>, window_params = [{transform_indices = @transform_0, window_bounds = array<i64: 16, 512>}, {transform_indices = @transform_1, window_bounds = array<i64: 512, 256>}, {transform_indices = @transform_2, window_bounds = array<i64: 1, 256>}, {transform_indices = @transform_3, window_bounds = array<i64: 1, 256>}, {transform_indices = @transform_4, window_bounds = array<i64: 16, 256>}]} {
    %c0_i32 = arith.constant 0 : i32
    %0 = arith.cmpi eq, %arg2, %c0_i32 : i32
    %1 = arith.extui %0 : i1 to i32
    %c0_i32_0 = arith.constant 0 : i32
    %2 = arith.cmpi ne, %1, %c0_i32_0 : i32
    scf.if %2 {
      %cst_9 = arith.constant 0.000000e+00 : f32
      %15 = vector.broadcast %cst_9 : f32 to vector<16x256xf32>
      %c0_10 = arith.constant 0 : index
      %c0_11 = arith.constant 0 : index
      %16 = vector.load %arg8[%c0_10, %c0_11] : memref<16x256xf32, #tpu.memory_space<vmem>>, vector<16x256xf32>
      tpu.vector_store %arg8[%c0_10, %c0_11], %15 {strides = array<i32>} : memref<16x256xf32, #tpu.memory_space<vmem>>, vector<16x256xf32>,
    } else {
    }
    %c512_i32 = arith.constant 512 : i32
    %3 = arith.muli %arg2, %c512_i32 : i32
    %4 = tpu.assume_multiple %3, 128 : i32
    %c0 = arith.constant 0 : index
    %c0_1 = arith.constant 0 : index
    %5 = vector.load %arg8[%c0, %c0_1] : memref<16x256xf32, #tpu.memory_space<vmem>>, vector<16x256xf32>
    %c0_2 = arith.constant 0 : index
    %c0_3 = arith.constant 0 : index
    %6 = vector.load %arg3[%c0_2, %c0_3] : memref<16x512xbf16, #tpu.memory_space<vmem>>, vector<16x512xbf16>
    %7 = arith.index_cast %4 : i32 to index
    %c0_4 = arith.constant 0 : index
    %8 = vector.load %arg4[%7, %c0_4] : memref<512x256xbf16, #tpu.memory_space<vmem>>, vector<512x256xbf16>
    %cst = arith.constant dense<0.000000e+00> : vector<16x256xf32>
    %9 = tpu.matmul %6, %8, %cst {dimension_numbers = #tpu.dot_dimension_numbers<[1], [0], [0], [1], [0, 0, 1, 1], [], []>} : vector<16x512xbf16>, vector<512x256xbf16>, vector<16x256xf32> -> vector<16x256xf32>
    %10 = arith.addf %5, %9 : vector<16x256xf32>
    %c0_5 = arith.constant 0 : index
    %c0_6 = arith.constant 0 : index
    %11 = vector.load %arg8[%c0_5, %c0_6] : memref<16x256xf32, #tpu.memory_space<vmem>>, vector<16x256xf32>
    tpu.vector_store %arg8[%c0_5, %c0_6], %10 {strides = array<i32>} : memref<16x256xf32, #tpu.memory_space<vmem>>, vector<16x256xf32>,
    %c0_i32_7 = arith.constant 0 : i32
    %12 = arith.cmpi eq, %arg2, %c0_i32_7 : i32
    %13 = arith.extui %12 : i1 to i32
    %c0_i32_8 = arith.constant 0 : i32
    %14 = arith.cmpi ne, %13, %c0_i32_8 : i32
    scf.if %14 {
      %c0_9 = arith.constant 0 : index
      %c0_10 = arith.constant 0 : index
      %15 = vector.load %arg8[%c0_9, %c0_10] : memref<16x256xf32, #tpu.memory_space<vmem>>, vector<16x256xf32>
      %c0_11 = arith.constant 0 : index
      %c0_12 = arith.constant 0 : index
      %16 = vector.load %arg5[%c0_11, %c0_12] : memref<1x256xf32, #tpu.memory_space<vmem>>, vector<1x256xf32>
      %17 = vector.broadcast %16 : vector<1x256xf32> to vector<16x256xf32>
      %18 = arith.mulf %15, %17 : vector<16x256xf32>
      %c0_13 = arith.constant 0 : index
      %c0_14 = arith.constant 0 : index
      %19 = vector.load %arg6[%c0_13, %c0_14] : memref<1x256xf32, #tpu.memory_space<vmem>>, vector<1x256xf32>
      %20 = vector.broadcast %19 : vector<1x256xf32> to vector<16x256xf32>
      %21 = arith.addf %18, %20 : vector<16x256xf32>
      %cst_15 = arith.constant 0.000000e+00 : f32
      %22 = vector.broadcast %cst_15 : f32 to vector<16x256xf32>
      %23 = arith.maximumf %21, %22 : vector<16x256xf32>
      %24 = arith.truncf %23 : vector<16x256xf32> to vector<16x256xbf16>
      %c0_16 = arith.constant 0 : index
      %c0_17 = arith.constant 0 : index
      %25 = vector.load %arg7[%c0_16, %c0_17] : memref<16x256xbf16, #tpu.memory_space<vmem>>, vector<16x256xbf16>
      tpu.vector_store %arg7[%c0_16, %c0_17], %24 {strides = array<i32>} : memref<16x256xbf16, #tpu.memory_space<vmem>>, vector<16x256xbf16>,
    } else {
    }
    return
  }
  func.func @transform_0(%arg0: i32, %arg1: i32, %arg2: i32) -> (i32, i32) {
    %c0_i32 = arith.constant 0 : i32
    return %arg1, %arg2 : i32, i32
  }
  func.func @transform_1(%arg0: i32, %arg1: i32, %arg2: i32) -> (i32, i32) {
    %c0_i32 = arith.constant 0 : i32
    %c0_i32_0 = arith.constant 0 : i32
    return %c0_i32, %arg0 : i32, i32
  }
  func.func @transform_2(%arg0: i32, %arg1: i32, %arg2: i32) -> (i32, i32) {
    %c0_i32 = arith.constant 0 : i32
    %c0_i32_0 = arith.constant 0 : i32
    return %c0_i32, %arg0 : i32, i32
  }
  func.func @transform_3(%arg0: i32, %arg1: i32, %arg2: i32) -> (i32, i32) {
    %c0_i32 = arith.constant 0 : i32
    %c0_i32_0 = arith.constant 0 : i32
    return %c0_i32, %arg0 : i32, i32
  }
  func.func @transform_4(%arg0: i32, %arg1: i32, %arg2: i32) -> (i32, i32) {
    %c0_i32 = arith.constant 0 : i32
    return %arg1, %arg0 : i32, i32
  }
}

module attributes {stable_mosaic.version = 11 : i64} {
  func.func @_mm_kernel(%arg0: i32, %arg1: i32, %arg2: i32, %arg3: memref<16x640xbf16, #tpu.memory_space<vmem>>, %arg4: memref<1280x256xbf16, #tpu.memory_space<vmem>>, %arg5: memref<1x256xf32, #tpu.memory_space<vmem>>, %arg6: memref<1x256xf32, #tpu.memory_space<vmem>>, %arg7: memref<16x256xbf16, #tpu.memory_space<vmem>>, %arg8: memref<16x256xf32, #tpu.memory_space<vmem>>) attributes {dimension_semantics = [#tpu.dimension_semantics<parallel>, #tpu.dimension_semantics<parallel>, #tpu.dimension_semantics<arbitrary>], iteration_bounds = array<i64: 1, 1, 2>, scalar_prefetch = 0 : i64, scratch_operands = 1 : i64, tpu.core_type = #tpu.core_type<tc>, window_params = [{transform_indices = @transform_0, window_bounds = array<i64: 16, 640>}, {transform_indices = @transform_1, window_bounds = array<i64: 1280, 256>}, {transform_indices = @transform_2, window_bounds = array<i64: 1, 256>}, {transform_indices = @transform_3, window_bounds = array<i64: 1, 256>}, {transform_indices = @transform_4, window_bounds = array<i64: 16, 256>}]} {
    %c0_i32 = arith.constant 0 : i32
    %0 = arith.cmpi eq, %arg2, %c0_i32 : i32
    %1 = arith.extui %0 : i1 to i32
    %c0_i32_0 = arith.constant 0 : i32
    %2 = arith.cmpi ne, %1, %c0_i32_0 : i32
    scf.if %2 {
      %cst_8 = arith.constant 0.000000e+00 : f32
      %15 = vector.broadcast %cst_8 : f32 to vector<16x256xf32>
      %c0_9 = arith.constant 0 : index
      %c0_10 = arith.constant 0 : index
      %16 = vector.load %arg8[%c0_9, %c0_10] : memref<16x256xf32, #tpu.memory_space<vmem>>, vector<16x256xf32>
      tpu.vector_store %arg8[%c0_9, %c0_10], %15 {strides = array<i32>} : memref<16x256xf32, #tpu.memory_space<vmem>>, vector<16x256xf32>,
    } else {
    }
    %c640_i32 = arith.constant 640 : i32
    %3 = arith.muli %arg2, %c640_i32 : i32
    %4 = tpu.assume_multiple %3, 128 : i32
    %c0 = arith.constant 0 : index
    %c0_1 = arith.constant 0 : index
    %5 = vector.load %arg8[%c0, %c0_1] : memref<16x256xf32, #tpu.memory_space<vmem>>, vector<16x256xf32>
    %c0_2 = arith.constant 0 : index
    %c0_3 = arith.constant 0 : index
    %6 = vector.load %arg3[%c0_2, %c0_3] : memref<16x640xbf16, #tpu.memory_space<vmem>>, vector<16x640xbf16>
    %7 = arith.index_cast %4 : i32 to index
    %c0_4 = arith.constant 0 : index
    %8 = vector.load %arg4[%7, %c0_4] : memref<1280x256xbf16, #tpu.memory_space<vmem>>, vector<640x256xbf16>
    %cst = arith.constant dense<0.000000e+00> : vector<16x256xf32>
    %9 = tpu.matmul %6, %8, %cst {dimension_numbers = #tpu.dot_dimension_numbers<[1], [0], [0], [1], [0, 0, 1, 1], [], []>} : vector<16x640xbf16>, vector<640x256xbf16>, vector<16x256xf32> -> vector<16x256xf32>
    %10 = arith.addf %5, %9 : vector<16x256xf32>
    %c0_5 = arith.constant 0 : index
    %c0_6 = arith.constant 0 : index
    %11 = vector.load %arg8[%c0_5, %c0_6] : memref<16x256xf32, #tpu.memory_space<vmem>>, vector<16x256xf32>
    tpu.vector_store %arg8[%c0_5, %c0_6], %10 {strides = array<i32>} : memref<16x256xf32, #tpu.memory_space<vmem>>, vector<16x256xf32>,
    %c1_i32 = arith.constant 1 : i32
    %12 = arith.cmpi eq, %arg2, %c1_i32 : i32
    %13 = arith.extui %12 : i1 to i32
    %c0_i32_7 = arith.constant 0 : i32
    %14 = arith.cmpi ne, %13, %c0_i32_7 : i32
    scf.if %14 {
      %c0_8 = arith.constant 0 : index
      %c0_9 = arith.constant 0 : index
      %15 = vector.load %arg8[%c0_8, %c0_9] : memref<16x256xf32, #tpu.memory_space<vmem>>, vector<16x256xf32>
      %c0_10 = arith.constant 0 : index
      %c0_11 = arith.constant 0 : index
      %16 = vector.load %arg5[%c0_10, %c0_11] : memref<1x256xf32, #tpu.memory_space<vmem>>, vector<1x256xf32>
      %17 = vector.broadcast %16 : vector<1x256xf32> to vector<16x256xf32>
      %18 = arith.mulf %15, %17 : vector<16x256xf32>
      %c0_12 = arith.constant 0 : index
      %c0_13 = arith.constant 0 : index
      %19 = vector.load %arg6[%c0_12, %c0_13] : memref<1x256xf32, #tpu.memory_space<vmem>>, vector<1x256xf32>
      %20 = vector.broadcast %19 : vector<1x256xf32> to vector<16x256xf32>
      %21 = arith.addf %18, %20 : vector<16x256xf32>
      %cst_14 = arith.constant 0.000000e+00 : f32
      %22 = vector.broadcast %cst_14 : f32 to vector<16x256xf32>
      %23 = arith.maximumf %21, %22 : vector<16x256xf32>
      %24 = arith.truncf %23 : vector<16x256xf32> to vector<16x256xbf16>
      %c0_15 = arith.constant 0 : index
      %c0_16 = arith.constant 0 : index
      %25 = vector.load %arg7[%c0_15, %c0_16] : memref<16x256xbf16, #tpu.memory_space<vmem>>, vector<16x256xbf16>
      tpu.vector_store %arg7[%c0_15, %c0_16], %24 {strides = array<i32>} : memref<16x256xbf16, #tpu.memory_space<vmem>>, vector<16x256xbf16>,
    } else {
    }
    return
  }
  func.func @transform_0(%arg0: i32, %arg1: i32, %arg2: i32) -> (i32, i32) {
    %c0_i32 = arith.constant 0 : i32
    return %arg1, %arg2 : i32, i32
  }
  func.func @transform_1(%arg0: i32, %arg1: i32, %arg2: i32) -> (i32, i32) {
    %c0_i32 = arith.constant 0 : i32
    %c0_i32_0 = arith.constant 0 : i32
    return %c0_i32, %arg0 : i32, i32
  }
  func.func @transform_2(%arg0: i32, %arg1: i32, %arg2: i32) -> (i32, i32) {
    %c0_i32 = arith.constant 0 : i32
    %c0_i32_0 = arith.constant 0 : i32
    return %c0_i32, %arg0 : i32, i32
  }
  func.func @transform_3(%arg0: i32, %arg1: i32, %arg2: i32) -> (i32, i32) {
    %c0_i32 = arith.constant 0 : i32
    %c0_i32_0 = arith.constant 0 : i32
    return %c0_i32, %arg0 : i32, i32
  }
  func.func @transform_4(%arg0: i32, %arg1: i32, %arg2: i32) -> (i32, i32) {
    %c0_i32 = arith.constant 0 : i32
    return %arg1, %arg0 : i32, i32
  }
}

module attributes {stable_mosaic.version = 11 : i64} {
  func.func @_mm_kernel(%arg0: i32, %arg1: i32, %arg2: i32, %arg3: memref<128x128xbf16, #tpu.memory_space<vmem>>, %arg4: memref<128x128xbf16, #tpu.memory_space<vmem>>, %arg5: memref<1x128xf32, #tpu.memory_space<vmem>>, %arg6: memref<1x128xf32, #tpu.memory_space<vmem>>, %arg7: memref<128x128xbf16, #tpu.memory_space<vmem>>, %arg8: memref<128x128xf32, #tpu.memory_space<vmem>>) attributes {dimension_semantics = [#tpu.dimension_semantics<parallel>, #tpu.dimension_semantics<parallel>, #tpu.dimension_semantics<arbitrary>], iteration_bounds = array<i64: 1, 1, 1>, scalar_prefetch = 0 : i64, scratch_operands = 1 : i64, tpu.core_type = #tpu.core_type<tc>, window_params = [{transform_indices = @transform_0, window_bounds = array<i64: 128, 128>}, {transform_indices = @transform_1, window_bounds = array<i64: 128, 128>}, {transform_indices = @transform_2, window_bounds = array<i64: 1, 128>}, {transform_indices = @transform_3, window_bounds = array<i64: 1, 128>}, {transform_indices = @transform_4, window_bounds = array<i64: 128, 128>}]} {
    %c0_i32 = arith.constant 0 : i32
    %0 = arith.cmpi eq, %arg2, %c0_i32 : i32
    %1 = arith.extui %0 : i1 to i32
    %c0_i32_0 = arith.constant 0 : i32
    %2 = arith.cmpi ne, %1, %c0_i32_0 : i32
    scf.if %2 {
      %cst_9 = arith.constant 0.000000e+00 : f32
      %15 = vector.broadcast %cst_9 : f32 to vector<128x128xf32>
      %c0_10 = arith.constant 0 : index
      %c0_11 = arith.constant 0 : index
      %16 = vector.load %arg8[%c0_10, %c0_11] : memref<128x128xf32, #tpu.memory_space<vmem>>, vector<128x128xf32>
      tpu.vector_store %arg8[%c0_10, %c0_11], %15 {strides = array<i32>} : memref<128x128xf32, #tpu.memory_space<vmem>>, vector<128x128xf32>,
    } else {
    }
    %c128_i32 = arith.constant 128 : i32
    %3 = arith.muli %arg2, %c128_i32 : i32
    %4 = tpu.assume_multiple %3, 128 : i32
    %c0 = arith.constant 0 : index
    %c0_1 = arith.constant 0 : index
    %5 = vector.load %arg8[%c0, %c0_1] : memref<128x128xf32, #tpu.memory_space<vmem>>, vector<128x128xf32>
    %c0_2 = arith.constant 0 : index
    %c0_3 = arith.constant 0 : index
    %6 = vector.load %arg3[%c0_2, %c0_3] : memref<128x128xbf16, #tpu.memory_space<vmem>>, vector<128x128xbf16>
    %7 = arith.index_cast %4 : i32 to index
    %c0_4 = arith.constant 0 : index
    %8 = vector.load %arg4[%7, %c0_4] : memref<128x128xbf16, #tpu.memory_space<vmem>>, vector<128x128xbf16>
    %cst = arith.constant dense<0.000000e+00> : vector<128x128xf32>
    %9 = tpu.matmul %6, %8, %cst {dimension_numbers = #tpu.dot_dimension_numbers<[1], [0], [0], [1], [0, 0, 1, 1], [], []>} : vector<128x128xbf16>, vector<128x128xbf16>, vector<128x128xf32> -> vector<128x128xf32>
    %10 = arith.addf %5, %9 : vector<128x128xf32>
    %c0_5 = arith.constant 0 : index
    %c0_6 = arith.constant 0 : index
    %11 = vector.load %arg8[%c0_5, %c0_6] : memref<128x128xf32, #tpu.memory_space<vmem>>, vector<128x128xf32>
    tpu.vector_store %arg8[%c0_5, %c0_6], %10 {strides = array<i32>} : memref<128x128xf32, #tpu.memory_space<vmem>>, vector<128x128xf32>,
    %c0_i32_7 = arith.constant 0 : i32
    %12 = arith.cmpi eq, %arg2, %c0_i32_7 : i32
    %13 = arith.extui %12 : i1 to i32
    %c0_i32_8 = arith.constant 0 : i32
    %14 = arith.cmpi ne, %13, %c0_i32_8 : i32
    scf.if %14 {
      %c0_9 = arith.constant 0 : index
      %c0_10 = arith.constant 0 : index
      %15 = vector.load %arg8[%c0_9, %c0_10] : memref<128x128xf32, #tpu.memory_space<vmem>>, vector<128x128xf32>
      %c0_11 = arith.constant 0 : index
      %c0_12 = arith.constant 0 : index
      %16 = vector.load %arg5[%c0_11, %c0_12] : memref<1x128xf32, #tpu.memory_space<vmem>>, vector<1x128xf32>
      %17 = vector.broadcast %16 : vector<1x128xf32> to vector<128x128xf32>
      %18 = arith.mulf %15, %17 : vector<128x128xf32>
      %c0_13 = arith.constant 0 : index
      %c0_14 = arith.constant 0 : index
      %19 = vector.load %arg6[%c0_13, %c0_14] : memref<1x128xf32, #tpu.memory_space<vmem>>, vector<1x128xf32>
      %20 = vector.broadcast %19 : vector<1x128xf32> to vector<128x128xf32>
      %21 = arith.addf %18, %20 : vector<128x128xf32>
      %22 = arith.truncf %21 : vector<128x128xf32> to vector<128x128xbf16>
      %c0_15 = arith.constant 0 : index
      %c0_16 = arith.constant 0 : index
      %23 = vector.load %arg7[%c0_15, %c0_16] : memref<128x128xbf16, #tpu.memory_space<vmem>>, vector<128x128xbf16>
      tpu.vector_store %arg7[%c0_15, %c0_16], %22 {strides = array<i32>} : memref<128x128xbf16, #tpu.memory_space<vmem>>, vector<128x128xbf16>,
    } else {
    }
    return
  }
  func.func @transform_0(%arg0: i32, %arg1: i32, %arg2: i32) -> (i32, i32) {
    %c0_i32 = arith.constant 0 : i32
    return %arg1, %arg2 : i32, i32
  }
  func.func @transform_1(%arg0: i32, %arg1: i32, %arg2: i32) -> (i32, i32) {
    %c0_i32 = arith.constant 0 : i32
    %c0_i32_0 = arith.constant 0 : i32
    return %c0_i32, %arg0 : i32, i32
  }
  func.func @transform_2(%arg0: i32, %arg1: i32, %arg2: i32) -> (i32, i32) {
    %c0_i32 = arith.constant 0 : i32
    %c0_i32_0 = arith.constant 0 : i32
    return %c0_i32, %arg0 : i32, i32
  }
  func.func @transform_3(%arg0: i32, %arg1: i32, %arg2: i32) -> (i32, i32) {
    %c0_i32 = arith.constant 0 : i32
    %c0_i32_0 = arith.constant 0 : i32
    return %c0_i32, %arg0 : i32, i32
  }
  func.func @transform_4(%arg0: i32, %arg1: i32, %arg2: i32) -> (i32, i32) {
    %c0_i32 = arith.constant 0 : i32
    return %arg1, %arg0 : i32, i32
  }
}

module attributes {stable_mosaic.version = 11 : i64} {
  func.func @_mm_kernel(%arg0: i32, %arg1: i32, %arg2: i32, %arg3: memref<128x384xbf16, #tpu.memory_space<vmem>>, %arg4: memref<3456x256xbf16, #tpu.memory_space<vmem>>, %arg5: memref<1x256xf32, #tpu.memory_space<vmem>>, %arg6: memref<1x256xf32, #tpu.memory_space<vmem>>, %arg7: memref<128x256xbf16, #tpu.memory_space<vmem>>, %arg8: memref<128x256xf32, #tpu.memory_space<vmem>>) attributes {dimension_semantics = [#tpu.dimension_semantics<parallel>, #tpu.dimension_semantics<parallel>, #tpu.dimension_semantics<arbitrary>], iteration_bounds = array<i64: 1, 1, 9>, scalar_prefetch = 0 : i64, scratch_operands = 1 : i64, tpu.core_type = #tpu.core_type<tc>, window_params = [{transform_indices = @transform_0, window_bounds = array<i64: 128, 384>}, {transform_indices = @transform_1, window_bounds = array<i64: 3456, 256>}, {transform_indices = @transform_2, window_bounds = array<i64: 1, 256>}, {transform_indices = @transform_3, window_bounds = array<i64: 1, 256>}, {transform_indices = @transform_4, window_bounds = array<i64: 128, 256>}]} {
    %c0_i32 = arith.constant 0 : i32
    %0 = arith.cmpi eq, %arg2, %c0_i32 : i32
    %1 = arith.extui %0 : i1 to i32
    %c0_i32_0 = arith.constant 0 : i32
    %2 = arith.cmpi ne, %1, %c0_i32_0 : i32
    scf.if %2 {
      %cst_8 = arith.constant 0.000000e+00 : f32
      %15 = vector.broadcast %cst_8 : f32 to vector<128x256xf32>
      %c0_9 = arith.constant 0 : index
      %c0_10 = arith.constant 0 : index
      %16 = vector.load %arg8[%c0_9, %c0_10] : memref<128x256xf32, #tpu.memory_space<vmem>>, vector<128x256xf32>
      tpu.vector_store %arg8[%c0_9, %c0_10], %15 {strides = array<i32>} : memref<128x256xf32, #tpu.memory_space<vmem>>, vector<128x256xf32>,
    } else {
    }
    %c384_i32 = arith.constant 384 : i32
    %3 = arith.muli %arg2, %c384_i32 : i32
    %4 = tpu.assume_multiple %3, 128 : i32
    %c0 = arith.constant 0 : index
    %c0_1 = arith.constant 0 : index
    %5 = vector.load %arg8[%c0, %c0_1] : memref<128x256xf32, #tpu.memory_space<vmem>>, vector<128x256xf32>
    %c0_2 = arith.constant 0 : index
    %c0_3 = arith.constant 0 : index
    %6 = vector.load %arg3[%c0_2, %c0_3] : memref<128x384xbf16, #tpu.memory_space<vmem>>, vector<128x384xbf16>
    %7 = arith.index_cast %4 : i32 to index
    %c0_4 = arith.constant 0 : index
    %8 = vector.load %arg4[%7, %c0_4] : memref<3456x256xbf16, #tpu.memory_space<vmem>>, vector<384x256xbf16>
    %cst = arith.constant dense<0.000000e+00> : vector<128x256xf32>
    %9 = tpu.matmul %6, %8, %cst {dimension_numbers = #tpu.dot_dimension_numbers<[1], [0], [0], [1], [0, 0, 1, 1], [], []>} : vector<128x384xbf16>, vector<384x256xbf16>, vector<128x256xf32> -> vector<128x256xf32>
    %10 = arith.addf %5, %9 : vector<128x256xf32>
    %c0_5 = arith.constant 0 : index
    %c0_6 = arith.constant 0 : index
    %11 = vector.load %arg8[%c0_5, %c0_6] : memref<128x256xf32, #tpu.memory_space<vmem>>, vector<128x256xf32>
    tpu.vector_store %arg8[%c0_5, %c0_6], %10 {strides = array<i32>} : memref<128x256xf32, #tpu.memory_space<vmem>>, vector<128x256xf32>,
    %c8_i32 = arith.constant 8 : i32
    %12 = arith.cmpi eq, %arg2, %c8_i32 : i32
    %13 = arith.extui %12 : i1 to i32
    %c0_i32_7 = arith.constant 0 : i32
    %14 = arith.cmpi ne, %13, %c0_i32_7 : i32
    scf.if %14 {
      %c0_8 = arith.constant 0 : index
      %c0_9 = arith.constant 0 : index
      %15 = vector.load %arg8[%c0_8, %c0_9] : memref<128x256xf32, #tpu.memory_space<vmem>>, vector<128x256xf32>
      %c0_10 = arith.constant 0 : index
      %c0_11 = arith.constant 0 : index
      %16 = vector.load %arg5[%c0_10, %c0_11] : memref<1x256xf32, #tpu.memory_space<vmem>>, vector<1x256xf32>
      %17 = vector.broadcast %16 : vector<1x256xf32> to vector<128x256xf32>
      %18 = arith.mulf %15, %17 : vector<128x256xf32>
      %c0_12 = arith.constant 0 : index
      %c0_13 = arith.constant 0 : index
      %19 = vector.load %arg6[%c0_12, %c0_13] : memref<1x256xf32, #tpu.memory_space<vmem>>, vector<1x256xf32>
      %20 = vector.broadcast %19 : vector<1x256xf32> to vector<128x256xf32>
      %21 = arith.addf %18, %20 : vector<128x256xf32>
      %cst_14 = arith.constant 0.000000e+00 : f32
      %22 = vector.broadcast %cst_14 : f32 to vector<128x256xf32>
      %23 = arith.maximumf %21, %22 : vector<128x256xf32>
      %24 = arith.truncf %23 : vector<128x256xf32> to vector<128x256xbf16>
      %c0_15 = arith.constant 0 : index
      %c0_16 = arith.constant 0 : index
      %25 = vector.load %arg7[%c0_15, %c0_16] : memref<128x256xbf16, #tpu.memory_space<vmem>>, vector<128x256xbf16>
      tpu.vector_store %arg7[%c0_15, %c0_16], %24 {strides = array<i32>} : memref<128x256xbf16, #tpu.memory_space<vmem>>, vector<128x256xbf16>,
    } else {
    }
    return
  }
  func.func @transform_0(%arg0: i32, %arg1: i32, %arg2: i32) -> (i32, i32) {
    %c0_i32 = arith.constant 0 : i32
    return %arg1, %arg2 : i32, i32
  }
  func.func @transform_1(%arg0: i32, %arg1: i32, %arg2: i32) -> (i32, i32) {
    %c0_i32 = arith.constant 0 : i32
    %c0_i32_0 = arith.constant 0 : i32
    return %c0_i32, %arg0 : i32, i32
  }
  func.func @transform_2(%arg0: i32, %arg1: i32, %arg2: i32) -> (i32, i32) {
    %c0_i32 = arith.constant 0 : i32
    %c0_i32_0 = arith.constant 0 : i32
    return %c0_i32, %arg0 : i32, i32
  }
  func.func @transform_3(%arg0: i32, %arg1: i32, %arg2: i32) -> (i32, i32) {
    %c0_i32 = arith.constant 0 : i32
    %c0_i32_0 = arith.constant 0 : i32
    return %c0_i32, %arg0 : i32, i32
  }
  func.func @transform_4(%arg0: i32, %arg1: i32, %arg2: i32) -> (i32, i32) {
    %c0_i32 = arith.constant 0 : i32
    return %arg1, %arg0 : i32, i32
  }
}

module attributes {stable_mosaic.version = 11 : i64} {
  func.func @_mm_kernel(%arg0: i32, %arg1: i32, %arg2: i32, %arg3: memref<128x768xbf16, #tpu.memory_space<vmem>>, %arg4: memref<2304x256xbf16, #tpu.memory_space<vmem>>, %arg5: memref<1x256xf32, #tpu.memory_space<vmem>>, %arg6: memref<1x256xf32, #tpu.memory_space<vmem>>, %arg7: memref<128x256xbf16, #tpu.memory_space<vmem>>, %arg8: memref<128x256xf32, #tpu.memory_space<vmem>>) attributes {dimension_semantics = [#tpu.dimension_semantics<parallel>, #tpu.dimension_semantics<parallel>, #tpu.dimension_semantics<arbitrary>], iteration_bounds = array<i64: 1, 1, 3>, scalar_prefetch = 0 : i64, scratch_operands = 1 : i64, tpu.core_type = #tpu.core_type<tc>, window_params = [{transform_indices = @transform_0, window_bounds = array<i64: 128, 768>}, {transform_indices = @transform_1, window_bounds = array<i64: 2304, 256>}, {transform_indices = @transform_2, window_bounds = array<i64: 1, 256>}, {transform_indices = @transform_3, window_bounds = array<i64: 1, 256>}, {transform_indices = @transform_4, window_bounds = array<i64: 128, 256>}]} {
    %c0_i32 = arith.constant 0 : i32
    %0 = arith.cmpi eq, %arg2, %c0_i32 : i32
    %1 = arith.extui %0 : i1 to i32
    %c0_i32_0 = arith.constant 0 : i32
    %2 = arith.cmpi ne, %1, %c0_i32_0 : i32
    scf.if %2 {
      %cst_8 = arith.constant 0.000000e+00 : f32
      %15 = vector.broadcast %cst_8 : f32 to vector<128x256xf32>
      %c0_9 = arith.constant 0 : index
      %c0_10 = arith.constant 0 : index
      %16 = vector.load %arg8[%c0_9, %c0_10] : memref<128x256xf32, #tpu.memory_space<vmem>>, vector<128x256xf32>
      tpu.vector_store %arg8[%c0_9, %c0_10], %15 {strides = array<i32>} : memref<128x256xf32, #tpu.memory_space<vmem>>, vector<128x256xf32>,
    } else {
    }
    %c768_i32 = arith.constant 768 : i32
    %3 = arith.muli %arg2, %c768_i32 : i32
    %4 = tpu.assume_multiple %3, 128 : i32
    %c0 = arith.constant 0 : index
    %c0_1 = arith.constant 0 : index
    %5 = vector.load %arg8[%c0, %c0_1] : memref<128x256xf32, #tpu.memory_space<vmem>>, vector<128x256xf32>
    %c0_2 = arith.constant 0 : index
    %c0_3 = arith.constant 0 : index
    %6 = vector.load %arg3[%c0_2, %c0_3] : memref<128x768xbf16, #tpu.memory_space<vmem>>, vector<128x768xbf16>
    %7 = arith.index_cast %4 : i32 to index
    %c0_4 = arith.constant 0 : index
    %8 = vector.load %arg4[%7, %c0_4] : memref<2304x256xbf16, #tpu.memory_space<vmem>>, vector<768x256xbf16>
    %cst = arith.constant dense<0.000000e+00> : vector<128x256xf32>
    %9 = tpu.matmul %6, %8, %cst {dimension_numbers = #tpu.dot_dimension_numbers<[1], [0], [0], [1], [0, 0, 1, 1], [], []>} : vector<128x768xbf16>, vector<768x256xbf16>, vector<128x256xf32> -> vector<128x256xf32>
    %10 = arith.addf %5, %9 : vector<128x256xf32>
    %c0_5 = arith.constant 0 : index
    %c0_6 = arith.constant 0 : index
    %11 = vector.load %arg8[%c0_5, %c0_6] : memref<128x256xf32, #tpu.memory_space<vmem>>, vector<128x256xf32>
    tpu.vector_store %arg8[%c0_5, %c0_6], %10 {strides = array<i32>} : memref<128x256xf32, #tpu.memory_space<vmem>>, vector<128x256xf32>,
    %c2_i32 = arith.constant 2 : i32
    %12 = arith.cmpi eq, %arg2, %c2_i32 : i32
    %13 = arith.extui %12 : i1 to i32
    %c0_i32_7 = arith.constant 0 : i32
    %14 = arith.cmpi ne, %13, %c0_i32_7 : i32
    scf.if %14 {
      %c0_8 = arith.constant 0 : index
      %c0_9 = arith.constant 0 : index
      %15 = vector.load %arg8[%c0_8, %c0_9] : memref<128x256xf32, #tpu.memory_space<vmem>>, vector<128x256xf32>
      %c0_10 = arith.constant 0 : index
      %c0_11 = arith.constant 0 : index
      %16 = vector.load %arg5[%c0_10, %c0_11] : memref<1x256xf32, #tpu.memory_space<vmem>>, vector<1x256xf32>
      %17 = vector.broadcast %16 : vector<1x256xf32> to vector<128x256xf32>
      %18 = arith.mulf %15, %17 : vector<128x256xf32>
      %c0_12 = arith.constant 0 : index
      %c0_13 = arith.constant 0 : index
      %19 = vector.load %arg6[%c0_12, %c0_13] : memref<1x256xf32, #tpu.memory_space<vmem>>, vector<1x256xf32>
      %20 = vector.broadcast %19 : vector<1x256xf32> to vector<128x256xf32>
      %21 = arith.addf %18, %20 : vector<128x256xf32>
      %cst_14 = arith.constant 0.000000e+00 : f32
      %22 = vector.broadcast %cst_14 : f32 to vector<128x256xf32>
      %23 = arith.maximumf %21, %22 : vector<128x256xf32>
      %24 = arith.truncf %23 : vector<128x256xf32> to vector<128x256xbf16>
      %c0_15 = arith.constant 0 : index
      %c0_16 = arith.constant 0 : index
      %25 = vector.load %arg7[%c0_15, %c0_16] : memref<128x256xbf16, #tpu.memory_space<vmem>>, vector<128x256xbf16>
      tpu.vector_store %arg7[%c0_15, %c0_16], %24 {strides = array<i32>} : memref<128x256xbf16, #tpu.memory_space<vmem>>, vector<128x256xbf16>,
    } else {
    }
    return
  }
  func.func @transform_0(%arg0: i32, %arg1: i32, %arg2: i32) -> (i32, i32) {
    %c0_i32 = arith.constant 0 : i32
    return %arg1, %arg2 : i32, i32
  }
  func.func @transform_1(%arg0: i32, %arg1: i32, %arg2: i32) -> (i32, i32) {
    %c0_i32 = arith.constant 0 : i32
    %c0_i32_0 = arith.constant 0 : i32
    return %c0_i32, %arg0 : i32, i32
  }
  func.func @transform_2(%arg0: i32, %arg1: i32, %arg2: i32) -> (i32, i32) {
    %c0_i32 = arith.constant 0 : i32
    %c0_i32_0 = arith.constant 0 : i32
    return %c0_i32, %arg0 : i32, i32
  }
  func.func @transform_3(%arg0: i32, %arg1: i32, %arg2: i32) -> (i32, i32) {
    %c0_i32 = arith.constant 0 : i32
    %c0_i32_0 = arith.constant 0 : i32
    return %c0_i32, %arg0 : i32, i32
  }
  func.func @transform_4(%arg0: i32, %arg1: i32, %arg2: i32) -> (i32, i32) {
    %c0_i32 = arith.constant 0 : i32
    return %arg1, %arg0 : i32, i32
  }
}

module attributes {stable_mosaic.version = 11 : i64} {
  func.func @_mm_kernel(%arg0: i32, %arg1: i32, %arg2: i32, %arg3: memref<128x256xbf16, #tpu.memory_space<vmem>>, %arg4: memref<256x128xbf16, #tpu.memory_space<vmem>>, %arg5: memref<1x128xf32, #tpu.memory_space<vmem>>, %arg6: memref<1x128xf32, #tpu.memory_space<vmem>>, %arg7: memref<128x128xf32, #tpu.memory_space<vmem>>, %arg8: memref<128x128xf32, #tpu.memory_space<vmem>>) attributes {dimension_semantics = [#tpu.dimension_semantics<parallel>, #tpu.dimension_semantics<parallel>, #tpu.dimension_semantics<arbitrary>], iteration_bounds = array<i64: 1, 1, 1>, scalar_prefetch = 0 : i64, scratch_operands = 1 : i64, tpu.core_type = #tpu.core_type<tc>, window_params = [{transform_indices = @transform_0, window_bounds = array<i64: 128, 256>}, {transform_indices = @transform_1, window_bounds = array<i64: 256, 128>}, {transform_indices = @transform_2, window_bounds = array<i64: 1, 128>}, {transform_indices = @transform_3, window_bounds = array<i64: 1, 128>}, {transform_indices = @transform_4, window_bounds = array<i64: 128, 128>}]} {
    %c0_i32 = arith.constant 0 : i32
    %0 = arith.cmpi eq, %arg2, %c0_i32 : i32
    %1 = arith.extui %0 : i1 to i32
    %c0_i32_0 = arith.constant 0 : i32
    %2 = arith.cmpi ne, %1, %c0_i32_0 : i32
    scf.if %2 {
      %cst_9 = arith.constant 0.000000e+00 : f32
      %15 = vector.broadcast %cst_9 : f32 to vector<128x128xf32>
      %c0_10 = arith.constant 0 : index
      %c0_11 = arith.constant 0 : index
      %16 = vector.load %arg8[%c0_10, %c0_11] : memref<128x128xf32, #tpu.memory_space<vmem>>, vector<128x128xf32>
      tpu.vector_store %arg8[%c0_10, %c0_11], %15 {strides = array<i32>} : memref<128x128xf32, #tpu.memory_space<vmem>>, vector<128x128xf32>,
    } else {
    }
    %c256_i32 = arith.constant 256 : i32
    %3 = arith.muli %arg2, %c256_i32 : i32
    %4 = tpu.assume_multiple %3, 128 : i32
    %c0 = arith.constant 0 : index
    %c0_1 = arith.constant 0 : index
    %5 = vector.load %arg8[%c0, %c0_1] : memref<128x128xf32, #tpu.memory_space<vmem>>, vector<128x128xf32>
    %c0_2 = arith.constant 0 : index
    %c0_3 = arith.constant 0 : index
    %6 = vector.load %arg3[%c0_2, %c0_3] : memref<128x256xbf16, #tpu.memory_space<vmem>>, vector<128x256xbf16>
    %7 = arith.index_cast %4 : i32 to index
    %c0_4 = arith.constant 0 : index
    %8 = vector.load %arg4[%7, %c0_4] : memref<256x128xbf16, #tpu.memory_space<vmem>>, vector<256x128xbf16>
    %cst = arith.constant dense<0.000000e+00> : vector<128x128xf32>
    %9 = tpu.matmul %6, %8, %cst {dimension_numbers = #tpu.dot_dimension_numbers<[1], [0], [0], [1], [0, 0, 1, 1], [], []>} : vector<128x256xbf16>, vector<256x128xbf16>, vector<128x128xf32> -> vector<128x128xf32>
    %10 = arith.addf %5, %9 : vector<128x128xf32>
    %c0_5 = arith.constant 0 : index
    %c0_6 = arith.constant 0 : index
    %11 = vector.load %arg8[%c0_5, %c0_6] : memref<128x128xf32, #tpu.memory_space<vmem>>, vector<128x128xf32>
    tpu.vector_store %arg8[%c0_5, %c0_6], %10 {strides = array<i32>} : memref<128x128xf32, #tpu.memory_space<vmem>>, vector<128x128xf32>,
    %c0_i32_7 = arith.constant 0 : i32
    %12 = arith.cmpi eq, %arg2, %c0_i32_7 : i32
    %13 = arith.extui %12 : i1 to i32
    %c0_i32_8 = arith.constant 0 : i32
    %14 = arith.cmpi ne, %13, %c0_i32_8 : i32
    scf.if %14 {
      %c0_9 = arith.constant 0 : index
      %c0_10 = arith.constant 0 : index
      %15 = vector.load %arg8[%c0_9, %c0_10] : memref<128x128xf32, #tpu.memory_space<vmem>>, vector<128x128xf32>
      %c0_11 = arith.constant 0 : index
      %c0_12 = arith.constant 0 : index
      %16 = vector.load %arg5[%c0_11, %c0_12] : memref<1x128xf32, #tpu.memory_space<vmem>>, vector<1x128xf32>
      %17 = vector.broadcast %16 : vector<1x128xf32> to vector<128x128xf32>
      %18 = arith.mulf %15, %17 : vector<128x128xf32>
      %c0_13 = arith.constant 0 : index
      %c0_14 = arith.constant 0 : index
      %19 = vector.load %arg6[%c0_13, %c0_14] : memref<1x128xf32, #tpu.memory_space<vmem>>, vector<1x128xf32>
      %20 = vector.broadcast %19 : vector<1x128xf32> to vector<128x128xf32>
      %21 = arith.addf %18, %20 : vector<128x128xf32>
      %c0_15 = arith.constant 0 : index
      %c0_16 = arith.constant 0 : index
      %22 = vector.load %arg7[%c0_15, %c0_16] : memref<128x128xf32, #tpu.memory_space<vmem>>, vector<128x128xf32>
      tpu.vector_store %arg7[%c0_15, %c0_16], %21 {strides = array<i32>} : memref<128x128xf32, #tpu.memory_space<vmem>>, vector<128x128xf32>,
    } else {
    }
    return
  }
  func.func @transform_0(%arg0: i32, %arg1: i32, %arg2: i32) -> (i32, i32) {
    %c0_i32 = arith.constant 0 : i32
    return %arg1, %arg2 : i32, i32
  }
  func.func @transform_1(%arg0: i32, %arg1: i32, %arg2: i32) -> (i32, i32) {
    %c0_i32 = arith.constant 0 : i32
    %c0_i32_0 = arith.constant 0 : i32
    return %c0_i32, %arg0 : i32, i32
  }
  func.func @transform_2(%arg0: i32, %arg1: i32, %arg2: i32) -> (i32, i32) {
    %c0_i32 = arith.constant 0 : i32
    %c0_i32_0 = arith.constant 0 : i32
    return %c0_i32, %arg0 : i32, i32
  }
  func.func @transform_3(%arg0: i32, %arg1: i32, %arg2: i32) -> (i32, i32) {
    %c0_i32 = arith.constant 0 : i32
    %c0_i32_0 = arith.constant 0 : i32
    return %c0_i32, %arg0 : i32, i32
  }
  func.func @transform_4(%arg0: i32, %arg1: i32, %arg2: i32) -> (i32, i32) {
    %c0_i32 = arith.constant 0 : i32
    return %arg1, %arg0 : i32, i32
  }
}

</mosaic_0001>

<bundles_post_ra>
// kernel: deeplabv3plus_forward.15
= control target key start
LH: loop header
LB: loop body
LE: loop exit
PB: predicated region body
PF: predicated region fallthrough
CT: control target
= control target key end

     0   :  { %s1734_s15 = smov 0   ;;  %s1736_s16 = smov 0   ;;  %s1987_s0 = inlined_call_operand.vmem [shape: bf16[128,1152], index: 0, kind: input, shape index: {}]   ;;  %s1988_s1 = inlined_call_operand.vmem [shape: bf16[1152,128], index: 1, kind: input, shape index: {}]   ;;  %s1989_s2 = inlined_call_operand.vmem [shape: f32[1,128], index: 2, kind: input, shape index: {}]   ;;  %s1990_s3 = inlined_call_operand.vmem [shape: f32[1,128], index: 3, kind: input, shape index: {}]   ;;  %s1991_s4 = inlined_call_operand.vmem [shape: bf16[128,128], index: 4, kind: output, shape index: {}]  }
   0x1   :  { %s1738_s17 = smov 0   ;;  %s1740_s18 = smov 0  }
   0x2   :  { %s1742_s19 = smov 0  }
   0x3 LB: > { %s26_s20 = sadd.s32 1, %s1702_s18  ;;  %p49_p1 = scmp.ne.s32.totalorder %s1694_s16, %s1690_s15  ;;  %s1706_s19 = sphi %s1742_s19, %s14_s19   ;;  %s1702_s18 = sphi %s1740_s18, %s1995_s18   ;;  %s1698_s17 = sphi %s1738_s17, %s1994_s17   ;;  %s1694_s16 = sphi %s1736_s16, %s1993_s16   ;;  %s1690_s15 = sphi %s1734_s15, %s1992_s15  }
   0x4   : > { %p27_p0 = scmp.ge.s32.totalorder %s26_s20, 3  ;;  %p50_p2 = scmp.eq.s32.totalorder %s1706_s19, 0 }
   0x5   : > { %s42_s22 = sadd.s32 1, %s1694_s16  ;;  %p1285_p5 = scmp.ge.s32.totalorder %s1706_s19, 3 }
   0x6   : > { %s1997_s20 = smov (%p27_p0, %s26_s20), 0  ;;  %p51_p3 = por %p50_p2, %p49_p1 }
   0x7   : > { %s38_s21 = ssub.s32 %s1702_s18, %s1997_s20  ;;  %200 = sbr.rel (%p1285_p5) target bundleno = 37 (0x25), region = 28 }
   0x8   : > { %p40_p4 = scmp.eq.s32.totalorder %s38_s21, 0 }
   0xa   : > { %s1769_s23 = scalar_select %p40_p4, %s1694_s16, %s42_s22  }
   0xe   : > { %203 = sbr.rel (!%p51_p3) target bundleno = 37 (0x25), region = 32  ;;  %s205_s24 = sand.u32 (%p51_p3), 1, %s1694_s16  }
   0xf   : > { %s1393_s25 = smul.u32 (%p51_p3), 12, %s1702_s18 }
  0x10   : > { %s1569_s26 = smul.u32 (%p51_p3), 192, %s205_s24 }
  0x11   : > { %s1777_s29 = scalar_lea.vmem (%p51_p3), %s1987_s0, %s1393_s25 }
  0x12   : > { %v228_v0 = vld [vmem:[%s1777_s29] sm:$0xff] (%p51_p3)  ;;  %v232_v2 = vld [vmem:[%s1777_s29 + $0x48] sm:$0xff] (%p51_p3)  ;;  %s1782_s30 = scalar_lea.vmem (%p51_p3), [#allocation3], %s1569_s26  ;;  %v236_v4 = vld [vmem:[%s1777_s29 + $0x90] sm:$0xff] (%p51_p3) }
  0x13   : > { %v230_v1 = vld [vmem:[%s1777_s29 + $0x24] sm:$0xff] (%p51_p3)  ;;  %229 = vst [vmem:[%s1782_s30] sm:$0xff] (%p51_p3), %v228_v0  ;;  %233 = vst [vmem:[%s1782_s30 + $0x18] sm:$0xff] (%p51_p3), %v232_v2  ;;  %v234_v3 = vld [vmem:[%s1777_s29 + $0x6c] sm:$0xff] (%p51_p3) }
  0x14   : > { %231 = vst [vmem:[%s1782_s30 + $0xc] sm:$0xff] (%p51_p3), %v230_v1  ;;  %v238_v5 = vld [vmem:[%s1777_s29 + $0xb4] sm:$0xff] (%p51_p3)  ;;  %235 = vst [vmem:[%s1782_s30 + $0x24] sm:$0xff] (%p51_p3), %v234_v3  ;;  %v242_v7 = vld [vmem:[%s1777_s29 + $0xfc] sm:$0xff] (%p51_p3) }
  0x15   : > { %237 = vst [vmem:[%s1782_s30 + $0x30] sm:$0xff] %v236_v4  ;;  %239 = vst [vmem:[%s1782_s30 + $0x3c] sm:$0xff] %v238_v5  ;;  %v240_v6 = vld [vmem:[%s1777_s29 + $0xd8] sm:$0xff]  ;;  %v244_v8 = vld [vmem:[%s1777_s29 + $0x120] sm:$0xff] }
  0x16   : > { %241 = vst [vmem:[%s1782_s30 + $0x48] sm:$0xff] %v240_v6  ;;  %243 = vst [vmem:[%s1782_s30 + $0x54] sm:$0xff] %v242_v7  ;;  %v246_v9 = vld [vmem:[%s1777_s29 + $0x144] sm:$0xff]  ;;  %v250_v11 = vld [vmem:[%s1777_s29 + $0x18c] sm:$0xff] }
  0x17   : > { %245 = vst [vmem:[%s1782_s30 + $0x60] sm:$0xff] %v244_v8  ;;  %v248_v10 = vld [vmem:[%s1777_s29 + $0x168] sm:$0xff]  ;;  %247 = vst [vmem:[%s1782_s30 + $0x6c] sm:$0xff] %v246_v9  ;;  %v252_v12 = vld [vmem:[%s1777_s29 + $0x1b0] sm:$0xff] }
  0x18   : > { %249 = vst [vmem:[%s1782_s30 + $0x78] sm:$0xff] %v248_v10  ;;  %251 = vst [vmem:[%s1782_s30 + $0x84] sm:$0xff] %v250_v11  ;;  %v254_v13 = vld [vmem:[%s1777_s29 + $0x1d4] sm:$0xff]  ;;  %v258_v15 = vld [vmem:[%s1777_s29 + $0x21c] sm:$0xff] }
  0x19   : > { %v256_v14 = vld [vmem:[%s1777_s29 + $0x1f8] sm:$0xff]  ;;  %253 = vst [vmem:[%s1782_s30 + $0x90] sm:$0xff] %v252_v12  ;;  %255 = vst [vmem:[%s1782_s30 + $0x9c] sm:$0xff] %v254_v13  ;;  %v1287_v16 = vld [vmem:[%s1777_s29 + $0x8] sm:$0xf] }
  0x1a   : > { %257 = vst [vmem:[%s1782_s30 + $0xa8] sm:$0xff] %v256_v14  ;;  %v1289_v17 = vld [vmem:[%s1777_s29 + $0x2c] sm:$0xf]  ;;  %259 = vst [vmem:[%s1782_s30 + $0xb4] sm:$0xff] %v258_v15  ;;  %v1291_v18 = vld [vmem:[%s1777_s29 + $0x50] sm:$0xf] }
  0x1b   : > { %1288 = vst [vmem:[%s1782_s30 + $0x8] sm:$0xf] %v1287_v16  ;;  %1290 = vst [vmem:[%s1782_s30 + $0x14] sm:$0xf] %v1289_v17  ;;  %v1293_v19 = vld [vmem:[%s1777_s29 + $0x74] sm:$0xf] }
  0x1c   : > { %v1295_v20 = vld [vmem:[%s1777_s29 + $0x98] sm:$0xf]  ;;  %1292 = vst [vmem:[%s1782_s30 + $0x20] sm:$0xf] %v1291_v18  ;;  %1294 = vst [vmem:[%s1782_s30 + $0x2c] sm:$0xf] %v1293_v19 }
  0x1d   : > { %1296 = vst [vmem:[%s1782_s30 + $0x38] sm:$0xf] %v1295_v20  ;;  %v1297_v21 = vld [vmem:[%s1777_s29 + $0xbc] sm:$0xf]  ;;  %v1299_v22 = vld [vmem:[%s1777_s29 + $0xe0] sm:$0xf] }
  0x1e   : > { %v1301_v23 = vld [vmem:[%s1777_s29 + $0x104] sm:$0xf]  ;;  %1298 = vst [vmem:[%s1782_s30 + $0x44] sm:$0xf] %v1297_v21  ;;  %1300 = vst [vmem:[%s1782_s30 + $0x50] sm:$0xf] %v1299_v22 }
  0x1f   : > { %1302 = vst [vmem:[%s1782_s30 + $0x5c] sm:$0xf] %v1301_v23  ;;  %v1303_v24 = vld [vmem:[%s1777_s29 + $0x128] sm:$0xf]  ;;  %v1305_v25 = vld [vmem:[%s1777_s29 + $0x14c] sm:$0xf] }
  0x20   : > { %v1307_v26 = vld [vmem:[%s1777_s29 + $0x170] sm:$0xf]  ;;  %1304 = vst [vmem:[%s1782_s30 + $0x68] sm:$0xf] %v1303_v24  ;;  %1306 = vst [vmem:[%s1782_s30 + $0x74] sm:$0xf] %v1305_v25 }
  0x21   : > { %1308 = vst [vmem:[%s1782_s30 + $0x80] sm:$0xf] %v1307_v26  ;;  %v1309_v27 = vld [vmem:[%s1777_s29 + $0x194] sm:$0xf]  ;;  %v1311_v28 = vld [vmem:[%s1777_s29 + $0x1b8] sm:$0xf] }
  0x22   : > { %v1313_v29 = vld [vmem:[%s1777_s29 + $0x1dc] sm:$0xf]  ;;  %1310 = vst [vmem:[%s1782_s30 + $0x8c] sm:$0xf] %v1309_v27  ;;  %1312 = vst [vmem:[%s1782_s30 + $0x98] sm:$0xf] %v1311_v28 }
  0x23   : > { %1314 = vst [vmem:[%s1782_s30 + $0xa4] sm:$0xf] %v1313_v29  ;;  %v1315_v30 = vld [vmem:[%s1777_s29 + $0x200] sm:$0xf]  ;;  %v1317_v31 = vld [vmem:[%s1777_s29 + $0x224] sm:$0xf] }
  0x24   : > { %1316 = vst [vmem:[%s1782_s30 + $0xb0] sm:$0xf] %v1315_v30  ;;  %1318 = vst [vmem:[%s1782_s30 + $0xbc] sm:$0xf] %v1317_v31 }
  0x25 PF: > { %p1319_p6 = scmp.ge.s32.totalorder %s1706_s19, 1  ;;  %p303_p7 = scmp.lt.s32.totalorder %s1706_s19, 4 }
  0x27   : > { %p304_p8 = pnand %p1319_p6, %p303_p7 }
  0x28   : > { %s310_s5 = sand.u32 (!%p304_p8), 1, %s1690_s15   ;;  %p1320_p9 = scmp.ne.s32.totalorder (!%p304_p8), %s1698_s17, 0 }
  0x29   : > { %307 = sbr.rel (%p304_p8) target bundleno = 389 (0x185), region = 58 }
  0x2a   : > { %s1570_s6 = smul.u32 (!%p304_p8), 192, %s310_s5 }
  0x2c   : > { %s1848_s7 = scalar_lea.vmem (!%p304_p8), [#allocation3], %s1570_s6 }
  0x30   : > { %373 = sbr.rel (%p1320_p9) target bundleno = 57 (0x39), region = 66  ;;  %v1708_v32 = vmov (!%p1320_p9), 0.0  }
  0x31   : > { %374 = vst [vmem:[#allocation2] sm:$0xff] (!%p1320_p9), %v1708_v32  ;;  %375 = vst [vmem:[#allocation2 + $0x8] sm:$0xff] (!%p1320_p9), %v1708_v32 }
  0x32   : > { %376 = vst [vmem:[#allocation2 + $0x10] sm:$0xff] (!%p1320_p9), %v1708_v32  ;;  %377 = vst [vmem:[#allocation2 + $0x18] sm:$0xff] (!%p1320_p9), %v1708_v32 }
  0x33   : > { %378 = vst [vmem:[#allocation2 + $0x20] sm:$0xff] (!%p1320_p9), %v1708_v32  ;;  %379 = vst [vmem:[#allocation2 + $0x28] sm:$0xff] (!%p1320_p9), %v1708_v32 }
  0x34   : > { %380 = vst [vmem:[#allocation2 + $0x30] sm:$0xff] (!%p1320_p9), %v1708_v32  ;;  %381 = vst [vmem:[#allocation2 + $0x38] sm:$0xff] (!%p1320_p9), %v1708_v32 }
  0x35   : > { %382 = vst [vmem:[#allocation2 + $0x40] sm:$0xff] (!%p1320_p9), %v1708_v32  ;;  %383 = vst [vmem:[#allocation2 + $0x48] sm:$0xff] (!%p1320_p9), %v1708_v32 }
  0x36   : > { %384 = vst [vmem:[#allocation2 + $0x50] sm:$0xff] (!%p1320_p9), %v1708_v32  ;;  %385 = vst [vmem:[#allocation2 + $0x58] sm:$0xff] (!%p1320_p9), %v1708_v32 }
  0x37   : > { %386 = vst [vmem:[#allocation2 + $0x60] sm:$0xff] %v1708_v32  ;;  %387 = vst [vmem:[#allocation2 + $0x68] sm:$0xff] %v1708_v32 }
  0x38   : > { %388 = vst [vmem:[#allocation2 + $0x70] sm:$0xff] %v1708_v32  ;;  %389 = vst [vmem:[#allocation2 + $0x78] sm:$0xff] %v1708_v32 }
  0x39 PF: > { %s390_s8 = smul.u32 384, %s1698_s17  ;;  %v1638_v33 = vld [vmem:[%s1848_s7 + $0x4] ss:$12 sps:$4 sm:$0xff]   ;;  %v1639_v34 = vld [vmem:[%s1848_s7 + $0x8] ss:$12 sps:$4 sm:$0xff]   ;;  %p1370_p10 = scmp.ne.s32.totalorder %s1698_s17, 2 }
  0x3a   : > { %795 = vmatprep.mubr.bf16.mxu0 %v1638_v33  ;;  %1553 = vmatprep.mubr.bf16.mxu1 %v1639_v34  ;;  %v1636_v59 = vld [vmem:[%s1848_s7] ss:$12 sps:$4 sm:$0xff]   ;;  %v1641_v60 = vld [vmem:[%s1848_s7 + $0x1c] ss:$12 sps:$4 sm:$0xff]   ;;  %v1647_v62 = vld [vmem:[%s1848_s7 + $0x38] ss:$12 sps:$4 sm:$0xff]  }
  0x3b   : > { %s439_s9 = sshra.s32 %s390_s8, 3  ;;  %v1640_v61 = vld [vmem:[%s1848_s7 + $0x20] ss:$12 sps:$4 sm:$0xff]   ;;  %v1643_v63 = vld [vmem:[%s1848_s7 + $0x18] ss:$12 sps:$4 sm:$0xff]  }
  0x3c   : > { %s1321_s10 = sshll.u32 %s439_s9, 2  ;;  %v1644_v0 = vld [vmem:[%s1848_s7 + $0x34] ss:$12 sps:$4 sm:$0xff]   ;;  %v1648_v1 = vld [vmem:[%s1848_s7 + $0x50] ss:$12 sps:$4 sm:$0xff]   ;;  %v392_v28 = vld [vmem:[#allocation2 + $0x8] sm:$0xff] }
  0x3d   : > { %s1857_s13 = scalar_lea.vmem %s1988_s1, %s1321_s10  ;;  %v1655_v2 = vld [vmem:[%s1848_s7 + $0x68] ss:$12 sps:$4 sm:$0xff]   ;;  %v1646_v3 = vld [vmem:[%s1848_s7 + $0x30] ss:$12 sps:$4 sm:$0xff]   ;;  %v1649_v4 = vld [vmem:[%s1848_s7 + $0x4c] ss:$12 sps:$4 sm:$0xff]  }
  0x3e   : > { %v1612_v35 = vld [vmem:[%s1857_s13 + $0x40] sm:$0xff]   ;;  %v1615_v38 = vld [vmem:[%s1857_s13 + $0x48] sm:$0xff]   ;;  %v1618_v41 = vld [vmem:[%s1857_s13 + $0x50] sm:$0xff]  }
  0x3f   : > { %v1613_v36 = vld [vmem:[%s1857_s13] sm:$0xff]   ;;  %1457 = vmatprep.subr.bf16.mxu0 %v1612_v35  ;;  %v1616_v39 = vld [vmem:[%s1857_s13 + $0x8] sm:$0xff]   ;;  %v1619_v42 = vld [vmem:[%s1857_s13 + $0x10] sm:$0xff]  }
  0x40   : > { %v1614_v37 = vld [vmem:[%s1857_s13 + $0x80] sm:$0xff]   ;;  %1458 = vmatpush3.bf16.msra.mxu0 %v1613_v36  ;;  %v1617_v40 = vld [vmem:[%s1857_s13 + $0x88] sm:$0xff]   ;;  %v1620_v43 = vld [vmem:[%s1857_s13 + $0x90] sm:$0xff]  }
  0x41   : > { %1537 = vmatprep.subr.bf16.mxu1 %v1614_v37  ;;  %1459 = vmatprep.subr.bf16.mxu0 %v1615_v38  ;;  %v1621_v44 = vld [vmem:[%s1857_s13 + $0x58] sm:$0xff]   ;;  %v1624_v47 = vld [vmem:[%s1857_s13 + $0x60] sm:$0xff]   ;;  %v1627_v50 = vld [vmem:[%s1857_s13 + $0x68] sm:$0xff]  }
  0x42   : > { %1538 = vmatpush3.bf16.msra.mxu1 %v1614_v37  ;;  %v1622_v45 = vld [vmem:[%s1857_s13 + $0x18] sm:$0xff]   ;;  %v1626_v48 = vld [vmem:[%s1857_s13 + $0xa0] sm:$0xff]   ;;  %v1629_v51 = vld [vmem:[%s1857_s13 + $0xa8] sm:$0xff]  }
  0x43   : > { %1539 = vmatprep.subr.bf16.mxu1 %v1617_v40  ;;  %v1623_v46 = vld [vmem:[%s1857_s13 + $0x98] sm:$0xff]   ;;  %v1625_v49 = vld [vmem:[%s1857_s13 + $0x20] sm:$0xff]   ;;  %v1628_v52 = vld [vmem:[%s1857_s13 + $0x28] sm:$0xff]  }
  0x44   : > { %1460 = vmatpush3.bf16.msra.mxu0 %v1616_v39  ;;  %v1630_v53 = vld [vmem:[%s1857_s13 + $0x70] sm:$0xff]   ;;  %v1633_v56 = vld [vmem:[%s1857_s13 + $0x78] sm:$0xff]   ;;  %v1656_v5 = vld [vmem:[%s1848_s7 + $0x80] ss:$12 sps:$4 sm:$0xff]  }
  0x45   : > { %1461 = vmatprep.subr.bf16.mxu0 %v1618_v41  ;;  %v1632_v54 = vld [vmem:[%s1857_s13 + $0xb0] sm:$0xff]   ;;  %v1635_v57 = vld [vmem:[%s1857_s13 + $0xb8] sm:$0xff]   ;;  %v1654_v10 = vld [vmem:[%s1848_s7 + $0x60] ss:$12 sps:$4 sm:$0xff]  }
  0x46   : > { %1540 = vmatpush3.bf16.msra.mxu1 %v1617_v40  ;;  %v1631_v55 = vld [vmem:[%s1857_s13 + $0x30] sm:$0xff]   ;;  %v1634_v58 = vld [vmem:[%s1857_s13 + $0x38] sm:$0xff]   ;;  %v391_v23 = vld [vmem:[#allocation2] sm:$0xff] }
  0x47   : > { %1541 = vmatprep.subr.bf16.mxu1 %v1620_v43  ;;  %v1663_v6 = vld [vmem:[%s1848_s7 + $0x98] ss:$12 sps:$4 sm:$0xff]   ;;  %v1651_v7 = vld [vmem:[%s1848_s7 + $0x48] ss:$12 sps:$4 sm:$0xff]   ;;  %v1664_v9 = vld [vmem:[%s1848_s7 + $0xb0] ss:$12 sps:$4 sm:$0xff]  }
  0x48   : > { %1462 = vmatpush3.bf16.msra.mxu0 %v1619_v42  ;;  %v1652_v8 = vld [vmem:[%s1848_s7 + $0x64] ss:$12 sps:$4 sm:$0xff]   ;;  %v1657_v11 = vld [vmem:[%s1848_s7 + $0x7c] ss:$12 sps:$4 sm:$0xff]   ;;  %v1660_v13 = vld [vmem:[%s1848_s7 + $0x94] ss:$12 sps:$4 sm:$0xff]  }
  0x49   : > { %1463 = vmatprep.subr.bf16.mxu0 %v1621_v44  ;;  %v1659_v12 = vld [vmem:[%s1848_s7 + $0x78] ss:$12 sps:$4 sm:$0xff]   ;;  %v1662_v14 = vld [vmem:[%s1848_s7 + $0x90] ss:$12 sps:$4 sm:$0xff]   ;;  %v1667_v16 = vld [vmem:[%s1848_s7 + $0xa8] ss:$12 sps:$4 sm:$0xff]  }
  0x4a   : > { %1542 = vmatpush3.bf16.msra.mxu1 %v1620_v43  ;;  %v1665_v15 = vld [vmem:[%s1848_s7 + $0xac] ss:$12 sps:$4 sm:$0xff]   ;;  %v393_v38 = vld [vmem:[#allocation2 + $0x10] sm:$0xff] }
  0x4b   : > { %1543 = vmatprep.subr.bf16.mxu1 %v1623_v46  ;;  %v394_v44 = vld [vmem:[#allocation2 + $0x18] sm:$0xff] }
  0x4c   : > { %1464 = vmatpush3.bf16.msra.mxu0 %v1622_v45 }
  0x4d   : > { %1465 = vmatprep.subr.bf16.mxu0 %v1624_v47 }
  0x4e   : > { %1544 = vmatpush3.bf16.msra.mxu1 %v1623_v46 }
  0x4f   : > { %1545 = vmatprep.subr.bf16.mxu1 %v1626_v48 }
  0x50   : > { %1466 = vmatpush3.bf16.msra.mxu0 %v1625_v49 }
  0x51   : > { %1467 = vmatprep.subr.bf16.mxu0 %v1627_v50 }
  0x52   : > { %1546 = vmatpush3.bf16.msra.mxu1 %v1626_v48 }
  0x53   : > { %1547 = vmatprep.subr.bf16.mxu1 %v1629_v51 }
  0x54   : > { %1468 = vmatpush3.bf16.msra.mxu0 %v1628_v52 }
  0x55   : > { %1469 = vmatprep.subr.bf16.mxu0 %v1630_v53 }
  0x56   : > { %1548 = vmatpush3.bf16.msra.mxu1 %v1629_v51 }
  0x57   : > { %1549 = vmatprep.subr.bf16.mxu1 %v1632_v54 }
  0x58   : > { %1470 = vmatpush3.bf16.msra.mxu0 %v1631_v55  ;;  %v395_v55 = vld [vmem:[#allocation2 + $0x20] sm:$0xff] }
  0x59   : > { %1471 = vmatprep.subr.bf16.mxu0 %v1633_v56 }
  0x5a   : > { %1550 = vmatpush3.bf16.msra.mxu1 %v1632_v54 }
  0x5b   : > { %1551 = vmatprep.subr.bf16.mxu1 %v1635_v57 }
  0x5c   : > { %1472 = vmatpush3.bf16.msra.mxu0 %v1634_v58 }
  0x5e   : > { %1552 = vmatpush3.bf16.msra.mxu1 %v1635_v57 }
  0x5f   : > { %796 = vmatmul.mubr.bf16.vlgmr.msra.gmra.mrb[0].mxu0 %v1636_v59 }
  0x60   : > { %803 = vmatprep.mubr.bf16.mxu0 %v1641_v60  ;;  %v396_v60 = vld [vmem:[#allocation2 + $0x28] sm:$0xff] }
  0x61   : > { %1554 = vmatmul.mubr.bf16.vlgmr.msra.gmra.mrb[0].mxu1 %v1640_v61 }
  0x62   : > { %1557 = vmatprep.mubr.bf16.mxu1 %v1647_v62 }
  0x67   : > { %804 = vmatmul.mubr.bf16.gmra.mrb[4].mxu0 %v1643_v63 }
  0x68   : > { %811 = vmatprep.mubr.bf16.mxu0 %v1644_v0 }
  0x69   : > { %1558 = vmatmul.mubr.bf16.gmra.mrb[4].mxu1 %v1648_v1 }
  0x6a   : > { %1561 = vmatprep.mubr.bf16.mxu1 %v1655_v2 }
  0x6f   : > { %812 = vmatmul.mubr.bf16.gmra.mrb[8].mxu0 %v1646_v3 }
  0x70   : > { %819 = vmatprep.mubr.bf16.mxu0 %v1649_v4 }
  0x71   : > { %1562 = vmatmul.mubr.bf16.gmra.mrb[8].mxu1 %v1656_v5 }
  0x72   : > { %1565 = vmatprep.mubr.bf16.mxu1 %v1663_v6  ;;  %v397_v6 = vld [vmem:[#allocation2 + $0x30] sm:$0xff] }
  0x77   : > { %820 = vmatmul.mubr.bf16.gmra.mrb[12].mxu0 %v1651_v7 }
  0x78   : > { %827 = vmatprep.mubr.bf16.mxu0 %v1652_v8 }
  0x79   : > { %1566 = vmatmul.mubr.bf16.gmra.mrb[12].mxu1 %v1664_v9 }
  0x7f   : > { %828 = vmatmul.mubr.bf16.gmra.mrb[16].mxu0 %v1654_v10 }
  0x80   : > { %835 = vmatprep.mubr.bf16.mxu0 %v1657_v11 }
  0x87   : > { %836 = vmatmul.mubr.bf16.gmra.mrb[20].mxu0 %v1659_v12  ;;  %v398_v12 = vld [vmem:[#allocation2 + $0x38] sm:$0xff] }
  0x88   : > { %843 = vmatprep.mubr.bf16.mxu0 %v1660_v13 }
  0x8f   : > { %844 = vmatmul.mubr.bf16.gmra.mrb[24].mxu0 %v1662_v14 }
  0x90   : > { %851 = vmatprep.mubr.bf16.mxu0 %v1665_v15 }
  0x97   : > { %852 = vmatmul.mubr.bf16.gmra.mrb[28].mxu0 %v1667_v16 }
 0x132   : > { %v1473_v17 = vpop.f32.mrb[0].mxu0 }
 0x133   : > { %v1474_v18 = vpop.f32.mrb[1].mxu0 }
 0x134   : > { %v1475_v19 = vadd.f32 %v1474_v18, %v1473_v17  ;;  %v1476_v20 = vpop.f32.mrb[2].mxu0  ;;  %v1555_v21 = vpop.f32.mrb[0].mxu1 }
 0x135   : > { %v1477_v22 = vpop.f32.mrb[3].mxu0  ;;  %v894_v24 = vpop.f32.mrb[1].mxu1 }
 0x136   : > { %v1478_v25 = vadd.f32 %v1477_v22, %v1476_v20  ;;  %v895_v26 = vadd.f32 %v1475_v19, %v894_v24  ;;  %v1556_v27 = vpop.f32.mrb[2].mxu1  ;;  %v399_v22 = vld [vmem:[#allocation2 + $0x40] sm:$0xff] }
 0x137   : > { %v897_v29 = vpop.f32.mrb[3].mxu1 }
 0x138   : > { %v957_v30 = vadd.f32 %v895_v26, %v391_v23  ;;  %v898_v31 = vadd.f32 %v1478_v25, %v897_v29  ;;  %v400_v25 = vld [vmem:[#allocation2 + $0x48] sm:$0xff] }
 0x13a   : > { %973 = vst [vmem:[#allocation2] sm:$0xff] %v957_v30  ;;  %v958_v32 = vadd.f32 %v898_v31, %v392_v28  ;;  %v1479_v33 = vpop.f32.mrb[4].mxu0 }
 0x13b   : > { %v1480_v34 = vpop.f32.mrb[5].mxu0 }
 0x13c   : > { %974 = vst [vmem:[#allocation2 + $0x8] sm:$0xff] %v958_v32  ;;  %v1481_v35 = vadd.f32 %v1480_v34, %v1479_v33  ;;  %v1482_v36 = vpop.f32.mrb[6].mxu0  ;;  %v1559_v37 = vpop.f32.mrb[4].mxu1  ;;  %v401_v33 = vld [vmem:[#allocation2 + $0x50] sm:$0xff] }
 0x13d   : > { %v1483_v39 = vpop.f32.mrb[7].mxu0  ;;  %v910_v40 = vpop.f32.mrb[5].mxu1 }
 0x13e   : > { %v903_v41 = vadd.f32 %v1555_v21, %v1481_v35  ;;  %v1484_v42 = vadd.f32 %v1483_v39, %v1482_v36  ;;  %v1560_v43 = vpop.f32.mrb[6].mxu1 }
 0x13f   : > { %v913_v45 = vpop.f32.mrb[7].mxu1 }
 0x140   : > { %v959_v46 = vadd.f32 %v903_v41, %v393_v38  ;;  %v906_v47 = vadd.f32 %v1556_v27, %v1484_v42 }
 0x142   : > { %975 = vst [vmem:[#allocation2 + $0x10] sm:$0xff] %v959_v46  ;;  %v960_v48 = vadd.f32 %v906_v47, %v394_v44  ;;  %v1485_v49 = vpop.f32.mrb[8].mxu0  ;;  %v403_v46 = vld [vmem:[#allocation2 + $0x60] sm:$0xff] }
 0x143   : > { %v1486_v50 = vpop.f32.mrb[9].mxu0 }
 0x144   : > { %976 = vst [vmem:[#allocation2 + $0x18] sm:$0xff] %v960_v48  ;;  %v1487_v51 = vadd.f32 %v1486_v50, %v1485_v49  ;;  %v1488_v52 = vpop.f32.mrb[10].mxu0  ;;  %v1563_v53 = vpop.f32.mrb[8].mxu1  ;;  %v404_v49 = vld [vmem:[#allocation2 + $0x68] sm:$0xff] }
 0x145   : > { %v1489_v54 = vpop.f32.mrb[11].mxu0  ;;  %v926_v56 = vpop.f32.mrb[9].mxu1 }
 0x146   : > { %v1490_v57 = vadd.f32 %v1489_v54, %v1488_v52  ;;  %v911_v58 = vadd.f32 %v1487_v51, %v910_v40  ;;  %v1564_v59 = vpop.f32.mrb[10].mxu1 }
 0x147   : > { %v929_v61 = vpop.f32.mrb[11].mxu1 }
 0x148   : > { %v961_v62 = vadd.f32 %v911_v58, %v395_v55  ;;  %v914_v63 = vadd.f32 %v1490_v57, %v913_v45  ;;  %v405_v57 = vld [vmem:[#allocation2 + $0x70] sm:$0xff] }
 0x14a   : > { %977 = vst [vmem:[#allocation2 + $0x20] sm:$0xff] %v961_v62  ;;  %v962_v0 = vadd.f32 %v914_v63, %v396_v60  ;;  %v1491_v1 = vpop.f32.mrb[12].mxu0 }
 0x14b   : > { %v1492_v2 = vpop.f32.mrb[13].mxu0 }
 0x14c   : > { %978 = vst [vmem:[#allocation2 + $0x28] sm:$0xff] %v962_v0  ;;  %v1493_v3 = vadd.f32 %v1492_v2, %v1491_v1  ;;  %v1494_v4 = vpop.f32.mrb[14].mxu0  ;;  %v1567_v5 = vpop.f32.mrb[12].mxu1  ;;  %v993_v1 = vld [vmem:[#allocation2] sm:$0xff] (!%p1370_p10)  ;;  %v994_v2 = vld [vmem:[#allocation2 + $0x8] sm:$0xff] (!%p1370_p10) }
 0x14d   : > { %v1495_v7 = vpop.f32.mrb[15].mxu0  ;;  %v942_v8 = vpop.f32.mrb[13].mxu1 }
 0x14e   : > { %v919_v9 = vadd.f32 %v1559_v37, %v1493_v3  ;;  %v1496_v10 = vadd.f32 %v1495_v7, %v1494_v4  ;;  %v1568_v11 = vpop.f32.mrb[14].mxu1  ;;  %v402_v37 = vld [vmem:[#allocation2 + $0x58] sm:$0xff]  ;;  %v1909_v3 = vld [vmem:[%s1989_s2] ss:$0 sm:$0xff] (!%p1370_p10)  ;;  %v995_v7 = vld [vmem:[#allocation2 + $0x10] sm:$0xff] (!%p1370_p10) }
 0x14f   : > { %v945_v13 = vpop.f32.mrb[15].mxu1  ;;  %v1016_v4 = vmul.f32 (!%p1370_p10), %v1909_v3, %v993_v1 }
 0x150   : > { %v963_v14 = vadd.f32 %v919_v9, %v397_v6  ;;  %v922_v15 = vadd.f32 %v1560_v43, %v1496_v10  ;;  %v1916_v6 = vld [vmem:[%s1990_s3] ss:$0 sm:$0xff] (!%p1370_p10)  ;;  %v1018_v9 = vmul.f32 (!%p1370_p10), %v1909_v3, %v995_v7 }
 0x152   : > { %979 = vst [vmem:[#allocation2 + $0x30] sm:$0xff] %v963_v14  ;;  %v964_v16 = vadd.f32 %v922_v15, %v398_v12  ;;  %v1497_v17 = vpop.f32.mrb[16].mxu0  ;;  %v1039_v14 = vadd.f32 (!%p1370_p10), %v1916_v6, %v1016_v4 }
 0x153   : > { %v1498_v18 = vpop.f32.mrb[17].mxu0  ;;  %v998_v12 = vld [vmem:[#allocation2 + $0x28] sm:$0xff] (!%p1370_p10) }
 0x154   : > { %980 = vst [vmem:[#allocation2 + $0x38] sm:$0xff] %v964_v16  ;;  %v1499_v19 = vadd.f32 %v1498_v18, %v1497_v17  ;;  %v1500_v20 = vpop.f32.mrb[18].mxu0  ;;  %v1021_v17 = vmul.f32 (!%p1370_p10), %v1909_v3, %v998_v12 }
 0x155   : > { %v1501_v21 = vpop.f32.mrb[19].mxu0 }
 0x156   : > { %v1502_v23 = vadd.f32 %v1501_v21, %v1500_v20  ;;  %v927_v24 = vadd.f32 %v1499_v19, %v926_v56  ;;  %v1041_v19 = vadd.f32 (!%p1370_p10), %v1916_v6, %v1018_v9 }
 0x158   : > { %v965_v26 = vadd.f32 %v927_v24, %v399_v22  ;;  %v930_v27 = vadd.f32 %v1502_v23, %v929_v61  ;;  %v406_v61 = vld [vmem:[#allocation2 + $0x78] sm:$0xff]  ;;  %v1055_v24 = vmax.f32 (!%p1370_p10), %v1039_v14, 0.0 }
 0x15a   : > { %981 = vst [vmem:[#allocation2 + $0x40] sm:$0xff] %v965_v26  ;;  %v966_v28 = vadd.f32 %v930_v27, %v400_v25  ;;  %v1503_v29 = vpop.f32.mrb[20].mxu0  ;;  %v1044_v27 = vadd.f32 (!%p1370_p10), %v1916_v6, %v1021_v17 }
 0x15b   : > { %v1504_v30 = vpop.f32.mrb[21].mxu0  ;;  %v1000_v18 = vld [vmem:[#allocation2 + $0x38] sm:$0xff] (!%p1370_p10) }
 0x15c   : > { %982 = vst [vmem:[#allocation2 + $0x48] sm:$0xff] %v966_v28  ;;  %v1505_v31 = vadd.f32 %v1504_v30, %v1503_v29  ;;  %v1506_v32 = vpop.f32.mrb[22].mxu0  ;;  %v1023_v22 = vmul.f32 (!%p1370_p10), %v1909_v3, %v1000_v18  ;;  %v1057_v29 = vmax.f32 (!%p1370_p10), %v1041_v19, 0.0 }
 0x15d   : > { %v1507_v34 = vpop.f32.mrb[23].mxu0 }
 0x15e   : > { %v935_v35 = vadd.f32 %v1563_v53, %v1505_v31  ;;  %v1508_v36 = vadd.f32 %v1507_v34, %v1506_v32  ;;  %v1046_v32 = vadd.f32 (!%p1370_p10), %v1916_v6, %v1023_v22 }
 0x160   : > { %v967_v38 = vadd.f32 %v935_v35, %v401_v33  ;;  %v938_v39 = vadd.f32 %v1564_v59, %v1508_v36 }
 0x161   : > { %v1001_v23 = vld [vmem:[#allocation2 + $0x40] sm:$0xff] (!%p1370_p10) }
 0x162   : > { %983 = vst [vmem:[#allocation2 + $0x50] sm:$0xff] %v967_v38  ;;  %v968_v40 = vadd.f32 %v938_v39, %v402_v37  ;;  %v1509_v41 = vpop.f32.mrb[24].mxu0  ;;  %v1060_v37 = vmax.f32 (!%p1370_p10), %v1044_v27, 0.0  ;;  %v1024_v38 = vmul.f32 (!%p1370_p10), %v1909_v3, %v1001_v23 }
 0x163   : > { %v1510_v42 = vpop.f32.mrb[25].mxu0  ;;  %v1002_v28 = vld [vmem:[#allocation2 + $0x48] sm:$0xff] (!%p1370_p10) }
 0x164   : > { %984 = vst [vmem:[#allocation2 + $0x58] sm:$0xff] %v968_v40  ;;  %v1511_v43 = vadd.f32 %v1510_v42, %v1509_v41  ;;  %v1512_v44 = vpop.f32.mrb[26].mxu0 }
 0x165   : > { %v1513_v45 = vpop.f32.mrb[27].mxu0 }
 0x166   : > { %v1514_v47 = vadd.f32 %v1513_v45, %v1512_v44  ;;  %v943_v48 = vadd.f32 %v1511_v43, %v942_v8  ;;  %v996_v8 = vld [vmem:[#allocation2 + $0x18] sm:$0xff] (!%p1370_p10)  ;;  %v1062_v43 = vmax.f32 (!%p1370_p10), %v1046_v32, 0.0  ;;  %v1025_v44 = vmul.f32 (!%p1370_p10), %v1909_v3, %v1002_v28 }
 0x167   : > { %v1019_v10 = vmul.f32 (!%p1370_p10), %v1909_v3, %v996_v8 }
 0x168   : > { %v969_v50 = vadd.f32 %v943_v48, %v403_v46  ;;  %v946_v51 = vadd.f32 %v1514_v47, %v945_v13  ;;  %v999_v13 = vld [vmem:[#allocation2 + $0x30] sm:$0xff] (!%p1370_p10)  ;;  %v1047_v47 = vadd.f32 (!%p1370_p10), %v1916_v6, %v1024_v38 }
 0x169   : > { %v1042_v20 = vadd.f32 (!%p1370_p10), %v1916_v6, %v1019_v10  ;;  %v1022_v21 = vmul.f32 (!%p1370_p10), %v1909_v3, %v999_v13  ;;  %v1003_v33 = vld [vmem:[#allocation2 + $0x50] sm:$0xff] (!%p1370_p10) }
 0x16a   : > { %985 = vst [vmem:[#allocation2 + $0x60] sm:$0xff] %v969_v50  ;;  %v970_v52 = vadd.f32 %v946_v51, %v404_v49  ;;  %v1515_v53 = vpop.f32.mrb[28].mxu0  ;;  %v1026_v48 = vmul.f32 (!%p1370_p10), %v1909_v3, %v1003_v33 }
 0x16b   : > { %v1516_v54 = vpop.f32.mrb[29].mxu0  ;;  %v1058_v30 = vmax.f32 (!%p1370_p10), %v1042_v20, 0.0  ;;  %v1045_v31 = vadd.f32 (!%p1370_p10), %v1916_v6, %v1022_v21  ;;  %v1004_v34 = vld [vmem:[#allocation2 + $0x58] sm:$0xff] (!%p1370_p10) }
 0x16c   : > { %986 = vst [vmem:[#allocation2 + $0x68] sm:$0xff] %v970_v52  ;;  %v1517_v55 = vadd.f32 %v1516_v54, %v1515_v53  ;;  %v1518_v56 = vpop.f32.mrb[30].mxu0  ;;  %v1027_v49 = vmul.f32 (!%p1370_p10), %v1909_v3, %v1004_v34  ;;  %v1048_v52 = vadd.f32 (!%p1370_p10), %v1916_v6, %v1025_v44 }
 0x16d   : > { %v1519_v58 = vpop.f32.mrb[31].mxu0  ;;  %v1418_v41 = vpack.c.bf16 (!%p1370_p10), %v1058_v30, %v1057_v29  ;;  %v1061_v42 = vmax.f32 (!%p1370_p10), %v1045_v31, 0.0 }
 0x16e   : > { %v951_v59 = vadd.f32 %v1567_v5, %v1517_v55  ;;  %v1520_v60 = vadd.f32 %v1519_v58, %v1518_v56  ;;  %992 = sbr.rel (%p1370_p10) target bundleno = 389 (0x185), region = 70  ;;  %v1017_v5 = vmul.f32 (!%p1370_p10), %v1909_v3, %v994_v2  ;;  %v1063_v55 = vmax.f32 (!%p1370_p10), %v1047_v47, 0.0 }
 0x16f   : > { %1450 = vst [vmem:[%s1991_s4 + $0x8] sm:$0xff] (!%p1370_p10), %v1418_v41   ;;  %v1428_v51 = vpack.c.bf16 (!%p1370_p10), %v1062_v43, %v1061_v42  ;;  %v1049_v56 = vadd.f32 (!%p1370_p10), %v1916_v6, %v1026_v48 }
 0x170   : > { %v971_v62 = vadd.f32 %v951_v59, %v405_v57  ;;  %v954_v63 = vadd.f32 %v1568_v11, %v1520_v60  ;;  %v997_v11 = vld [vmem:[#allocation2 + $0x20] sm:$0xff] (!%p1370_p10)  ;;  %v1040_v15 = vadd.f32 (!%p1370_p10), %v1916_v6, %v1017_v5  ;;  %v1050_v57 = vadd.f32 (!%p1370_p10), %v1916_v6, %v1027_v49 }
 0x171   : > { %v1020_v16 = vmul.f32 (!%p1370_p10), %v1909_v3, %v997_v11  ;;  %v1005_v39 = vld [vmem:[#allocation2 + $0x60] sm:$0xff] (!%p1370_p10)  ;;  %1452 = vst [vmem:[%s1991_s4 + $0x18] sm:$0xff] (!%p1370_p10), %v1428_v51   ;;  %v1064_v59 = vmax.f32 (!%p1370_p10), %v1048_v52, 0.0 }
 0x172   : > { %987 = vst [vmem:[#allocation2 + $0x70] sm:$0xff] %v971_v62  ;;  %v972_v0 = vadd.f32 %v954_v63, %v406_v61  ;;  %v1056_v25 = vmax.f32 (!%p1370_p10), %v1040_v15, 0.0  ;;  %v1028_v53 = vmul.f32 (!%p1370_p10), %v1909_v3, %v1005_v39  ;;  %v1065_v63 = vmax.f32 (!%p1370_p10), %v1049_v56, 0.0 }
 0x173   : > { %v1043_v26 = vadd.f32 (!%p1370_p10), %v1916_v6, %v1020_v16  ;;  %v1006_v40 = vld [vmem:[#allocation2 + $0x68] sm:$0xff] (!%p1370_p10)  ;;  %v1433_v2 = vpack.c.bf16 (!%p1370_p10), %v1064_v59, %v1063_v55 }
 0x174   : > { %988 = vst [vmem:[#allocation2 + $0x78] sm:$0xff] %v972_v0  ;;  %v1413_v35 = vpack.c.bf16 (!%p1370_p10), %v1056_v25, %v1055_v24  ;;  %v1029_v54 = vmul.f32 (!%p1370_p10), %v1909_v3, %v1006_v40  ;;  %v1051_v60 = vadd.f32 (!%p1370_p10), %v1916_v6, %v1028_v53  ;;  %v1066_v0 = vmax.f32 (!%p1370_p10), %v1050_v57, 0.0 }
 0x175   : > { %v1059_v36 = vmax.f32 %v1043_v26, 0.0  ;;  %1453 = vst [vmem:[%s1991_s4 + $0x20] sm:$0xff] %v1433_v2  }
 0x176   : > { %1414 = vst [vmem:[%s1991_s4] sm:$0xff] %v1413_v35   ;;  %v1052_v61 = vadd.f32 %v1916_v6, %v1029_v54  ;;  %v1067_v4 = vmax.f32 %v1051_v60, 0.0  ;;  %v1438_v8 = vpack.c.bf16 %v1066_v0, %v1065_v63 }
 0x177   : > { %v1423_v46 = vpack.c.bf16 %v1060_v37, %v1059_v36 }
 0x178   : > { %v1068_v5 = vmax.f32 %v1052_v61, 0.0  ;;  %1454 = vst [vmem:[%s1991_s4 + $0x28] sm:$0xff] %v1438_v8  }
 0x179   : > { %v1007_v45 = vld [vmem:[#allocation2 + $0x70] sm:$0xff]  ;;  %1451 = vst [vmem:[%s1991_s4 + $0x10] sm:$0xff] %v1423_v46  }
 0x17a   : > { %v1030_v58 = vmul.f32 %v1909_v3, %v1007_v45  ;;  %v1443_v10 = vpack.c.bf16 %v1068_v5, %v1067_v4 }
 0x17b   : > { %v1008_v50 = vld [vmem:[#allocation2 + $0x78] sm:$0xff] }
 0x17c   : > { %v1031_v62 = vmul.f32 %v1909_v3, %v1008_v50  ;;  %v1053_v1 = vadd.f32 %v1916_v6, %v1030_v58  ;;  %1455 = vst [vmem:[%s1991_s4 + $0x30] sm:$0xff] %v1443_v10  }
 0x17e   : > { %v1054_v7 = vadd.f32 %v1916_v6, %v1031_v62  ;;  %v1069_v9 = vmax.f32 %v1053_v1, 0.0 }
 0x180   : > { %v1070_v11 = vmax.f32 %v1054_v7, 0.0 }
 0x182   : > { %v1448_v3 = vpack.c.bf16 %v1070_v11, %v1069_v9 }
 0x184   : > { %1456 = vst [vmem:[%s1991_s4 + $0x38] sm:$0xff] %v1448_v3  }
 0x185 PF: > { %s14_s19 = sadd.s32 1, %s1706_s19   ;;  %s1992_s15 = smov %s1694_s16 }
 0x186   : > { %p11_p11 = scmp.ge.s32.totalorder %s14_s19, 5   ;;  %s1993_s16 = smov %s1769_s23 }
 0x187   : > { %s1994_s17 = smov %s1702_s18  ;;  %s1995_s18 = smov %s1997_s20 }
 0x188   :  { %13 = sbr.rel (!%p11_p11) target bundleno = 3 (0x3), region = 121 }

// kernel: deeplabv3plus_forward.14
= control target key start
LH: loop header
LB: loop body
LE: loop exit
PB: predicated region body
PF: predicated region fallthrough
CT: control target
= control target key end

     0   :  { %s3960_s15 = smov 0   ;;  %s3962_s16 = smov 0   ;;  %s4870_s0 = inlined_call_operand.vmem [shape: bf16[512,1152], index: 0, kind: input, shape index: {}]   ;;  %s4871_s1 = inlined_call_operand.vmem [shape: bf16[1152,128], index: 1, kind: input, shape index: {}]   ;;  %s4872_s2 = inlined_call_operand.vmem [shape: f32[1,128], index: 2, kind: input, shape index: {}]   ;;  %s4873_s3 = inlined_call_operand.vmem [shape: f32[1,128], index: 3, kind: input, shape index: {}]   ;;  %s4874_s4 = inlined_call_operand.vmem [shape: bf16[512,128], index: 4, kind: output, shape index: {}]  }
   0x1   :  { %s3964_s17 = smov 0   ;;  %s3966_s18 = smov 0  }
   0x2   :  { %s3968_s19 = smov 0  }
   0x3 LB: > { %s26_s20 = sadd.s32 1, %s3927_s18  ;;  %p49_p1 = scmp.ne.s32.totalorder %s3919_s16, %s3915_s15  ;;  %s3931_s19 = sphi %s3968_s19, %s14_s19   ;;  %s3927_s18 = sphi %s3966_s18, %s4878_s18   ;;  %s3923_s17 = sphi %s3964_s17, %s4877_s17   ;;  %s3919_s16 = sphi %s3962_s16, %s4876_s16   ;;  %s3915_s15 = sphi %s3960_s15, %s4875_s15  }
   0x4   : > { %p27_p0 = scmp.ge.s32.totalorder %s26_s20, 3  ;;  %p50_p2 = scmp.eq.s32.totalorder %s3931_s19, 0 }
   0x5   : > { %s42_s22 = sadd.s32 1, %s3919_s16  ;;  %p2965_p5 = scmp.ge.s32.totalorder %s3931_s19, 3 }
   0x6   : > { %s4880_s20 = smov (%p27_p0, %s26_s20), 0  ;;  %p51_p3 = por %p50_p2, %p49_p1 }
   0x7   : > { %s38_s21 = ssub.s32 %s3927_s18, %s4880_s20  ;;  %200 = sbr.rel (%p2965_p5) target bundleno = 93 (0x5d), region = 28 }
   0x8   : > { %p40_p4 = scmp.eq.s32.totalorder %s38_s21, 0 }
   0xa   : > { %s3995_s23 = scalar_select %p40_p4, %s3919_s16, %s42_s22  }
   0xe   : > { %203 = sbr.rel (!%p51_p3) target bundleno = 93 (0x5d), region = 32  ;;  %s205_s24 = sand.u32 (%p51_p3), 1, %s3919_s16  }
   0xf   : > { %s3289_s25 = smul.u32 (%p51_p3), 12, %s3927_s18 }
  0x10   : > { %s3697_s26 = smul.u32 (%p51_p3), 768, %s205_s24 }
  0x11   : > { %s4003_s29 = scalar_lea.vmem (%p51_p3), %s4870_s0, %s3289_s25 }
  0x12   : > { %v228_v0 = vld [vmem:[%s4003_s29] sm:$0xff] (%p51_p3)  ;;  %v232_v2 = vld [vmem:[%s4003_s29 + $0x48] sm:$0xff] (%p51_p3)  ;;  %s4008_s30 = scalar_lea.vmem (%p51_p3), [#allocation3], %s3697_s26  ;;  %v236_v4 = vld [vmem:[%s4003_s29 + $0x90] sm:$0xff] (%p51_p3) }
  0x13   : > { %v230_v1 = vld [vmem:[%s4003_s29 + $0x24] sm:$0xff] (%p51_p3)  ;;  %229 = vst [vmem:[%s4008_s30] sm:$0xff] (%p51_p3), %v228_v0  ;;  %233 = vst [vmem:[%s4008_s30 + $0x18] sm:$0xff] (%p51_p3), %v232_v2  ;;  %v234_v3 = vld [vmem:[%s4003_s29 + $0x6c] sm:$0xff] (%p51_p3) }
  0x14   : > { %231 = vst [vmem:[%s4008_s30 + $0xc] sm:$0xff] (%p51_p3), %v230_v1  ;;  %v238_v5 = vld [vmem:[%s4003_s29 + $0xb4] sm:$0xff] (%p51_p3)  ;;  %235 = vst [vmem:[%s4008_s30 + $0x24] sm:$0xff] (%p51_p3), %v234_v3  ;;  %v242_v7 = vld [vmem:[%s4003_s29 + $0xfc] sm:$0xff] (%p51_p3) }
  0x15   : > { %237 = vst [vmem:[%s4008_s30 + $0x30] sm:$0xff] %v236_v4  ;;  %239 = vst [vmem:[%s4008_s30 + $0x3c] sm:$0xff] %v238_v5  ;;  %v240_v6 = vld [vmem:[%s4003_s29 + $0xd8] sm:$0xff]  ;;  %v244_v8 = vld [vmem:[%s4003_s29 + $0x120] sm:$0xff] }
  0x16   : > { %241 = vst [vmem:[%s4008_s30 + $0x48] sm:$0xff] %v240_v6  ;;  %243 = vst [vmem:[%s4008_s30 + $0x54] sm:$0xff] %v242_v7  ;;  %v246_v9 = vld [vmem:[%s4003_s29 + $0x144] sm:$0xff]  ;;  %v250_v11 = vld [vmem:[%s4003_s29 + $0x18c] sm:$0xff] }
  0x17   : > { %245 = vst [vmem:[%s4008_s30 + $0x60] sm:$0xff] %v244_v8  ;;  %v248_v10 = vld [vmem:[%s4003_s29 + $0x168] sm:$0xff]  ;;  %247 = vst [vmem:[%s4008_s30 + $0x6c] sm:$0xff] %v246_v9  ;;  %v252_v12 = vld [vmem:[%s4003_s29 + $0x1b0] sm:$0xff] }
  0x18   : > { %249 = vst [vmem:[%s4008_s30 + $0x78] sm:$0xff] %v248_v10  ;;  %251 = vst [vmem:[%s4008_s30 + $0x84] sm:$0xff] %v250_v11  ;;  %v254_v13 = vld [vmem:[%s4003_s29 + $0x1d4] sm:$0xff]  ;;  %v258_v15 = vld [vmem:[%s4003_s29 + $0x21c] sm:$0xff] }
  0x19   : > { %v256_v14 = vld [vmem:[%s4003_s29 + $0x1f8] sm:$0xff]  ;;  %253 = vst [vmem:[%s4008_s30 + $0x90] sm:$0xff] %v252_v12  ;;  %255 = vst [vmem:[%s4008_s30 + $0x9c] sm:$0xff] %v254_v13  ;;  %v260_v16 = vld [vmem:[%s4003_s29 + $0x240] sm:$0xff] }
  0x1a   : > { %257 = vst [vmem:[%s4008_s30 + $0xa8] sm:$0xff] %v256_v14  ;;  %v262_v17 = vld [vmem:[%s4003_s29 + $0x264] sm:$0xff]  ;;  %259 = vst [vmem:[%s4008_s30 + $0xb4] sm:$0xff] %v258_v15  ;;  %v266_v19 = vld [vmem:[%s4003_s29 + $0x2ac] sm:$0xff] }
  0x1b   : > { %261 = vst [vmem:[%s4008_s30 + $0xc0] sm:$0xff] %v260_v16  ;;  %263 = vst [vmem:[%s4008_s30 + $0xcc] sm:$0xff] %v262_v17  ;;  %v264_v18 = vld [vmem:[%s4003_s29 + $0x288] sm:$0xff]  ;;  %v268_v20 = vld [vmem:[%s4003_s29 + $0x2d0] sm:$0xff] }
  0x1c   : > { %265 = vst [vmem:[%s4008_s30 + $0xd8] sm:$0xff] %v264_v18  ;;  %267 = vst [vmem:[%s4008_s30 + $0xe4] sm:$0xff] %v266_v19  ;;  %v270_v21 = vld [vmem:[%s4003_s29 + $0x2f4] sm:$0xff]  ;;  %v274_v23 = vld [vmem:[%s4003_s29 + $0x33c] sm:$0xff] }
  0x1d   : > { %269 = vst [vmem:[%s4008_s30 + $0xf0] sm:$0xff] %v268_v20  ;;  %v272_v22 = vld [vmem:[%s4003_s29 + $0x318] sm:$0xff]  ;;  %271 = vst [vmem:[%s4008_s30 + $0xfc] sm:$0xff] %v270_v21  ;;  %v276_v24 = vld [vmem:[%s4003_s29 + $0x360] sm:$0xff] }
  0x1e   : > { %273 = vst [vmem:[%s4008_s30 + $0x108] sm:$0xff] %v272_v22  ;;  %275 = vst [vmem:[%s4008_s30 + $0x114] sm:$0xff] %v274_v23  ;;  %v278_v25 = vld [vmem:[%s4003_s29 + $0x384] sm:$0xff]  ;;  %v282_v27 = vld [vmem:[%s4003_s29 + $0x3cc] sm:$0xff] }
  0x1f   : > { %v280_v26 = vld [vmem:[%s4003_s29 + $0x3a8] sm:$0xff]  ;;  %277 = vst [vmem:[%s4008_s30 + $0x120] sm:$0xff] %v276_v24  ;;  %279 = vst [vmem:[%s4008_s30 + $0x12c] sm:$0xff] %v278_v25  ;;  %v284_v28 = vld [vmem:[%s4003_s29 + $0x3f0] sm:$0xff] }
  0x20   : > { %281 = vst [vmem:[%s4008_s30 + $0x138] sm:$0xff] %v280_v26  ;;  %v286_v29 = vld [vmem:[%s4003_s29 + $0x414] sm:$0xff]  ;;  %283 = vst [vmem:[%s4008_s30 + $0x144] sm:$0xff] %v282_v27  ;;  %v290_v31 = vld [vmem:[%s4003_s29 + $0x45c] sm:$0xff] }
  0x21   : > { %285 = vst [vmem:[%s4008_s30 + $0x150] sm:$0xff] %v284_v28  ;;  %287 = vst [vmem:[%s4008_s30 + $0x15c] sm:$0xff] %v286_v29  ;;  %v288_v30 = vld [vmem:[%s4003_s29 + $0x438] sm:$0xff]  ;;  %v292_v32 = vld [vmem:[%s4003_s29 + $0x480] sm:$0xff] }
  0x22   : > { %289 = vst [vmem:[%s4008_s30 + $0x168] sm:$0xff] %v288_v30  ;;  %291 = vst [vmem:[%s4008_s30 + $0x174] sm:$0xff] %v290_v31  ;;  %v294_v33 = vld [vmem:[%s4003_s29 + $0x4a4] sm:$0xff]  ;;  %v298_v35 = vld [vmem:[%s4003_s29 + $0x4ec] sm:$0xff] }
  0x23   : > { %293 = vst [vmem:[%s4008_s30 + $0x180] sm:$0xff] %v292_v32  ;;  %v296_v34 = vld [vmem:[%s4003_s29 + $0x4c8] sm:$0xff]  ;;  %295 = vst [vmem:[%s4008_s30 + $0x18c] sm:$0xff] %v294_v33  ;;  %v300_v36 = vld [vmem:[%s4003_s29 + $0x510] sm:$0xff] }
  0x24   : > { %297 = vst [vmem:[%s4008_s30 + $0x198] sm:$0xff] %v296_v34  ;;  %299 = vst [vmem:[%s4008_s30 + $0x1a4] sm:$0xff] %v298_v35  ;;  %v302_v37 = vld [vmem:[%s4003_s29 + $0x534] sm:$0xff]  ;;  %v306_v39 = vld [vmem:[%s4003_s29 + $0x57c] sm:$0xff] }
  0x25   : > { %v304_v38 = vld [vmem:[%s4003_s29 + $0x558] sm:$0xff]  ;;  %301 = vst [vmem:[%s4008_s30 + $0x1b0] sm:$0xff] %v300_v36  ;;  %303 = vst [vmem:[%s4008_s30 + $0x1bc] sm:$0xff] %v302_v37  ;;  %v308_v40 = vld [vmem:[%s4003_s29 + $0x5a0] sm:$0xff] }
  0x26   : > { %305 = vst [vmem:[%s4008_s30 + $0x1c8] sm:$0xff] %v304_v38  ;;  %v310_v41 = vld [vmem:[%s4003_s29 + $0x5c4] sm:$0xff]  ;;  %307 = vst [vmem:[%s4008_s30 + $0x1d4] sm:$0xff] %v306_v39  ;;  %v314_v43 = vld [vmem:[%s4003_s29 + $0x60c] sm:$0xff] }
  0x27   : > { %309 = vst [vmem:[%s4008_s30 + $0x1e0] sm:$0xff] %v308_v40  ;;  %311 = vst [vmem:[%s4008_s30 + $0x1ec] sm:$0xff] %v310_v41  ;;  %v312_v42 = vld [vmem:[%s4003_s29 + $0x5e8] sm:$0xff]  ;;  %v316_v44 = vld [vmem:[%s4003_s29 + $0x630] sm:$0xff] }
  0x28   : > { %313 = vst [vmem:[%s4008_s30 + $0x1f8] sm:$0xff] %v312_v42  ;;  %315 = vst [vmem:[%s4008_s30 + $0x204] sm:$0xff] %v314_v43  ;;  %v318_v45 = vld [vmem:[%s4003_s29 + $0x654] sm:$0xff]  ;;  %v322_v47 = vld [vmem:[%s4003_s29 + $0x69c] sm:$0xff] }
  0x29   : > { %317 = vst [vmem:[%s4008_s30 + $0x210] sm:$0xff] %v316_v44  ;;  %v320_v46 = vld [vmem:[%s4003_s29 + $0x678] sm:$0xff]  ;;  %319 = vst [vmem:[%s4008_s30 + $0x21c] sm:$0xff] %v318_v45  ;;  %v324_v48 = vld [vmem:[%s4003_s29 + $0x6c0] sm:$0xff] }
  0x2a   : > { %321 = vst [vmem:[%s4008_s30 + $0x228] sm:$0xff] %v320_v46  ;;  %323 = vst [vmem:[%s4008_s30 + $0x234] sm:$0xff] %v322_v47  ;;  %v326_v49 = vld [vmem:[%s4003_s29 + $0x6e4] sm:$0xff]  ;;  %v330_v51 = vld [vmem:[%s4003_s29 + $0x72c] sm:$0xff] }
  0x2b   : > { %v328_v50 = vld [vmem:[%s4003_s29 + $0x708] sm:$0xff]  ;;  %325 = vst [vmem:[%s4008_s30 + $0x240] sm:$0xff] %v324_v48  ;;  %327 = vst [vmem:[%s4008_s30 + $0x24c] sm:$0xff] %v326_v49  ;;  %v332_v52 = vld [vmem:[%s4003_s29 + $0x750] sm:$0xff] }
  0x2c   : > { %329 = vst [vmem:[%s4008_s30 + $0x258] sm:$0xff] %v328_v50  ;;  %v334_v53 = vld [vmem:[%s4003_s29 + $0x774] sm:$0xff]  ;;  %331 = vst [vmem:[%s4008_s30 + $0x264] sm:$0xff] %v330_v51  ;;  %v338_v55 = vld [vmem:[%s4003_s29 + $0x7bc] sm:$0xff] }
  0x2d   : > { %333 = vst [vmem:[%s4008_s30 + $0x270] sm:$0xff] %v332_v52  ;;  %335 = vst [vmem:[%s4008_s30 + $0x27c] sm:$0xff] %v334_v53  ;;  %v336_v54 = vld [vmem:[%s4003_s29 + $0x798] sm:$0xff]  ;;  %v340_v56 = vld [vmem:[%s4003_s29 + $0x7e0] sm:$0xff] }
  0x2e   : > { %337 = vst [vmem:[%s4008_s30 + $0x288] sm:$0xff] %v336_v54  ;;  %339 = vst [vmem:[%s4008_s30 + $0x294] sm:$0xff] %v338_v55  ;;  %v342_v57 = vld [vmem:[%s4003_s29 + $0x804] sm:$0xff]  ;;  %v346_v59 = vld [vmem:[%s4003_s29 + $0x84c] sm:$0xff] }
  0x2f   : > { %341 = vst [vmem:[%s4008_s30 + $0x2a0] sm:$0xff] %v340_v56  ;;  %v344_v58 = vld [vmem:[%s4003_s29 + $0x828] sm:$0xff]  ;;  %343 = vst [vmem:[%s4008_s30 + $0x2ac] sm:$0xff] %v342_v57  ;;  %v348_v60 = vld [vmem:[%s4003_s29 + $0x870] sm:$0xff] }
  0x30   : > { %345 = vst [vmem:[%s4008_s30 + $0x2b8] sm:$0xff] %v344_v58  ;;  %347 = vst [vmem:[%s4008_s30 + $0x2c4] sm:$0xff] %v346_v59  ;;  %v350_v61 = vld [vmem:[%s4003_s29 + $0x894] sm:$0xff]  ;;  %v354_v63 = vld [vmem:[%s4003_s29 + $0x8dc] sm:$0xff] }
  0x31   : > { %v352_v62 = vld [vmem:[%s4003_s29 + $0x8b8] sm:$0xff]  ;;  %349 = vst [vmem:[%s4008_s30 + $0x2d0] sm:$0xff] %v348_v60  ;;  %351 = vst [vmem:[%s4008_s30 + $0x2dc] sm:$0xff] %v350_v61  ;;  %v2967_v0 = vld [vmem:[%s4003_s29 + $0x8] sm:$0xf] }
  0x32   : > { %353 = vst [vmem:[%s4008_s30 + $0x2e8] sm:$0xff] %v352_v62  ;;  %v2969_v1 = vld [vmem:[%s4003_s29 + $0x2c] sm:$0xf]  ;;  %355 = vst [vmem:[%s4008_s30 + $0x2f4] sm:$0xff] %v354_v63  ;;  %v2971_v2 = vld [vmem:[%s4003_s29 + $0x50] sm:$0xf] }
  0x33   : > { %2968 = vst [vmem:[%s4008_s30 + $0x8] sm:$0xf] %v2967_v0  ;;  %2970 = vst [vmem:[%s4008_s30 + $0x14] sm:$0xf] %v2969_v1  ;;  %v2973_v3 = vld [vmem:[%s4003_s29 + $0x74] sm:$0xf] }
  0x34   : > { %v2975_v4 = vld [vmem:[%s4003_s29 + $0x98] sm:$0xf]  ;;  %2972 = vst [vmem:[%s4008_s30 + $0x20] sm:$0xf] %v2971_v2  ;;  %2974 = vst [vmem:[%s4008_s30 + $0x2c] sm:$0xf] %v2973_v3 }
  0x35   : > { %2976 = vst [vmem:[%s4008_s30 + $0x38] sm:$0xf] %v2975_v4  ;;  %v2977_v5 = vld [vmem:[%s4003_s29 + $0xbc] sm:$0xf]  ;;  %v2979_v6 = vld [vmem:[%s4003_s29 + $0xe0] sm:$0xf] }
  0x36   : > { %v2981_v7 = vld [vmem:[%s4003_s29 + $0x104] sm:$0xf]  ;;  %2978 = vst [vmem:[%s4008_s30 + $0x44] sm:$0xf] %v2977_v5  ;;  %2980 = vst [vmem:[%s4008_s30 + $0x50] sm:$0xf] %v2979_v6 }
  0x37   : > { %2982 = vst [vmem:[%s4008_s30 + $0x5c] sm:$0xf] %v2981_v7  ;;  %v2983_v8 = vld [vmem:[%s4003_s29 + $0x128] sm:$0xf]  ;;  %v2985_v9 = vld [vmem:[%s4003_s29 + $0x14c] sm:$0xf] }
  0x38   : > { %v2987_v10 = vld [vmem:[%s4003_s29 + $0x170] sm:$0xf]  ;;  %2984 = vst [vmem:[%s4008_s30 + $0x68] sm:$0xf] %v2983_v8  ;;  %2986 = vst [vmem:[%s4008_s30 + $0x74] sm:$0xf] %v2985_v9 }
  0x39   : > { %2988 = vst [vmem:[%s4008_s30 + $0x80] sm:$0xf] %v2987_v10  ;;  %v2989_v11 = vld [vmem:[%s4003_s29 + $0x194] sm:$0xf]  ;;  %v2991_v12 = vld [vmem:[%s4003_s29 + $0x1b8] sm:$0xf] }
  0x3a   : > { %v2993_v13 = vld [vmem:[%s4003_s29 + $0x1dc] sm:$0xf]  ;;  %2990 = vst [vmem:[%s4008_s30 + $0x8c] sm:$0xf] %v2989_v11  ;;  %2992 = vst [vmem:[%s4008_s30 + $0x98] sm:$0xf] %v2991_v12 }
  0x3b   : > { %2994 = vst [vmem:[%s4008_s30 + $0xa4] sm:$0xf] %v2993_v13  ;;  %v2995_v14 = vld [vmem:[%s4003_s29 + $0x200] sm:$0xf]  ;;  %v2997_v15 = vld [vmem:[%s4003_s29 + $0x224] sm:$0xf] }
  0x3c   : > { %v2999_v16 = vld [vmem:[%s4003_s29 + $0x248] sm:$0xf]  ;;  %2996 = vst [vmem:[%s4008_s30 + $0xb0] sm:$0xf] %v2995_v14  ;;  %2998 = vst [vmem:[%s4008_s30 + $0xbc] sm:$0xf] %v2997_v15 }
  0x3d   : > { %3000 = vst [vmem:[%s4008_s30 + $0xc8] sm:$0xf] %v2999_v16  ;;  %v3001_v17 = vld [vmem:[%s4003_s29 + $0x26c] sm:$0xf]  ;;  %v3003_v18 = vld [vmem:[%s4003_s29 + $0x290] sm:$0xf] }
  0x3e   : > { %v3005_v19 = vld [vmem:[%s4003_s29 + $0x2b4] sm:$0xf]  ;;  %3002 = vst [vmem:[%s4008_s30 + $0xd4] sm:$0xf] %v3001_v17  ;;  %3004 = vst [vmem:[%s4008_s30 + $0xe0] sm:$0xf] %v3003_v18 }
  0x3f   : > { %3006 = vst [vmem:[%s4008_s30 + $0xec] sm:$0xf] %v3005_v19  ;;  %v3007_v20 = vld [vmem:[%s4003_s29 + $0x2d8] sm:$0xf]  ;;  %v3009_v21 = vld [vmem:[%s4003_s29 + $0x2fc] sm:$0xf] }
  0x40   : > { %v3011_v22 = vld [vmem:[%s4003_s29 + $0x320] sm:$0xf]  ;;  %3008 = vst [vmem:[%s4008_s30 + $0xf8] sm:$0xf] %v3007_v20  ;;  %3010 = vst [vmem:[%s4008_s30 + $0x104] sm:$0xf] %v3009_v21 }
  0x41   : > { %3012 = vst [vmem:[%s4008_s30 + $0x110] sm:$0xf] %v3011_v22  ;;  %v3013_v23 = vld [vmem:[%s4003_s29 + $0x344] sm:$0xf]  ;;  %v3015_v24 = vld [vmem:[%s4003_s29 + $0x368] sm:$0xf] }
  0x42   : > { %v3017_v25 = vld [vmem:[%s4003_s29 + $0x38c] sm:$0xf]  ;;  %3014 = vst [vmem:[%s4008_s30 + $0x11c] sm:$0xf] %v3013_v23  ;;  %3016 = vst [vmem:[%s4008_s30 + $0x128] sm:$0xf] %v3015_v24 }
  0x43   : > { %3018 = vst [vmem:[%s4008_s30 + $0x134] sm:$0xf] %v3017_v25  ;;  %v3019_v26 = vld [vmem:[%s4003_s29 + $0x3b0] sm:$0xf]  ;;  %v3021_v27 = vld [vmem:[%s4003_s29 + $0x3d4] sm:$0xf] }
  0x44   : > { %v3023_v28 = vld [vmem:[%s4003_s29 + $0x3f8] sm:$0xf]  ;;  %3020 = vst [vmem:[%s4008_s30 + $0x140] sm:$0xf] %v3019_v26  ;;  %3022 = vst [vmem:[%s4008_s30 + $0x14c] sm:$0xf] %v3021_v27 }
  0x45   : > { %3024 = vst [vmem:[%s4008_s30 + $0x158] sm:$0xf] %v3023_v28  ;;  %v3025_v29 = vld [vmem:[%s4003_s29 + $0x41c] sm:$0xf]  ;;  %v3027_v30 = vld [vmem:[%s4003_s29 + $0x440] sm:$0xf] }
  0x46   : > { %v3029_v31 = vld [vmem:[%s4003_s29 + $0x464] sm:$0xf]  ;;  %3026 = vst [vmem:[%s4008_s30 + $0x164] sm:$0xf] %v3025_v29  ;;  %3028 = vst [vmem:[%s4008_s30 + $0x170] sm:$0xf] %v3027_v30 }
  0x47   : > { %3030 = vst [vmem:[%s4008_s30 + $0x17c] sm:$0xf] %v3029_v31  ;;  %v3031_v32 = vld [vmem:[%s4003_s29 + $0x488] sm:$0xf]  ;;  %v3033_v33 = vld [vmem:[%s4003_s29 + $0x4ac] sm:$0xf] }
  0x48   : > { %v3035_v34 = vld [vmem:[%s4003_s29 + $0x4d0] sm:$0xf]  ;;  %3032 = vst [vmem:[%s4008_s30 + $0x188] sm:$0xf] %v3031_v32  ;;  %3034 = vst [vmem:[%s4008_s30 + $0x194] sm:$0xf] %v3033_v33 }
  0x49   : > { %3036 = vst [vmem:[%s4008_s30 + $0x1a0] sm:$0xf] %v3035_v34  ;;  %v3037_v35 = vld [vmem:[%s4003_s29 + $0x4f4] sm:$0xf]  ;;  %v3039_v36 = vld [vmem:[%s4003_s29 + $0x518] sm:$0xf] }
  0x4a   : > { %v3041_v37 = vld [vmem:[%s4003_s29 + $0x53c] sm:$0xf]  ;;  %3038 = vst [vmem:[%s4008_s30 + $0x1ac] sm:$0xf] %v3037_v35  ;;  %3040 = vst [vmem:[%s4008_s30 + $0x1b8] sm:$0xf] %v3039_v36 }
  0x4b   : > { %3042 = vst [vmem:[%s4008_s30 + $0x1c4] sm:$0xf] %v3041_v37  ;;  %v3043_v38 = vld [vmem:[%s4003_s29 + $0x560] sm:$0xf]  ;;  %v3045_v39 = vld [vmem:[%s4003_s29 + $0x584] sm:$0xf] }
  0x4c   : > { %v3047_v40 = vld [vmem:[%s4003_s29 + $0x5a8] sm:$0xf]  ;;  %3044 = vst [vmem:[%s4008_s30 + $0x1d0] sm:$0xf] %v3043_v38  ;;  %3046 = vst [vmem:[%s4008_s30 + $0x1dc] sm:$0xf] %v3045_v39 }
  0x4d   : > { %3048 = vst [vmem:[%s4008_s30 + $0x1e8] sm:$0xf] %v3047_v40  ;;  %v3049_v41 = vld [vmem:[%s4003_s29 + $0x5cc] sm:$0xf]  ;;  %v3051_v42 = vld [vmem:[%s4003_s29 + $0x5f0] sm:$0xf] }
  0x4e   : > { %v3053_v43 = vld [vmem:[%s4003_s29 + $0x614] sm:$0xf]  ;;  %3050 = vst [vmem:[%s4008_s30 + $0x1f4] sm:$0xf] %v3049_v41  ;;  %3052 = vst [vmem:[%s4008_s30 + $0x200] sm:$0xf] %v3051_v42 }
  0x4f   : > { %3054 = vst [vmem:[%s4008_s30 + $0x20c] sm:$0xf] %v3053_v43  ;;  %v3055_v44 = vld [vmem:[%s4003_s29 + $0x638] sm:$0xf]  ;;  %v3057_v45 = vld [vmem:[%s4003_s29 + $0x65c] sm:$0xf] }
  0x50   : > { %v3059_v46 = vld [vmem:[%s4003_s29 + $0x680] sm:$0xf]  ;;  %3056 = vst [vmem:[%s4008_s30 + $0x218] sm:$0xf] %v3055_v44  ;;  %3058 = vst [vmem:[%s4008_s30 + $0x224] sm:$0xf] %v3057_v45 }
  0x51   : > { %3060 = vst [vmem:[%s4008_s30 + $0x230] sm:$0xf] %v3059_v46  ;;  %v3061_v47 = vld [vmem:[%s4003_s29 + $0x6a4] sm:$0xf]  ;;  %v3063_v48 = vld [vmem:[%s4003_s29 + $0x6c8] sm:$0xf] }
  0x52   : > { %v3065_v49 = vld [vmem:[%s4003_s29 + $0x6ec] sm:$0xf]  ;;  %3062 = vst [vmem:[%s4008_s30 + $0x23c] sm:$0xf] %v3061_v47  ;;  %3064 = vst [vmem:[%s4008_s30 + $0x248] sm:$0xf] %v3063_v48 }
  0x53   : > { %3066 = vst [vmem:[%s4008_s30 + $0x254] sm:$0xf] %v3065_v49  ;;  %v3067_v50 = vld [vmem:[%s4003_s29 + $0x710] sm:$0xf]  ;;  %v3069_v51 = vld [vmem:[%s4003_s29 + $0x734] sm:$0xf] }
  0x54   : > { %v3071_v52 = vld [vmem:[%s4003_s29 + $0x758] sm:$0xf]  ;;  %3068 = vst [vmem:[%s4008_s30 + $0x260] sm:$0xf] %v3067_v50  ;;  %3070 = vst [vmem:[%s4008_s30 + $0x26c] sm:$0xf] %v3069_v51 }
  0x55   : > { %3072 = vst [vmem:[%s4008_s30 + $0x278] sm:$0xf] %v3071_v52  ;;  %v3073_v53 = vld [vmem:[%s4003_s29 + $0x77c] sm:$0xf]  ;;  %v3075_v54 = vld [vmem:[%s4003_s29 + $0x7a0] sm:$0xf] }
  0x56   : > { %v3077_v55 = vld [vmem:[%s4003_s29 + $0x7c4] sm:$0xf]  ;;  %3074 = vst [vmem:[%s4008_s30 + $0x284] sm:$0xf] %v3073_v53  ;;  %3076 = vst [vmem:[%s4008_s30 + $0x290] sm:$0xf] %v3075_v54 }
  0x57   : > { %3078 = vst [vmem:[%s4008_s30 + $0x29c] sm:$0xf] %v3077_v55  ;;  %v3079_v56 = vld [vmem:[%s4003_s29 + $0x7e8] sm:$0xf]  ;;  %v3081_v57 = vld [vmem:[%s4003_s29 + $0x80c] sm:$0xf] }
  0x58   : > { %v3083_v58 = vld [vmem:[%s4003_s29 + $0x830] sm:$0xf]  ;;  %3080 = vst [vmem:[%s4008_s30 + $0x2a8] sm:$0xf] %v3079_v56  ;;  %3082 = vst [vmem:[%s4008_s30 + $0x2b4] sm:$0xf] %v3081_v57 }
  0x59   : > { %3084 = vst [vmem:[%s4008_s30 + $0x2c0] sm:$0xf] %v3083_v58  ;;  %v3085_v59 = vld [vmem:[%s4003_s29 + $0x854] sm:$0xf]  ;;  %v3087_v60 = vld [vmem:[%s4003_s29 + $0x878] sm:$0xf] }
  0x5a   : > { %v3089_v61 = vld [vmem:[%s4003_s29 + $0x89c] sm:$0xf]  ;;  %3086 = vst [vmem:[%s4008_s30 + $0x2cc] sm:$0xf] %v3085_v59  ;;  %3088 = vst [vmem:[%s4008_s30 + $0x2d8] sm:$0xf] %v3087_v60 }
  0x5b   : > { %3090 = vst [vmem:[%s4008_s30 + $0x2e4] sm:$0xf] %v3089_v61  ;;  %v3091_v62 = vld [vmem:[%s4003_s29 + $0x8c0] sm:$0xf]  ;;  %v3093_v63 = vld [vmem:[%s4003_s29 + $0x8e4] sm:$0xf] }
  0x5c   : > { %3092 = vst [vmem:[%s4008_s30 + $0x2f0] sm:$0xf] %v3091_v62  ;;  %3094 = vst [vmem:[%s4008_s30 + $0x2fc] sm:$0xf] %v3093_v63 }
  0x5d PF: > { %p3095_p6 = scmp.ge.s32.totalorder %s3931_s19, 1  ;;  %p495_p7 = scmp.lt.s32.totalorder %s3931_s19, 4 }
  0x5f   : > { %p496_p8 = pnand %p3095_p6, %p495_p7 }
  0x60   : > { %s502_s5 = sand.u32 (!%p496_p8), 1, %s3915_s15   ;;  %p3096_p9 = scmp.ne.s32.totalorder (!%p496_p8), %s3923_s17, 0 }
  0x61   : > { %499 = sbr.rel (%p496_p8) target bundleno = 662 (0x296), region = 58 }
  0x62   : > { %s3698_s6 = smul.u32 (!%p496_p8), 768, %s502_s5 }
  0x64   : > { %s4266_s7 = scalar_lea.vmem (!%p496_p8), [#allocation3], %s3698_s6 }
  0x68   : > { %565 = sbr.rel (%p3096_p9) target bundleno = 137 (0x89), region = 66  ;;  %v3933_v0 = vmov (!%p3096_p9), 0.0  }
  0x69   : > { %566 = vst [vmem:[#allocation2] sm:$0xff] (!%p3096_p9), %v3933_v0  ;;  %567 = vst [vmem:[#allocation2 + $0x8] sm:$0xff] (!%p3096_p9), %v3933_v0 }
  0x6a   : > { %568 = vst [vmem:[#allocation2 + $0x10] sm:$0xff] (!%p3096_p9), %v3933_v0  ;;  %569 = vst [vmem:[#allocation2 + $0x18] sm:$0xff] (!%p3096_p9), %v3933_v0 }
  0x6b   : > { %570 = vst [vmem:[#allocation2 + $0x20] sm:$0xff] (!%p3096_p9), %v3933_v0  ;;  %571 = vst [vmem:[#allocation2 + $0x28] sm:$0xff] (!%p3096_p9), %v3933_v0 }
  0x6c   : > { %572 = vst [vmem:[#allocation2 + $0x30] sm:$0xff] (!%p3096_p9), %v3933_v0  ;;  %573 = vst [vmem:[#allocation2 + $0x38] sm:$0xff] (!%p3096_p9), %v3933_v0 }
  0x6d   : > { %574 = vst [vmem:[#allocation2 + $0x40] sm:$0xff] (!%p3096_p9), %v3933_v0  ;;  %575 = vst [vmem:[#allocation2 + $0x48] sm:$0xff] (!%p3096_p9), %v3933_v0 }
  0x6e   : > { %576 = vst [vmem:[#allocation2 + $0x50] sm:$0xff] (!%p3096_p9), %v3933_v0  ;;  %577 = vst [vmem:[#allocation2 + $0x58] sm:$0xff] (!%p3096_p9), %v3933_v0 }
  0x6f   : > { %578 = vst [vmem:[#allocation2 + $0x60] sm:$0xff] %v3933_v0  ;;  %579 = vst [vmem:[#allocation2 + $0x68] sm:$0xff] %v3933_v0 }
  0x70   : > { %580 = vst [vmem:[#allocation2 + $0x70] sm:$0xff] %v3933_v0  ;;  %581 = vst [vmem:[#allocation2 + $0x78] sm:$0xff] %v3933_v0 }
  0x71   : > { %582 = vst [vmem:[#allocation2 + $0x80] sm:$0xff] %v3933_v0  ;;  %583 = vst [vmem:[#allocation2 + $0x88] sm:$0xff] %v3933_v0 }
  0x72   : > { %584 = vst [vmem:[#allocation2 + $0x90] sm:$0xff] %v3933_v0  ;;  %585 = vst [vmem:[#allocation2 + $0x98] sm:$0xff] %v3933_v0 }
  0x73   : > { %586 = vst [vmem:[#allocation2 + $0xa0] sm:$0xff] %v3933_v0  ;;  %587 = vst [vmem:[#allocation2 + $0xa8] sm:$0xff] %v3933_v0 }
  0x74   : > { %588 = vst [vmem:[#allocation2 + $0xb0] sm:$0xff] %v3933_v0  ;;  %589 = vst [vmem:[#allocation2 + $0xb8] sm:$0xff] %v3933_v0 }
  0x75   : > { %590 = vst [vmem:[#allocation2 + $0xc0] sm:$0xff] %v3933_v0  ;;  %591 = vst [vmem:[#allocation2 + $0xc8] sm:$0xff] %v3933_v0 }
  0x76   : > { %592 = vst [vmem:[#allocation2 + $0xd0] sm:$0xff] %v3933_v0  ;;  %593 = vst [vmem:[#allocation2 + $0xd8] sm:$0xff] %v3933_v0 }
  0x77   : > { %594 = vst [vmem:[#allocation2 + $0xe0] sm:$0xff] %v3933_v0  ;;  %595 = vst [vmem:[#allocation2 + $0xe8] sm:$0xff] %v3933_v0 }
  0x78   : > { %596 = vst [vmem:[#allocation2 + $0xf0] sm:$0xff] %v3933_v0  ;;  %597 = vst [vmem:[#allocation2 + $0xf8] sm:$0xff] %v3933_v0 }
  0x79   : > { %598 = vst [vmem:[#allocation2 + $0x100] sm:$0xff] %v3933_v0  ;;  %599 = vst [vmem:[#allocation2 + $0x108] sm:$0xff] %v3933_v0 }
  0x7a   : > { %600 = vst [vmem:[#allocation2 + $0x110] sm:$0xff] %v3933_v0  ;;  %601 = vst [vmem:[#allocation2 + $0x118] sm:$0xff] %v3933_v0 }
  0x7b   : > { %602 = vst [vmem:[#allocation2 + $0x120] sm:$0xff] %v3933_v0  ;;  %603 = vst [vmem:[#allocation2 + $0x128] sm:$0xff] %v3933_v0 }
  0x7c   : > { %604 = vst [vmem:[#allocation2 + $0x130] sm:$0xff] %v3933_v0  ;;  %605 = vst [vmem:[#allocation2 + $0x138] sm:$0xff] %v3933_v0 }
  0x7d   : > { %606 = vst [vmem:[#allocation2 + $0x140] sm:$0xff] %v3933_v0  ;;  %607 = vst [vmem:[#allocation2 + $0x148] sm:$0xff] %v3933_v0 }
  0x7e   : > { %608 = vst [vmem:[#allocation2 + $0x150] sm:$0xff] %v3933_v0  ;;  %609 = vst [vmem:[#allocation2 + $0x158] sm:$0xff] %v3933_v0 }
  0x7f   : > { %610 = vst [vmem:[#allocation2 + $0x160] sm:$0xff] %v3933_v0  ;;  %611 = vst [vmem:[#allocation2 + $0x168] sm:$0xff] %v3933_v0 }
  0x80   : > { %612 = vst [vmem:[#allocation2 + $0x170] sm:$0xff] %v3933_v0  ;;  %613 = vst [vmem:[#allocation2 + $0x178] sm:$0xff] %v3933_v0 }
  0x81   : > { %614 = vst [vmem:[#allocation2 + $0x180] sm:$0xff] %v3933_v0  ;;  %615 = vst [vmem:[#allocation2 + $0x188] sm:$0xff] %v3933_v0 }
  0x82   : > { %616 = vst [vmem:[#allocation2 + $0x190] sm:$0xff] %v3933_v0  ;;  %617 = vst [vmem:[#allocation2 + $0x198] sm:$0xff] %v3933_v0 }
  0x83   : > { %618 = vst [vmem:[#allocation2 + $0x1a0] sm:$0xff] %v3933_v0  ;;  %619 = vst [vmem:[#allocation2 + $0x1a8] sm:$0xff] %v3933_v0 }
  0x84   : > { %620 = vst [vmem:[#allocation2 + $0x1b0] sm:$0xff] %v3933_v0  ;;  %621 = vst [vmem:[#allocation2 + $0x1b8] sm:$0xff] %v3933_v0 }
  0x85   : > { %622 = vst [vmem:[#allocation2 + $0x1c0] sm:$0xff] %v3933_v0  ;;  %623 = vst [vmem:[#allocation2 + $0x1c8] sm:$0xff] %v3933_v0 }
  0x86   : > { %624 = vst [vmem:[#allocation2 + $0x1d0] sm:$0xff] %v3933_v0  ;;  %625 = vst [vmem:[#allocation2 + $0x1d8] sm:$0xff] %v3933_v0 }
  0x87   : > { %626 = vst [vmem:[#allocation2 + $0x1e0] sm:$0xff] %v3933_v0  ;;  %627 = vst [vmem:[#allocation2 + $0x1e8] sm:$0xff] %v3933_v0 }
  0x88   : > { %628 = vst [vmem:[#allocation2 + $0x1f0] sm:$0xff] %v3933_v0  ;;  %629 = vst [vmem:[#allocation2 + $0x1f8] sm:$0xff] %v3933_v0 }
  0x89 PF: > { %s630_s8 = smul.u32 384, %s3923_s17  ;;  %v3934_v1 = vmov 0   ;;  %v3759_v2 = vld [vmem:[%s4266_s7 + $0x4] ss:$12 sps:$4 sm:$0xff]   ;;  %v3757_v21 = vld [vmem:[%s4266_s7] ss:$12 sps:$4 sm:$0xff]  }
  0x8a   : > { %1531 = vmatprep.subr.bf16.mxu0 %v3934_v1  ;;  %3665 = vmatprep.subr.bf16.mxu1 %v3934_v1  ;;  %v3762_v3 = vld [vmem:[%s4266_s7 + $0x244] ss:$12 sps:$4 sm:$0xff]   ;;  %v3760_v22 = vld [vmem:[%s4266_s7 + $0x240] ss:$12 sps:$4 sm:$0xff]   ;;  %v3764_v23 = vld [vmem:[%s4266_s7 + $0x1c] ss:$12 sps:$4 sm:$0xff]  }
  0x8b   : > { %s823_s9 = sshra.s32 %s630_s8, 3  ;;  %1563 = vmatprep.mubr.bf16.mxu0 %v3759_v2  ;;  %1755 = vmatprep.mubr.bf16.mxu1 %v3762_v3  ;;  %v3766_v24 = vld [vmem:[%s4266_s7 + $0x25c] ss:$12 sps:$4 sm:$0xff]   ;;  %v3768_v26 = vld [vmem:[%s4266_s7 + $0x18] ss:$12 sps:$4 sm:$0xff]   ;;  %p3218_p10 = scmp.ne.s32.totalorder %s3923_s17, 2 }
  0x8c   : > { %s3097_s10 = sshll.u32 %s823_s9, 2  ;;  %v3769_v28 = vld [vmem:[%s4266_s7 + $0x258] ss:$12 sps:$4 sm:$0xff]   ;;  %v3771_v29 = vld [vmem:[%s4266_s7 + $0x34] ss:$12 sps:$4 sm:$0xff]  }
  0x8d   : > { %s4341_s13 = scalar_lea.vmem %s4871_s1, %s3097_s10  ;;  %v3773_v30 = vld [vmem:[%s4266_s7 + $0x274] ss:$12 sps:$4 sm:$0xff]   ;;  %v3775_v32 = vld [vmem:[%s4266_s7 + $0x30] ss:$12 sps:$4 sm:$0xff]   ;;  %v3778_v35 = vld [vmem:[%s4266_s7 + $0x4c] ss:$12 sps:$4 sm:$0xff]  }
  0x8e   : > { %v3741_v4 = vld [vmem:[%s4341_s13] sm:$0xff]   ;;  %v3742_v5 = vld [vmem:[%s4341_s13 + $0x8] sm:$0xff]   ;;  %v3743_v6 = vld [vmem:[%s4341_s13 + $0x10] sm:$0xff]  }
  0x8f   : > { %1532 = vmatpush1.bf16.msra.mxu0 %v3741_v4  ;;  %3681 = vmatpush1.bf16.msra.mxu1 %v3741_v4  ;;  %v3744_v7 = vld [vmem:[%s4341_s13 + $0x18] sm:$0xff]   ;;  %v3745_v8 = vld [vmem:[%s4341_s13 + $0x20] sm:$0xff]   ;;  %v3746_v9 = vld [vmem:[%s4341_s13 + $0x28] sm:$0xff]  }
  0x90   : > { %1533 = vmatprep.subr.bf16.mxu0 %v3934_v1  ;;  %3666 = vmatprep.subr.bf16.mxu1 %v3934_v1  ;;  %v3747_v10 = vld [vmem:[%s4341_s13 + $0x30] sm:$0xff]   ;;  %v3748_v11 = vld [vmem:[%s4341_s13 + $0x38] sm:$0xff]   ;;  %v3749_v12 = vld [vmem:[%s4341_s13 + $0x40] sm:$0xff]  }
  0x91   : > { %v3750_v13 = vld [vmem:[%s4341_s13 + $0x48] sm:$0xff]   ;;  %v3751_v14 = vld [vmem:[%s4341_s13 + $0x50] sm:$0xff]   ;;  %v3752_v15 = vld [vmem:[%s4341_s13 + $0x58] sm:$0xff]  }
  0x92   : > { %v3753_v16 = vld [vmem:[%s4341_s13 + $0x60] sm:$0xff]   ;;  %v3754_v17 = vld [vmem:[%s4341_s13 + $0x68] sm:$0xff]   ;;  %v3755_v18 = vld [vmem:[%s4341_s13 + $0x70] sm:$0xff]  }
  0x93   : > { %1534 = vmatpush1.bf16.msra.mxu0 %v3742_v5  ;;  %3682 = vmatpush1.bf16.msra.mxu1 %v3742_v5  ;;  %v3756_v19 = vld [vmem:[%s4341_s13 + $0x78] sm:$0xff]   ;;  %v3763_v20 = vld [vmem:[%s4341_s13 + $0x80] sm:$0xff]   ;;  %v3770_v25 = vld [vmem:[%s4341_s13 + $0x88] sm:$0xff]  }
  0x94   : > { %1535 = vmatprep.subr.bf16.mxu0 %v3934_v1  ;;  %3667 = vmatprep.subr.bf16.mxu1 %v3934_v1  ;;  %v3777_v27 = vld [vmem:[%s4341_s13 + $0x90] sm:$0xff]   ;;  %v3784_v31 = vld [vmem:[%s4341_s13 + $0x98] sm:$0xff]   ;;  %v3791_v34 = vld [vmem:[%s4341_s13 + $0xa0] sm:$0xff]  }
  0x95   : > { %v3776_v33 = vld [vmem:[%s4266_s7 + $0x270] ss:$12 sps:$4 sm:$0xff]   ;;  %v3780_v36 = vld [vmem:[%s4266_s7 + $0x28c] ss:$12 sps:$4 sm:$0xff]   ;;  %v3782_v39 = vld [vmem:[%s4266_s7 + $0x48] ss:$12 sps:$4 sm:$0xff]  }
  0x96   : > { %v3798_v37 = vld [vmem:[%s4341_s13 + $0xa8] sm:$0xff]   ;;  %v3805_v38 = vld [vmem:[%s4341_s13 + $0xb0] sm:$0xff]   ;;  %v3812_v43 = vld [vmem:[%s4341_s13 + $0xb8] sm:$0xff]  }
  0x97   : > { %1536 = vmatpush1.bf16.msra.mxu0 %v3743_v6  ;;  %3683 = vmatpush1.bf16.msra.mxu1 %v3743_v6  ;;  %v3783_v40 = vld [vmem:[%s4266_s7 + $0x288] ss:$12 sps:$4 sm:$0xff]   ;;  %v3785_v41 = vld [vmem:[%s4266_s7 + $0x64] ss:$12 sps:$4 sm:$0xff]   ;;  %v3789_v44 = vld [vmem:[%s4266_s7 + $0x60] ss:$12 sps:$4 sm:$0xff]  }
  0x98   : > { %1537 = vmatprep.subr.bf16.mxu0 %v3934_v1  ;;  %3668 = vmatprep.subr.bf16.mxu1 %v3934_v1  ;;  %v3787_v42 = vld [vmem:[%s4266_s7 + $0x2a4] ss:$12 sps:$4 sm:$0xff]   ;;  %v3790_v45 = vld [vmem:[%s4266_s7 + $0x2a0] ss:$12 sps:$4 sm:$0xff]   ;;  %v3792_v46 = vld [vmem:[%s4266_s7 + $0x7c] ss:$12 sps:$4 sm:$0xff]  }
  0x99   : > { %v3794_v47 = vld [vmem:[%s4266_s7 + $0x2bc] ss:$12 sps:$4 sm:$0xff]   ;;  %v3796_v48 = vld [vmem:[%s4266_s7 + $0x78] ss:$12 sps:$4 sm:$0xff]   ;;  %v3799_v50 = vld [vmem:[%s4266_s7 + $0x94] ss:$12 sps:$4 sm:$0xff]  }
  0x9a   : > { %v3797_v49 = vld [vmem:[%s4266_s7 + $0x2b8] ss:$12 sps:$4 sm:$0xff]   ;;  %v3801_v51 = vld [vmem:[%s4266_s7 + $0x2d4] ss:$12 sps:$4 sm:$0xff]   ;;  %v3803_v52 = vld [vmem:[%s4266_s7 + $0x90] ss:$12 sps:$4 sm:$0xff]  }
  0x9b   : > { %1538 = vmatpush1.bf16.msra.mxu0 %v3744_v7  ;;  %3684 = vmatpush1.bf16.msra.mxu1 %v3744_v7  ;;  %v3804_v53 = vld [vmem:[%s4266_s7 + $0x2d0] ss:$12 sps:$4 sm:$0xff]   ;;  %v3806_v54 = vld [vmem:[%s4266_s7 + $0xac] ss:$12 sps:$4 sm:$0xff]   ;;  %v3810_v56 = vld [vmem:[%s4266_s7 + $0xa8] ss:$12 sps:$4 sm:$0xff]  }
  0x9c   : > { %1539 = vmatprep.subr.bf16.mxu0 %v3934_v1  ;;  %3669 = vmatprep.subr.bf16.mxu1 %v3934_v1  ;;  %v3808_v55 = vld [vmem:[%s4266_s7 + $0x2ec] ss:$12 sps:$4 sm:$0xff]   ;;  %v3811_v57 = vld [vmem:[%s4266_s7 + $0x2e8] ss:$12 sps:$4 sm:$0xff]   ;;  %v3813_v58 = vld [vmem:[%s4266_s7 + $0xc4] ss:$12 sps:$4 sm:$0xff]  }
  0x9d   : > { %v3815_v59 = vld [vmem:[%s4266_s7 + $0x8] ss:$12 sps:$4 sm:$0xff]   ;;  %v3816_v60 = vld [vmem:[%s4266_s7 + $0xc0] ss:$12 sps:$4 sm:$0xff]   ;;  %v3820_v63 = vld [vmem:[%s4266_s7 + $0x38] ss:$12 sps:$4 sm:$0xff]  }
  0x9e   : > { %v3817_v61 = vld [vmem:[%s4266_s7 + $0x20] ss:$12 sps:$4 sm:$0xff]   ;;  %v3818_v62 = vld [vmem:[%s4266_s7 + $0xdc] ss:$12 sps:$4 sm:$0xff]   ;;  %v3821_v0 = vld [vmem:[%s4266_s7 + $0xd8] ss:$12 sps:$4 sm:$0xff]  }
  0x9f   : > { %1540 = vmatpush1.bf16.msra.mxu0 %v3745_v8  ;;  %3685 = vmatpush1.bf16.msra.mxu1 %v3745_v8  ;;  %v3823_v2 = vld [vmem:[%s4266_s7 + $0xf4] ss:$12 sps:$4 sm:$0xff]   ;;  %v3826_v4 = vld [vmem:[%s4266_s7 + $0xf0] ss:$12 sps:$4 sm:$0xff]   ;;  %v3828_v6 = vld [vmem:[%s4266_s7 + $0x10c] ss:$12 sps:$4 sm:$0xff]  }
  0xa0   : > { %1541 = vmatprep.subr.bf16.mxu0 %v3934_v1  ;;  %3670 = vmatprep.subr.bf16.mxu1 %v3934_v1  ;;  %v3825_v3 = vld [vmem:[%s4266_s7 + $0x68] ss:$12 sps:$4 sm:$0xff]   ;;  %v3827_v5 = vld [vmem:[%s4266_s7 + $0x80] ss:$12 sps:$4 sm:$0xff]   ;;  %v3830_v7 = vld [vmem:[%s4266_s7 + $0x98] ss:$12 sps:$4 sm:$0xff]  }
  0xa1   : > { %v3831_v8 = vld [vmem:[%s4266_s7 + $0x108] ss:$12 sps:$4 sm:$0xff]  }
  0xa3   : > { %1542 = vmatpush1.bf16.msra.mxu0 %v3746_v9  ;;  %3686 = vmatpush1.bf16.msra.mxu1 %v3746_v9  ;;  %v3832_v9 = vld [vmem:[%s4266_s7 + $0xb0] ss:$12 sps:$4 sm:$0xff]  }
  0xa4   : > { %1543 = vmatprep.subr.bf16.mxu0 %v3934_v1  ;;  %3671 = vmatprep.subr.bf16.mxu1 %v3934_v1 }
  0xa7   : > { %1544 = vmatpush1.bf16.msra.mxu0 %v3747_v10  ;;  %3687 = vmatpush1.bf16.msra.mxu1 %v3747_v10  ;;  %v3833_v10 = vld [vmem:[%s4266_s7 + $0x124] ss:$12 sps:$4 sm:$0xff]  }
  0xa8   : > { %1545 = vmatprep.subr.bf16.mxu0 %v3934_v1  ;;  %3672 = vmatprep.subr.bf16.mxu1 %v3934_v1 }
  0xab   : > { %1546 = vmatpush1.bf16.msra.mxu0 %v3748_v11  ;;  %3688 = vmatpush1.bf16.msra.mxu1 %v3748_v11  ;;  %v3835_v11 = vld [vmem:[%s4266_s7 + $0xc8] ss:$12 sps:$4 sm:$0xff]  }
  0xac   : > { %1547 = vmatprep.subr.bf16.mxu0 %v3934_v1  ;;  %3673 = vmatprep.subr.bf16.mxu1 %v3934_v1 }
  0xaf   : > { %1548 = vmatpush1.bf16.msra.mxu0 %v3749_v12  ;;  %3689 = vmatpush1.bf16.msra.mxu1 %v3749_v12  ;;  %v3836_v12 = vld [vmem:[%s4266_s7 + $0x120] ss:$12 sps:$4 sm:$0xff]  }
  0xb0   : > { %1549 = vmatprep.subr.bf16.mxu0 %v3934_v1  ;;  %3674 = vmatprep.subr.bf16.mxu1 %v3934_v1 }
  0xb3   : > { %1550 = vmatpush1.bf16.msra.mxu0 %v3750_v13  ;;  %3690 = vmatpush1.bf16.msra.mxu1 %v3750_v13  ;;  %v3837_v13 = vld [vmem:[%s4266_s7 + $0xe0] ss:$12 sps:$4 sm:$0xff]  }
  0xb4   : > { %1551 = vmatprep.subr.bf16.mxu0 %v3934_v1  ;;  %3675 = vmatprep.subr.bf16.mxu1 %v3934_v1 }
  0xb7   : > { %1552 = vmatpush1.bf16.msra.mxu0 %v3751_v14  ;;  %3691 = vmatpush1.bf16.msra.mxu1 %v3751_v14  ;;  %v3838_v14 = vld [vmem:[%s4266_s7 + $0x13c] ss:$12 sps:$4 sm:$0xff]  }
  0xb8   : > { %1553 = vmatprep.subr.bf16.mxu0 %v3934_v1  ;;  %3676 = vmatprep.subr.bf16.mxu1 %v3934_v1 }
  0xbb   : > { %1554 = vmatpush1.bf16.msra.mxu0 %v3752_v15  ;;  %3692 = vmatpush1.bf16.msra.mxu1 %v3752_v15  ;;  %v3840_v15 = vld [vmem:[%s4266_s7 + $0xf8] ss:$12 sps:$4 sm:$0xff]  }
  0xbc   : > { %1555 = vmatprep.subr.bf16.mxu0 %v3934_v1  ;;  %3677 = vmatprep.subr.bf16.mxu1 %v3934_v1 }
  0xbf   : > { %1556 = vmatpush1.bf16.msra.mxu0 %v3753_v16  ;;  %3693 = vmatpush1.bf16.msra.mxu1 %v3753_v16  ;;  %v3841_v16 = vld [vmem:[%s4266_s7 + $0x138] ss:$12 sps:$4 sm:$0xff]  }
  0xc0   : > { %1557 = vmatprep.subr.bf16.mxu0 %v3934_v1  ;;  %3678 = vmatprep.subr.bf16.mxu1 %v3934_v1 }
  0xc3   : > { %1558 = vmatpush1.bf16.msra.mxu0 %v3754_v17  ;;  %3694 = vmatpush1.bf16.msra.mxu1 %v3754_v17  ;;  %v3842_v17 = vld [vmem:[%s4266_s7 + $0x110] ss:$12 sps:$4 sm:$0xff]  }
  0xc4   : > { %1559 = vmatprep.subr.bf16.mxu0 %v3934_v1  ;;  %3679 = vmatprep.subr.bf16.mxu1 %v3934_v1 }
  0xc7   : > { %1560 = vmatpush1.bf16.msra.mxu0 %v3755_v18  ;;  %3695 = vmatpush1.bf16.msra.mxu1 %v3755_v18  ;;  %v3843_v18 = vld [vmem:[%s4266_s7 + $0x154] ss:$12 sps:$4 sm:$0xff]  }
  0xc8   : > { %1561 = vmatprep.subr.bf16.mxu0 %v3934_v1  ;;  %3680 = vmatprep.subr.bf16.mxu1 %v3934_v1  ;;  %v3822_v1 = vld [vmem:[%s4266_s7 + $0x50] ss:$12 sps:$4 sm:$0xff]  }
  0xcb   : > { %1562 = vmatpush1.bf16.msra.mxu0 %v3756_v19  ;;  %3696 = vmatpush1.bf16.msra.mxu1 %v3756_v19  ;;  %v3845_v19 = vld [vmem:[%s4266_s7 + $0x128] ss:$12 sps:$4 sm:$0xff]  }
  0xcc   : > { %3585 = vmatprep.subr.bf16.mxu1 %v3763_v20 }
  0xce   : > { %1564 = vmatmul.mubr.bf16.vlgmr.msra.gmra.mrb[0].mxu0 %v3757_v21  ;;  %1756 = vmatmul.mubr.bf16.vlgmr.msra.gmra.mrb[0].mxu1 %v3760_v22  ;;  %v3847_v21 = vld [vmem:[%s4266_s7 + $0x140] ss:$12 sps:$4 sm:$0xff]  }
  0xcf   : > { %3586 = vmatpush3.bf16.msra.mxu1 %v3763_v20  ;;  %1571 = vmatprep.mubr.bf16.mxu0 %v3764_v23  ;;  %v3846_v20 = vld [vmem:[%s4266_s7 + $0x150] ss:$12 sps:$4 sm:$0xff]   ;;  %v3848_v22 = vld [vmem:[%s4266_s7 + $0x16c] ss:$12 sps:$4 sm:$0xff]  }
  0xd0   : > { %1763 = vmatprep.mubr.bf16.mxu1 %v3766_v24  ;;  %3587 = vmatprep.subr.bf16.mxu1 %v3770_v25  ;;  %v3850_v23 = vld [vmem:[%s4266_s7 + $0x158] ss:$12 sps:$4 sm:$0xff]   ;;  %v3851_v24 = vld [vmem:[%s4266_s7 + $0x168] ss:$12 sps:$4 sm:$0xff]  }
  0xd3   : > { %3588 = vmatpush3.bf16.msra.mxu1 %v3770_v25  ;;  %v3852_v25 = vld [vmem:[%s4266_s7 + $0x170] ss:$12 sps:$4 sm:$0xff]  }
  0xd4   : > { %3589 = vmatprep.subr.bf16.mxu1 %v3777_v27 }
  0xd6   : > { %1572 = vmatmul.mubr.bf16.gmra.mrb[4].mxu0 %v3768_v26  ;;  %1764 = vmatmul.mubr.bf16.gmra.mrb[4].mxu1 %v3769_v28  ;;  %v3853_v26 = vld [vmem:[%s4266_s7 + $0x184] ss:$12 sps:$4 sm:$0xff]   ;;  %v3856_v28 = vld [vmem:[%s4266_s7 + $0x180] ss:$12 sps:$4 sm:$0xff]  }
  0xd7   : > { %1579 = vmatprep.mubr.bf16.mxu0 %v3771_v29  ;;  %1771 = vmatprep.mubr.bf16.mxu1 %v3773_v30  ;;  %v3857_v29 = vld [vmem:[%s4266_s7 + $0x1a0] ss:$12 sps:$4 sm:$0xff]   ;;  %v3858_v30 = vld [vmem:[%s4266_s7 + $0x19c] ss:$12 sps:$4 sm:$0xff]  }
  0xd8   : > { %3590 = vmatpush3.bf16.msra.mxu1 %v3777_v27  ;;  %v3855_v27 = vld [vmem:[%s4266_s7 + $0x188] ss:$12 sps:$4 sm:$0xff]  }
  0xd9   : > { %3591 = vmatprep.subr.bf16.mxu1 %v3784_v31 }
  0xdc   : > { %3592 = vmatpush3.bf16.msra.mxu1 %v3784_v31  ;;  %v3860_v31 = vld [vmem:[%s4266_s7 + $0x1b8] ss:$12 sps:$4 sm:$0xff]  }
  0xdd   : > { %3593 = vmatprep.subr.bf16.mxu1 %v3791_v34 }
  0xde   : > { %1580 = vmatmul.mubr.bf16.gmra.mrb[8].mxu0 %v3775_v32  ;;  %1772 = vmatmul.mubr.bf16.gmra.mrb[8].mxu1 %v3776_v33  ;;  %v3861_v32 = vld [vmem:[%s4266_s7 + $0x198] ss:$12 sps:$4 sm:$0xff]   ;;  %v3862_v33 = vld [vmem:[%s4266_s7 + $0x1d0] ss:$12 sps:$4 sm:$0xff]  }
  0xdf   : > { %1587 = vmatprep.mubr.bf16.mxu0 %v3778_v35  ;;  %1779 = vmatprep.mubr.bf16.mxu1 %v3780_v36  ;;  %v3865_v35 = vld [vmem:[%s4266_s7 + $0x1e8] ss:$12 sps:$4 sm:$0xff]   ;;  %v3866_v36 = vld [vmem:[%s4266_s7 + $0x1b0] ss:$12 sps:$4 sm:$0xff]  }
  0xe0   : > { %3594 = vmatpush3.bf16.msra.mxu1 %v3791_v34  ;;  %v3863_v34 = vld [vmem:[%s4266_s7 + $0x1b4] ss:$12 sps:$4 sm:$0xff]  }
  0xe1   : > { %3595 = vmatprep.subr.bf16.mxu1 %v3798_v37 }
  0xe4   : > { %3596 = vmatpush3.bf16.msra.mxu1 %v3798_v37  ;;  %v3867_v37 = vld [vmem:[%s4266_s7 + $0x200] ss:$12 sps:$4 sm:$0xff]  }
  0xe5   : > { %3597 = vmatprep.subr.bf16.mxu1 %v3805_v38 }
  0xe6   : > { %1588 = vmatmul.mubr.bf16.gmra.mrb[12].mxu0 %v3782_v39  ;;  %1780 = vmatmul.mubr.bf16.gmra.mrb[12].mxu1 %v3783_v40  ;;  %v3870_v39 = vld [vmem:[%s4266_s7 + $0x218] ss:$12 sps:$4 sm:$0xff]   ;;  %v3871_v40 = vld [vmem:[%s4266_s7 + $0x1c8] ss:$12 sps:$4 sm:$0xff]  }
  0xe7   : > { %1595 = vmatprep.mubr.bf16.mxu0 %v3785_v41  ;;  %1787 = vmatprep.mubr.bf16.mxu1 %v3787_v42  ;;  %v3872_v41 = vld [vmem:[%s4266_s7 + $0x230] ss:$12 sps:$4 sm:$0xff]  }
  0xe8   : > { %3598 = vmatpush3.bf16.msra.mxu1 %v3805_v38  ;;  %v3868_v38 = vld [vmem:[%s4266_s7 + $0x1cc] ss:$12 sps:$4 sm:$0xff]   ;;  %v3873_v42 = vld [vmem:[%s4266_s7 + $0x1e4] ss:$12 sps:$4 sm:$0xff]  }
  0xe9   : > { %3599 = vmatprep.subr.bf16.mxu1 %v3812_v43 }
  0xec   : > { %3600 = vmatpush3.bf16.msra.mxu1 %v3812_v43  ;;  %v3875_v43 = vld [vmem:[%s4266_s7 + $0x248] ss:$12 sps:$4 sm:$0xff]  }
  0xee   : > { %1596 = vmatmul.mubr.bf16.gmra.mrb[16].mxu0 %v3789_v44  ;;  %1788 = vmatmul.mubr.bf16.gmra.mrb[16].mxu1 %v3790_v45  ;;  %v3876_v44 = vld [vmem:[%s4266_s7 + $0x1e0] ss:$12 sps:$4 sm:$0xff]  }
  0xef   : > { %1603 = vmatprep.mubr.bf16.mxu0 %v3792_v46  ;;  %1795 = vmatprep.mubr.bf16.mxu1 %v3794_v47  ;;  %v3877_v45 = vld [vmem:[%s4266_s7 + $0x260] ss:$12 sps:$4 sm:$0xff]   ;;  %v3878_v46 = vld [vmem:[%s4266_s7 + $0x1fc] ss:$12 sps:$4 sm:$0xff]   ;;  %v3880_v47 = vld [vmem:[%s4266_s7 + $0x278] ss:$12 sps:$4 sm:$0xff]  }
  0xf6   : > { %1604 = vmatmul.mubr.bf16.gmra.mrb[20].mxu0 %v3796_v48  ;;  %1796 = vmatmul.mubr.bf16.gmra.mrb[20].mxu1 %v3797_v49  ;;  %v3881_v48 = vld [vmem:[%s4266_s7 + $0x1f8] ss:$12 sps:$4 sm:$0xff]   ;;  %v3882_v49 = vld [vmem:[%s4266_s7 + $0x290] ss:$12 sps:$4 sm:$0xff]  }
  0xf7   : > { %1611 = vmatprep.mubr.bf16.mxu0 %v3799_v50  ;;  %1803 = vmatprep.mubr.bf16.mxu1 %v3801_v51  ;;  %v3883_v50 = vld [vmem:[%s4266_s7 + $0x214] ss:$12 sps:$4 sm:$0xff]  }
  0xf8   : > { %v3885_v51 = vld [vmem:[%s4266_s7 + $0x2a8] ss:$12 sps:$4 sm:$0xff]  }
  0xfe   : > { %1612 = vmatmul.mubr.bf16.gmra.mrb[24].mxu0 %v3803_v52  ;;  %1804 = vmatmul.mubr.bf16.gmra.mrb[24].mxu1 %v3804_v53  ;;  %v3886_v52 = vld [vmem:[%s4266_s7 + $0x210] ss:$12 sps:$4 sm:$0xff]   ;;  %v3887_v53 = vld [vmem:[%s4266_s7 + $0x2c0] ss:$12 sps:$4 sm:$0xff]  }
  0xff   : > { %1619 = vmatprep.mubr.bf16.mxu0 %v3806_v54  ;;  %1811 = vmatprep.mubr.bf16.mxu1 %v3808_v55  ;;  %v3888_v54 = vld [vmem:[%s4266_s7 + $0x22c] ss:$12 sps:$4 sm:$0xff]  }
 0x100   : > { %v3890_v55 = vld [vmem:[%s4266_s7 + $0x2d8] ss:$12 sps:$4 sm:$0xff]  }
 0x106   : > { %1620 = vmatmul.mubr.bf16.gmra.mrb[28].mxu0 %v3810_v56  ;;  %1812 = vmatmul.mubr.bf16.gmra.mrb[28].mxu1 %v3811_v57  ;;  %v3891_v56 = vld [vmem:[%s4266_s7 + $0x228] ss:$12 sps:$4 sm:$0xff]   ;;  %v3892_v57 = vld [vmem:[%s4266_s7 + $0x2f0] ss:$12 sps:$4 sm:$0xff]  }
 0x107   : > { %1627 = vmatprep.mubr.bf16.mxu0 %v3813_v58  ;;  %3601 = vmatprep.mubr.bf16.mxu1 %v3815_v59 }
 0x10e   : > { %1628 = vmatmul.mubr.bf16.gmra.mrb[32].mxu0 %v3816_v60  ;;  %3602 = vmatmul.mubr.bf16.vlgmr.msra.gmra.mrb[32].mxu1 %v3817_v61 }
 0x10f   : > { %1635 = vmatprep.mubr.bf16.mxu0 %v3818_v62  ;;  %3605 = vmatprep.mubr.bf16.mxu1 %v3820_v63 }
 0x116   : > { %1636 = vmatmul.mubr.bf16.gmra.mrb[36].mxu0 %v3821_v0  ;;  %3606 = vmatmul.mubr.bf16.gmra.mrb[36].mxu1 %v3822_v1 }
 0x117   : > { %1643 = vmatprep.mubr.bf16.mxu0 %v3823_v2  ;;  %3609 = vmatprep.mubr.bf16.mxu1 %v3825_v3 }
 0x11e   : > { %1644 = vmatmul.mubr.bf16.gmra.mrb[40].mxu0 %v3826_v4  ;;  %3610 = vmatmul.mubr.bf16.gmra.mrb[40].mxu1 %v3827_v5 }
 0x11f   : > { %1651 = vmatprep.mubr.bf16.mxu0 %v3828_v6  ;;  %3613 = vmatprep.mubr.bf16.mxu1 %v3830_v7 }
 0x126   : > { %1652 = vmatmul.mubr.bf16.gmra.mrb[44].mxu0 %v3831_v8  ;;  %3614 = vmatmul.mubr.bf16.gmra.mrb[44].mxu1 %v3832_v9 }
 0x127   : > { %1659 = vmatprep.mubr.bf16.mxu0 %v3833_v10  ;;  %3617 = vmatprep.mubr.bf16.mxu1 %v3835_v11 }
 0x12e   : > { %1660 = vmatmul.mubr.bf16.gmra.mrb[48].mxu0 %v3836_v12  ;;  %3618 = vmatmul.mubr.bf16.gmra.mrb[48].mxu1 %v3837_v13 }
 0x12f   : > { %1667 = vmatprep.mubr.bf16.mxu0 %v3838_v14  ;;  %3621 = vmatprep.mubr.bf16.mxu1 %v3840_v15 }
 0x136   : > { %1668 = vmatmul.mubr.bf16.gmra.mrb[52].mxu0 %v3841_v16  ;;  %3622 = vmatmul.mubr.bf16.gmra.mrb[52].mxu1 %v3842_v17 }
 0x137   : > { %1675 = vmatprep.mubr.bf16.mxu0 %v3843_v18  ;;  %3625 = vmatprep.mubr.bf16.mxu1 %v3845_v19 }
 0x13e   : > { %1676 = vmatmul.mubr.bf16.gmra.mrb[56].mxu0 %v3846_v20  ;;  %3626 = vmatmul.mubr.bf16.gmra.mrb[56].mxu1 %v3847_v21 }
 0x13f   : > { %1683 = vmatprep.mubr.bf16.mxu0 %v3848_v22  ;;  %3629 = vmatprep.mubr.bf16.mxu1 %v3850_v23 }
 0x146   : > { %1684 = vmatmul.mubr.bf16.gmra.mrb[60].mxu0 %v3851_v24  ;;  %3630 = vmatmul.mubr.bf16.gmra.mrb[60].mxu1 %v3852_v25 }
 0x147   : > { %1691 = vmatprep.mubr.bf16.mxu0 %v3853_v26  ;;  %3633 = vmatprep.mubr.bf16.mxu1 %v3855_v27 }
 0x14e   : > { %1692 = vmatmul.mubr.bf16.gmra.mrb[64].mxu0 %v3856_v28  ;;  %3634 = vmatmul.mubr.bf16.gmra.mrb[64].mxu1 %v3857_v29 }
 0x14f   : > { %1699 = vmatprep.mubr.bf16.mxu0 %v3858_v30  ;;  %3637 = vmatprep.mubr.bf16.mxu1 %v3860_v31 }
 0x156   : > { %1700 = vmatmul.mubr.bf16.gmra.mrb[68].mxu0 %v3861_v32  ;;  %3638 = vmatmul.mubr.bf16.gmra.mrb[68].mxu1 %v3862_v33 }
 0x157   : > { %1707 = vmatprep.mubr.bf16.mxu0 %v3863_v34  ;;  %3641 = vmatprep.mubr.bf16.mxu1 %v3865_v35 }
 0x15e   : > { %1708 = vmatmul.mubr.bf16.gmra.mrb[72].mxu0 %v3866_v36  ;;  %3642 = vmatmul.mubr.bf16.gmra.mrb[72].mxu1 %v3867_v37 }
 0x15f   : > { %1715 = vmatprep.mubr.bf16.mxu0 %v3868_v38  ;;  %3645 = vmatprep.mubr.bf16.mxu1 %v3870_v39 }
 0x166   : > { %1716 = vmatmul.mubr.bf16.gmra.mrb[76].mxu0 %v3871_v40  ;;  %3646 = vmatmul.mubr.bf16.gmra.mrb[76].mxu1 %v3872_v41 }
 0x167   : > { %1723 = vmatprep.mubr.bf16.mxu0 %v3873_v42  ;;  %3649 = vmatprep.mubr.bf16.mxu1 %v3875_v43 }
 0x16e   : > { %1724 = vmatmul.mubr.bf16.gmra.mrb[80].mxu0 %v3876_v44  ;;  %3650 = vmatmul.mubr.bf16.gmra.mrb[80].mxu1 %v3877_v45 }
 0x16f   : > { %1731 = vmatprep.mubr.bf16.mxu0 %v3878_v46  ;;  %3653 = vmatprep.mubr.bf16.mxu1 %v3880_v47 }
 0x176   : > { %1732 = vmatmul.mubr.bf16.gmra.mrb[84].mxu0 %v3881_v48  ;;  %3654 = vmatmul.mubr.bf16.gmra.mrb[84].mxu1 %v3882_v49 }
 0x177   : > { %1739 = vmatprep.mubr.bf16.mxu0 %v3883_v50  ;;  %3657 = vmatprep.mubr.bf16.mxu1 %v3885_v51 }
 0x17e   : > { %1740 = vmatmul.mubr.bf16.gmra.mrb[88].mxu0 %v3886_v52  ;;  %3658 = vmatmul.mubr.bf16.gmra.mrb[88].mxu1 %v3887_v53 }
 0x17f   : > { %1747 = vmatprep.mubr.bf16.mxu0 %v3888_v54  ;;  %3661 = vmatprep.mubr.bf16.mxu1 %v3890_v55 }
 0x186   : > { %1748 = vmatmul.mubr.bf16.gmra.mrb[92].mxu0 %v3891_v56  ;;  %3662 = vmatmul.mubr.bf16.gmra.mrb[92].mxu1 %v3892_v57 }
 0x1a1   : > { %v4491_v58 = vpop.f32.mrb[0].mxu0  ;;  %v4493_v59 = vpop.f32.mrb[0].mxu1 }
 0x1a2   : > { %v1567_v60 = vpop.f32.mrb[1].mxu0  ;;  %v1759_v61 = vpop.f32.mrb[1].mxu1 }
 0x1a3   : > { %v4495_v62 = vpop.f32.mrb[2].mxu0  ;;  %v4497_v63 = vpop.f32.mrb[2].mxu1  ;;  %v633_v61 = vld [vmem:[#allocation2 + $0x10] sm:$0xff] }
 0x1a4   : > { %v1570_v0 = vpop.f32.mrb[3].mxu0  ;;  %v1762_v1 = vpop.f32.mrb[3].mxu1 }
 0x1a9   : > { %v1573_v2 = vpop.f32.mrb[4].mxu0  ;;  %v4499_v3 = vpop.f32.mrb[4].mxu1 }
 0x1aa   : > { %v1575_v4 = vpop.f32.mrb[5].mxu0  ;;  %v1767_v5 = vpop.f32.mrb[5].mxu1 }
 0x1ab   : > { %v4501_v6 = vpop.f32.mrb[6].mxu0  ;;  %v4503_v7 = vpop.f32.mrb[6].mxu1  ;;  %v631_v5 = vld [vmem:[#allocation2] sm:$0xff] }
 0x1ac   : > { %v1578_v8 = vpop.f32.mrb[7].mxu0  ;;  %v1770_v9 = vpop.f32.mrb[7].mxu1 }
 0x1b1   : > { %v4505_v10 = vpop.f32.mrb[8].mxu0  ;;  %v4507_v11 = vpop.f32.mrb[8].mxu1 }
 0x1b2   : > { %v1583_v12 = vpop.f32.mrb[9].mxu0  ;;  %v1775_v13 = vpop.f32.mrb[9].mxu1 }
 0x1b3   : > { %v4509_v14 = vpop.f32.mrb[10].mxu0  ;;  %v4511_v15 = vpop.f32.mrb[10].mxu1  ;;  %v634_v13 = vld [vmem:[#allocation2 + $0x18] sm:$0xff] }
 0x1b4   : > { %v1586_v16 = vpop.f32.mrb[11].mxu0  ;;  %v1778_v17 = vpop.f32.mrb[11].mxu1 }
 0x1b9   : > { %v4513_v18 = vpop.f32.mrb[12].mxu0  ;;  %v4515_v19 = vpop.f32.mrb[12].mxu1 }
 0x1ba   : > { %v1591_v20 = vpop.f32.mrb[13].mxu0  ;;  %v1783_v21 = vpop.f32.mrb[13].mxu1 }
 0x1bb   : > { %v4517_v22 = vpop.f32.mrb[14].mxu0  ;;  %v4519_v23 = vpop.f32.mrb[14].mxu1 }
 0x1bc   : > { %v1594_v24 = vpop.f32.mrb[15].mxu0  ;;  %v1786_v25 = vpop.f32.mrb[15].mxu1 }
 0x1bd   : > { %v632_v24 = vld [vmem:[#allocation2 + $0x8] sm:$0xff] }
 0x1c1   : > { %v4521_v26 = vpop.f32.mrb[16].mxu0  ;;  %v4523_v27 = vpop.f32.mrb[16].mxu1 }
 0x1c2   : > { %v1599_v28 = vpop.f32.mrb[17].mxu0  ;;  %v1791_v29 = vpop.f32.mrb[17].mxu1 }
 0x1c3   : > { %v4525_v30 = vpop.f32.mrb[18].mxu0  ;;  %v4527_v31 = vpop.f32.mrb[18].mxu1 }
 0x1c4   : > { %v1602_v32 = vpop.f32.mrb[19].mxu0  ;;  %v1794_v33 = vpop.f32.mrb[19].mxu1 }
 0x1c5   : > { %v637_v33 = vld [vmem:[#allocation2 + $0x30] sm:$0xff] }
 0x1c9   : > { %v4529_v34 = vpop.f32.mrb[20].mxu0  ;;  %v4531_v35 = vpop.f32.mrb[20].mxu1 }
 0x1ca   : > { %v1607_v36 = vpop.f32.mrb[21].mxu0  ;;  %v1799_v37 = vpop.f32.mrb[21].mxu1 }
 0x1cb   : > { %v4533_v38 = vpop.f32.mrb[22].mxu0  ;;  %v4535_v39 = vpop.f32.mrb[22].mxu1 }
 0x1cc   : > { %v1610_v40 = vpop.f32.mrb[23].mxu0  ;;  %v1802_v41 = vpop.f32.mrb[23].mxu1 }
 0x1d1   : > { %v4537_v42 = vpop.f32.mrb[24].mxu0  ;;  %v4539_v43 = vpop.f32.mrb[24].mxu1 }
 0x1d2   : > { %v1615_v44 = vpop.f32.mrb[25].mxu0  ;;  %v1807_v45 = vpop.f32.mrb[25].mxu1 }
 0x1d3   : > { %v4541_v46 = vpop.f32.mrb[26].mxu0  ;;  %v4543_v47 = vpop.f32.mrb[26].mxu1 }
 0x1d4   : > { %v1618_v48 = vpop.f32.mrb[27].mxu0  ;;  %v1810_v49 = vpop.f32.mrb[27].mxu1 }
 0x1d9   : > { %v4545_v50 = vpop.f32.mrb[28].mxu0  ;;  %v4547_v51 = vpop.f32.mrb[28].mxu1 }
 0x1da   : > { %v1623_v52 = vpop.f32.mrb[29].mxu0  ;;  %v1815_v53 = vpop.f32.mrb[29].mxu1 }
 0x1db   : > { %v4549_v54 = vpop.f32.mrb[30].mxu0  ;;  %v4551_v55 = vpop.f32.mrb[30].mxu1 }
 0x1dc   : > { %v1626_v56 = vpop.f32.mrb[31].mxu0  ;;  %v1818_v57 = vpop.f32.mrb[31].mxu1 }
 0x1dd   : > { %v636_v56 = vld [vmem:[#allocation2 + $0x28] sm:$0xff] }
 0x1e1   : > { %v4553_v60 = vpop.f32.mrb[32].mxu0  ;;  %v3603_v0 = vpop.f32.mrb[32].mxu1 }
 0x1e2   : > { %v1863_v1 = vadd.f32 %v3603_v0, %v1573_v2  ;;  %v1631_v4 = vpop.f32.mrb[33].mxu0  ;;  %v1854_v8 = vpop.f32.mrb[33].mxu1 }
 0x1e3   : > { %v1855_v9 = vadd.f32 %v1854_v8, %v4491_v58  ;;  %v4556_v12 = vpop.f32.mrb[34].mxu0  ;;  %v3604_v16 = vpop.f32.mrb[34].mxu1  ;;  %v641_v4 = vld [vmem:[#allocation2 + $0x50] sm:$0xff] }
 0x1e4   : > { %v2111_v17 = vadd.f32 %v1863_v1, %v633_v61  ;;  %v1866_v20 = vadd.f32 %v3604_v16, %v4501_v6  ;;  %v1634_v21 = vpop.f32.mrb[35].mxu0  ;;  %v1857_v25 = vpop.f32.mrb[35].mxu1  ;;  %v635_v6 = vld [vmem:[#allocation2 + $0x20] sm:$0xff] }
 0x1e5   : > { %v2109_v28 = vadd.f32 %v1855_v9, %v631_v5  ;;  %v1858_v29 = vadd.f32 %v1857_v25, %v4495_v62  ;;  %v638_v62 = vld [vmem:[#allocation2 + $0x38] sm:$0xff] }
 0x1e6   : > { %2175 = vst [vmem:[#allocation2 + $0x10] sm:$0xff] %v2111_v17  ;;  %v2112_v2 = vadd.f32 %v1866_v20, %v634_v13 }
 0x1e7   : > { %2173 = vst [vmem:[#allocation2] sm:$0xff] %v2109_v28  ;;  %v2110_v32 = vadd.f32 %v1858_v29, %v632_v24  ;;  %v640_v28 = vld [vmem:[#allocation2 + $0x48] sm:$0xff] }
 0x1e8   : > { %2176 = vst [vmem:[#allocation2 + $0x18] sm:$0xff] %v2112_v2 }
 0x1e9   : > { %2174 = vst [vmem:[#allocation2 + $0x8] sm:$0xff] %v2110_v32  ;;  %v4560_v58 = vpop.f32.mrb[36].mxu0  ;;  %v3607_v36 = vpop.f32.mrb[36].mxu1 }
 0x1ea   : > { %v1879_v37 = vadd.f32 %v3607_v36, %v4513_v18  ;;  %v1639_v40 = vpop.f32.mrb[37].mxu0  ;;  %v1870_v41 = vpop.f32.mrb[37].mxu1  ;;  %v645_v36 = vld [vmem:[#allocation2 + $0x70] sm:$0xff] }
 0x1eb   : > { %v1871_v44 = vadd.f32 %v1870_v41, %v4505_v10  ;;  %v4564_v45 = vpop.f32.mrb[38].mxu0  ;;  %v3608_v48 = vpop.f32.mrb[38].mxu1  ;;  %v643_v41 = vld [vmem:[#allocation2 + $0x60] sm:$0xff] }
 0x1ec   : > { %v2115_v49 = vadd.f32 %v1879_v37, %v637_v33  ;;  %v1882_v52 = vadd.f32 %v3608_v48, %v4517_v22  ;;  %v1642_v53 = vpop.f32.mrb[39].mxu0  ;;  %v1873_v57 = vpop.f32.mrb[39].mxu1  ;;  %v639_v22 = vld [vmem:[#allocation2 + $0x40] sm:$0xff]  ;;  %v646_v48 = vld [vmem:[#allocation2 + $0x78] sm:$0xff] }
 0x1ed   : > { %v2113_v61 = vadd.f32 %v1871_v44, %v635_v6  ;;  %v1874_v0 = vadd.f32 %v1873_v57, %v4509_v14  ;;  %v642_v14 = vld [vmem:[#allocation2 + $0x58] sm:$0xff] }
 0x1ee   : > { %2179 = vst [vmem:[#allocation2 + $0x30] sm:$0xff] %v2115_v49  ;;  %v2116_v18 = vadd.f32 %v1882_v52, %v638_v62 }
 0x1ef   : > { %2177 = vst [vmem:[#allocation2 + $0x20] sm:$0xff] %v2113_v61  ;;  %v2114_v1 = vadd.f32 %v1874_v0, %v636_v56  ;;  %v644_v56 = vld [vmem:[#allocation2 + $0x68] sm:$0xff] }
 0x1f0   : > { %2180 = vst [vmem:[#allocation2 + $0x38] sm:$0xff] %v2116_v18 }
 0x1f1   : > { %2178 = vst [vmem:[#allocation2 + $0x28] sm:$0xff] %v2114_v1  ;;  %v4568_v10 = vpop.f32.mrb[40].mxu0  ;;  %v3611_v5 = vpop.f32.mrb[40].mxu1 }
 0x1f2   : > { %v1895_v8 = vadd.f32 %v3611_v5, %v4529_v34  ;;  %v1647_v9 = vpop.f32.mrb[41].mxu0  ;;  %v1886_v13 = vpop.f32.mrb[41].mxu1 }
 0x1f3   : > { %v1887_v16 = vadd.f32 %v1886_v13, %v4521_v26  ;;  %v4572_v17 = vpop.f32.mrb[42].mxu0  ;;  %v3612_v20 = vpop.f32.mrb[42].mxu1  ;;  %v647_v9 = vld [vmem:[#allocation2 + $0x80] sm:$0xff] }
 0x1f4   : > { %v2119_v21 = vadd.f32 %v1895_v8, %v641_v4  ;;  %v1898_v24 = vadd.f32 %v3612_v20, %v4533_v38  ;;  %v1650_v25 = vpop.f32.mrb[43].mxu0  ;;  %v1889_v29 = vpop.f32.mrb[43].mxu1 }
 0x1f5   : > { %v2117_v2 = vadd.f32 %v1887_v16, %v639_v22  ;;  %v1890_v32 = vadd.f32 %v1889_v29, %v4525_v30  ;;  %v650_v16 = vld [vmem:[#allocation2 + $0x98] sm:$0xff] }
 0x1f6   : > { %2183 = vst [vmem:[#allocation2 + $0x50] sm:$0xff] %v2119_v21  ;;  %v2120_v34 = vadd.f32 %v1898_v24, %v642_v14  ;;  %v648_v24 = vld [vmem:[#allocation2 + $0x88] sm:$0xff] }
 0x1f7   : > { %2181 = vst [vmem:[#allocation2 + $0x40] sm:$0xff] %v2117_v2  ;;  %v2118_v33 = vadd.f32 %v1890_v32, %v640_v28 }
 0x1f8   : > { %2184 = vst [vmem:[#allocation2 + $0x58] sm:$0xff] %v2120_v34 }
 0x1f9   : > { %2182 = vst [vmem:[#allocation2 + $0x48] sm:$0xff] %v2118_v33  ;;  %v1653_v26 = vpop.f32.mrb[44].mxu0  ;;  %v3615_v37 = vpop.f32.mrb[44].mxu1 }
 0x1fa   : > { %v1911_v40 = vadd.f32 %v3615_v37, %v4545_v50  ;;  %v1655_v6 = vpop.f32.mrb[45].mxu0  ;;  %v1902_v38 = vpop.f32.mrb[45].mxu1  ;;  %v651_v37 = vld [vmem:[#allocation2 + $0xa0] sm:$0xff] }
 0x1fb   : > { %v1903_v44 = vadd.f32 %v1902_v38, %v4537_v42  ;;  %v1656_v62 = vpop.f32.mrb[46].mxu0  ;;  %v3616_v49 = vpop.f32.mrb[46].mxu1  ;;  %v649_v42 = vld [vmem:[#allocation2 + $0x90] sm:$0xff] }
 0x1fc   : > { %v2123_v30 = vadd.f32 %v1911_v40, %v645_v36  ;;  %v1914_v52 = vadd.f32 %v3616_v49, %v4549_v54  ;;  %v1658_v53 = vpop.f32.mrb[47].mxu0  ;;  %v1905_v57 = vpop.f32.mrb[47].mxu1  ;;  %v652_v49 = vld [vmem:[#allocation2 + $0xa8] sm:$0xff] }
 0x1fd   : > { %v2121_v61 = vadd.f32 %v1903_v44, %v643_v41  ;;  %v1906_v0 = vadd.f32 %v1905_v57, %v4541_v46  ;;  %v654_v41 = vld [vmem:[#allocation2 + $0xb8] sm:$0xff] }
 0x1fe   : > { %2187 = vst [vmem:[#allocation2 + $0x70] sm:$0xff] %v2123_v30  ;;  %v2124_v18 = vadd.f32 %v1914_v52, %v646_v48 }
 0x1ff   : > { %2185 = vst [vmem:[#allocation2 + $0x60] sm:$0xff] %v2121_v61  ;;  %v2122_v50 = vadd.f32 %v1906_v0, %v644_v56  ;;  %v657_v61 = vld [vmem:[#allocation2 + $0xd0] sm:$0xff] }
 0x200   : > { %2188 = vst [vmem:[#allocation2 + $0x78] sm:$0xff] %v2124_v18 }
 0x201   : > { %2186 = vst [vmem:[#allocation2 + $0x68] sm:$0xff] %v2122_v50  ;;  %v1661_v1 = vpop.f32.mrb[48].mxu0  ;;  %v3619_v4 = vpop.f32.mrb[48].mxu1  ;;  %v655_v50 = vld [vmem:[#allocation2 + $0xc0] sm:$0xff] }
 0x202   : > { %v1927_v5 = vadd.f32 %v3619_v4, %v4560_v58  ;;  %v1663_v8 = vpop.f32.mrb[49].mxu0  ;;  %v1918_v54 = vpop.f32.mrb[49].mxu1 }
 0x203   : > { %v1919_v22 = vadd.f32 %v1918_v54, %v4553_v60  ;;  %v1664_v13 = vpop.f32.mrb[50].mxu0  ;;  %v3620_v14 = vpop.f32.mrb[50].mxu1  ;;  %v653_v60 = vld [vmem:[#allocation2 + $0xb0] sm:$0xff] }
 0x204   : > { %v2127_v46 = vadd.f32 %v1927_v5, %v649_v42  ;;  %v1930_v20 = vadd.f32 %v3620_v14, %v4564_v45  ;;  %v1666_v21 = vpop.f32.mrb[51].mxu0  ;;  %v1921_v25 = vpop.f32.mrb[51].mxu1  ;;  %v658_v5 = vld [vmem:[#allocation2 + $0xd8] sm:$0xff] }
 0x205   : > { %v2125_v28 = vadd.f32 %v1919_v22, %v647_v9  ;;  %v1922_v29 = vadd.f32 %v1921_v25, %v4556_v12  ;;  %v656_v22 = vld [vmem:[#allocation2 + $0xc8] sm:$0xff]  ;;  %v661_v25 = vld [vmem:[#allocation2 + $0xf0] sm:$0xff] }
 0x206   : > { %2191 = vst [vmem:[#allocation2 + $0x90] sm:$0xff] %v2127_v46  ;;  %v2128_v2 = vadd.f32 %v1930_v20, %v650_v16 }
 0x207   : > { %2189 = vst [vmem:[#allocation2 + $0x80] sm:$0xff] %v2125_v28  ;;  %v2126_v58 = vadd.f32 %v1922_v29, %v648_v24 }
 0x208   : > { %2192 = vst [vmem:[#allocation2 + $0x98] sm:$0xff] %v2128_v2  ;;  %v659_v2 = vld [vmem:[#allocation2 + $0xe0] sm:$0xff] }
 0x209   : > { %2190 = vst [vmem:[#allocation2 + $0x88] sm:$0xff] %v2126_v58  ;;  %v1669_v32 = vpop.f32.mrb[52].mxu0  ;;  %v3623_v34 = vpop.f32.mrb[52].mxu1 }
 0x20a   : > { %v1943_v33 = vadd.f32 %v3623_v34, %v1653_v26  ;;  %v1671_v36 = vpop.f32.mrb[53].mxu0  ;;  %v1934_v40 = vpop.f32.mrb[53].mxu1  ;;  %v662_v34 = vld [vmem:[#allocation2 + $0xf8] sm:$0xff] }
 0x20b   : > { %v1935_v45 = vadd.f32 %v1934_v40, %v4568_v10  ;;  %v1672_v6 = vpop.f32.mrb[54].mxu0  ;;  %v3624_v38 = vpop.f32.mrb[54].mxu1  ;;  %v660_v40 = vld [vmem:[#allocation2 + $0xe8] sm:$0xff] }
 0x20c   : > { %v2131_v44 = vadd.f32 %v1943_v33, %v653_v60  ;;  %v1946_v12 = vadd.f32 %v3624_v38, %v1656_v62  ;;  %v1674_v48 = vpop.f32.mrb[55].mxu0  ;;  %v1937_v30 = vpop.f32.mrb[55].mxu1 }
 0x20d   : > { %v2129_v52 = vadd.f32 %v1935_v45, %v651_v37  ;;  %v1938_v53 = vadd.f32 %v1937_v30, %v4572_v17  ;;  %v663_v30 = vld [vmem:[#allocation2 + $0x100] sm:$0xff] }
 0x20e   : > { %2195 = vst [vmem:[#allocation2 + $0xb0] sm:$0xff] %v2131_v44  ;;  %v2132_v56 = vadd.f32 %v1946_v12, %v654_v41 }
 0x20f   : > { %2193 = vst [vmem:[#allocation2 + $0xa0] sm:$0xff] %v2129_v52  ;;  %v2130_v26 = vadd.f32 %v1938_v53, %v652_v49 }
 0x210   : > { %2196 = vst [vmem:[#allocation2 + $0xb8] sm:$0xff] %v2132_v56 }
 0x211   : > { %2194 = vst [vmem:[#allocation2 + $0xa8] sm:$0xff] %v2130_v26  ;;  %v1677_v57 = vpop.f32.mrb[56].mxu0  ;;  %v3627_v10 = vpop.f32.mrb[56].mxu1 }
 0x212   : > { %v1959_v0 = vadd.f32 %v3627_v10, %v1669_v32  ;;  %v1679_v18 = vpop.f32.mrb[57].mxu0  ;;  %v1950_v42 = vpop.f32.mrb[57].mxu1 }
 0x213   : > { %v1951_v62 = vadd.f32 %v1950_v42, %v1661_v1  ;;  %v1680_v4 = vpop.f32.mrb[58].mxu0  ;;  %v3628_v8 = vpop.f32.mrb[58].mxu1  ;;  %v665_v42 = vld [vmem:[#allocation2 + $0x110] sm:$0xff] }
 0x214   : > { %v2135_v9 = vadd.f32 %v1959_v0, %v657_v61  ;;  %v1962_v54 = vadd.f32 %v3628_v8, %v1672_v6  ;;  %v1682_v17 = vpop.f32.mrb[59].mxu0  ;;  %v1953_v16 = vpop.f32.mrb[59].mxu1  ;;  %v664_v61 = vld [vmem:[#allocation2 + $0x108] sm:$0xff] }
 0x215   : > { %v2133_v14 = vadd.f32 %v1951_v62, %v655_v50  ;;  %v1954_v46 = vadd.f32 %v1953_v16, %v1664_v13 }
 0x216   : > { %2199 = vst [vmem:[#allocation2 + $0xd0] sm:$0xff] %v2135_v9  ;;  %v2136_v20 = vadd.f32 %v1962_v54, %v658_v5  ;;  %v666_v54 = vld [vmem:[#allocation2 + $0x118] sm:$0xff] }
 0x217   : > { %2197 = vst [vmem:[#allocation2 + $0xc0] sm:$0xff] %v2133_v14  ;;  %v2134_v21 = vadd.f32 %v1954_v46, %v656_v22 }
 0x218   : > { %2200 = vst [vmem:[#allocation2 + $0xd8] sm:$0xff] %v2136_v20 }
 0x219   : > { %2198 = vst [vmem:[#allocation2 + $0xc8] sm:$0xff] %v2134_v21  ;;  %v1685_v24 = vpop.f32.mrb[60].mxu0  ;;  %v3631_v28 = vpop.f32.mrb[60].mxu1 }
 0x21a   : > { %v1975_v1 = vadd.f32 %v3631_v28, %v1685_v24  ;;  %v1687_v29 = vpop.f32.mrb[61].mxu0  ;;  %v1966_v58 = vpop.f32.mrb[61].mxu1  ;;  %v667_v24 = vld [vmem:[#allocation2 + $0x120] sm:$0xff] }
 0x21b   : > { %v1967_v32 = vadd.f32 %v1966_v58, %v1677_v57  ;;  %v1688_v60 = vpop.f32.mrb[62].mxu0  ;;  %v3632_v33 = vpop.f32.mrb[62].mxu1  ;;  %v668_v58 = vld [vmem:[#allocation2 + $0x128] sm:$0xff] }
 0x21c   : > { %v2139_v36 = vadd.f32 %v1975_v1, %v661_v25  ;;  %v1978_v37 = vadd.f32 %v3632_v33, %v1688_v60  ;;  %v1690_v13 = vpop.f32.mrb[63].mxu0  ;;  %v1969_v45 = vpop.f32.mrb[63].mxu1 }
 0x21d   : > { %v2137_v6 = vadd.f32 %v1967_v32, %v659_v2  ;;  %v1970_v41 = vadd.f32 %v1969_v45, %v1680_v4 }
 0x21e   : > { %2203 = vst [vmem:[#allocation2 + $0xf0] sm:$0xff] %v2139_v36  ;;  %v2140_v38 = vadd.f32 %v1978_v37, %v662_v34 }
 0x21f   : > { %2201 = vst [vmem:[#allocation2 + $0xe0] sm:$0xff] %v2137_v6  ;;  %v2138_v44 = vadd.f32 %v1970_v41, %v660_v40  ;;  %v669_v40 = vld [vmem:[#allocation2 + $0x130] sm:$0xff] }
 0x220   : > { %2204 = vst [vmem:[#allocation2 + $0xf8] sm:$0xff] %v2140_v38 }
 0x221   : > { %2202 = vst [vmem:[#allocation2 + $0xe8] sm:$0xff] %v2138_v44  ;;  %v1693_v12 = vpop.f32.mrb[64].mxu0  ;;  %v3635_v48 = vpop.f32.mrb[64].mxu1 }
 0x222   : > { %v1695_v49 = vpop.f32.mrb[65].mxu0  ;;  %v1982_v52 = vpop.f32.mrb[65].mxu1 }
 0x223   : > { %v1983_v53 = vadd.f32 %v1982_v52, %v1693_v12  ;;  %v1696_v56 = vpop.f32.mrb[66].mxu0  ;;  %v3636_v26 = vpop.f32.mrb[66].mxu1  ;;  %v670_v12 = vld [vmem:[#allocation2 + $0x138] sm:$0xff] }
 0x224   : > { %v1698_v57 = vpop.f32.mrb[67].mxu0  ;;  %v1985_v10 = vpop.f32.mrb[67].mxu1 }
 0x225   : > { %v2141_v0 = vadd.f32 %v1983_v53, %v663_v30  ;;  %v1986_v18 = vadd.f32 %v1985_v10, %v1696_v56  ;;  %v671_v57 = vld [vmem:[#allocation2 + $0x140] sm:$0xff]  ;;  %v681_v10 = vld [vmem:[#allocation2 + $0x190] sm:$0xff] }
 0x227   : > { %2205 = vst [vmem:[#allocation2 + $0x100] sm:$0xff] %v2141_v0  ;;  %v2142_v50 = vadd.f32 %v1986_v18, %v664_v61 }
 0x229   : > { %2206 = vst [vmem:[#allocation2 + $0x108] sm:$0xff] %v2142_v50  ;;  %v1701_v62 = vpop.f32.mrb[68].mxu0  ;;  %v3639_v4 = vpop.f32.mrb[68].mxu1 }
 0x22a   : > { %v1991_v5 = vadd.f32 %v3635_v48, %v1701_v62  ;;  %v1703_v8 = vpop.f32.mrb[69].mxu0  ;;  %v1998_v9 = vpop.f32.mrb[69].mxu1  ;;  %v679_v62 = vld [vmem:[#allocation2 + $0x180] sm:$0xff] }
 0x22b   : > { %v1704_v17 = vpop.f32.mrb[70].mxu0  ;;  %v3640_v22 = vpop.f32.mrb[70].mxu1  ;;  %v672_v8 = vld [vmem:[#allocation2 + $0x148] sm:$0xff] }
 0x22c   : > { %v2143_v16 = vadd.f32 %v1991_v5, %v665_v42  ;;  %v1994_v14 = vadd.f32 %v3636_v26, %v1704_v17  ;;  %v1706_v46 = vpop.f32.mrb[71].mxu0  ;;  %v2001_v20 = vpop.f32.mrb[71].mxu1 }
 0x22e   : > { %2207 = vst [vmem:[#allocation2 + $0x110] sm:$0xff] %v2143_v16  ;;  %v2144_v21 = vadd.f32 %v1994_v14, %v666_v54  ;;  %v682_v54 = vld [vmem:[#allocation2 + $0x198] sm:$0xff] }
 0x230   : > { %2208 = vst [vmem:[#allocation2 + $0x118] sm:$0xff] %v2144_v21  ;;  %v680_v21 = vld [vmem:[#allocation2 + $0x188] sm:$0xff] }
 0x231   : > { %v1709_v25 = vpop.f32.mrb[72].mxu0  ;;  %v4586_v28 = vpop.f32.mrb[72].mxu1 }
 0x232   : > { %v1999_v1 = vadd.f32 %v1998_v9, %v1709_v25  ;;  %v1711_v29 = vpop.f32.mrb[73].mxu0  ;;  %v2014_v2 = vpop.f32.mrb[73].mxu1 }
 0x233   : > { %v1712_v32 = vpop.f32.mrb[74].mxu0  ;;  %v4588_v60 = vpop.f32.mrb[74].mxu1 }
 0x234   : > { %v2145_v34 = vadd.f32 %v1999_v1, %v667_v24  ;;  %v2002_v33 = vadd.f32 %v2001_v20, %v1712_v32  ;;  %v1714_v36 = vpop.f32.mrb[75].mxu0  ;;  %v2017_v37 = vpop.f32.mrb[75].mxu1  ;;  %v685_v32 = vld [vmem:[#allocation2 + $0x1b0] sm:$0xff] }
 0x236   : > { %2209 = vst [vmem:[#allocation2 + $0x120] sm:$0xff] %v2145_v34  ;;  %v2146_v13 = vadd.f32 %v2002_v33, %v668_v58 }
 0x238   : > { %2210 = vst [vmem:[#allocation2 + $0x128] sm:$0xff] %v2146_v13 }
 0x239   : > { %v1717_v45 = vpop.f32.mrb[76].mxu0  ;;  %v4590_v6 = vpop.f32.mrb[76].mxu1 }
 0x23a   : > { %v2007_v41 = vadd.f32 %v3639_v4, %v1717_v45  ;;  %v1719_v38 = vpop.f32.mrb[77].mxu0  ;;  %v4592_v44 = vpop.f32.mrb[77].mxu1 }
 0x23b   : > { %v1720_v48 = vpop.f32.mrb[78].mxu0  ;;  %v4594_v49 = vpop.f32.mrb[78].mxu1 }
 0x23c   : > { %v2147_v30 = vadd.f32 %v2007_v41, %v669_v40  ;;  %v2010_v52 = vadd.f32 %v3640_v22, %v1720_v48  ;;  %v1722_v53 = vpop.f32.mrb[79].mxu0  ;;  %v4596_v56 = vpop.f32.mrb[79].mxu1  ;;  %v674_v40 = vld [vmem:[#allocation2 + $0x158] sm:$0xff] }
 0x23d   : > { %v686_v41 = vld [vmem:[#allocation2 + $0x1b8] sm:$0xff] }
 0x23e   : > { %2211 = vst [vmem:[#allocation2 + $0x130] sm:$0xff] %v2147_v30  ;;  %v2148_v26 = vadd.f32 %v2010_v52, %v670_v12 }
 0x240   : > { %2212 = vst [vmem:[#allocation2 + $0x138] sm:$0xff] %v2148_v26  ;;  %v684_v26 = vld [vmem:[#allocation2 + $0x1a8] sm:$0xff] }
 0x241   : > { %v1725_v61 = vpop.f32.mrb[80].mxu0  ;;  %v3651_v0 = vpop.f32.mrb[80].mxu1 }
 0x242   : > { %v2015_v18 = vadd.f32 %v2014_v2, %v1725_v61  ;;  %v2055_v50 = vadd.f32 %v3651_v0, %v4499_v3  ;;  %v1727_v42 = vpop.f32.mrb[81].mxu0  ;;  %v2046_v4 = vpop.f32.mrb[81].mxu1  ;;  %v673_v2 = vld [vmem:[#allocation2 + $0x150] sm:$0xff]  ;;  %v675_v0 = vld [vmem:[#allocation2 + $0x160] sm:$0xff] }
 0x243   : > { %v2047_v5 = vadd.f32 %v2046_v4, %v4493_v59  ;;  %v1728_v9 = vpop.f32.mrb[82].mxu0  ;;  %v3652_v17 = vpop.f32.mrb[82].mxu1  ;;  %v687_v4 = vld [vmem:[#allocation2 + $0x1c0] sm:$0xff] }
 0x244   : > { %v2149_v22 = vadd.f32 %v2015_v18, %v671_v57  ;;  %v2159_v16 = vadd.f32 %v2055_v50, %v681_v10  ;;  %v2018_v14 = vadd.f32 %v2017_v37, %v1728_v9  ;;  %v2058_v46 = vadd.f32 %v3652_v17, %v4503_v7  ;;  %v1730_v20 = vpop.f32.mrb[83].mxu0  ;;  %v2049_v24 = vpop.f32.mrb[83].mxu1  ;;  %v683_v37 = vld [vmem:[#allocation2 + $0x1a0] sm:$0xff] }
 0x245   : > { %v2157_v25 = vadd.f32 %v2047_v5, %v679_v62  ;;  %v2050_v3 = vadd.f32 %v2049_v24, %v4497_v63 }
 0x246   : > { %2213 = vst [vmem:[#allocation2 + $0x140] sm:$0xff] %v2149_v22  ;;  %2223 = vst [vmem:[#allocation2 + $0x190] sm:$0xff] %v2159_v16  ;;  %v2150_v1 = vadd.f32 %v2018_v14, %v672_v8  ;;  %v2160_v29 = vadd.f32 %v2058_v46, %v682_v54  ;;  %v676_v8 = vld [vmem:[#allocation2 + $0x168] sm:$0xff]  ;;  %v690_v54 = vld [vmem:[#allocation2 + $0x1d8] sm:$0xff] }
 0x247   : > { %2221 = vst [vmem:[#allocation2 + $0x180] sm:$0xff] %v2157_v25  ;;  %v2158_v59 = vadd.f32 %v2050_v3, %v680_v21  ;;  %v688_v21 = vld [vmem:[#allocation2 + $0x1c8] sm:$0xff] }
 0x248   : > { %2214 = vst [vmem:[#allocation2 + $0x148] sm:$0xff] %v2150_v1  ;;  %2224 = vst [vmem:[#allocation2 + $0x198] sm:$0xff] %v2160_v29  ;;  %v677_v1 = vld [vmem:[#allocation2 + $0x170] sm:$0xff] }
 0x249   : > { %2222 = vst [vmem:[#allocation2 + $0x188] sm:$0xff] %v2158_v59  ;;  %v1733_v58 = vpop.f32.mrb[84].mxu0  ;;  %v3655_v34 = vpop.f32.mrb[84].mxu1 }
 0x24a   : > { %v2023_v7 = vadd.f32 %v4586_v28, %v1733_v58  ;;  %v2071_v33 = vadd.f32 %v3655_v34, %v4515_v19  ;;  %v1735_v36 = vpop.f32.mrb[85].mxu0  ;;  %v2062_v63 = vpop.f32.mrb[85].mxu1 }
 0x24b   : > { %v2063_v13 = vadd.f32 %v2062_v63, %v4507_v11  ;;  %v1736_v45 = vpop.f32.mrb[86].mxu0  ;;  %v3656_v38 = vpop.f32.mrb[86].mxu1  ;;  %v694_v36 = vld [vmem:[#allocation2 + $0x1f8] sm:$0xff] }
 0x24c   : > { %v2151_v12 = vadd.f32 %v2023_v7, %v673_v2  ;;  %v2163_v48 = vadd.f32 %v2071_v33, %v685_v32  ;;  %v2026_v30 = vadd.f32 %v4588_v60, %v1736_v45  ;;  %v2074_v52 = vadd.f32 %v3656_v38, %v4519_v23  ;;  %v1738_v53 = vpop.f32.mrb[87].mxu0  ;;  %v2065_v28 = vpop.f32.mrb[87].mxu1  ;;  %v689_v60 = vld [vmem:[#allocation2 + $0x1d0] sm:$0xff]  ;;  %v691_v32 = vld [vmem:[#allocation2 + $0x1e0] sm:$0xff]  ;;  %v678_v7 = vld [vmem:[#allocation2 + $0x178] sm:$0xff] }
 0x24d   : > { %v2161_v57 = vadd.f32 %v2063_v13, %v683_v37  ;;  %v2066_v19 = vadd.f32 %v2065_v28, %v4511_v15  ;;  %v692_v38 = vld [vmem:[#allocation2 + $0x1e8] sm:$0xff]  ;;  %v2243_v28 = vld [vmem:[#allocation2 + $0x10] sm:$0xff] (!%p3218_p10) }
 0x24e   : > { %2215 = vst [vmem:[#allocation2 + $0x150] sm:$0xff] %v2151_v12  ;;  %2227 = vst [vmem:[#allocation2 + $0x1b0] sm:$0xff] %v2163_v48  ;;  %v2152_v61 = vadd.f32 %v2026_v30, %v674_v40  ;;  %v2164_v11 = vadd.f32 %v2074_v52, %v686_v41  ;;  %v4624_v52 = vld [vmem:[%s4872_s2] ss:$0 sm:$0xff] (!%p3218_p10) }
 0x24f   : > { %2225 = vst [vmem:[#allocation2 + $0x1a0] sm:$0xff] %v2161_v57  ;;  %v2162_v10 = vadd.f32 %v2066_v19, %v684_v26  ;;  %v4631_v26 = vld [vmem:[%s4873_s3] ss:$0 sm:$0xff] (!%p3218_p10)  ;;  %v2244_v57 = vld [vmem:[#allocation2 + $0x18] sm:$0xff] (!%p3218_p10)  ;;  %v2314_v19 = vmul.f32 (!%p3218_p10), %v4624_v52, %v2243_v28  ;;  %v2259_v28 = vld [vmem:[#allocation2 + $0x90] sm:$0xff] (!%p3218_p10) }
 0x250   : > { %2216 = vst [vmem:[#allocation2 + $0x158] sm:$0xff] %v2152_v61  ;;  %2228 = vst [vmem:[#allocation2 + $0x1b8] sm:$0xff] %v2164_v11  ;;  %v2315_v61 = vmul.f32 (!%p3218_p10), %v4624_v52, %v2244_v57  ;;  %v2245_v11 = vld [vmem:[#allocation2 + $0x20] sm:$0xff] (!%p3218_p10)  ;;  %v2260_v57 = vld [vmem:[#allocation2 + $0x98] sm:$0xff] (!%p3218_p10) }
 0x251   : > { %2226 = vst [vmem:[#allocation2 + $0x1a8] sm:$0xff] %v2162_v10  ;;  %v1741_v18 = vpop.f32.mrb[88].mxu0  ;;  %v3659_v50 = vpop.f32.mrb[88].mxu1  ;;  %v2246_v10 = vld [vmem:[#allocation2 + $0x28] sm:$0xff] (!%p3218_p10) }
 0x252   : > { %v2031_v23 = vadd.f32 %v4592_v44, %v1741_v18  ;;  %v2087_v42 = vadd.f32 %v3659_v50, %v4531_v35  ;;  %v1743_v62 = vpop.f32.mrb[89].mxu0  ;;  %v2078_v15 = vpop.f32.mrb[89].mxu1  ;;  %v2316_v50 = vmul.f32 (!%p3218_p10), %v4624_v52, %v2245_v11 }
 0x253   : > { %v2079_v5 = vadd.f32 %v2078_v15, %v4523_v27  ;;  %v1744_v9 = vpop.f32.mrb[90].mxu0  ;;  %v3660_v17 = vpop.f32.mrb[90].mxu1  ;;  %v2385_v62 = vadd.f32 (!%p3218_p10), %v4631_v26, %v2314_v19 }
 0x254   : > { %v2153_v22 = vadd.f32 %v2031_v23, %v675_v0  ;;  %v2167_v16 = vadd.f32 %v2087_v42, %v689_v60  ;;  %v2034_v14 = vadd.f32 %v4596_v56, %v1744_v9  ;;  %v2090_v46 = vadd.f32 %v3660_v17, %v4535_v39  ;;  %v1746_v20 = vpop.f32.mrb[91].mxu0  ;;  %v2081_v44 = vpop.f32.mrb[91].mxu1  ;;  %v693_v56 = vld [vmem:[#allocation2 + $0x1f0] sm:$0xff]  ;;  %v2248_v42 = vld [vmem:[#allocation2 + $0x38] sm:$0xff] (!%p3218_p10) }
 0x255   : > { %v2165_v24 = vadd.f32 %v2079_v5, %v687_v4  ;;  %v2082_v35 = vadd.f32 %v2081_v44, %v4527_v31  ;;  %v2247_v0 = vld [vmem:[#allocation2 + $0x30] sm:$0xff] (!%p3218_p10)  ;;  %v2317_v23 = vmul.f32 (!%p3218_p10), %v4624_v52, %v2246_v10  ;;  %v2386_v4 = vadd.f32 (!%p3218_p10), %v4631_v26, %v2315_v61 }
 0x256   : > { %2217 = vst [vmem:[#allocation2 + $0x160] sm:$0xff] %v2153_v22  ;;  %2231 = vst [vmem:[#allocation2 + $0x1d0] sm:$0xff] %v2167_v16  ;;  %v2154_v25 = vadd.f32 %v2034_v14, %v676_v8  ;;  %v2168_v27 = vadd.f32 %v2090_v46, %v690_v54  ;;  %v2318_v15 = vmul.f32 (!%p3218_p10), %v4624_v52, %v2247_v0  ;;  %v2249_v8 = vld [vmem:[#allocation2 + $0x40] sm:$0xff] (!%p3218_p10)  ;;  %v2250_v16 = vld [vmem:[#allocation2 + $0x48] sm:$0xff] (!%p3218_p10)  ;;  %v2449_v14 = vmax.f32 (!%p3218_p10), %v2385_v62, 0.0 }
 0x257   : > { %2229 = vst [vmem:[#allocation2 + $0x1c0] sm:$0xff] %v2165_v24  ;;  %v2166_v3 = vadd.f32 %v2082_v35, %v688_v21  ;;  %v2319_v5 = vmul.f32 (!%p3218_p10), %v4624_v52, %v2248_v42  ;;  %v2387_v17 = vadd.f32 (!%p3218_p10), %v4631_v26, %v2316_v50  ;;  %v2388_v22 = vadd.f32 (!%p3218_p10), %v4631_v26, %v2317_v23  ;;  %v2251_v44 = vld [vmem:[#allocation2 + $0x50] sm:$0xff] (!%p3218_p10)  ;;  %v2252_v24 = vld [vmem:[#allocation2 + $0x58] sm:$0xff] (!%p3218_p10)  ;;  %v2261_v0 = vld [vmem:[#allocation2 + $0xa0] sm:$0xff] (!%p3218_p10) }
 0x258   : > { %2218 = vst [vmem:[#allocation2 + $0x168] sm:$0xff] %v2154_v25  ;;  %2232 = vst [vmem:[#allocation2 + $0x1d8] sm:$0xff] %v2168_v27  ;;  %v2450_v46 = vmax.f32 (!%p3218_p10), %v2386_v4, 0.0  ;;  %v2389_v20 = vadd.f32 (!%p3218_p10), %v4631_v26, %v2318_v15  ;;  %v2263_v62 = vld [vmem:[#allocation2 + $0xb0] sm:$0xff] (!%p3218_p10) }
 0x259   : > { %2230 = vst [vmem:[#allocation2 + $0x1c8] sm:$0xff] %v2166_v3  ;;  %v1749_v29 = vpop.f32.mrb[92].mxu0  ;;  %v3663_v59 = vpop.f32.mrb[92].mxu1  ;;  %v2390_v21 = vadd.f32 (!%p3218_p10), %v4631_v26, %v2319_v5  ;;  %v2451_v25 = vmax.f32 (!%p3218_p10), %v2387_v17, 0.0  ;;  %v2452_v27 = vmax.f32 (!%p3218_p10), %v2388_v22, 0.0  ;;  %v2320_v3 = vmul.f32 (!%p3218_p10), %v4624_v52, %v2249_v8 }
 0x25a   : > { %v2039_v39 = vadd.f32 %v4590_v6, %v1749_v29  ;;  %v2103_v2 = vadd.f32 %v3663_v59, %v4547_v51  ;;  %v1751_v58 = vpop.f32.mrb[93].mxu0  ;;  %v2094_v31 = vpop.f32.mrb[93].mxu1  ;;  %v2254_v29 = vld [vmem:[#allocation2 + $0x68] sm:$0xff] (!%p3218_p10)  ;;  %v2453_v59 = vmax.f32 (!%p3218_p10), %v2389_v20, 0.0  ;;  %v2330_v5 = vmul.f32 (!%p3218_p10), %v4624_v52, %v2259_v28 }
 0x25b   : > { %v2095_v34 = vadd.f32 %v2094_v31, %v4539_v43  ;;  %v1752_v33 = vpop.f32.mrb[94].mxu0  ;;  %v3664_v37 = vpop.f32.mrb[94].mxu1  ;;  %2240 = sbr.rel (%p3218_p10) target bundleno = 662 (0x296), region = 70  ;;  %v2255_v58 = vld [vmem:[#allocation2 + $0x70] sm:$0xff] (!%p3218_p10)  ;;  %v2391_v31 = vadd.f32 (!%p3218_p10), %v4631_v26, %v2320_v3  ;;  %v2331_v8 = vmul.f32 (!%p3218_p10), %v4624_v52, %v2260_v57  ;;  %v2332_v22 = vmul.f32 (!%p3218_p10), %v4624_v52, %v2261_v0  ;;  %v2266_v3 = vld [vmem:[#allocation2 + $0xc8] sm:$0xff] (!%p3218_p10) }
 0x25c   : > { %v2155_v63 = vadd.f32 %v2039_v39, %v677_v1  ;;  %v2171_v13 = vadd.f32 %v2103_v2, %v693_v56  ;;  %v2042_v40 = vadd.f32 %v4594_v49, %v1752_v33  ;;  %v2106_v45 = vadd.f32 %v3664_v37, %v4551_v55  ;;  %v1754_v41 = vpop.f32.mrb[95].mxu0  ;;  %v2097_v6 = vpop.f32.mrb[95].mxu1  ;;  %v2241_v49 = vld [vmem:[#allocation2] sm:$0xff] (!%p3218_p10)  ;;  %v2242_v55 = vld [vmem:[#allocation2 + $0x8] sm:$0xff] (!%p3218_p10)  ;;  %v2256_v33 = vld [vmem:[#allocation2 + $0x78] sm:$0xff] (!%p3218_p10) }
 0x25d   : > { %v2169_v12 = vadd.f32 %v2095_v34, %v691_v32  ;;  %v2098_v51 = vadd.f32 %v2097_v6, %v4543_v47  ;;  %v2312_v47 = vmul.f32 (!%p3218_p10), %v4624_v52, %v2241_v49  ;;  %v2313_v53 = vmul.f32 (!%p3218_p10), %v4624_v52, %v2242_v55  ;;  %v2253_v1 = vld [vmem:[#allocation2 + $0x60] sm:$0xff] (!%p3218_p10) }
 0x25e   : > { %2219 = vst [vmem:[#allocation2 + $0x170] sm:$0xff] %v2155_v63  ;;  %2235 = vst [vmem:[#allocation2 + $0x1f0] sm:$0xff] %v2171_v13  ;;  %v2156_v48 = vadd.f32 %v2042_v40, %v678_v7  ;;  %v2172_v43 = vadd.f32 %v2106_v45, %v694_v36  ;;  %v3362_v56 = vpack.c.bf16 (!%p3218_p10), %v2450_v46, %v2449_v14  ;;  %v2454_v39 = vmax.f32 (!%p3218_p10), %v2390_v21, 0.0  ;;  %v2257_v40 = vld [vmem:[#allocation2 + $0x80] sm:$0xff] (!%p3218_p10) }
 0x25f   : > { %2233 = vst [vmem:[#allocation2 + $0x1e0] sm:$0xff] %v2169_v12  ;;  %v2170_v30 = vadd.f32 %v2098_v51, %v692_v38  ;;  %v2383_v18 = vadd.f32 (!%p3218_p10), %v4631_v26, %v2312_v47  ;;  %v2384_v60 = vadd.f32 (!%p3218_p10), %v4631_v26, %v2313_v53  ;;  %v2321_v2 = vmul.f32 (!%p3218_p10), %v4624_v52, %v2250_v16  ;;  %v2265_v14 = vld [vmem:[#allocation2 + $0xc0] sm:$0xff] (!%p3218_p10) }
 0x260   : > { %2220 = vst [vmem:[#allocation2 + $0x178] sm:$0xff] %v2156_v48  ;;  %2236 = vst [vmem:[#allocation2 + $0x1f8] sm:$0xff] %v2172_v43  ;;  %v3367_v32 = vpack.c.bf16 (!%p3218_p10), %v2452_v27, %v2451_v25  ;;  %v2322_v34 = vmul.f32 (!%p3218_p10), %v4624_v52, %v2251_v44  ;;  %v2323_v7 = vmul.f32 (!%p3218_p10), %v4624_v52, %v2252_v24  ;;  %v2455_v45 = vmax.f32 (!%p3218_p10), %v2391_v31, 0.0 }
 0x261   : > { %2234 = vst [vmem:[#allocation2 + $0x1e8] sm:$0xff] %v2170_v30  ;;  %v2447_v9 = vmax.f32 (!%p3218_p10), %v2383_v18, 0.0  ;;  %v2448_v54 = vmax.f32 (!%p3218_p10), %v2384_v60, 0.0  ;;  %3514 = vst [vmem:[%s4874_s4 + $0x8] sm:$0xff] (!%p3218_p10), %v3362_v56   ;;  %v3372_v36 = vpack.c.bf16 (!%p3218_p10), %v2454_v39, %v2453_v59  ;;  %v2392_v37 = vadd.f32 (!%p3218_p10), %v4631_v26, %v2321_v2  ;;  %v2258_v30 = vld [vmem:[#allocation2 + $0x88] sm:$0xff] (!%p3218_p10)  ;;  %v2267_v39 = vld [vmem:[#allocation2 + $0xd0] sm:$0xff] (!%p3218_p10) }
 0x262   : > { %v2324_v63 = vmul.f32 %v4624_v52, %v2253_v1  ;;  %v2325_v13 = vmul.f32 %v4624_v52, %v2254_v29  ;;  %3515 = vst [vmem:[%s4874_s4 + $0x10] sm:$0xff] %v3367_v32   ;;  %v2393_v41 = vadd.f32 %v4631_v26, %v2322_v34  ;;  %v2394_v38 = vadd.f32 %v4631_v26, %v2323_v7  ;;  %v2262_v18 = vld [vmem:[#allocation2 + $0xa8] sm:$0xff]  ;;  %v2268_v2 = vld [vmem:[#allocation2 + $0xd8] sm:$0xff]  ;;  %v2269_v7 = vld [vmem:[#allocation2 + $0xe0] sm:$0xff] }
 0x263   : > { %v3357_v35 = vpack.c.bf16 %v2448_v54, %v2447_v9  ;;  %v2326_v6 = vmul.f32 %v4624_v52, %v2255_v58  ;;  %3516 = vst [vmem:[%s4874_s4 + $0x18] sm:$0xff] %v3372_v36   ;;  %v2456_v12 = vmax.f32 %v2392_v37, 0.0  ;;  %v2327_v43 = vmul.f32 %v4624_v52, %v2256_v33  ;;  %v2264_v9 = vld [vmem:[#allocation2 + $0xb8] sm:$0xff]  ;;  %v2270_v33 = vld [vmem:[#allocation2 + $0xe8] sm:$0xff] }
 0x264   : > { %v2395_v51 = vadd.f32 %v4631_v26, %v2324_v63  ;;  %v2396_v48 = vadd.f32 %v4631_v26, %v2325_v13  ;;  %v2457_v49 = vmax.f32 %v2393_v41, 0.0  ;;  %v2458_v55 = vmax.f32 %v2394_v38, 0.0 }
 0x265   : > { %3358 = vst [vmem:[%s4874_s4] sm:$0xff] %v3357_v35   ;;  %v2397_v47 = vadd.f32 %v4631_v26, %v2326_v6  ;;  %v2328_v53 = vmul.f32 %v4624_v52, %v2257_v40  ;;  %v3377_v19 = vpack.c.bf16 %v2456_v12, %v2455_v45  ;;  %v2398_v10 = vadd.f32 %v4631_v26, %v2327_v43  ;;  %v2271_v40 = vld [vmem:[#allocation2 + $0xf0] sm:$0xff]  ;;  %v2272_v12 = vld [vmem:[#allocation2 + $0xf8] sm:$0xff] }
 0x266   : > { %v2459_v61 = vmax.f32 %v2395_v51, 0.0  ;;  %v2460_v11 = vmax.f32 %v2396_v48, 0.0  ;;  %v3382_v60 = vpack.c.bf16 %v2458_v55, %v2457_v49  ;;  %v2329_v23 = vmul.f32 %v4624_v52, %v2258_v30  ;;  %v2273_v49 = vld [vmem:[#allocation2 + $0x100] sm:$0xff] }
 0x267   : > { %v2461_v50 = vmax.f32 %v2397_v47, 0.0  ;;  %v2399_v42 = vadd.f32 %v4631_v26, %v2328_v53  ;;  %3517 = vst [vmem:[%s4874_s4 + $0x20] sm:$0xff] %v3377_v19   ;;  %v2462_v15 = vmax.f32 %v2398_v10, 0.0  ;;  %v2333_v16 = vmul.f32 %v4624_v52, %v2262_v18  ;;  %v2274_v10 = vld [vmem:[#allocation2 + $0x108] sm:$0xff] }
 0x268   : > { %v3387_v4 = vpack.c.bf16 %v2460_v11, %v2459_v61  ;;  %3518 = vst [vmem:[%s4874_s4 + $0x28] sm:$0xff] %v3382_v60   ;;  %v2400_v54 = vadd.f32 %v4631_v26, %v2329_v23  ;;  %v2401_v20 = vadd.f32 %v4631_v26, %v2330_v5  ;;  %v2402_v21 = vadd.f32 %v4631_v26, %v2331_v8  ;;  %v2275_v23 = vld [vmem:[#allocation2 + $0x110] sm:$0xff]  ;;  %v2277_v8 = vld [vmem:[#allocation2 + $0x120] sm:$0xff] }
 0x269   : > { %v2463_v17 = vmax.f32 %v2399_v42, 0.0  ;;  %v3392_v46 = vpack.c.bf16 %v2462_v15, %v2461_v50  ;;  %v2334_v44 = vmul.f32 %v4624_v52, %v2263_v62  ;;  %v2403_v35 = vadd.f32 %v4631_v26, %v2332_v22  ;;  %v2276_v42 = vld [vmem:[#allocation2 + $0x118] sm:$0xff] }
 0x26a   : > { %3519 = vst [vmem:[%s4874_s4 + $0x30] sm:$0xff] %v3387_v4   ;;  %v2464_v24 = vmax.f32 %v2400_v54, 0.0  ;;  %v2404_v25 = vadd.f32 %v4631_v26, %v2333_v16  ;;  %v2335_v27 = vmul.f32 %v4624_v52, %v2264_v9  ;;  %v2465_v1 = vmax.f32 %v2401_v20, 0.0  ;;  %v2278_v9 = vld [vmem:[#allocation2 + $0x128] sm:$0xff] }
 0x26b   : > { %3520 = vst [vmem:[%s4874_s4 + $0x38] sm:$0xff] %v3392_v46   ;;  %v2466_v29 = vmax.f32 %v2402_v21, 0.0  ;;  %v2405_v56 = vadd.f32 %v4631_v26, %v2334_v44  ;;  %v2336_v59 = vmul.f32 %v4624_v52, %v2265_v14  ;;  %v2467_v32 = vmax.f32 %v2403_v35, 0.0  ;;  %v2279_v14 = vld [vmem:[#allocation2 + $0x130] sm:$0xff] }
 0x26c   : > { %v3397_v58 = vpack.c.bf16 %v2464_v24, %v2463_v17  ;;  %v2468_v31 = vmax.f32 %v2404_v25, 0.0  ;;  %v2406_v34 = vadd.f32 %v4631_v26, %v2335_v27  ;;  %v2337_v63 = vmul.f32 %v4624_v52, %v2266_v3  ;;  %v2280_v24 = vld [vmem:[#allocation2 + $0x138] sm:$0xff] }
 0x26d   : > { %v3402_v36 = vpack.c.bf16 %v2466_v29, %v2465_v1  ;;  %v2469_v37 = vmax.f32 %v2405_v56, 0.0  ;;  %v2407_v13 = vadd.f32 %v4631_v26, %v2336_v59  ;;  %v2338_v38 = vmul.f32 %v4624_v52, %v2267_v39  ;;  %v2281_v1 = vld [vmem:[#allocation2 + $0x140] sm:$0xff] }
 0x26e   : > { %3521 = vst [vmem:[%s4874_s4 + $0x40] sm:$0xff] %v3397_v58   ;;  %v3407_v45 = vpack.c.bf16 %v2468_v31, %v2467_v32  ;;  %v2470_v41 = vmax.f32 %v2406_v34, 0.0  ;;  %v2339_v6 = vmul.f32 %v4624_v52, %v2268_v2  ;;  %v2408_v51 = vadd.f32 %v4631_v26, %v2337_v63  ;;  %v2282_v34 = vld [vmem:[#allocation2 + $0x148] sm:$0xff]  ;;  %v2283_v63 = vld [vmem:[#allocation2 + $0x150] sm:$0xff] }
 0x26f   : > { %3522 = vst [vmem:[%s4874_s4 + $0x48] sm:$0xff] %v3402_v36   ;;  %v2471_v48 = vmax.f32 %v2407_v13, 0.0  ;;  %v2340_v43 = vmul.f32 %v4624_v52, %v2269_v7  ;;  %v2341_v30 = vmul.f32 %v4624_v52, %v2270_v33  ;;  %v2409_v47 = vadd.f32 %v4631_v26, %v2338_v38  ;;  %v2284_v13 = vld [vmem:[#allocation2 + $0x158] sm:$0xff] }
 0x270   : > { %3523 = vst [vmem:[%s4874_s4 + $0x50] sm:$0xff] %v3407_v45   ;;  %v3412_v55 = vpack.c.bf16 %v2470_v41, %v2469_v37  ;;  %v2410_v53 = vadd.f32 %v4631_v26, %v2339_v6  ;;  %v2342_v28 = vmul.f32 %v4624_v52, %v2271_v40  ;;  %v2472_v57 = vmax.f32 %v2408_v51, 0.0  ;;  %v2285_v6 = vld [vmem:[#allocation2 + $0x160] sm:$0xff] }
 0x271   : > { %v2411_v19 = vadd.f32 %v4631_v26, %v2340_v43  ;;  %v2412_v61 = vadd.f32 %v4631_v26, %v2341_v30  ;;  %v2343_v11 = vmul.f32 %v4624_v52, %v2272_v12  ;;  %v2473_v0 = vmax.f32 %v2409_v47, 0.0  ;;  %v2286_v12 = vld [vmem:[#allocation2 + $0x168] sm:$0xff] }
 0x272   : > { %3524 = vst [vmem:[%s4874_s4 + $0x58] sm:$0xff] %v3412_v55   ;;  %v2474_v18 = vmax.f32 %v2410_v53, 0.0  ;;  %v2413_v60 = vadd.f32 %v4631_v26, %v2342_v28  ;;  %v2344_v50 = vmul.f32 %v4624_v52, %v2273_v49  ;;  %v3417_v62 = vpack.c.bf16 %v2472_v57, %v2471_v48  ;;  %v2287_v49 = vld [vmem:[#allocation2 + $0x170] sm:$0xff]  ;;  %v2288_v57 = vld [vmem:[#allocation2 + $0x178] sm:$0xff] }
 0x273   : > { %v2475_v4 = vmax.f32 %v2411_v19, 0.0  ;;  %v2476_v15 = vmax.f32 %v2412_v61, 0.0  ;;  %v2414_v5 = vadd.f32 %v4631_v26, %v2343_v11  ;;  %v2345_v22 = vmul.f32 %v4624_v52, %v2274_v10 }
 0x274   : > { %v3422_v54 = vpack.c.bf16 %v2474_v18, %v2473_v0  ;;  %v2477_v17 = vmax.f32 %v2413_v60, 0.0  ;;  %v2415_v16 = vadd.f32 %v4631_v26, %v2344_v50  ;;  %3525 = vst [vmem:[%s4874_s4 + $0x60] sm:$0xff] %v3417_v62   ;;  %v2346_v21 = vmul.f32 %v4624_v52, %v2275_v23  ;;  %v2289_v0 = vld [vmem:[#allocation2 + $0x180] sm:$0xff] }
 0x275   : > { %v3427_v46 = vpack.c.bf16 %v2476_v15, %v2475_v4  ;;  %v2478_v20 = vmax.f32 %v2414_v5, 0.0  ;;  %v2347_v44 = vmul.f32 %v4624_v52, %v2276_v42  ;;  %v2416_v35 = vadd.f32 %v4631_v26, %v2345_v22  ;;  %v2290_v5 = vld [vmem:[#allocation2 + $0x188] sm:$0xff]  ;;  %v2291_v22 = vld [vmem:[#allocation2 + $0x190] sm:$0xff] }
 0x276   : > { %3526 = vst [vmem:[%s4874_s4 + $0x68] sm:$0xff] %v3422_v54   ;;  %v2479_v25 = vmax.f32 %v2415_v16, 0.0  ;;  %v2348_v27 = vmul.f32 %v4624_v52, %v2277_v8  ;;  %v2349_v3 = vmul.f32 %v4624_v52, %v2278_v9  ;;  %v2417_v56 = vadd.f32 %v4631_v26, %v2346_v21  ;;  %v2292_v16 = vld [vmem:[#allocation2 + $0x198] sm:$0xff] }
 0x277   : > { %3527 = vst [vmem:[%s4874_s4 + $0x70] sm:$0xff] %v3427_v46   ;;  %v3432_v29 = vpack.c.bf16 %v2478_v20, %v2477_v17  ;;  %v2418_v59 = vadd.f32 %v4631_v26, %v2347_v44  ;;  %v2350_v39 = vmul.f32 %v4624_v52, %v2279_v14  ;;  %v2480_v2 = vmax.f32 %v2416_v35, 0.0  ;;  %v2293_v44 = vld [vmem:[#allocation2 + $0x1a0] sm:$0xff] }
 0x278   : > { %v2419_v58 = vadd.f32 %v4631_v26, %v2348_v27  ;;  %v2420_v32 = vadd.f32 %v4631_v26, %v2349_v3  ;;  %v2351_v31 = vmul.f32 %v4624_v52, %v2280_v24  ;;  %v2481_v7 = vmax.f32 %v2417_v56, 0.0  ;;  %v2294_v24 = vld [vmem:[#allocation2 + $0x1a8] sm:$0xff] }
 0x279   : > { %3528 = vst [vmem:[%s4874_s4 + $0x78] sm:$0xff] %v3432_v29   ;;  %v2482_v33 = vmax.f32 %v2418_v59, 0.0  ;;  %v2421_v36 = vadd.f32 %v4631_v26, %v2350_v39  ;;  %v2352_v37 = vmul.f32 %v4624_v52, %v2281_v1  ;;  %v3437_v40 = vpack.c.bf16 %v2480_v2, %v2479_v25  ;;  %v2295_v1 = vld [vmem:[#allocation2 + $0x1b0] sm:$0xff]  ;;  %v2296_v2 = vld [vmem:[#allocation2 + $0x1b8] sm:$0xff] }
 0x27a   : > { %v2483_v45 = vmax.f32 %v2419_v58, 0.0  ;;  %v2484_v41 = vmax.f32 %v2420_v32, 0.0  ;;  %v2422_v38 = vadd.f32 %v4631_v26, %v2351_v31  ;;  %v2353_v43 = vmul.f32 %v4624_v52, %v2282_v34 }
 0x27b   : > { %v3442_v51 = vpack.c.bf16 %v2482_v33, %v2481_v7  ;;  %v2485_v48 = vmax.f32 %v2421_v36, 0.0  ;;  %v2423_v30 = vadd.f32 %v4631_v26, %v2352_v37  ;;  %3529 = vst [vmem:[%s4874_s4 + $0x80] sm:$0xff] %v3437_v40   ;;  %v2354_v53 = vmul.f32 %v4624_v52, %v2283_v63  ;;  %v2297_v7 = vld [vmem:[#allocation2 + $0x1c0] sm:$0xff] }
 0x27c   : > { %v3447_v55 = vpack.c.bf16 %v2484_v41, %v2483_v45  ;;  %v2486_v47 = vmax.f32 %v2422_v38, 0.0  ;;  %v2355_v28 = vmul.f32 %v4624_v52, %v2284_v13  ;;  %v2424_v19 = vadd.f32 %v4631_v26, %v2353_v43  ;;  %v2298_v38 = vld [vmem:[#allocation2 + $0x1c8] sm:$0xff]  ;;  %v2299_v43 = vld [vmem:[#allocation2 + $0x1d0] sm:$0xff] }
 0x27d   : > { %3530 = vst [vmem:[%s4874_s4 + $0x88] sm:$0xff] %v3442_v51   ;;  %v2487_v61 = vmax.f32 %v2423_v30, 0.0  ;;  %v2356_v11 = vmul.f32 %v4624_v52, %v2285_v6  ;;  %v2357_v10 = vmul.f32 %v4624_v52, %v2286_v12  ;;  %v2425_v60 = vadd.f32 %v4631_v26, %v2354_v53  ;;  %v2300_v30 = vld [vmem:[#allocation2 + $0x1d8] sm:$0xff] }
 0x27e   : > { %3531 = vst [vmem:[%s4874_s4 + $0x90] sm:$0xff] %v3447_v55   ;;  %v3452_v18 = vpack.c.bf16 %v2486_v47, %v2485_v48  ;;  %v2426_v50 = vadd.f32 %v4631_v26, %v2355_v28  ;;  %v2358_v23 = vmul.f32 %v4624_v52, %v2287_v49  ;;  %v2488_v42 = vmax.f32 %v2424_v19, 0.0  ;;  %v2301_v28 = vld [vmem:[#allocation2 + $0x1e0] sm:$0xff] }
 0x27f   : > { %v2427_v62 = vadd.f32 %v4631_v26, %v2356_v11  ;;  %v2428_v4 = vadd.f32 %v4631_v26, %v2357_v10  ;;  %v2359_v15 = vmul.f32 %v4624_v52, %v2288_v57  ;;  %v2489_v8 = vmax.f32 %v2425_v60, 0.0  ;;  %v2302_v57 = vld [vmem:[#allocation2 + $0x1e8] sm:$0xff] }
 0x280   : > { %3532 = vst [vmem:[%s4874_s4 + $0x98] sm:$0xff] %v3452_v18   ;;  %v2490_v9 = vmax.f32 %v2426_v50, 0.0  ;;  %v2429_v54 = vadd.f32 %v4631_v26, %v2358_v23  ;;  %v2360_v17 = vmul.f32 %v4624_v52, %v2289_v0  ;;  %v3457_v14 = vpack.c.bf16 %v2488_v42, %v2487_v61  ;;  %v2303_v0 = vld [vmem:[#allocation2 + $0x1f0] sm:$0xff]  ;;  %v2304_v42 = vld [vmem:[#allocation2 + $0x1f8] sm:$0xff] }
 0x281   : > { %v2491_v46 = vmax.f32 %v2427_v62, 0.0  ;;  %v2492_v20 = vmax.f32 %v2428_v4, 0.0  ;;  %v2430_v21 = vadd.f32 %v4631_v26, %v2359_v15  ;;  %v2361_v27 = vmul.f32 %v4624_v52, %v2290_v5 }
 0x282   : > { %v3462_v35 = vpack.c.bf16 %v2490_v9, %v2489_v8  ;;  %v2493_v25 = vmax.f32 %v2429_v54, 0.0  ;;  %v2431_v3 = vadd.f32 %v4631_v26, %v2360_v17  ;;  %3533 = vst [vmem:[%s4874_s4 + $0xa0] sm:$0xff] %v3457_v14   ;;  %v2362_v59 = vmul.f32 %v4624_v52, %v2291_v22 }
 0x283   : > { %v3467_v29 = vpack.c.bf16 %v2492_v20, %v2491_v46  ;;  %v2494_v56 = vmax.f32 %v2430_v21, 0.0  ;;  %v2363_v39 = vmul.f32 %v4624_v52, %v2292_v16  ;;  %v2432_v58 = vadd.f32 %v4631_v26, %v2361_v27 }
 0x284   : > { %3534 = vst [vmem:[%s4874_s4 + $0xa8] sm:$0xff] %v3462_v35   ;;  %v2495_v32 = vmax.f32 %v2431_v3, 0.0  ;;  %v2364_v31 = vmul.f32 %v4624_v52, %v2293_v44  ;;  %v2365_v34 = vmul.f32 %v4624_v52, %v2294_v24  ;;  %v2433_v36 = vadd.f32 %v4631_v26, %v2362_v59 }
 0x285   : > { %3535 = vst [vmem:[%s4874_s4 + $0xb0] sm:$0xff] %v3467_v29   ;;  %v3472_v33 = vpack.c.bf16 %v2494_v56, %v2493_v25  ;;  %v2434_v37 = vadd.f32 %v4631_v26, %v2363_v39  ;;  %v2366_v63 = vmul.f32 %v4624_v52, %v2295_v1  ;;  %v2496_v13 = vmax.f32 %v2432_v58, 0.0 }
 0x286   : > { %v2435_v40 = vadd.f32 %v4631_v26, %v2364_v31  ;;  %v2436_v45 = vadd.f32 %v4631_v26, %v2365_v34  ;;  %v2367_v41 = vmul.f32 %v4624_v52, %v2296_v2  ;;  %v2497_v6 = vmax.f32 %v2433_v36, 0.0 }
 0x287   : > { %3536 = vst [vmem:[%s4874_s4 + $0xb8] sm:$0xff] %v3472_v33   ;;  %v2498_v12 = vmax.f32 %v2434_v37, 0.0  ;;  %v2437_v51 = vadd.f32 %v4631_v26, %v2366_v63  ;;  %v2368_v48 = vmul.f32 %v4624_v52, %v2297_v7  ;;  %v3477_v49 = vpack.c.bf16 %v2496_v13, %v2495_v32 }
 0x288   : > { %v2499_v55 = vmax.f32 %v2435_v40, 0.0  ;;  %v2500_v47 = vmax.f32 %v2436_v45, 0.0  ;;  %v2438_v53 = vadd.f32 %v4631_v26, %v2367_v41  ;;  %v2369_v11 = vmul.f32 %v4624_v52, %v2298_v38 }
 0x289   : > { %v3482_v19 = vpack.c.bf16 %v2498_v12, %v2497_v6  ;;  %v2501_v61 = vmax.f32 %v2437_v51, 0.0  ;;  %v2439_v10 = vadd.f32 %v4631_v26, %v2368_v48  ;;  %3537 = vst [vmem:[%s4874_s4 + $0xc0] sm:$0xff] %v3477_v49   ;;  %v2370_v50 = vmul.f32 %v4624_v52, %v2299_v43 }
 0x28a   : > { %v3487_v18 = vpack.c.bf16 %v2500_v47, %v2499_v55  ;;  %v2502_v60 = vmax.f32 %v2438_v53, 0.0  ;;  %v2371_v23 = vmul.f32 %v4624_v52, %v2300_v30  ;;  %v2440_v62 = vadd.f32 %v4631_v26, %v2369_v11 }
 0x28b   : > { %3538 = vst [vmem:[%s4874_s4 + $0xc8] sm:$0xff] %v3482_v19   ;;  %v2503_v4 = vmax.f32 %v2439_v10, 0.0  ;;  %v2372_v15 = vmul.f32 %v4624_v52, %v2301_v28  ;;  %v2373_v5 = vmul.f32 %v4624_v52, %v2302_v57  ;;  %v2441_v9 = vadd.f32 %v4631_v26, %v2370_v50 }
 0x28c   : > { %3539 = vst [vmem:[%s4874_s4 + $0xd0] sm:$0xff] %v3487_v18   ;;  %v3492_v8 = vpack.c.bf16 %v2502_v60, %v2501_v61  ;;  %v2442_v54 = vadd.f32 %v4631_v26, %v2371_v23  ;;  %v2374_v17 = vmul.f32 %v4624_v52, %v2303_v0  ;;  %v2504_v22 = vmax.f32 %v2440_v62, 0.0 }
 0x28d   : > { %v2443_v16 = vadd.f32 %v4631_v26, %v2372_v15  ;;  %v2444_v14 = vadd.f32 %v4631_v26, %v2373_v5  ;;  %v2375_v46 = vmul.f32 %v4624_v52, %v2304_v42  ;;  %v2505_v20 = vmax.f32 %v2441_v9, 0.0 }
 0x28e   : > { %3540 = vst [vmem:[%s4874_s4 + $0xd8] sm:$0xff] %v3492_v8   ;;  %v2506_v21 = vmax.f32 %v2442_v54, 0.0  ;;  %v2445_v44 = vadd.f32 %v4631_v26, %v2374_v17  ;;  %v3497_v24 = vpack.c.bf16 %v2504_v22, %v2503_v4 }
 0x28f   : > { %v2507_v35 = vmax.f32 %v2443_v16, 0.0  ;;  %v2508_v25 = vmax.f32 %v2444_v14, 0.0  ;;  %v2446_v27 = vadd.f32 %v4631_v26, %v2375_v46 }
 0x290   : > { %v3502_v3 = vpack.c.bf16 %v2506_v21, %v2505_v20  ;;  %v2509_v1 = vmax.f32 %v2445_v44, 0.0  ;;  %3541 = vst [vmem:[%s4874_s4 + $0xe0] sm:$0xff] %v3497_v24  }
 0x291   : > { %v3507_v52 = vpack.c.bf16 %v2508_v25, %v2507_v35  ;;  %v2510_v29 = vmax.f32 %v2446_v27, 0.0 }
 0x292   : > { %3542 = vst [vmem:[%s4874_s4 + $0xe8] sm:$0xff] %v3502_v3  }
 0x293   : > { %3543 = vst [vmem:[%s4874_s4 + $0xf0] sm:$0xff] %v3507_v52   ;;  %v3512_v56 = vpack.c.bf16 %v2510_v29, %v2509_v1 }
 0x295   : > { %3544 = vst [vmem:[%s4874_s4 + $0xf8] sm:$0xff] %v3512_v56  }
 0x296 PF: > { %s14_s19 = sadd.s32 1, %s3931_s19   ;;  %s4875_s15 = smov %s3919_s16 }
 0x297   : > { %p11_p11 = scmp.ge.s32.totalorder %s14_s19, 5   ;;  %s4876_s16 = smov %s3995_s23 }
 0x298   : > { %s4877_s17 = smov %s3927_s18  ;;  %s4878_s18 = smov %s4880_s20 }
 0x299   :  { %13 = sbr.rel (!%p11_p11) target bundleno = 3 (0x3), region = 121 }

// kernel: deeplabv3plus_forward.16
= control target key start
LH: loop header
LB: loop body
LE: loop exit
PB: predicated region body
PF: predicated region fallthrough
CT: control target
= control target key end

     0   :  { %s1134_s15 = smov 0   ;;  %s1136_s16 = smov 0   ;;  %s1247_s0 = inlined_call_operand.vmem [shape: bf16[32,1152], index: 0, kind: input, shape index: {}]   ;;  %s1248_s1 = inlined_call_operand.vmem [shape: bf16[1152,128], index: 1, kind: input, shape index: {}]   ;;  %s1249_s2 = inlined_call_operand.vmem [shape: f32[1,128], index: 2, kind: input, shape index: {}]   ;;  %s1250_s3 = inlined_call_operand.vmem [shape: f32[1,128], index: 3, kind: input, shape index: {}]   ;;  %s1251_s4 = inlined_call_operand.vmem [shape: bf16[32,128], index: 4, kind: output, shape index: {}]  }
   0x1   :  { %s1138_s17 = smov 0   ;;  %s1140_s18 = smov 0  }
   0x2   :  { %s1142_s19 = smov 0  }
   0x3 LB: > { %s26_s20 = sadd.s32 1, %s1102_s18  ;;  %p49_p1 = scmp.ne.s32.totalorder %s1094_s16, %s1090_s15  ;;  %s1106_s19 = sphi %s1142_s19, %s14_s19   ;;  %s1102_s18 = sphi %s1140_s18, %s1255_s18   ;;  %s1098_s17 = sphi %s1138_s17, %s1254_s17   ;;  %s1094_s16 = sphi %s1136_s16, %s1253_s16   ;;  %s1090_s15 = sphi %s1134_s15, %s1252_s15  }
   0x4   : > { %p27_p0 = scmp.ge.s32.totalorder %s26_s20, 3  ;;  %p50_p2 = scmp.eq.s32.totalorder %s1106_s19, 0 }
   0x5   : > { %s42_s22 = sadd.s32 1, %s1094_s16  ;;  %p865_p5 = scmp.ge.s32.totalorder %s1106_s19, 3 }
   0x6   : > { %s1257_s20 = smov (%p27_p0, %s26_s20), 0  ;;  %p51_p3 = por %p50_p2, %p49_p1 }
   0x7   : > { %s38_s21 = ssub.s32 %s1102_s18, %s1257_s20  ;;  %200 = sbr.rel (%p865_p5) target bundleno = 23 (0x17), region = 28 }
   0x8   : > { %p40_p4 = scmp.eq.s32.totalorder %s38_s21, 0 }
   0xa   : > { %s1169_s23 = scalar_select %p40_p4, %s1094_s16, %s42_s22  }
   0xe   : > { %203 = sbr.rel (!%p51_p3) target bundleno = 23 (0x17), region = 32  ;;  %s205_s24 = sand.u32 (%p51_p3), 1, %s1094_s16  }
   0xf   : > { %s919_s25 = smul.u32 (%p51_p3), 12, %s1102_s18 }
  0x10   : > { %s993_s26 = smul.u32 (%p51_p3), 48, %s205_s24 }
  0x11   : > { %s213_s29 = scalar_lea.vmem (%p51_p3), %s1247_s0, %s919_s25 }
  0x12   : > { %v228_v0 = vld [vmem:[%s213_s29] sm:$0xff] (%p51_p3)  ;;  %v232_v2 = vld [vmem:[%s213_s29 + $0x48] sm:$0xff] (%p51_p3)  ;;  %s207_s30 = scalar_lea.vmem (%p51_p3), [#allocation3], %s993_s26  ;;  %v871_v6 = vld [vmem:[%s213_s29 + $0x50] sm:$0xf] (%p51_p3) }
  0x13   : > { %v230_v1 = vld [vmem:[%s213_s29 + $0x24] sm:$0xff] (%p51_p3)  ;;  %229 = vst [vmem:[%s207_s30] sm:$0xff] (%p51_p3), %v228_v0  ;;  %233 = vst [vmem:[%s207_s30 + $0x18] sm:$0xff] (%p51_p3), %v232_v2  ;;  %v234_v3 = vld [vmem:[%s213_s29 + $0x6c] sm:$0xff] (%p51_p3) }
  0x14   : > { %231 = vst [vmem:[%s207_s30 + $0xc] sm:$0xff] (%p51_p3), %v230_v1  ;;  %v867_v4 = vld [vmem:[%s213_s29 + $0x8] sm:$0xf] (%p51_p3)  ;;  %v869_v5 = vld [vmem:[%s213_s29 + $0x2c] sm:$0xf] (%p51_p3)  ;;  %235 = vst [vmem:[%s207_s30 + $0x24] sm:$0xff] (%p51_p3), %v234_v3 }
  0x15   : > { %868 = vst [vmem:[%s207_s30 + $0x8] sm:$0xf] %v867_v4  ;;  %870 = vst [vmem:[%s207_s30 + $0x14] sm:$0xf] %v869_v5  ;;  %v873_v7 = vld [vmem:[%s213_s29 + $0x74] sm:$0xf] }
  0x16   : > { %872 = vst [vmem:[%s207_s30 + $0x20] sm:$0xf] %v871_v6  ;;  %874 = vst [vmem:[%s207_s30 + $0x2c] sm:$0xf] %v873_v7 }
  0x17 PF: > { %p875_p6 = scmp.ge.s32.totalorder %s1106_s19, 1  ;;  %p255_p7 = scmp.lt.s32.totalorder %s1106_s19, 4 }
  0x19   : > { %p256_p8 = pnand %p875_p6, %p255_p7 }
  0x1a   : > { %s262_s5 = sand.u32 (!%p256_p8), 1, %s1090_s15   ;;  %p876_p9 = scmp.ne.s32.totalorder (!%p256_p8), %s1098_s17, 0 }
  0x1b   : > { %259 = sbr.rel (%p256_p8) target bundleno = 325 (0x145), region = 58 }
  0x1c   : > { %s994_s6 = smul.u32 (!%p256_p8), 48, %s262_s5 }
  0x1e   : > { %s1180_s7 = scalar_lea.vmem (!%p256_p8), [#allocation3], %s994_s6 }
  0x22   : > { %325 = sbr.rel (%p876_p9) target bundleno = 41 (0x29), region = 66  ;;  %v1108_v8 = vmov (!%p876_p9), 0.0  }
  0x23   : > { %326 = vst [vmem:[#allocation2] sm:$0xff] (!%p876_p9), %v1108_v8  ;;  %327 = vst [vmem:[#allocation2 + $0x8] sm:$0xff] (!%p876_p9), %v1108_v8 }
  0x24   : > { %328 = vst [vmem:[#allocation2 + $0x10] sm:$0xff] (!%p876_p9), %v1108_v8  ;;  %329 = vst [vmem:[#allocation2 + $0x18] sm:$0xff] (!%p876_p9), %v1108_v8 }
  0x29 PF: > { %s330_s8 = smul.u32 384, %s1098_s17  ;;  %v1062_v9 = vld [vmem:[%s1180_s7 + $0x4] ss:$12 sps:$4 sm:$0xff]   ;;  %v1063_v10 = vld [vmem:[%s1180_s7 + $0x8] ss:$12 sps:$4 sm:$0xff]   ;;  %p908_p10 = scmp.ne.s32.totalorder %s1098_s17, 2 }
  0x2a   : > { %603 = vmatprep.mubr.bf16.mxu0 %v1062_v9  ;;  %989 = vmatprep.mubr.bf16.mxu1 %v1063_v10  ;;  %v1060_v35 = vld [vmem:[%s1180_s7] ss:$12 sps:$4 sm:$0xff]   ;;  %v1065_v36 = vld [vmem:[%s1180_s7 + $0x1c] ss:$12 sps:$4 sm:$0xff]   ;;  %v1067_v38 = vld [vmem:[%s1180_s7 + $0x18] ss:$12 sps:$4 sm:$0xff]  }
  0x2b   : > { %s343_s9 = sshra.s32 %s330_s8, 3  ;;  %v1064_v37 = vld [vmem:[%s1180_s7 + $0x20] ss:$12 sps:$4 sm:$0xff]  }
  0x2c   : > { %s877_s10 = sshll.u32 %s343_s9, 2  ;;  %v331_v45 = vld [vmem:[#allocation2] sm:$0xff]  ;;  %v332_v50 = vld [vmem:[#allocation2 + $0x8] sm:$0xff]  ;;  %v333_v59 = vld [vmem:[#allocation2 + $0x10] sm:$0xff] }
  0x2d   : > { %s1189_s13 = scalar_lea.vmem %s1248_s1, %s877_s10  ;;  %v334_v63 = vld [vmem:[#allocation2 + $0x18] sm:$0xff]  ;;  %v909_v5 = vld [vmem:[%s1249_s2] ss:$0 sm:$0xff] (!%p908_p10) }
  0x2e   : > { %v1036_v11 = vld [vmem:[%s1189_s13 + $0x40] sm:$0xff]   ;;  %v1039_v14 = vld [vmem:[%s1189_s13 + $0x48] sm:$0xff]   ;;  %v1042_v17 = vld [vmem:[%s1189_s13 + $0x50] sm:$0xff]  }
  0x2f   : > { %v1037_v12 = vld [vmem:[%s1189_s13] sm:$0xff]   ;;  %935 = vmatprep.subr.bf16.mxu0 %v1036_v11  ;;  %v1040_v15 = vld [vmem:[%s1189_s13 + $0x8] sm:$0xff]   ;;  %v1043_v18 = vld [vmem:[%s1189_s13 + $0x10] sm:$0xff]  }
  0x30   : > { %v1038_v13 = vld [vmem:[%s1189_s13 + $0x80] sm:$0xff]   ;;  %936 = vmatpush3.bf16.msra.mxu0 %v1037_v12  ;;  %v1041_v16 = vld [vmem:[%s1189_s13 + $0x88] sm:$0xff]   ;;  %v1044_v19 = vld [vmem:[%s1189_s13 + $0x90] sm:$0xff]  }
  0x31   : > { %973 = vmatprep.subr.bf16.mxu1 %v1038_v13  ;;  %937 = vmatprep.subr.bf16.mxu0 %v1039_v14  ;;  %v1045_v20 = vld [vmem:[%s1189_s13 + $0x58] sm:$0xff]   ;;  %v1048_v23 = vld [vmem:[%s1189_s13 + $0x60] sm:$0xff]   ;;  %v1051_v26 = vld [vmem:[%s1189_s13 + $0x68] sm:$0xff]  }
  0x32   : > { %974 = vmatpush3.bf16.msra.mxu1 %v1038_v13  ;;  %v1046_v21 = vld [vmem:[%s1189_s13 + $0x18] sm:$0xff]   ;;  %v1050_v24 = vld [vmem:[%s1189_s13 + $0xa0] sm:$0xff]   ;;  %v1053_v27 = vld [vmem:[%s1189_s13 + $0xa8] sm:$0xff]  }
  0x33   : > { %975 = vmatprep.subr.bf16.mxu1 %v1041_v16  ;;  %v1047_v22 = vld [vmem:[%s1189_s13 + $0x98] sm:$0xff]   ;;  %v1049_v25 = vld [vmem:[%s1189_s13 + $0x20] sm:$0xff]   ;;  %v1052_v28 = vld [vmem:[%s1189_s13 + $0x28] sm:$0xff]  }
  0x34   : > { %938 = vmatpush3.bf16.msra.mxu0 %v1040_v15  ;;  %v1054_v29 = vld [vmem:[%s1189_s13 + $0x70] sm:$0xff]   ;;  %v1057_v32 = vld [vmem:[%s1189_s13 + $0x78] sm:$0xff]   ;;  %v910_v8 = vld [vmem:[%s1250_s3] ss:$0 sm:$0xff] (!%p908_p10) }
  0x35   : > { %939 = vmatprep.subr.bf16.mxu0 %v1042_v17  ;;  %v1056_v30 = vld [vmem:[%s1189_s13 + $0xb0] sm:$0xff]   ;;  %v1059_v33 = vld [vmem:[%s1189_s13 + $0xb8] sm:$0xff]  }
  0x36   : > { %976 = vmatpush3.bf16.msra.mxu1 %v1041_v16  ;;  %v1055_v31 = vld [vmem:[%s1189_s13 + $0x30] sm:$0xff]   ;;  %v1058_v34 = vld [vmem:[%s1189_s13 + $0x38] sm:$0xff]  }
  0x37   : > { %977 = vmatprep.subr.bf16.mxu1 %v1044_v19 }
  0x38   : > { %940 = vmatpush3.bf16.msra.mxu0 %v1043_v18 }
  0x39   : > { %941 = vmatprep.subr.bf16.mxu0 %v1045_v20 }
  0x3a   : > { %978 = vmatpush3.bf16.msra.mxu1 %v1044_v19 }
  0x3b   : > { %979 = vmatprep.subr.bf16.mxu1 %v1047_v22 }
  0x3c   : > { %942 = vmatpush3.bf16.msra.mxu0 %v1046_v21 }
  0x3d   : > { %943 = vmatprep.subr.bf16.mxu0 %v1048_v23 }
  0x3e   : > { %980 = vmatpush3.bf16.msra.mxu1 %v1047_v22 }
  0x3f   : > { %981 = vmatprep.subr.bf16.mxu1 %v1050_v24 }
  0x40   : > { %944 = vmatpush3.bf16.msra.mxu0 %v1049_v25 }
  0x41   : > { %945 = vmatprep.subr.bf16.mxu0 %v1051_v26 }
  0x42   : > { %982 = vmatpush3.bf16.msra.mxu1 %v1050_v24 }
  0x43   : > { %983 = vmatprep.subr.bf16.mxu1 %v1053_v27 }
  0x44   : > { %946 = vmatpush3.bf16.msra.mxu0 %v1052_v28 }
  0x45   : > { %947 = vmatprep.subr.bf16.mxu0 %v1054_v29 }
  0x46   : > { %984 = vmatpush3.bf16.msra.mxu1 %v1053_v27 }
  0x47   : > { %985 = vmatprep.subr.bf16.mxu1 %v1056_v30 }
  0x48   : > { %948 = vmatpush3.bf16.msra.mxu0 %v1055_v31 }
  0x49   : > { %949 = vmatprep.subr.bf16.mxu0 %v1057_v32 }
  0x4a   : > { %986 = vmatpush3.bf16.msra.mxu1 %v1056_v30 }
  0x4b   : > { %987 = vmatprep.subr.bf16.mxu1 %v1059_v33 }
  0x4c   : > { %950 = vmatpush3.bf16.msra.mxu0 %v1058_v34 }
  0x4e   : > { %988 = vmatpush3.bf16.msra.mxu1 %v1059_v33 }
  0x4f   : > { %604 = vmatmul.mubr.bf16.vlgmr.msra.gmra.mrb[0].mxu0 %v1060_v35 }
  0x50   : > { %611 = vmatprep.mubr.bf16.mxu0 %v1065_v36 }
  0x51   : > { %990 = vmatmul.mubr.bf16.vlgmr.msra.gmra.mrb[0].mxu1 %v1064_v37 }
  0x57   : > { %612 = vmatmul.mubr.bf16.gmra.mrb[4].mxu0 %v1067_v38 }
 0x122   : > { %v951_v39 = vpop.f32.mrb[0].mxu0 }
 0x123   : > { %v952_v40 = vpop.f32.mrb[1].mxu0 }
 0x124   : > { %v953_v41 = vadd.f32 %v952_v40, %v951_v39  ;;  %v954_v42 = vpop.f32.mrb[2].mxu0  ;;  %v991_v43 = vpop.f32.mrb[0].mxu1 }
 0x125   : > { %v955_v44 = vpop.f32.mrb[3].mxu0  ;;  %v654_v46 = vpop.f32.mrb[1].mxu1 }
 0x126   : > { %v956_v47 = vadd.f32 %v955_v44, %v954_v42  ;;  %v655_v48 = vadd.f32 %v953_v41, %v654_v46  ;;  %v992_v49 = vpop.f32.mrb[2].mxu1 }
 0x127   : > { %v657_v51 = vpop.f32.mrb[3].mxu1 }
 0x128   : > { %v669_v52 = vadd.f32 %v655_v48, %v331_v45  ;;  %v658_v53 = vadd.f32 %v956_v47, %v657_v51 }
 0x12a   : > { %673 = vst [vmem:[#allocation2] sm:$0xff] %v669_v52  ;;  %v670_v54 = vadd.f32 %v658_v53, %v332_v50  ;;  %v957_v55 = vpop.f32.mrb[4].mxu0 }
 0x12b   : > { %v958_v56 = vpop.f32.mrb[5].mxu0 }
 0x12c   : > { %674 = vst [vmem:[#allocation2 + $0x8] sm:$0xff] %v670_v54  ;;  %v959_v57 = vadd.f32 %v958_v56, %v957_v55  ;;  %v960_v58 = vpop.f32.mrb[6].mxu0 }
 0x12d   : > { %v961_v60 = vpop.f32.mrb[7].mxu0 }
 0x12e   : > { %v663_v61 = vadd.f32 %v991_v43, %v959_v57  ;;  %v962_v62 = vadd.f32 %v961_v60, %v960_v58  ;;  %680 = sbr.rel (%p908_p10) target bundleno = 325 (0x145), region = 70 }
 0x130   : > { %v671_v0 = vadd.f32 %v663_v61, %v333_v59  ;;  %v666_v1 = vadd.f32 %v992_v49, %v962_v62 }
 0x131   : > { %v681_v3 = vld [vmem:[#allocation2] sm:$0xff] (!%p908_p10) }
 0x132   : > { %675 = vst [vmem:[#allocation2 + $0x10] sm:$0xff] %v671_v0  ;;  %v672_v2 = vadd.f32 %v666_v1, %v334_v63  ;;  %v692_v6 = vmul.f32 (!%p908_p10), %v909_v5, %v681_v3 }
 0x133   : > { %v682_v4 = vld [vmem:[#allocation2 + $0x8] sm:$0xff] (!%p908_p10) }
 0x134   : > { %676 = vst [vmem:[#allocation2 + $0x18] sm:$0xff] %v672_v2  ;;  %v693_v7 = vmul.f32 (!%p908_p10), %v909_v5, %v682_v4  ;;  %v703_v13 = vadd.f32 (!%p908_p10), %v910_v8, %v692_v6 }
 0x136   : > { %v704_v14 = vadd.f32 %v910_v8, %v693_v7  ;;  %v707_v17 = vmax.f32 %v703_v13, 0.0 }
 0x138   : > { %v708_v18 = vmax.f32 %v704_v14, 0.0 }
 0x139   : > { %v683_v9 = vld [vmem:[#allocation2 + $0x10] sm:$0xff] }
 0x13a   : > { %v694_v11 = vmul.f32 %v909_v5, %v683_v9  ;;  %v927_v21 = vpack.c.bf16 %v708_v18, %v707_v17 }
 0x13b   : > { %v684_v10 = vld [vmem:[#allocation2 + $0x18] sm:$0xff] }
 0x13c   : > { %v695_v12 = vmul.f32 %v909_v5, %v684_v10  ;;  %v705_v15 = vadd.f32 %v910_v8, %v694_v11  ;;  %928 = vst [vmem:[%s1251_s4] sm:$0xff] %v927_v21  }
 0x13e   : > { %v706_v16 = vadd.f32 %v910_v8, %v695_v12  ;;  %v709_v19 = vmax.f32 %v705_v15, 0.0 }
 0x140   : > { %v710_v20 = vmax.f32 %v706_v16, 0.0 }
 0x142   : > { %v932_v22 = vpack.c.bf16 %v710_v20, %v709_v19 }
 0x144   : > { %934 = vst [vmem:[%s1251_s4 + $0x8] sm:$0xff] %v932_v22  }
 0x145 PF: > { %s14_s19 = sadd.s32 1, %s1106_s19   ;;  %s1252_s15 = smov %s1094_s16 }
 0x146   : > { %p11_p11 = scmp.ge.s32.totalorder %s14_s19, 5   ;;  %s1253_s16 = smov %s1169_s23 }
 0x147   : > { %s1254_s17 = smov %s1102_s18  ;;  %s1255_s18 = smov %s1257_s20 }
 0x148   :  { %13 = sbr.rel (!%p11_p11) target bundleno = 3 (0x3), region = 121 }

// kernel: deeplabv3plus_forward.17
= control target key start
LH: loop header
LB: loop body
LE: loop exit
PB: predicated region body
PF: predicated region fallthrough
CT: control target
= control target key end

     0   :  { %s2415_s0 = inlined_call_operand.vmem [shape: bf16[16,1152], index: 0, kind: input, shape index: {}]   ;;  %s2416_s1 = inlined_call_operand.vmem [shape: bf16[1152,512], index: 1, kind: input, shape index: {}]   ;;  %s2417_s2 = inlined_call_operand.vmem [shape: f32[1,512], index: 2, kind: input, shape index: {}]   ;;  %s2418_s3 = inlined_call_operand.vmem [shape: f32[1,512], index: 3, kind: input, shape index: {}]   ;;  %s2419_s4 = inlined_call_operand.vmem [shape: bf16[16,512], index: 4, kind: output, shape index: {}]  }
   0x1   :  { %2420 = sst [smem:[#allocation6_spill]] %s2415_s0 }
   0x2   :  { %s1910_s15 = smov 0   ;;  %s1912_s16 = smov 0  }
   0x3   :  { %s1914_s17 = smov 0   ;;  %s1916_s18 = smov 0  }
   0x4   :  { %s1918_s19 = smov 0   ;;  %s1920_s20 = smov 0  }
   0x5   :  { %s1922_s21 = smov 0   ;;  %s1924_s22 = smov 0  }
   0x6   :  { %s1926_s23 = smov 0  }
   0x7 LB: > { %s1570_s24 = sadd.s32 4294967295, %s1881_s23   ;;  %s26_s25 = sadd.s32 1, %s1873_s21  ;;  %s1881_s23 = sphi %s1926_s23, %s14_s23   ;;  %s1877_s22 = sphi %s1924_s22, %s2431_s22   ;;  %s1873_s21 = sphi %s1922_s21, %s2430_s21   ;;  %s1869_s20 = sphi %s1920_s20, %s2429_s20   ;;  %s1865_s19 = sphi %s1918_s19, %s2428_s19   ;;  %s1861_s18 = sphi %s1916_s18, %s2427_s18   ;;  %s1857_s17 = sphi %s1914_s17, %s2426_s17   ;;  %s1853_s16 = sphi %s1912_s16, %s2425_s16   ;;  %s1849_s15 = sphi %s1910_s15, %s2424_s15  }
   0x8   : > { %p27_p0 = scmp.ge.s32.totalorder %s26_s25, 3  ;;  %s33_s26 = sadd.s32 1, %s1877_s22 }
   0x9   : > { %s42_s27 = sadd.s32 1, %s1861_s18  ;;  %p49_p1 = scmp.ne.s32.totalorder %s1861_s18, %s1857_s17 }
   0xa   : > { %s2433_s25 = smov (%p27_p0, %s26_s25), 0  ;;  %s2435_s26 = smov (!%p27_p0, %s33_s26), %s1877_s22 }
   0xb   : > { %s38_s28 = ssub.s32 %s1873_s21, %s2433_s25  ;;  %p50_p2 = scmp.eq.s32.totalorder %s1881_s23, 0 }
   0xc   : > { %p35_p3 = scmp.ge.s32.totalorder %s2435_s26, 2  ;;  %p40_p4 = scmp.eq.s32.totalorder %s38_s28, 0 }
   0xd   : > { %p51_p5 = por %p50_p2, %p49_p1  ;;  %s68_s29 = sadd.s32 1, %s1853_s16 }
   0xe   : > { %s2437_s26 = smov (%p35_p3, %s2435_s26), 0  ;;  %p75_p6 = scmp.ne.s32.totalorder %s1853_s16, %s1849_s15 }
   0xf   : > { %s1971_s30 = scalar_select %p40_p4, %s1861_s18, %s42_s27  }
  0x10   : > { %s65_s5 = ssub.s32 %s1877_s22, %s2437_s26  ;;  %p159_p8 = scmp.eq.s32.totalorder %s1570_s24, 5 }
  0x11   : > { %p66_p7 = scmp.eq.s32.totalorder %s65_s5, 0  ;;  %p1977_p9 = por %p75_p6, %p50_p2 }
  0x12   : > { %p1984_p10 = por %p159_p8, %p75_p6  ;;  %p1573_p11 = scmp.ge.s32.totalorder %s1881_s23, 6 }
  0x13   : > { %s1982_s7 = scalar_select %p66_p7, %s1853_s16, %s68_s29  }
  0x14   : > { %181 = sbr.rel (%p1573_p11) target bundleno = 114 (0x72), region = 16 }
  0x1b   : > { %184 = sbr.rel (!%p51_p5) target bundleno = 38 (0x26), region = 20  ;;  %s186_s9 = sand.u32 (%p51_p5), 1, %s1861_s18  }
  0x1c   : > { %s1647_s10 = smul.u32 (%p51_p5), 12, %s1873_s21  ;;  %s2423_s0 = sld [smem:[#allocation6_spill]] (%p51_p5) }
  0x1d   : > { %s1657_s11 = smul.u32 (%p51_p5), 24, %s186_s9 }
  0x1f   : > { %s188_s24 = scalar_lea.vmem (%p51_p5), [#allocation3], %s1657_s11 }
  0x22   : > { %s194_s14 = scalar_lea.vmem %s2423_s0, %s1647_s10 }
  0x23   : > { %v209_v0 = vld [vmem:[%s194_s14] sm:$0xff]  ;;  %v1575_v2 = vld [vmem:[%s194_s14 + $0x8] sm:$0xf]  ;;  %v1577_v3 = vld [vmem:[%s194_s14 + $0x2c] sm:$0xf] }
  0x24   : > { %v211_v1 = vld [vmem:[%s194_s14 + $0x24] sm:$0xff]  ;;  %210 = vst [vmem:[%s188_s24] sm:$0xff] %v209_v0  ;;  %1576 = vst [vmem:[%s188_s24 + $0x8] sm:$0xf] %v1575_v2 }
  0x25   : > { %212 = vst [vmem:[%s188_s24 + $0xc] sm:$0xff] %v211_v1  ;;  %1578 = vst [vmem:[%s188_s24 + $0x14] sm:$0xf] %v1577_v3 }
  0x26 PF: > { %229 = sbr.rel (!%p1977_p9) target bundleno = 114 (0x72), region = 46  ;;  %s231_s27 = sand.u32 (%p1977_p9), 1, %s1853_s16  }
  0x27   : > { %s1648_s28 = sshll.u32 (%p1977_p9), %s1877_s22, 3  ;;  %s1658_s29 = smul.u32 (%p1977_p9), 1152, %s231_s27 }
  0x28   : > { %s2001_s10 = scalar_lea.vmem (%p1977_p9), %s2416_s1, %s1648_s28 }
  0x29   : > { %v550_v4 = vld [vmem:[%s2001_s10] sm:$0xff] (%p1977_p9)  ;;  %v552_v5 = vld [vmem:[%s2001_s10 + $0x10] sm:$0xff] (%p1977_p9)  ;;  %s2009_s6 = scalar_lea.vmem (%p1977_p9), [#allocation4], %s1658_s29 }
  0x2a   : > { %v554_v6 = vld [vmem:[%s2001_s10 + $0x20] sm:$0xff] (%p1977_p9)  ;;  %v556_v7 = vld [vmem:[%s2001_s10 + $0x30] sm:$0xff] (%p1977_p9)  ;;  %551 = vst [vmem:[%s2009_s6] sm:$0xff] (%p1977_p9), %v550_v4  ;;  %553 = vst [vmem:[%s2009_s6 + $0x8] sm:$0xff] (%p1977_p9), %v552_v5 }
  0x2b   : > { %v558_v8 = vld [vmem:[%s2001_s10 + $0x40] sm:$0xff] (%p1977_p9)  ;;  %v560_v9 = vld [vmem:[%s2001_s10 + $0x50] sm:$0xff] (%p1977_p9)  ;;  %555 = vst [vmem:[%s2009_s6 + $0x10] sm:$0xff] (%p1977_p9), %v554_v6  ;;  %557 = vst [vmem:[%s2009_s6 + $0x18] sm:$0xff] (%p1977_p9), %v556_v7 }
  0x2c   : > { %559 = vst [vmem:[%s2009_s6 + $0x20] sm:$0xff] (%p1977_p9), %v558_v8  ;;  %561 = vst [vmem:[%s2009_s6 + $0x28] sm:$0xff] (%p1977_p9), %v560_v9  ;;  %v562_v10 = vld [vmem:[%s2001_s10 + $0x60] sm:$0xff] (%p1977_p9)  ;;  %v564_v11 = vld [vmem:[%s2001_s10 + $0x70] sm:$0xff] (%p1977_p9) }
  0x2d   : > { %v566_v12 = vld [vmem:[%s2001_s10 + $0x80] sm:$0xff]  ;;  %563 = vst [vmem:[%s2009_s6 + $0x30] sm:$0xff] %v562_v10  ;;  %565 = vst [vmem:[%s2009_s6 + $0x38] sm:$0xff] %v564_v11  ;;  %v568_v13 = vld [vmem:[%s2001_s10 + $0x90] sm:$0xff] }
  0x2e   : > { %567 = vst [vmem:[%s2009_s6 + $0x40] sm:$0xff] %v566_v12  ;;  %v570_v14 = vld [vmem:[%s2001_s10 + $0xa0] sm:$0xff]  ;;  %v572_v15 = vld [vmem:[%s2001_s10 + $0xb0] sm:$0xff]  ;;  %569 = vst [vmem:[%s2009_s6 + $0x48] sm:$0xff] %v568_v13 }
  0x2f   : > { %571 = vst [vmem:[%s2009_s6 + $0x50] sm:$0xff] %v570_v14  ;;  %573 = vst [vmem:[%s2009_s6 + $0x58] sm:$0xff] %v572_v15  ;;  %v574_v16 = vld [vmem:[%s2001_s10 + $0xc0] sm:$0xff]  ;;  %v576_v17 = vld [vmem:[%s2001_s10 + $0xd0] sm:$0xff] }
  0x30   : > { %v578_v18 = vld [vmem:[%s2001_s10 + $0xe0] sm:$0xff]  ;;  %575 = vst [vmem:[%s2009_s6 + $0x60] sm:$0xff] %v574_v16  ;;  %577 = vst [vmem:[%s2009_s6 + $0x68] sm:$0xff] %v576_v17  ;;  %v580_v19 = vld [vmem:[%s2001_s10 + $0xf0] sm:$0xff] }
  0x31   : > { %579 = vst [vmem:[%s2009_s6 + $0x70] sm:$0xff] %v578_v18  ;;  %v582_v20 = vld [vmem:[%s2001_s10 + $0x100] sm:$0xff]  ;;  %v584_v21 = vld [vmem:[%s2001_s10 + $0x110] sm:$0xff]  ;;  %581 = vst [vmem:[%s2009_s6 + $0x78] sm:$0xff] %v580_v19 }
  0x32   : > { %583 = vst [vmem:[%s2009_s6 + $0x80] sm:$0xff] %v582_v20  ;;  %585 = vst [vmem:[%s2009_s6 + $0x88] sm:$0xff] %v584_v21  ;;  %v586_v22 = vld [vmem:[%s2001_s10 + $0x120] sm:$0xff]  ;;  %v588_v23 = vld [vmem:[%s2001_s10 + $0x130] sm:$0xff] }
  0x33   : > { %v590_v24 = vld [vmem:[%s2001_s10 + $0x140] sm:$0xff]  ;;  %587 = vst [vmem:[%s2009_s6 + $0x90] sm:$0xff] %v586_v22  ;;  %589 = vst [vmem:[%s2009_s6 + $0x98] sm:$0xff] %v588_v23  ;;  %v592_v25 = vld [vmem:[%s2001_s10 + $0x150] sm:$0xff] }
  0x34   : > { %591 = vst [vmem:[%s2009_s6 + $0xa0] sm:$0xff] %v590_v24  ;;  %v594_v26 = vld [vmem:[%s2001_s10 + $0x160] sm:$0xff]  ;;  %v596_v27 = vld [vmem:[%s2001_s10 + $0x170] sm:$0xff]  ;;  %593 = vst [vmem:[%s2009_s6 + $0xa8] sm:$0xff] %v592_v25 }
  0x35   : > { %595 = vst [vmem:[%s2009_s6 + $0xb0] sm:$0xff] %v594_v26  ;;  %597 = vst [vmem:[%s2009_s6 + $0xb8] sm:$0xff] %v596_v27  ;;  %v598_v28 = vld [vmem:[%s2001_s10 + $0x180] sm:$0xff]  ;;  %v600_v29 = vld [vmem:[%s2001_s10 + $0x190] sm:$0xff] }
  0x36   : > { %v602_v30 = vld [vmem:[%s2001_s10 + $0x1a0] sm:$0xff]  ;;  %599 = vst [vmem:[%s2009_s6 + $0xc0] sm:$0xff] %v598_v28  ;;  %601 = vst [vmem:[%s2009_s6 + $0xc8] sm:$0xff] %v600_v29  ;;  %v604_v31 = vld [vmem:[%s2001_s10 + $0x1b0] sm:$0xff] }
  0x37   : > { %603 = vst [vmem:[%s2009_s6 + $0xd0] sm:$0xff] %v602_v30  ;;  %v606_v32 = vld [vmem:[%s2001_s10 + $0x1c0] sm:$0xff]  ;;  %v608_v33 = vld [vmem:[%s2001_s10 + $0x1d0] sm:$0xff]  ;;  %605 = vst [vmem:[%s2009_s6 + $0xd8] sm:$0xff] %v604_v31 }
  0x38   : > { %607 = vst [vmem:[%s2009_s6 + $0xe0] sm:$0xff] %v606_v32  ;;  %609 = vst [vmem:[%s2009_s6 + $0xe8] sm:$0xff] %v608_v33  ;;  %v610_v34 = vld [vmem:[%s2001_s10 + $0x1e0] sm:$0xff]  ;;  %v612_v35 = vld [vmem:[%s2001_s10 + $0x1f0] sm:$0xff] }
  0x39   : > { %v614_v36 = vld [vmem:[%s2001_s10 + $0x200] sm:$0xff]  ;;  %611 = vst [vmem:[%s2009_s6 + $0xf0] sm:$0xff] %v610_v34  ;;  %613 = vst [vmem:[%s2009_s6 + $0xf8] sm:$0xff] %v612_v35  ;;  %v616_v37 = vld [vmem:[%s2001_s10 + $0x210] sm:$0xff] }
  0x3a   : > { %615 = vst [vmem:[%s2009_s6 + $0x100] sm:$0xff] %v614_v36  ;;  %v618_v38 = vld [vmem:[%s2001_s10 + $0x220] sm:$0xff]  ;;  %v620_v39 = vld [vmem:[%s2001_s10 + $0x230] sm:$0xff]  ;;  %617 = vst [vmem:[%s2009_s6 + $0x108] sm:$0xff] %v616_v37 }
  0x3b   : > { %619 = vst [vmem:[%s2009_s6 + $0x110] sm:$0xff] %v618_v38  ;;  %621 = vst [vmem:[%s2009_s6 + $0x118] sm:$0xff] %v620_v39  ;;  %v622_v40 = vld [vmem:[%s2001_s10 + $0x240] sm:$0xff]  ;;  %v624_v41 = vld [vmem:[%s2001_s10 + $0x250] sm:$0xff] }
  0x3c   : > { %v626_v42 = vld [vmem:[%s2001_s10 + $0x260] sm:$0xff]  ;;  %623 = vst [vmem:[%s2009_s6 + $0x120] sm:$0xff] %v622_v40  ;;  %625 = vst [vmem:[%s2009_s6 + $0x128] sm:$0xff] %v624_v41  ;;  %v628_v43 = vld [vmem:[%s2001_s10 + $0x270] sm:$0xff] }
  0x3d   : > { %627 = vst [vmem:[%s2009_s6 + $0x130] sm:$0xff] %v626_v42  ;;  %v630_v44 = vld [vmem:[%s2001_s10 + $0x280] sm:$0xff]  ;;  %v632_v45 = vld [vmem:[%s2001_s10 + $0x290] sm:$0xff]  ;;  %629 = vst [vmem:[%s2009_s6 + $0x138] sm:$0xff] %v628_v43 }
  0x3e   : > { %631 = vst [vmem:[%s2009_s6 + $0x140] sm:$0xff] %v630_v44  ;;  %633 = vst [vmem:[%s2009_s6 + $0x148] sm:$0xff] %v632_v45  ;;  %v634_v46 = vld [vmem:[%s2001_s10 + $0x2a0] sm:$0xff]  ;;  %v636_v47 = vld [vmem:[%s2001_s10 + $0x2b0] sm:$0xff] }
  0x3f   : > { %v638_v48 = vld [vmem:[%s2001_s10 + $0x2c0] sm:$0xff]  ;;  %635 = vst [vmem:[%s2009_s6 + $0x150] sm:$0xff] %v634_v46  ;;  %637 = vst [vmem:[%s2009_s6 + $0x158] sm:$0xff] %v636_v47  ;;  %v640_v49 = vld [vmem:[%s2001_s10 + $0x2d0] sm:$0xff] }
  0x40   : > { %639 = vst [vmem:[%s2009_s6 + $0x160] sm:$0xff] %v638_v48  ;;  %v642_v50 = vld [vmem:[%s2001_s10 + $0x2e0] sm:$0xff]  ;;  %v644_v51 = vld [vmem:[%s2001_s10 + $0x2f0] sm:$0xff]  ;;  %641 = vst [vmem:[%s2009_s6 + $0x168] sm:$0xff] %v640_v49 }
  0x41   : > { %643 = vst [vmem:[%s2009_s6 + $0x170] sm:$0xff] %v642_v50  ;;  %645 = vst [vmem:[%s2009_s6 + $0x178] sm:$0xff] %v644_v51  ;;  %v646_v52 = vld [vmem:[%s2001_s10 + $0x300] sm:$0xff]  ;;  %v648_v53 = vld [vmem:[%s2001_s10 + $0x310] sm:$0xff] }
  0x42   : > { %v650_v54 = vld [vmem:[%s2001_s10 + $0x320] sm:$0xff]  ;;  %647 = vst [vmem:[%s2009_s6 + $0x180] sm:$0xff] %v646_v52  ;;  %649 = vst [vmem:[%s2009_s6 + $0x188] sm:$0xff] %v648_v53  ;;  %v652_v55 = vld [vmem:[%s2001_s10 + $0x330] sm:$0xff] }
  0x43   : > { %651 = vst [vmem:[%s2009_s6 + $0x190] sm:$0xff] %v650_v54  ;;  %v654_v56 = vld [vmem:[%s2001_s10 + $0x340] sm:$0xff]  ;;  %v656_v57 = vld [vmem:[%s2001_s10 + $0x350] sm:$0xff]  ;;  %653 = vst [vmem:[%s2009_s6 + $0x198] sm:$0xff] %v652_v55 }
  0x44   : > { %655 = vst [vmem:[%s2009_s6 + $0x1a0] sm:$0xff] %v654_v56  ;;  %657 = vst [vmem:[%s2009_s6 + $0x1a8] sm:$0xff] %v656_v57  ;;  %v658_v58 = vld [vmem:[%s2001_s10 + $0x360] sm:$0xff]  ;;  %v660_v59 = vld [vmem:[%s2001_s10 + $0x370] sm:$0xff] }
  0x45   : > { %v662_v60 = vld [vmem:[%s2001_s10 + $0x380] sm:$0xff]  ;;  %659 = vst [vmem:[%s2009_s6 + $0x1b0] sm:$0xff] %v658_v58  ;;  %661 = vst [vmem:[%s2009_s6 + $0x1b8] sm:$0xff] %v660_v59  ;;  %v664_v61 = vld [vmem:[%s2001_s10 + $0x390] sm:$0xff] }
  0x46   : > { %663 = vst [vmem:[%s2009_s6 + $0x1c0] sm:$0xff] %v662_v60  ;;  %v666_v62 = vld [vmem:[%s2001_s10 + $0x3a0] sm:$0xff]  ;;  %v668_v63 = vld [vmem:[%s2001_s10 + $0x3b0] sm:$0xff]  ;;  %665 = vst [vmem:[%s2009_s6 + $0x1c8] sm:$0xff] %v664_v61 }
  0x47   : > { %667 = vst [vmem:[%s2009_s6 + $0x1d0] sm:$0xff] %v666_v62  ;;  %669 = vst [vmem:[%s2009_s6 + $0x1d8] sm:$0xff] %v668_v63  ;;  %v670_v0 = vld [vmem:[%s2001_s10 + $0x3c0] sm:$0xff]  ;;  %v672_v1 = vld [vmem:[%s2001_s10 + $0x3d0] sm:$0xff] }
  0x48   : > { %v674_v2 = vld [vmem:[%s2001_s10 + $0x3e0] sm:$0xff]  ;;  %671 = vst [vmem:[%s2009_s6 + $0x1e0] sm:$0xff] %v670_v0  ;;  %673 = vst [vmem:[%s2009_s6 + $0x1e8] sm:$0xff] %v672_v1  ;;  %v676_v3 = vld [vmem:[%s2001_s10 + $0x3f0] sm:$0xff] }
  0x49   : > { %675 = vst [vmem:[%s2009_s6 + $0x1f0] sm:$0xff] %v674_v2  ;;  %v678_v4 = vld [vmem:[%s2001_s10 + $0x400] sm:$0xff]  ;;  %v680_v5 = vld [vmem:[%s2001_s10 + $0x410] sm:$0xff]  ;;  %677 = vst [vmem:[%s2009_s6 + $0x1f8] sm:$0xff] %v676_v3 }
  0x4a   : > { %679 = vst [vmem:[%s2009_s6 + $0x200] sm:$0xff] %v678_v4  ;;  %681 = vst [vmem:[%s2009_s6 + $0x208] sm:$0xff] %v680_v5  ;;  %v682_v6 = vld [vmem:[%s2001_s10 + $0x420] sm:$0xff]  ;;  %v684_v7 = vld [vmem:[%s2001_s10 + $0x430] sm:$0xff] }
  0x4b   : > { %v686_v8 = vld [vmem:[%s2001_s10 + $0x440] sm:$0xff]  ;;  %683 = vst [vmem:[%s2009_s6 + $0x210] sm:$0xff] %v682_v6  ;;  %685 = vst [vmem:[%s2009_s6 + $0x218] sm:$0xff] %v684_v7  ;;  %v688_v9 = vld [vmem:[%s2001_s10 + $0x450] sm:$0xff] }
  0x4c   : > { %687 = vst [vmem:[%s2009_s6 + $0x220] sm:$0xff] %v686_v8  ;;  %v690_v10 = vld [vmem:[%s2001_s10 + $0x460] sm:$0xff]  ;;  %v692_v11 = vld [vmem:[%s2001_s10 + $0x470] sm:$0xff]  ;;  %689 = vst [vmem:[%s2009_s6 + $0x228] sm:$0xff] %v688_v9 }
  0x4d   : > { %691 = vst [vmem:[%s2009_s6 + $0x230] sm:$0xff] %v690_v10  ;;  %693 = vst [vmem:[%s2009_s6 + $0x238] sm:$0xff] %v692_v11  ;;  %v694_v12 = vld [vmem:[%s2001_s10 + $0x480] sm:$0xff]  ;;  %v696_v13 = vld [vmem:[%s2001_s10 + $0x490] sm:$0xff] }
  0x4e   : > { %v698_v14 = vld [vmem:[%s2001_s10 + $0x4a0] sm:$0xff]  ;;  %695 = vst [vmem:[%s2009_s6 + $0x240] sm:$0xff] %v694_v12  ;;  %697 = vst [vmem:[%s2009_s6 + $0x248] sm:$0xff] %v696_v13  ;;  %v700_v15 = vld [vmem:[%s2001_s10 + $0x4b0] sm:$0xff] }
  0x4f   : > { %699 = vst [vmem:[%s2009_s6 + $0x250] sm:$0xff] %v698_v14  ;;  %v702_v16 = vld [vmem:[%s2001_s10 + $0x4c0] sm:$0xff]  ;;  %v704_v17 = vld [vmem:[%s2001_s10 + $0x4d0] sm:$0xff]  ;;  %701 = vst [vmem:[%s2009_s6 + $0x258] sm:$0xff] %v700_v15 }
  0x50   : > { %703 = vst [vmem:[%s2009_s6 + $0x260] sm:$0xff] %v702_v16  ;;  %705 = vst [vmem:[%s2009_s6 + $0x268] sm:$0xff] %v704_v17  ;;  %v706_v18 = vld [vmem:[%s2001_s10 + $0x4e0] sm:$0xff]  ;;  %v708_v19 = vld [vmem:[%s2001_s10 + $0x4f0] sm:$0xff] }
  0x51   : > { %v710_v20 = vld [vmem:[%s2001_s10 + $0x500] sm:$0xff]  ;;  %707 = vst [vmem:[%s2009_s6 + $0x270] sm:$0xff] %v706_v18  ;;  %709 = vst [vmem:[%s2009_s6 + $0x278] sm:$0xff] %v708_v19  ;;  %v712_v21 = vld [vmem:[%s2001_s10 + $0x510] sm:$0xff] }
  0x52   : > { %711 = vst [vmem:[%s2009_s6 + $0x280] sm:$0xff] %v710_v20  ;;  %v714_v22 = vld [vmem:[%s2001_s10 + $0x520] sm:$0xff]  ;;  %v716_v23 = vld [vmem:[%s2001_s10 + $0x530] sm:$0xff]  ;;  %713 = vst [vmem:[%s2009_s6 + $0x288] sm:$0xff] %v712_v21 }
  0x53   : > { %715 = vst [vmem:[%s2009_s6 + $0x290] sm:$0xff] %v714_v22  ;;  %717 = vst [vmem:[%s2009_s6 + $0x298] sm:$0xff] %v716_v23  ;;  %v718_v24 = vld [vmem:[%s2001_s10 + $0x540] sm:$0xff]  ;;  %v720_v25 = vld [vmem:[%s2001_s10 + $0x550] sm:$0xff] }
  0x54   : > { %v722_v26 = vld [vmem:[%s2001_s10 + $0x560] sm:$0xff]  ;;  %719 = vst [vmem:[%s2009_s6 + $0x2a0] sm:$0xff] %v718_v24  ;;  %721 = vst [vmem:[%s2009_s6 + $0x2a8] sm:$0xff] %v720_v25  ;;  %v724_v27 = vld [vmem:[%s2001_s10 + $0x570] sm:$0xff] }
  0x55   : > { %723 = vst [vmem:[%s2009_s6 + $0x2b0] sm:$0xff] %v722_v26  ;;  %v726_v28 = vld [vmem:[%s2001_s10 + $0x580] sm:$0xff]  ;;  %v728_v29 = vld [vmem:[%s2001_s10 + $0x590] sm:$0xff]  ;;  %725 = vst [vmem:[%s2009_s6 + $0x2b8] sm:$0xff] %v724_v27 }
  0x56   : > { %727 = vst [vmem:[%s2009_s6 + $0x2c0] sm:$0xff] %v726_v28  ;;  %729 = vst [vmem:[%s2009_s6 + $0x2c8] sm:$0xff] %v728_v29  ;;  %v730_v30 = vld [vmem:[%s2001_s10 + $0x5a0] sm:$0xff]  ;;  %v732_v31 = vld [vmem:[%s2001_s10 + $0x5b0] sm:$0xff] }
  0x57   : > { %v734_v32 = vld [vmem:[%s2001_s10 + $0x5c0] sm:$0xff]  ;;  %731 = vst [vmem:[%s2009_s6 + $0x2d0] sm:$0xff] %v730_v30  ;;  %733 = vst [vmem:[%s2009_s6 + $0x2d8] sm:$0xff] %v732_v31  ;;  %v736_v33 = vld [vmem:[%s2001_s10 + $0x5d0] sm:$0xff] }
  0x58   : > { %735 = vst [vmem:[%s2009_s6 + $0x2e0] sm:$0xff] %v734_v32  ;;  %v738_v34 = vld [vmem:[%s2001_s10 + $0x5e0] sm:$0xff]  ;;  %v740_v35 = vld [vmem:[%s2001_s10 + $0x5f0] sm:$0xff]  ;;  %737 = vst [vmem:[%s2009_s6 + $0x2e8] sm:$0xff] %v736_v33 }
  0x59   : > { %739 = vst [vmem:[%s2009_s6 + $0x2f0] sm:$0xff] %v738_v34  ;;  %741 = vst [vmem:[%s2009_s6 + $0x2f8] sm:$0xff] %v740_v35  ;;  %v742_v36 = vld [vmem:[%s2001_s10 + $0x600] sm:$0xff]  ;;  %v744_v37 = vld [vmem:[%s2001_s10 + $0x610] sm:$0xff] }
  0x5a   : > { %v746_v38 = vld [vmem:[%s2001_s10 + $0x620] sm:$0xff]  ;;  %743 = vst [vmem:[%s2009_s6 + $0x300] sm:$0xff] %v742_v36  ;;  %745 = vst [vmem:[%s2009_s6 + $0x308] sm:$0xff] %v744_v37  ;;  %v748_v39 = vld [vmem:[%s2001_s10 + $0x630] sm:$0xff] }
  0x5b   : > { %747 = vst [vmem:[%s2009_s6 + $0x310] sm:$0xff] %v746_v38  ;;  %v750_v40 = vld [vmem:[%s2001_s10 + $0x640] sm:$0xff]  ;;  %v752_v41 = vld [vmem:[%s2001_s10 + $0x650] sm:$0xff]  ;;  %749 = vst [vmem:[%s2009_s6 + $0x318] sm:$0xff] %v748_v39 }
  0x5c   : > { %751 = vst [vmem:[%s2009_s6 + $0x320] sm:$0xff] %v750_v40  ;;  %753 = vst [vmem:[%s2009_s6 + $0x328] sm:$0xff] %v752_v41  ;;  %v754_v42 = vld [vmem:[%s2001_s10 + $0x660] sm:$0xff]  ;;  %v756_v43 = vld [vmem:[%s2001_s10 + $0x670] sm:$0xff] }
  0x5d   : > { %v758_v44 = vld [vmem:[%s2001_s10 + $0x680] sm:$0xff]  ;;  %755 = vst [vmem:[%s2009_s6 + $0x330] sm:$0xff] %v754_v42  ;;  %757 = vst [vmem:[%s2009_s6 + $0x338] sm:$0xff] %v756_v43  ;;  %v760_v45 = vld [vmem:[%s2001_s10 + $0x690] sm:$0xff] }
  0x5e   : > { %759 = vst [vmem:[%s2009_s6 + $0x340] sm:$0xff] %v758_v44  ;;  %v762_v46 = vld [vmem:[%s2001_s10 + $0x6a0] sm:$0xff]  ;;  %v764_v47 = vld [vmem:[%s2001_s10 + $0x6b0] sm:$0xff]  ;;  %761 = vst [vmem:[%s2009_s6 + $0x348] sm:$0xff] %v760_v45 }
  0x5f   : > { %763 = vst [vmem:[%s2009_s6 + $0x350] sm:$0xff] %v762_v46  ;;  %765 = vst [vmem:[%s2009_s6 + $0x358] sm:$0xff] %v764_v47  ;;  %v766_v48 = vld [vmem:[%s2001_s10 + $0x6c0] sm:$0xff]  ;;  %v768_v49 = vld [vmem:[%s2001_s10 + $0x6d0] sm:$0xff] }
  0x60   : > { %v770_v50 = vld [vmem:[%s2001_s10 + $0x6e0] sm:$0xff]  ;;  %767 = vst [vmem:[%s2009_s6 + $0x360] sm:$0xff] %v766_v48  ;;  %769 = vst [vmem:[%s2009_s6 + $0x368] sm:$0xff] %v768_v49  ;;  %v772_v51 = vld [vmem:[%s2001_s10 + $0x6f0] sm:$0xff] }
  0x61   : > { %771 = vst [vmem:[%s2009_s6 + $0x370] sm:$0xff] %v770_v50  ;;  %v774_v52 = vld [vmem:[%s2001_s10 + $0x700] sm:$0xff]  ;;  %v776_v53 = vld [vmem:[%s2001_s10 + $0x710] sm:$0xff]  ;;  %773 = vst [vmem:[%s2009_s6 + $0x378] sm:$0xff] %v772_v51 }
  0x62   : > { %775 = vst [vmem:[%s2009_s6 + $0x380] sm:$0xff] %v774_v52  ;;  %777 = vst [vmem:[%s2009_s6 + $0x388] sm:$0xff] %v776_v53  ;;  %v778_v54 = vld [vmem:[%s2001_s10 + $0x720] sm:$0xff]  ;;  %v780_v55 = vld [vmem:[%s2001_s10 + $0x730] sm:$0xff] }
  0x63   : > { %v782_v56 = vld [vmem:[%s2001_s10 + $0x740] sm:$0xff]  ;;  %779 = vst [vmem:[%s2009_s6 + $0x390] sm:$0xff] %v778_v54  ;;  %781 = vst [vmem:[%s2009_s6 + $0x398] sm:$0xff] %v780_v55  ;;  %v784_v57 = vld [vmem:[%s2001_s10 + $0x750] sm:$0xff] }
  0x64   : > { %783 = vst [vmem:[%s2009_s6 + $0x3a0] sm:$0xff] %v782_v56  ;;  %v786_v58 = vld [vmem:[%s2001_s10 + $0x760] sm:$0xff]  ;;  %v788_v59 = vld [vmem:[%s2001_s10 + $0x770] sm:$0xff]  ;;  %785 = vst [vmem:[%s2009_s6 + $0x3a8] sm:$0xff] %v784_v57 }
  0x65   : > { %787 = vst [vmem:[%s2009_s6 + $0x3b0] sm:$0xff] %v786_v58  ;;  %789 = vst [vmem:[%s2009_s6 + $0x3b8] sm:$0xff] %v788_v59  ;;  %v790_v60 = vld [vmem:[%s2001_s10 + $0x780] sm:$0xff]  ;;  %v792_v61 = vld [vmem:[%s2001_s10 + $0x790] sm:$0xff] }
  0x66   : > { %v794_v62 = vld [vmem:[%s2001_s10 + $0x7a0] sm:$0xff]  ;;  %791 = vst [vmem:[%s2009_s6 + $0x3c0] sm:$0xff] %v790_v60  ;;  %793 = vst [vmem:[%s2009_s6 + $0x3c8] sm:$0xff] %v792_v61  ;;  %v796_v63 = vld [vmem:[%s2001_s10 + $0x7b0] sm:$0xff] }
  0x67   : > { %795 = vst [vmem:[%s2009_s6 + $0x3d0] sm:$0xff] %v794_v62  ;;  %v798_v0 = vld [vmem:[%s2001_s10 + $0x7c0] sm:$0xff]  ;;  %v800_v1 = vld [vmem:[%s2001_s10 + $0x7d0] sm:$0xff]  ;;  %797 = vst [vmem:[%s2009_s6 + $0x3d8] sm:$0xff] %v796_v63 }
  0x68   : > { %799 = vst [vmem:[%s2009_s6 + $0x3e0] sm:$0xff] %v798_v0  ;;  %801 = vst [vmem:[%s2009_s6 + $0x3e8] sm:$0xff] %v800_v1  ;;  %v802_v2 = vld [vmem:[%s2001_s10 + $0x7e0] sm:$0xff]  ;;  %v804_v3 = vld [vmem:[%s2001_s10 + $0x7f0] sm:$0xff] }
  0x69   : > { %v806_v4 = vld [vmem:[%s2001_s10 + $0x800] sm:$0xff]  ;;  %803 = vst [vmem:[%s2009_s6 + $0x3f0] sm:$0xff] %v802_v2  ;;  %805 = vst [vmem:[%s2009_s6 + $0x3f8] sm:$0xff] %v804_v3  ;;  %v808_v5 = vld [vmem:[%s2001_s10 + $0x810] sm:$0xff] }
  0x6a   : > { %807 = vst [vmem:[%s2009_s6 + $0x400] sm:$0xff] %v806_v4  ;;  %v810_v6 = vld [vmem:[%s2001_s10 + $0x820] sm:$0xff]  ;;  %v812_v7 = vld [vmem:[%s2001_s10 + $0x830] sm:$0xff]  ;;  %809 = vst [vmem:[%s2009_s6 + $0x408] sm:$0xff] %v808_v5 }
  0x6b   : > { %811 = vst [vmem:[%s2009_s6 + $0x410] sm:$0xff] %v810_v6  ;;  %813 = vst [vmem:[%s2009_s6 + $0x418] sm:$0xff] %v812_v7  ;;  %v814_v8 = vld [vmem:[%s2001_s10 + $0x840] sm:$0xff]  ;;  %v816_v9 = vld [vmem:[%s2001_s10 + $0x850] sm:$0xff] }
  0x6c   : > { %v818_v10 = vld [vmem:[%s2001_s10 + $0x860] sm:$0xff]  ;;  %815 = vst [vmem:[%s2009_s6 + $0x420] sm:$0xff] %v814_v8  ;;  %817 = vst [vmem:[%s2009_s6 + $0x428] sm:$0xff] %v816_v9  ;;  %v820_v11 = vld [vmem:[%s2001_s10 + $0x870] sm:$0xff] }
  0x6d   : > { %819 = vst [vmem:[%s2009_s6 + $0x430] sm:$0xff] %v818_v10  ;;  %v822_v12 = vld [vmem:[%s2001_s10 + $0x880] sm:$0xff]  ;;  %v824_v13 = vld [vmem:[%s2001_s10 + $0x890] sm:$0xff]  ;;  %821 = vst [vmem:[%s2009_s6 + $0x438] sm:$0xff] %v820_v11 }
  0x6e   : > { %823 = vst [vmem:[%s2009_s6 + $0x440] sm:$0xff] %v822_v12  ;;  %825 = vst [vmem:[%s2009_s6 + $0x448] sm:$0xff] %v824_v13  ;;  %v826_v14 = vld [vmem:[%s2001_s10 + $0x8a0] sm:$0xff]  ;;  %v828_v15 = vld [vmem:[%s2001_s10 + $0x8b0] sm:$0xff] }
  0x6f   : > { %v830_v16 = vld [vmem:[%s2001_s10 + $0x8c0] sm:$0xff]  ;;  %827 = vst [vmem:[%s2009_s6 + $0x450] sm:$0xff] %v826_v14  ;;  %829 = vst [vmem:[%s2009_s6 + $0x458] sm:$0xff] %v828_v15  ;;  %v832_v17 = vld [vmem:[%s2001_s10 + $0x8d0] sm:$0xff] }
  0x70   : > { %831 = vst [vmem:[%s2009_s6 + $0x460] sm:$0xff] %v830_v16  ;;  %v834_v18 = vld [vmem:[%s2001_s10 + $0x8e0] sm:$0xff]  ;;  %v836_v19 = vld [vmem:[%s2001_s10 + $0x8f0] sm:$0xff]  ;;  %833 = vst [vmem:[%s2009_s6 + $0x468] sm:$0xff] %v832_v17 }
  0x71   : > { %835 = vst [vmem:[%s2009_s6 + $0x470] sm:$0xff] %v834_v18  ;;  %837 = vst [vmem:[%s2009_s6 + $0x478] sm:$0xff] %v836_v19 }
  0x72 PF: > { %p1581_p12 = scmp.ge.s32.totalorder %s1881_s23, 1  ;;  %p858_p13 = scmp.lt.s32.totalorder %s1881_s23, 7 }
  0x74   : > { %p859_p0 = pnand %p1581_p12, %p858_p13 }
  0x75   : > { %s865_s11 = sand.u32 (!%p859_p0), 1, %s1857_s17   ;;  %s872_s12 = sand.u32 (!%p859_p0), 1, %s1849_s15  }
  0x76   : > { %862 = sbr.rel (%p859_p0) target bundleno = 446 (0x1be), region = 92  ;;  %s1582_s14 = sshll.u32 (!%p859_p0), %s872_s12, 4 }
  0x77   : > { %s1659_s13 = smul.u32 (!%p859_p0), 24, %s865_s11  ;;  %s1583_s27 = sshll.u32 (!%p859_p0), %s1869_s20, 1 }
  0x78   : > { %s1660_s24 = smul.u32 (!%p859_p0), 1152, %s872_s12  ;;  %p912_p1 = scmp.lt.s32.totalorder (!%p859_p0), %s1583_s27, 3 }
  0x79   : > { %s2308_s0 = scalar_lea.vmem (!%p859_p0), [#allocation3], %s1659_s13  ;;  %s2310_s17 = scalar_lea.vmem (!%p859_p0), [#allocation5], %s1582_s14 }
  0x7a   : > { %s874_s15 = scalar_lea.vmem (!%p859_p0), [#allocation4], %s1660_s24  ;;  %p1585_p2 = scmp.ne.s32.totalorder (!%p859_p0), %s1865_s19, 0 }
  0x7d   : > { %s2439_s27 = smov (!%p912_p1, %s1583_s27), 3  ;;  %927 = sbr.rel (%p1585_p2) target bundleno = 132 (0x84), region = 104 }
  0x7e   : > { %s914_s5 = scalar_lea.vmem %s2417_s2, %s2439_s27  ;;  %s919_s6 = scalar_lea.vmem %s2418_s3, %s2439_s27  ;;  %v1883_v20 = vmov (!%p1585_p2), 0.0  }
  0x7f   : > { %928 = vst [vmem:[#allocation2] sm:$0xff] (!%p1585_p2), %v1883_v20  ;;  %929 = vst [vmem:[#allocation2 + $0x8] sm:$0xff] (!%p1585_p2), %v1883_v20 }
  0x80   : > { %930 = vst [vmem:[#allocation2 + $0x10] sm:$0xff] (!%p1585_p2), %v1883_v20  ;;  %931 = vst [vmem:[#allocation2 + $0x18] sm:$0xff] (!%p1585_p2), %v1883_v20 }
  0x84 PF: > { %s932_s11 = smul.u32 384, %s1865_s19  ;;  %v1884_v21 = vmov 0   ;;  %v1810_v22 = vld [vmem:[%s2308_s0 + $0x4] ss:$12 sps:$4 sm:$0xff]   ;;  %v1807_v62 = vld [vmem:[%s2308_s0 + $0x8] ss:$12 sps:$4 sm:$0xff]  }
  0x85   : > { %1325 = vmatprep.mubr.bf16.mxu0 %v1884_v21  ;;  %1282 = vmatprep.mubr.bf16.mxu1 %v1810_v22  ;;  %v1808_v8 = vld [vmem:[%s2308_s0] ss:$12 sps:$4 sm:$0xff]   ;;  %p1639_p3 = scmp.ne.s32.totalorder %s1865_s19, 2 }
  0x86   : > { %s941_s12 = sshra.s32 %s932_s11, 3  ;;  %v933_v13 = vld [vmem:[#allocation2] sm:$0xff]  ;;  %v934_v16 = vld [vmem:[#allocation2 + $0x8] sm:$0xff] }
  0x87   : > { %s1649_s13 = sshll.u32 %s941_s12, 3  ;;  %v935_v19 = vld [vmem:[#allocation2 + $0x10] sm:$0xff] }
  0x88   : > { %s2315_s24 = scalar_lea.vmem %s874_s15, %s1649_s13 [#allocation4] }
  0x89   : > { %v1735_v23 = vld [vmem:[%s2315_s24 + $0x4] ss:$8 sps:$4 sm:$0xff]   ;;  %v1737_v24 = vld [vmem:[%s2315_s24] ss:$8 sps:$4 sm:$0xff]   ;;  %v1738_v25 = vld [vmem:[%s2315_s24 + $0x14] ss:$8 sps:$4 sm:$0xff]  }
  0x8a   : > { %1250 = vmatprep.subr.bf16.mxu1 %v1735_v23  ;;  %v1740_v26 = vld [vmem:[%s2315_s24 + $0x10] ss:$8 sps:$4 sm:$0xff]   ;;  %v1741_v27 = vld [vmem:[%s2315_s24 + $0x24] ss:$8 sps:$4 sm:$0xff]   ;;  %v1743_v28 = vld [vmem:[%s2315_s24 + $0x20] ss:$8 sps:$4 sm:$0xff]  }
  0x8b   : > { %1251 = vmatpush1.bf16.msra.mxu1 %v1737_v24  ;;  %v1744_v29 = vld [vmem:[%s2315_s24 + $0x34] ss:$8 sps:$4 sm:$0xff]   ;;  %v1746_v30 = vld [vmem:[%s2315_s24 + $0x30] ss:$8 sps:$4 sm:$0xff]   ;;  %v1759_v31 = vld [vmem:[%s2315_s24 + $0x104] ss:$8 sps:$4 sm:$0xff]  }
  0x8c   : > { %1252 = vmatprep.subr.bf16.mxu1 %v1738_v25  ;;  %v1761_v32 = vld [vmem:[%s2315_s24 + $0x100] ss:$8 sps:$4 sm:$0xff]   ;;  %v1747_v33 = vld [vmem:[%s2315_s24 + $0x44] ss:$8 sps:$4 sm:$0xff]   ;;  %1293 = vmatprep.subr.bf16.mxu0 %v1759_v31  ;;  %v1765_v34 = vld [vmem:[%s2315_s24 + $0x114] ss:$8 sps:$4 sm:$0xff]  }
  0x8d   : > { %1294 = vmatpush1.bf16.msra.mxu0 %v1761_v32  ;;  %v1767_v35 = vld [vmem:[%s2315_s24 + $0x110] ss:$8 sps:$4 sm:$0xff]   ;;  %v1749_v36 = vld [vmem:[%s2315_s24 + $0x40] ss:$8 sps:$4 sm:$0xff]   ;;  %v1750_v37 = vld [vmem:[%s2315_s24 + $0x54] ss:$8 sps:$4 sm:$0xff]  }
  0x8e   : > { %1295 = vmatprep.subr.bf16.mxu0 %v1765_v34  ;;  %v1771_v38 = vld [vmem:[%s2315_s24 + $0x124] ss:$8 sps:$4 sm:$0xff]   ;;  %v1773_v39 = vld [vmem:[%s2315_s24 + $0x120] ss:$8 sps:$4 sm:$0xff]   ;;  %v1752_v40 = vld [vmem:[%s2315_s24 + $0x50] ss:$8 sps:$4 sm:$0xff]  }
  0x8f   : > { %1253 = vmatpush1.bf16.msra.mxu1 %v1740_v26  ;;  %v1777_v41 = vld [vmem:[%s2315_s24 + $0x134] ss:$8 sps:$4 sm:$0xff]   ;;  %v1753_v42 = vld [vmem:[%s2315_s24 + $0x64] ss:$8 sps:$4 sm:$0xff]   ;;  %v1779_v43 = vld [vmem:[%s2315_s24 + $0x130] ss:$8 sps:$4 sm:$0xff]  }
  0x90   : > { %1254 = vmatprep.subr.bf16.mxu1 %v1741_v27  ;;  %v1755_v44 = vld [vmem:[%s2315_s24 + $0x60] ss:$8 sps:$4 sm:$0xff]   ;;  %v1783_v45 = vld [vmem:[%s2315_s24 + $0x144] ss:$8 sps:$4 sm:$0xff]   ;;  %v1756_v46 = vld [vmem:[%s2315_s24 + $0x74] ss:$8 sps:$4 sm:$0xff]  }
  0x91   : > { %1296 = vmatpush1.bf16.msra.mxu0 %v1767_v35  ;;  %v1785_v47 = vld [vmem:[%s2315_s24 + $0x140] ss:$8 sps:$4 sm:$0xff]   ;;  %v1758_v48 = vld [vmem:[%s2315_s24 + $0x70] ss:$8 sps:$4 sm:$0xff]   ;;  %v1789_v49 = vld [vmem:[%s2315_s24 + $0x154] ss:$8 sps:$4 sm:$0xff]  }
  0x92   : > { %1297 = vmatprep.subr.bf16.mxu0 %v1771_v38  ;;  %v1762_v50 = vld [vmem:[%s2315_s24 + $0x84] ss:$8 sps:$4 sm:$0xff]   ;;  %v1791_v51 = vld [vmem:[%s2315_s24 + $0x150] ss:$8 sps:$4 sm:$0xff]   ;;  %v1764_v52 = vld [vmem:[%s2315_s24 + $0x80] ss:$8 sps:$4 sm:$0xff]  }
  0x93   : > { %1255 = vmatpush1.bf16.msra.mxu1 %v1743_v28  ;;  %v1795_v53 = vld [vmem:[%s2315_s24 + $0x164] ss:$8 sps:$4 sm:$0xff]   ;;  %v1768_v54 = vld [vmem:[%s2315_s24 + $0x94] ss:$8 sps:$4 sm:$0xff]   ;;  %v1797_v55 = vld [vmem:[%s2315_s24 + $0x160] ss:$8 sps:$4 sm:$0xff]  }
  0x94   : > { %1256 = vmatprep.subr.bf16.mxu1 %v1744_v29  ;;  %v1770_v56 = vld [vmem:[%s2315_s24 + $0x90] ss:$8 sps:$4 sm:$0xff]   ;;  %v1801_v57 = vld [vmem:[%s2315_s24 + $0x174] ss:$8 sps:$4 sm:$0xff]   ;;  %v1774_v58 = vld [vmem:[%s2315_s24 + $0xa4] ss:$8 sps:$4 sm:$0xff]   ;;  %v1354_v29 = vlaneseq (!%p1639_p3) }
  0x95   : > { %1298 = vmatpush1.bf16.msra.mxu0 %v1773_v39  ;;  %v1803_v59 = vld [vmem:[%s2315_s24 + $0x170] ss:$8 sps:$4 sm:$0xff]   ;;  %v1776_v60 = vld [vmem:[%s2315_s24 + $0xa0] ss:$8 sps:$4 sm:$0xff]   ;;  %v1780_v61 = vld [vmem:[%s2315_s24 + $0xb4] ss:$8 sps:$4 sm:$0xff]  }
  0x96   : > { %1299 = vmatprep.subr.bf16.mxu0 %v1777_v41  ;;  %v1782_v63 = vld [vmem:[%s2315_s24 + $0xb0] ss:$8 sps:$4 sm:$0xff]   ;;  %v1786_v0 = vld [vmem:[%s2315_s24 + $0xc4] ss:$8 sps:$4 sm:$0xff]   ;;  %v1788_v1 = vld [vmem:[%s2315_s24 + $0xc0] ss:$8 sps:$4 sm:$0xff]  }
  0x97   : > { %1257 = vmatpush1.bf16.msra.mxu1 %v1746_v30  ;;  %v1792_v2 = vld [vmem:[%s2315_s24 + $0xd4] ss:$8 sps:$4 sm:$0xff]   ;;  %v1794_v3 = vld [vmem:[%s2315_s24 + $0xd0] ss:$8 sps:$4 sm:$0xff]   ;;  %v1798_v4 = vld [vmem:[%s2315_s24 + $0xe4] ss:$8 sps:$4 sm:$0xff]  }
  0x98   : > { %1258 = vmatprep.subr.bf16.mxu1 %v1747_v33  ;;  %v1800_v5 = vld [vmem:[%s2315_s24 + $0xe0] ss:$8 sps:$4 sm:$0xff]   ;;  %v1804_v6 = vld [vmem:[%s2315_s24 + $0xf4] ss:$8 sps:$4 sm:$0xff]   ;;  %v1806_v7 = vld [vmem:[%s2315_s24 + $0xf0] ss:$8 sps:$4 sm:$0xff]  }
  0x99   : > { %1300 = vmatpush1.bf16.msra.mxu0 %v1779_v43  ;;  %v936_v23 = vld [vmem:[#allocation2 + $0x18] sm:$0xff]  ;;  %v1355_v30 = vshrl.u32 (!%p1639_p3), %v1354_v29, 7  ;;  %v1352_v31 = vld [vmem:[%s914_s5] sm:$0x3] (!%p1639_p3) }
  0x9a   : > { %1301 = vmatprep.subr.bf16.mxu0 %v1783_v45  ;;  %v1368_v32 = vld [vmem:[%s919_s6] sm:$0x3] (!%p1639_p3) }
  0x9b   : > { %1259 = vmatpush1.bf16.msra.mxu1 %v1749_v36  ;;  %v1356_v34 = vsub.s32 (!%p1639_p3), 0, %v1355_v30  ;;  %v1360_v35 = vsub.s32 (!%p1639_p3), 1, %v1355_v30 }
  0x9c   : > { %1260 = vmatprep.subr.bf16.mxu1 %v1750_v37 }
  0x9d   : > { %1302 = vmatpush1.bf16.msra.mxu0 %v1785_v47  ;;  %v1357_v39 = vrot.slane (!%p1639_p3), %v1352_v31, %v1356_v34  ;;  %v1373_v41 = vrot.slane (!%p1639_p3), %v1368_v32, %v1356_v34 }
  0x9e   : > { %1303 = vmatprep.subr.bf16.mxu0 %v1789_v49 }
  0x9f   : > { %1261 = vmatpush1.bf16.msra.mxu1 %v1752_v40  ;;  %v1361_v40 = vrot.slane (!%p1639_p3), %v1352_v31, %v1360_v35 }
  0xa0   : > { %1262 = vmatprep.subr.bf16.mxu1 %v1753_v42  ;;  %v1377_v42 = vrot.slane (!%p1639_p3), %v1368_v32, %v1360_v35 }
  0xa1   : > { %1304 = vmatpush1.bf16.msra.mxu0 %v1791_v51 }
  0xa2   : > { %1305 = vmatprep.subr.bf16.mxu0 %v1795_v53 }
  0xa3   : > { %1263 = vmatpush1.bf16.msra.mxu1 %v1755_v44 }
  0xa4   : > { %1264 = vmatprep.subr.bf16.mxu1 %v1756_v46 }
  0xa5   : > { %1306 = vmatpush1.bf16.msra.mxu0 %v1797_v55 }
  0xa6   : > { %1307 = vmatprep.subr.bf16.mxu0 %v1801_v57 }
  0xa7   : > { %1265 = vmatpush1.bf16.msra.mxu1 %v1758_v48 }
  0xa8   : > { %1266 = vmatprep.subr.bf16.mxu1 %v1762_v50 }
  0xa9   : > { %1308 = vmatpush1.bf16.msra.mxu0 %v1803_v59 }
  0xab   : > { %1267 = vmatpush1.bf16.msra.mxu1 %v1764_v52 }
  0xac   : > { %1268 = vmatprep.subr.bf16.mxu1 %v1768_v54  ;;  %1326 = vmatmul.mubr.bf16.vlgmr.msra.gmra.mrb[0].mxu0 %v1807_v62 }
  0xaf   : > { %1269 = vmatpush1.bf16.msra.mxu1 %v1770_v56 }
  0xb0   : > { %1270 = vmatprep.subr.bf16.mxu1 %v1774_v58 }
  0xb3   : > { %1271 = vmatpush1.bf16.msra.mxu1 %v1776_v60 }
  0xb4   : > { %1272 = vmatprep.subr.bf16.mxu1 %v1780_v61 }
  0xb7   : > { %1273 = vmatpush1.bf16.msra.mxu1 %v1782_v63 }
  0xb8   : > { %1274 = vmatprep.subr.bf16.mxu1 %v1786_v0 }
  0xbb   : > { %1275 = vmatpush1.bf16.msra.mxu1 %v1788_v1 }
  0xbc   : > { %1276 = vmatprep.subr.bf16.mxu1 %v1792_v2 }
  0xbf   : > { %1277 = vmatpush1.bf16.msra.mxu1 %v1794_v3 }
  0xc0   : > { %1278 = vmatprep.subr.bf16.mxu1 %v1798_v4 }
  0xc3   : > { %1279 = vmatpush1.bf16.msra.mxu1 %v1800_v5 }
  0xc4   : > { %1280 = vmatprep.subr.bf16.mxu1 %v1804_v6 }
  0xc7   : > { %1281 = vmatpush1.bf16.msra.mxu1 %v1806_v7 }
  0xca   : > { %1283 = vmatmul.mubr.bf16.vlgmr.msra.gmra.mrb[0].mxu1 %v1808_v8 }
 0x17f   : > { %v1327_v9 = vpop.f32.mrb[0].mxu0 }
 0x180   : > { %v1329_v10 = vpop.f32.mrb[1].mxu0 }
 0x181   : > { %v1331_v11 = vpop.f32.mrb[2].mxu0 }
 0x182   : > { %v1333_v12 = vpop.f32.mrb[3].mxu0 }
 0x19d   : > { %v1284_v14 = vpop.f32.mrb[0].mxu1 }
 0x19e   : > { %v1328_v15 = vadd.f32 %v1327_v9, %v1284_v14  ;;  %v1286_v17 = vpop.f32.mrb[1].mxu1 }
 0x19f   : > { %v1330_v18 = vadd.f32 %v1329_v10, %v1286_v17  ;;  %v1288_v20 = vpop.f32.mrb[2].mxu1  ;;  %1347 = sbr.rel (%p1639_p3) target bundleno = 438 (0x1b6), region = 108 }
 0x1a0   : > { %v1336_v21 = vadd.f32 %v1328_v15, %v933_v13  ;;  %v1332_v22 = vadd.f32 %v1331_v11, %v1288_v20  ;;  %v1290_v24 = vpop.f32.mrb[3].mxu1 }
 0x1a1   : > { %v1337_v25 = vadd.f32 %v1330_v18, %v934_v16  ;;  %v1334_v26 = vadd.f32 %v1333_v12, %v1290_v24 }
 0x1a2   : > { %1340 = vst [vmem:[#allocation2] sm:$0xff] %v1336_v21  ;;  %v1338_v27 = vadd.f32 %v1332_v22, %v935_v19 }
 0x1a3   : > { %1341 = vst [vmem:[#allocation2 + $0x8] sm:$0xff] %v1337_v25  ;;  %v1339_v28 = vadd.f32 %v1334_v26, %v936_v23 }
 0x1a4   : > { %1342 = vst [vmem:[#allocation2 + $0x10] sm:$0xff] %v1338_v27 }
 0x1a5   : > { %1343 = vst [vmem:[#allocation2 + $0x18] sm:$0xff] %v1339_v28 }
 0x1a9   : > { %v1348_v33 = vld [vmem:[#allocation2] sm:$0xff] }
 0x1aa   : > { %v1349_v36 = vld [vmem:[#allocation2 + $0x8] sm:$0xff]  ;;  %v1364_v43 = vmul.f32 %v1357_v39, %v1348_v33 }
 0x1ab   : > { %v1350_v37 = vld [vmem:[#allocation2 + $0x10] sm:$0xff]  ;;  %v1365_v44 = vmul.f32 %v1361_v40, %v1349_v36 }
 0x1ac   : > { %v1351_v38 = vld [vmem:[#allocation2 + $0x18] sm:$0xff]  ;;  %v1366_v45 = vmul.f32 %v1357_v39, %v1350_v37  ;;  %v1380_v47 = vadd.f32 %v1373_v41, %v1364_v43 }
 0x1ad   : > { %v1367_v46 = vmul.f32 %v1361_v40, %v1351_v38  ;;  %v1381_v48 = vadd.f32 %v1377_v42, %v1365_v44 }
 0x1ae   : > { %v1382_v49 = vadd.f32 %v1373_v41, %v1366_v45  ;;  %v1384_v51 = vmax.f32 %v1380_v47, 0.0 }
 0x1af   : > { %v1383_v50 = vadd.f32 %v1377_v42, %v1367_v46  ;;  %v1385_v52 = vmax.f32 %v1381_v48, 0.0 }
 0x1b0   : > { %v1386_v53 = vmax.f32 %v1382_v49, 0.0 }
 0x1b1   : > { %v1387_v54 = vmax.f32 %v1383_v50, 0.0  ;;  %v1650_v55 = vpack.c.bf16 %v1385_v52, %v1384_v51 }
 0x1b3   : > { %v1651_v56 = vpack.c.bf16 %v1387_v54, %v1386_v53  ;;  %1400 = vst [vmem:[%s2310_s17] sm:$0xff] %v1650_v55 }
 0x1b5   : > { %1401 = vst [vmem:[%s2310_s17 + $0x8] sm:$0xff] %v1651_v56 }
 0x1b6 PF: > { %1408 = sbr.rel (!%p1984_p10) target bundleno = 446 (0x1be), region = 112  ;;  %s1652_s19 = sshll.u32 (%p1984_p10), %s1869_s20, 3 }
 0x1b7   : > { %s1414_s9 = scalar_lea.vmem (%p1984_p10), %s2419_s4, %s1652_s19 }
 0x1ba   : > { %v1444_v57 = vld [vmem:[%s2310_s17] sm:$0xff] (%p1984_p10) }
 0x1bb   : > { %1445 = vst [vmem:[%s1414_s9] sm:$0xff] (%p1984_p10), %v1444_v57 }
 0x1bc   : > { %v1446_v58 = vld [vmem:[%s2310_s17 + $0x8] sm:$0xff] (%p1984_p10) }
 0x1bd   : > { %1447 = vst [vmem:[%s1414_s9 + $0x10] sm:$0xff] %v1446_v58 }
 0x1be PF: > { %s14_s23 = sadd.s32 1, %s1881_s23   ;;  %s2424_s15 = smov %s1853_s16 }
 0x1bf   : > { %p11_p4 = scmp.ge.s32.totalorder %s14_s23, 8   ;;  %s2425_s16 = smov %s1982_s7 }
 0x1c0   : > { %s2426_s17 = smov %s1861_s18  ;;  %s2427_s18 = smov %s1971_s30 }
 0x1c1   : > { %s2428_s19 = smov %s1873_s21  ;;  %s2429_s20 = smov %s1877_s22 }
 0x1c2   : > { %s2430_s21 = smov %s2433_s25  ;;  %s2431_s22 = smov %s2437_s26 }
 0x1c3   :  { %13 = sbr.rel (!%p11_p4) target bundleno = 7 (0x7), region = 202 }

// kernel: deeplabv3plus_forward.19
= control target key start
LH: loop header
LB: loop body
LE: loop exit
PB: predicated region body
PF: predicated region fallthrough
CT: control target
= control target key end

     0   :  { %s1681_s15 = smov 0   ;;  %s1683_s16 = smov 0   ;;  %s1866_s0 = inlined_call_operand.vmem [shape: bf16[16,4608], index: 0, kind: input, shape index: {}]   ;;  %s1867_s1 = inlined_call_operand.vmem [shape: bf16[4608,256], index: 1, kind: input, shape index: {}]   ;;  %s1868_s2 = inlined_call_operand.vmem [shape: f32[1,256], index: 2, kind: input, shape index: {}]   ;;  %s1869_s3 = inlined_call_operand.vmem [shape: f32[1,256], index: 3, kind: input, shape index: {}]   ;;  %s1870_s4 = inlined_call_operand.vmem [shape: bf16[16,256], index: 4, kind: output, shape index: {}]  }
   0x1   :  { %s1685_s17 = smov 0   ;;  %s1687_s18 = smov 0  }
   0x2   :  { %s1689_s19 = smov 0  }
   0x3 LB: > { %s26_s20 = sadd.s32 1, %s1649_s18  ;;  %p49_p1 = scmp.ne.s32.totalorder %s1641_s16, %s1637_s15  ;;  %s1653_s19 = sphi %s1689_s19, %s14_s19   ;;  %s1649_s18 = sphi %s1687_s18, %s1874_s18   ;;  %s1645_s17 = sphi %s1685_s17, %s1873_s17   ;;  %s1641_s16 = sphi %s1683_s16, %s1872_s16   ;;  %s1637_s15 = sphi %s1681_s15, %s1871_s15  }
   0x4   : > { %p27_p0 = scmp.ge.s32.totalorder %s26_s20, 6  ;;  %p50_p2 = scmp.eq.s32.totalorder %s1653_s19, 0 }
   0x5   : > { %s42_s22 = sadd.s32 1, %s1641_s16  ;;  %p1292_p5 = scmp.ge.s32.totalorder %s1653_s19, 6 }
   0x6   : > { %s1876_s20 = smov (%p27_p0, %s26_s20), 0  ;;  %p51_p3 = por %p50_p2, %p49_p1 }
   0x7   : > { %s38_s21 = ssub.s32 %s1649_s18, %s1876_s20  ;;  %206 = sbr.rel (%p1292_p5) target bundleno = 22 (0x16), region = 28 }
   0x8   : > { %p40_p4 = scmp.eq.s32.totalorder %s38_s21, 0 }
   0xa   : > { %s1716_s23 = scalar_select %p40_p4, %s1641_s16, %s42_s22  }
   0xe   : > { %209 = sbr.rel (!%p51_p3) target bundleno = 22 (0x16), region = 32  ;;  %s211_s24 = sand.u32 (%p51_p3), 1, %s1641_s16  }
   0xf   : > { %s1407_s25 = smul.u32 (%p51_p3), 24, %s1649_s18 }
  0x10   : > { %s1419_s26 = smul.u32 (%p51_p3), 48, %s211_s24 }
  0x11   : > { %s219_s29 = scalar_lea.vmem (%p51_p3), %s1866_s0, %s1407_s25 }
  0x12   : > { %v232_v0 = vld [vmem:[%s219_s29] sm:$0xff] (%p51_p3)  ;;  %v234_v1 = vld [vmem:[%s219_s29 + $0x8] sm:$0xff] (%p51_p3)  ;;  %v236_v2 = vld [vmem:[%s219_s29 + $0x10] sm:$0xff] (%p51_p3)  ;;  %s213_s30 = scalar_lea.vmem (%p51_p3), [#allocation3], %s1419_s26 }
  0x13   : > { %233 = vst [vmem:[%s213_s30] sm:$0xff] (%p51_p3), %v232_v0  ;;  %235 = vst [vmem:[%s213_s30 + $0x8] sm:$0xff] (%p51_p3), %v234_v1  ;;  %v238_v3 = vld [vmem:[%s219_s29 + $0x90] sm:$0xff] (%p51_p3)  ;;  %v240_v4 = vld [vmem:[%s219_s29 + $0x98] sm:$0xff] (%p51_p3) }
  0x14   : > { %237 = vst [vmem:[%s213_s30 + $0x10] sm:$0xff] (%p51_p3), %v236_v2  ;;  %v242_v5 = vld [vmem:[%s219_s29 + $0xa0] sm:$0xff] (%p51_p3)  ;;  %239 = vst [vmem:[%s213_s30 + $0x18] sm:$0xff] (%p51_p3), %v238_v3 }
  0x15   : > { %241 = vst [vmem:[%s213_s30 + $0x20] sm:$0xff] %v240_v4  ;;  %243 = vst [vmem:[%s213_s30 + $0x28] sm:$0xff] %v242_v5 }
  0x16 PF: > { %p1294_p6 = scmp.ge.s32.totalorder %s1653_s19, 1  ;;  %p248_p7 = scmp.lt.s32.totalorder %s1653_s19, 7 }
  0x18   : > { %p249_p8 = pnand %p1294_p6, %p248_p7 }
  0x19   : > { %s255_s5 = sand.u32 (!%p249_p8), 1, %s1637_s15   ;;  %p1295_p9 = scmp.ne.s32.totalorder (!%p249_p8), %s1645_s17, 0 }
  0x1a   : > { %252 = sbr.rel (%p249_p8) target bundleno = 410 (0x19a), region = 55 }
  0x1b   : > { %s1420_s6 = smul.u32 (!%p249_p8), 48, %s255_s5 }
  0x1d   : > { %s1727_s7 = scalar_lea.vmem (!%p249_p8), [#allocation3], %s1420_s6 }
  0x21   : > { %331 = sbr.rel (%p1295_p9) target bundleno = 40 (0x28), region = 63  ;;  %v1655_v6 = vmov (!%p1295_p9), 0.0  }
  0x22   : > { %332 = vst [vmem:[#allocation2] sm:$0xff] (!%p1295_p9), %v1655_v6  ;;  %333 = vst [vmem:[#allocation2 + $0x8] sm:$0xff] (!%p1295_p9), %v1655_v6 }
  0x23   : > { %334 = vst [vmem:[#allocation2 + $0x10] sm:$0xff] (!%p1295_p9), %v1655_v6  ;;  %335 = vst [vmem:[#allocation2 + $0x18] sm:$0xff] (!%p1295_p9), %v1655_v6 }
  0x28 PF: > { %s336_s8 = smul.u32 768, %s1645_s17  ;;  %v1515_v7 = vld [vmem:[%s1727_s7 + $0xc] ss:$24 sps:$4 sm:$0xff]   ;;  %v1513_v1 = vld [vmem:[%s1727_s7 + $0x8] ss:$24 sps:$4 sm:$0xff]   ;;  %p1400_p10 = scmp.ne.s32.totalorder %s1645_s17, 5 }
  0x29   : > { %v1608_v8 = vld [vmem:[%s1727_s7 + $0x4] ss:$24 sps:$4 sm:$0xff]   ;;  %1033 = vmatprep.mubr.bf16.mxu0 %v1515_v7  ;;  %v1614_v3 = vld [vmem:[%s1727_s7 + $0x14] ss:$24 sps:$4 sm:$0xff]  }
  0x2a   : > { %s347_s9 = sshra.s32 %s336_s8, 3  ;;  %990 = vmatprep.mubr.bf16.mxu1 %v1608_v8 }
  0x2b   : > { %s1408_s10 = sshll.u32 %s347_s9, 3 }
  0x2c   : > { %s1736_s13 = scalar_lea.vmem %s1867_s1, %s1408_s10 }
  0x2d   : > { %v1462_v9 = vld [vmem:[%s1736_s13 + $0x104] ss:$8 sps:$4 sm:$0xff]   ;;  %v1464_v10 = vld [vmem:[%s1736_s13 + $0x100] ss:$8 sps:$4 sm:$0xff]   ;;  %v1465_v11 = vld [vmem:[%s1736_s13 + $0x114] ss:$8 sps:$4 sm:$0xff]  }
  0x2e   : > { %1001 = vmatprep.subr.bf16.mxu0 %v1462_v9  ;;  %v1467_v12 = vld [vmem:[%s1736_s13 + $0x110] ss:$8 sps:$4 sm:$0xff]   ;;  %v1468_v13 = vld [vmem:[%s1736_s13 + $0x124] ss:$8 sps:$4 sm:$0xff]   ;;  %v1470_v14 = vld [vmem:[%s1736_s13 + $0x120] ss:$8 sps:$4 sm:$0xff]  }
  0x2f   : > { %1002 = vmatpush1.bf16.msra.mxu0 %v1464_v10  ;;  %v1471_v15 = vld [vmem:[%s1736_s13 + $0x134] ss:$8 sps:$4 sm:$0xff]   ;;  %v1473_v16 = vld [vmem:[%s1736_s13 + $0x130] ss:$8 sps:$4 sm:$0xff]   ;;  %v1474_v17 = vld [vmem:[%s1736_s13 + $0x144] ss:$8 sps:$4 sm:$0xff]  }
  0x30   : > { %1003 = vmatprep.subr.bf16.mxu0 %v1465_v11  ;;  %v1476_v18 = vld [vmem:[%s1736_s13 + $0x140] ss:$8 sps:$4 sm:$0xff]   ;;  %v1477_v19 = vld [vmem:[%s1736_s13 + $0x154] ss:$8 sps:$4 sm:$0xff]   ;;  %v1479_v20 = vld [vmem:[%s1736_s13 + $0x150] ss:$8 sps:$4 sm:$0xff]  }
  0x31   : > { %v1480_v21 = vld [vmem:[%s1736_s13 + $0x164] ss:$8 sps:$4 sm:$0xff]   ;;  %v1512_v23 = vld [vmem:[%s1736_s13] ss:$8 sps:$4 sm:$0xff]   ;;  %v1483_v25 = vld [vmem:[%s1736_s13 + $0x174] ss:$8 sps:$4 sm:$0xff]  }
  0x32   : > { %v1509_v22 = vld [vmem:[%s1736_s13 + $0x4] ss:$8 sps:$4 sm:$0xff]   ;;  %v1482_v24 = vld [vmem:[%s1736_s13 + $0x160] ss:$8 sps:$4 sm:$0xff]   ;;  %v1519_v26 = vld [vmem:[%s1736_s13 + $0x14] ss:$8 sps:$4 sm:$0xff]  }
  0x33   : > { %1004 = vmatpush1.bf16.msra.mxu0 %v1467_v12  ;;  %958 = vmatprep.subr.bf16.mxu1 %v1509_v22  ;;  %v1521_v27 = vld [vmem:[%s1736_s13 + $0x10] ss:$8 sps:$4 sm:$0xff]   ;;  %v1486_v29 = vld [vmem:[%s1736_s13 + $0x184] ss:$8 sps:$4 sm:$0xff]   ;;  %v1527_v31 = vld [vmem:[%s1736_s13 + $0x20] ss:$8 sps:$4 sm:$0xff]  }
  0x34   : > { %1005 = vmatprep.subr.bf16.mxu0 %v1468_v13  ;;  %959 = vmatpush1.bf16.msra.mxu1 %v1512_v23  ;;  %v1485_v28 = vld [vmem:[%s1736_s13 + $0x170] ss:$8 sps:$4 sm:$0xff]   ;;  %v1525_v30 = vld [vmem:[%s1736_s13 + $0x24] ss:$8 sps:$4 sm:$0xff]   ;;  %v1531_v32 = vld [vmem:[%s1736_s13 + $0x34] ss:$8 sps:$4 sm:$0xff]  }
  0x35   : > { %960 = vmatprep.subr.bf16.mxu1 %v1519_v26  ;;  %v1488_v33 = vld [vmem:[%s1736_s13 + $0x180] ss:$8 sps:$4 sm:$0xff]   ;;  %v1489_v34 = vld [vmem:[%s1736_s13 + $0x194] ss:$8 sps:$4 sm:$0xff]   ;;  %v1533_v35 = vld [vmem:[%s1736_s13 + $0x30] ss:$8 sps:$4 sm:$0xff]  }
  0x36   : > { %v1537_v36 = vld [vmem:[%s1736_s13 + $0x44] ss:$8 sps:$4 sm:$0xff]   ;;  %v1491_v37 = vld [vmem:[%s1736_s13 + $0x190] ss:$8 sps:$4 sm:$0xff]   ;;  %v1539_v39 = vld [vmem:[%s1736_s13 + $0x40] ss:$8 sps:$4 sm:$0xff]  }
  0x37   : > { %1006 = vmatpush1.bf16.msra.mxu0 %v1470_v14  ;;  %v1492_v38 = vld [vmem:[%s1736_s13 + $0x1a4] ss:$8 sps:$4 sm:$0xff]   ;;  %v1543_v40 = vld [vmem:[%s1736_s13 + $0x54] ss:$8 sps:$4 sm:$0xff]   ;;  %v1494_v41 = vld [vmem:[%s1736_s13 + $0x1a0] ss:$8 sps:$4 sm:$0xff]  }
  0x38   : > { %1007 = vmatprep.subr.bf16.mxu0 %v1471_v15  ;;  %961 = vmatpush1.bf16.msra.mxu1 %v1521_v27  ;;  %v1495_v42 = vld [vmem:[%s1736_s13 + $0x1b4] ss:$8 sps:$4 sm:$0xff]   ;;  %v1545_v43 = vld [vmem:[%s1736_s13 + $0x50] ss:$8 sps:$4 sm:$0xff]   ;;  %v1549_v44 = vld [vmem:[%s1736_s13 + $0x64] ss:$8 sps:$4 sm:$0xff]  }
  0x39   : > { %962 = vmatprep.subr.bf16.mxu1 %v1525_v30  ;;  %v1497_v45 = vld [vmem:[%s1736_s13 + $0x1b0] ss:$8 sps:$4 sm:$0xff]   ;;  %v1498_v46 = vld [vmem:[%s1736_s13 + $0x1c4] ss:$8 sps:$4 sm:$0xff]   ;;  %v1551_v47 = vld [vmem:[%s1736_s13 + $0x60] ss:$8 sps:$4 sm:$0xff]  }
  0x3a   : > { %v1555_v48 = vld [vmem:[%s1736_s13 + $0x74] ss:$8 sps:$4 sm:$0xff]   ;;  %v1500_v49 = vld [vmem:[%s1736_s13 + $0x1c0] ss:$8 sps:$4 sm:$0xff]   ;;  %v1557_v51 = vld [vmem:[%s1736_s13 + $0x70] ss:$8 sps:$4 sm:$0xff]  }
  0x3b   : > { %1008 = vmatpush1.bf16.msra.mxu0 %v1473_v16  ;;  %v1501_v50 = vld [vmem:[%s1736_s13 + $0x1d4] ss:$8 sps:$4 sm:$0xff]   ;;  %v1561_v52 = vld [vmem:[%s1736_s13 + $0x84] ss:$8 sps:$4 sm:$0xff]   ;;  %v1503_v53 = vld [vmem:[%s1736_s13 + $0x1d0] ss:$8 sps:$4 sm:$0xff]  }
  0x3c   : > { %1009 = vmatprep.subr.bf16.mxu0 %v1474_v17  ;;  %963 = vmatpush1.bf16.msra.mxu1 %v1527_v31  ;;  %v1504_v54 = vld [vmem:[%s1736_s13 + $0x1e4] ss:$8 sps:$4 sm:$0xff]   ;;  %v1563_v55 = vld [vmem:[%s1736_s13 + $0x80] ss:$8 sps:$4 sm:$0xff]   ;;  %v1567_v56 = vld [vmem:[%s1736_s13 + $0x94] ss:$8 sps:$4 sm:$0xff]  }
  0x3d   : > { %964 = vmatprep.subr.bf16.mxu1 %v1531_v32  ;;  %v1506_v57 = vld [vmem:[%s1736_s13 + $0x1e0] ss:$8 sps:$4 sm:$0xff]   ;;  %v1507_v58 = vld [vmem:[%s1736_s13 + $0x1f4] ss:$8 sps:$4 sm:$0xff]   ;;  %v1569_v59 = vld [vmem:[%s1736_s13 + $0x90] ss:$8 sps:$4 sm:$0xff]  }
  0x3e   : > { %v1573_v60 = vld [vmem:[%s1736_s13 + $0xa4] ss:$8 sps:$4 sm:$0xff]   ;;  %v1511_v61 = vld [vmem:[%s1736_s13 + $0x1f0] ss:$8 sps:$4 sm:$0xff]   ;;  %v1575_v63 = vld [vmem:[%s1736_s13 + $0xa0] ss:$8 sps:$4 sm:$0xff]  }
  0x3f   : > { %1010 = vmatpush1.bf16.msra.mxu0 %v1476_v18  ;;  %v1518_v62 = vld [vmem:[%s1736_s13 + $0x204] ss:$8 sps:$4 sm:$0xff]   ;;  %v1579_v0 = vld [vmem:[%s1736_s13 + $0xb4] ss:$8 sps:$4 sm:$0xff]   ;;  %v1516_v2 = vld [vmem:[%s1736_s13 + $0x200] ss:$8 sps:$4 sm:$0xff]  }
  0x40   : > { %1011 = vmatprep.subr.bf16.mxu0 %v1477_v19  ;;  %965 = vmatpush1.bf16.msra.mxu1 %v1533_v35  ;;  %v1524_v4 = vld [vmem:[%s1736_s13 + $0x214] ss:$8 sps:$4 sm:$0xff]   ;;  %v1581_v5 = vld [vmem:[%s1736_s13 + $0xb0] ss:$8 sps:$4 sm:$0xff]   ;;  %v1585_v6 = vld [vmem:[%s1736_s13 + $0xc4] ss:$8 sps:$4 sm:$0xff]  }
  0x41   : > { %966 = vmatprep.subr.bf16.mxu1 %v1537_v36  ;;  %v1522_v7 = vld [vmem:[%s1736_s13 + $0x210] ss:$8 sps:$4 sm:$0xff]   ;;  %v1530_v8 = vld [vmem:[%s1736_s13 + $0x224] ss:$8 sps:$4 sm:$0xff]   ;;  %v1587_v9 = vld [vmem:[%s1736_s13 + $0xc0] ss:$8 sps:$4 sm:$0xff]  }
  0x42   : > { %v1591_v10 = vld [vmem:[%s1736_s13 + $0xd4] ss:$8 sps:$4 sm:$0xff]   ;;  %v1528_v11 = vld [vmem:[%s1736_s13 + $0x220] ss:$8 sps:$4 sm:$0xff]   ;;  %v1593_v13 = vld [vmem:[%s1736_s13 + $0xd0] ss:$8 sps:$4 sm:$0xff]  }
  0x43   : > { %1012 = vmatpush1.bf16.msra.mxu0 %v1479_v20  ;;  %v1536_v12 = vld [vmem:[%s1736_s13 + $0x234] ss:$8 sps:$4 sm:$0xff]   ;;  %v1597_v14 = vld [vmem:[%s1736_s13 + $0xe4] ss:$8 sps:$4 sm:$0xff]   ;;  %v1534_v15 = vld [vmem:[%s1736_s13 + $0x230] ss:$8 sps:$4 sm:$0xff]  }
  0x44   : > { %1013 = vmatprep.subr.bf16.mxu0 %v1480_v21  ;;  %967 = vmatpush1.bf16.msra.mxu1 %v1539_v39  ;;  %v1542_v16 = vld [vmem:[%s1736_s13 + $0x244] ss:$8 sps:$4 sm:$0xff]   ;;  %v1599_v17 = vld [vmem:[%s1736_s13 + $0xe0] ss:$8 sps:$4 sm:$0xff]   ;;  %v1603_v18 = vld [vmem:[%s1736_s13 + $0xf4] ss:$8 sps:$4 sm:$0xff]  }
  0x45   : > { %968 = vmatprep.subr.bf16.mxu1 %v1543_v40  ;;  %v1540_v19 = vld [vmem:[%s1736_s13 + $0x240] ss:$8 sps:$4 sm:$0xff]   ;;  %v1548_v20 = vld [vmem:[%s1736_s13 + $0x254] ss:$8 sps:$4 sm:$0xff]   ;;  %v1605_v21 = vld [vmem:[%s1736_s13 + $0xf0] ss:$8 sps:$4 sm:$0xff]  }
  0x46   : > { %v1546_v22 = vld [vmem:[%s1736_s13 + $0x250] ss:$8 sps:$4 sm:$0xff]   ;;  %v1560_v26 = vld [vmem:[%s1736_s13 + $0x274] ss:$8 sps:$4 sm:$0xff]   ;;  %v1578_v32 = vld [vmem:[%s1736_s13 + $0x2a4] ss:$8 sps:$4 sm:$0xff]  }
  0x47   : > { %1014 = vmatpush1.bf16.msra.mxu0 %v1482_v24  ;;  %v1606_v23 = vld [vmem:[%s1727_s7] ss:$24 sps:$4 sm:$0xff]   ;;  %v1554_v24 = vld [vmem:[%s1736_s13 + $0x264] ss:$8 sps:$4 sm:$0xff]   ;;  %v1572_v30 = vld [vmem:[%s1736_s13 + $0x294] ss:$8 sps:$4 sm:$0xff]  }
  0x48   : > { %1015 = vmatprep.subr.bf16.mxu0 %v1483_v25  ;;  %969 = vmatpush1.bf16.msra.mxu1 %v1545_v43  ;;  %v1552_v25 = vld [vmem:[%s1736_s13 + $0x260] ss:$8 sps:$4 sm:$0xff]   ;;  %v1558_v27 = vld [vmem:[%s1736_s13 + $0x270] ss:$8 sps:$4 sm:$0xff]   ;;  %v1590_v36 = vld [vmem:[%s1736_s13 + $0x2c4] ss:$8 sps:$4 sm:$0xff]  }
  0x49   : > { %970 = vmatprep.subr.bf16.mxu1 %v1549_v44  ;;  %v1570_v31 = vld [vmem:[%s1736_s13 + $0x290] ss:$8 sps:$4 sm:$0xff]   ;;  %v1602_v40 = vld [vmem:[%s1736_s13 + $0x2e4] ss:$8 sps:$4 sm:$0xff]  }
  0x4a   : > { %v1582_v35 = vld [vmem:[%s1736_s13 + $0x2b0] ss:$8 sps:$4 sm:$0xff]  }
  0x4b   : > { %1016 = vmatpush1.bf16.msra.mxu0 %v1485_v28  ;;  %v1566_v28 = vld [vmem:[%s1736_s13 + $0x284] ss:$8 sps:$4 sm:$0xff]   ;;  %v1594_v39 = vld [vmem:[%s1736_s13 + $0x2d0] ss:$8 sps:$4 sm:$0xff]  }
  0x4c   : > { %1017 = vmatprep.subr.bf16.mxu0 %v1486_v29  ;;  %971 = vmatpush1.bf16.msra.mxu1 %v1551_v47  ;;  %v1564_v29 = vld [vmem:[%s1736_s13 + $0x280] ss:$8 sps:$4 sm:$0xff]   ;;  %v1609_v43 = vld [vmem:[%s1736_s13 + $0x2f0] ss:$8 sps:$4 sm:$0xff]  }
  0x4d   : > { %972 = vmatprep.subr.bf16.mxu1 %v1555_v48  ;;  %v1612_v44 = vld [vmem:[%s1727_s7 + $0x10] ss:$24 sps:$4 sm:$0xff]  }
  0x4f   : > { %1018 = vmatpush1.bf16.msra.mxu0 %v1488_v33  ;;  %v1576_v33 = vld [vmem:[%s1736_s13 + $0x2a0] ss:$8 sps:$4 sm:$0xff]  }
  0x50   : > { %1019 = vmatprep.subr.bf16.mxu0 %v1489_v34  ;;  %973 = vmatpush1.bf16.msra.mxu1 %v1557_v51  ;;  %v1584_v34 = vld [vmem:[%s1736_s13 + $0x2b4] ss:$8 sps:$4 sm:$0xff]  }
  0x51   : > { %974 = vmatprep.subr.bf16.mxu1 %v1561_v52  ;;  %v338_v52 = vld [vmem:[#allocation2 + $0x8] sm:$0xff] }
  0x53   : > { %1020 = vmatpush1.bf16.msra.mxu0 %v1491_v37  ;;  %v1588_v37 = vld [vmem:[%s1736_s13 + $0x2c0] ss:$8 sps:$4 sm:$0xff]  }
  0x54   : > { %1021 = vmatprep.subr.bf16.mxu0 %v1492_v38  ;;  %975 = vmatpush1.bf16.msra.mxu1 %v1563_v55  ;;  %v1596_v38 = vld [vmem:[%s1736_s13 + $0x2d4] ss:$8 sps:$4 sm:$0xff]  }
  0x55   : > { %976 = vmatprep.subr.bf16.mxu1 %v1567_v56  ;;  %v339_v55 = vld [vmem:[#allocation2 + $0x10] sm:$0xff] }
  0x57   : > { %1022 = vmatpush1.bf16.msra.mxu0 %v1494_v41  ;;  %v1600_v41 = vld [vmem:[%s1736_s13 + $0x2e0] ss:$8 sps:$4 sm:$0xff]  }
  0x58   : > { %1023 = vmatprep.subr.bf16.mxu0 %v1495_v42  ;;  %977 = vmatpush1.bf16.msra.mxu1 %v1569_v59  ;;  %v1611_v42 = vld [vmem:[%s1736_s13 + $0x2f4] ss:$8 sps:$4 sm:$0xff]  }
  0x59   : > { %978 = vmatprep.subr.bf16.mxu1 %v1573_v60  ;;  %v340_v59 = vld [vmem:[#allocation2 + $0x18] sm:$0xff] }
  0x5b   : > { %1024 = vmatpush1.bf16.msra.mxu0 %v1497_v45 }
  0x5c   : > { %1025 = vmatprep.subr.bf16.mxu0 %v1498_v46  ;;  %979 = vmatpush1.bf16.msra.mxu1 %v1575_v63 }
  0x5d   : > { %980 = vmatprep.subr.bf16.mxu1 %v1579_v0 }
  0x5f   : > { %1026 = vmatpush1.bf16.msra.mxu0 %v1500_v49  ;;  %v337_v49 = vld [vmem:[#allocation2] sm:$0xff] }
  0x60   : > { %1027 = vmatprep.subr.bf16.mxu0 %v1501_v50  ;;  %981 = vmatpush1.bf16.msra.mxu1 %v1581_v5 }
  0x61   : > { %982 = vmatprep.subr.bf16.mxu1 %v1585_v6 }
  0x63   : > { %1028 = vmatpush1.bf16.msra.mxu0 %v1503_v53 }
  0x64   : > { %1029 = vmatprep.subr.bf16.mxu0 %v1504_v54  ;;  %983 = vmatpush1.bf16.msra.mxu1 %v1587_v9 }
  0x65   : > { %984 = vmatprep.subr.bf16.mxu1 %v1591_v10 }
  0x67   : > { %1030 = vmatpush1.bf16.msra.mxu0 %v1506_v57 }
  0x68   : > { %1031 = vmatprep.subr.bf16.mxu0 %v1507_v58  ;;  %985 = vmatpush1.bf16.msra.mxu1 %v1593_v13 }
  0x69   : > { %986 = vmatprep.subr.bf16.mxu1 %v1597_v14 }
  0x6b   : > { %1032 = vmatpush1.bf16.msra.mxu0 %v1511_v61 }
  0x6c   : > { %1044 = vmatprep.subr.bf16.mxu0 %v1518_v62  ;;  %987 = vmatpush1.bf16.msra.mxu1 %v1599_v17 }
  0x6d   : > { %988 = vmatprep.subr.bf16.mxu1 %v1603_v18 }
  0x6e   : > { %1034 = vmatmul.mubr.bf16.vlgmr.msra.gmra.mrb[0].mxu0 %v1513_v1  ;;  %v1105_v1 = vlaneseq (!%p1400_p10) }
  0x6f   : > { %1045 = vmatpush1.bf16.msra.mxu0 %v1516_v2  ;;  %1076 = vmatprep.mubr.bf16.mxu0 %v1614_v3  ;;  %v1103_v3 = vld [vmem:[%s1868_s2] sm:$0x3] (!%p1400_p10) }
  0x70   : > { %1046 = vmatprep.subr.bf16.mxu0 %v1524_v4  ;;  %989 = vmatpush1.bf16.msra.mxu1 %v1605_v21  ;;  %v1106_v2 = vshrl.u32 (!%p1400_p10), %v1105_v1, 7  ;;  %v1119_v4 = vld [vmem:[%s1869_s3] sm:$0x3] (!%p1400_p10) }
  0x72   : > { %v1107_v6 = vsub.s32 (!%p1400_p10), 0, %v1106_v2 }
  0x73   : > { %1047 = vmatpush1.bf16.msra.mxu0 %v1522_v7  ;;  %991 = vmatmul.mubr.bf16.vlgmr.msra.gmra.mrb[0].mxu1 %v1606_v23  ;;  %v1111_v7 = vsub.s32 (!%p1400_p10), 1, %v1106_v2 }
  0x74   : > { %1048 = vmatprep.subr.bf16.mxu0 %v1530_v8  ;;  %v1124_v13 = vrot.slane (!%p1400_p10), %v1119_v4, %v1107_v6 }
  0x75   : > { %v1128_v14 = vrot.slane (!%p1400_p10), %v1119_v4, %v1111_v7 }
  0x77   : > { %1049 = vmatpush1.bf16.msra.mxu0 %v1528_v11  ;;  %v1108_v11 = vrot.slane (!%p1400_p10), %v1103_v3, %v1107_v6 }
  0x78   : > { %1050 = vmatprep.subr.bf16.mxu0 %v1536_v12  ;;  %v1112_v12 = vrot.slane (!%p1400_p10), %v1103_v3, %v1111_v7 }
  0x7b   : > { %1051 = vmatpush1.bf16.msra.mxu0 %v1534_v15 }
  0x7c   : > { %1052 = vmatprep.subr.bf16.mxu0 %v1542_v16 }
  0x7f   : > { %1053 = vmatpush1.bf16.msra.mxu0 %v1540_v19 }
  0x80   : > { %1054 = vmatprep.subr.bf16.mxu0 %v1548_v20 }
  0x83   : > { %1055 = vmatpush1.bf16.msra.mxu0 %v1546_v22 }
  0x84   : > { %1056 = vmatprep.subr.bf16.mxu0 %v1554_v24 }
  0x87   : > { %1057 = vmatpush1.bf16.msra.mxu0 %v1552_v25 }
  0x88   : > { %1058 = vmatprep.subr.bf16.mxu0 %v1560_v26 }
  0x8b   : > { %1059 = vmatpush1.bf16.msra.mxu0 %v1558_v27 }
  0x8c   : > { %1060 = vmatprep.subr.bf16.mxu0 %v1566_v28 }
  0x8f   : > { %1061 = vmatpush1.bf16.msra.mxu0 %v1564_v29 }
  0x90   : > { %1062 = vmatprep.subr.bf16.mxu0 %v1572_v30 }
  0x93   : > { %1063 = vmatpush1.bf16.msra.mxu0 %v1570_v31 }
  0x94   : > { %1064 = vmatprep.subr.bf16.mxu0 %v1578_v32 }
  0x97   : > { %1065 = vmatpush1.bf16.msra.mxu0 %v1576_v33 }
  0x98   : > { %1066 = vmatprep.subr.bf16.mxu0 %v1584_v34 }
  0x9b   : > { %1067 = vmatpush1.bf16.msra.mxu0 %v1582_v35 }
  0x9c   : > { %1068 = vmatprep.subr.bf16.mxu0 %v1590_v36 }
  0x9f   : > { %1069 = vmatpush1.bf16.msra.mxu0 %v1588_v37 }
  0xa0   : > { %1070 = vmatprep.subr.bf16.mxu0 %v1596_v38 }
  0xa3   : > { %1071 = vmatpush1.bf16.msra.mxu0 %v1594_v39 }
  0xa4   : > { %1072 = vmatprep.subr.bf16.mxu0 %v1602_v40 }
  0xa7   : > { %1073 = vmatpush1.bf16.msra.mxu0 %v1600_v41 }
  0xa8   : > { %1074 = vmatprep.subr.bf16.mxu0 %v1611_v42 }
  0xab   : > { %1075 = vmatpush1.bf16.msra.mxu0 %v1609_v43 }
  0xae   : > { %1077 = vmatmul.mubr.bf16.vlgmr.msra.gmra.mrb[0].mxu0 %v1612_v44 }
 0x146   : > { %v992_v45 = vpop.f32.mrb[0].mxu1 }
 0x147   : > { %v994_v46 = vpop.f32.mrb[1].mxu1 }
 0x148   : > { %v996_v47 = vpop.f32.mrb[2].mxu1 }
 0x149   : > { %v998_v48 = vpop.f32.mrb[3].mxu1 }
 0x181   : > { %v1078_v50 = vpop.f32.mrb[0].mxu0 }
 0x182   : > { %v1411_v51 = vadd.f32 %v1078_v50, %v992_v45  ;;  %v1080_v53 = vpop.f32.mrb[1].mxu0 }
 0x183   : > { %v1412_v54 = vadd.f32 %v1080_v53, %v994_v46  ;;  %v1082_v56 = vpop.f32.mrb[2].mxu0  ;;  %1098 = sbr.rel (%p1400_p10) target bundleno = 410 (0x19a), region = 67 }
 0x184   : > { %v1087_v57 = vadd.f32 %v1411_v51, %v337_v49  ;;  %v1413_v58 = vadd.f32 %v1082_v56, %v996_v47  ;;  %v1084_v60 = vpop.f32.mrb[3].mxu0 }
 0x185   : > { %v1088_v61 = vadd.f32 %v1412_v54, %v338_v52  ;;  %v1414_v62 = vadd.f32 %v1084_v60, %v998_v48 }
 0x186   : > { %1091 = vst [vmem:[#allocation2] sm:$0xff] %v1087_v57  ;;  %v1089_v63 = vadd.f32 %v1413_v58, %v339_v55 }
 0x187   : > { %1092 = vst [vmem:[#allocation2 + $0x8] sm:$0xff] %v1088_v61  ;;  %v1090_v0 = vadd.f32 %v1414_v62, %v340_v59 }
 0x188   : > { %1093 = vst [vmem:[#allocation2 + $0x10] sm:$0xff] %v1089_v63 }
 0x189   : > { %1094 = vst [vmem:[#allocation2 + $0x18] sm:$0xff] %v1090_v0 }
 0x18d   : > { %v1099_v5 = vld [vmem:[#allocation2] sm:$0xff] }
 0x18e   : > { %v1100_v8 = vld [vmem:[#allocation2 + $0x8] sm:$0xff]  ;;  %v1115_v15 = vmul.f32 %v1108_v11, %v1099_v5 }
 0x18f   : > { %v1101_v9 = vld [vmem:[#allocation2 + $0x10] sm:$0xff]  ;;  %v1116_v16 = vmul.f32 %v1112_v12, %v1100_v8 }
 0x190   : > { %v1102_v10 = vld [vmem:[#allocation2 + $0x18] sm:$0xff]  ;;  %v1117_v17 = vmul.f32 %v1108_v11, %v1101_v9  ;;  %v1131_v19 = vadd.f32 %v1124_v13, %v1115_v15 }
 0x191   : > { %v1118_v18 = vmul.f32 %v1112_v12, %v1102_v10  ;;  %v1132_v20 = vadd.f32 %v1128_v14, %v1116_v16 }
 0x192   : > { %v1133_v21 = vadd.f32 %v1124_v13, %v1117_v17  ;;  %v1135_v23 = vmax.f32 %v1131_v19, 0.0 }
 0x193   : > { %v1134_v22 = vadd.f32 %v1128_v14, %v1118_v18  ;;  %v1136_v24 = vmax.f32 %v1132_v20, 0.0 }
 0x194   : > { %v1137_v25 = vmax.f32 %v1133_v21, 0.0 }
 0x195   : > { %v1138_v26 = vmax.f32 %v1134_v22, 0.0  ;;  %v1409_v27 = vpack.c.bf16 %v1136_v24, %v1135_v23 }
 0x197   : > { %v1410_v28 = vpack.c.bf16 %v1138_v26, %v1137_v25  ;;  %1151 = vst [vmem:[%s1870_s4] sm:$0xff] %v1409_v27 }
 0x199   : > { %1152 = vst [vmem:[%s1870_s4 + $0x8] sm:$0xff] %v1410_v28 }
 0x19a PF: > { %s14_s19 = sadd.s32 1, %s1653_s19   ;;  %s1871_s15 = smov %s1641_s16 }
 0x19b   : > { %p11_p11 = scmp.ge.s32.totalorder %s14_s19, 8   ;;  %s1872_s16 = smov %s1716_s23 }
 0x19c   : > { %s1873_s17 = smov %s1649_s18  ;;  %s1874_s18 = smov %s1876_s20 }
 0x19d   :  { %13 = sbr.rel (!%p11_p11) target bundleno = 3 (0x3), region = 112 }

// kernel: deeplabv3plus_forward.18
= control target key start
LH: loop header
LB: loop body
LE: loop exit
PB: predicated region body
PF: predicated region fallthrough
CT: control target
= control target key end

     0   :  { %s1019_s1 = inlined_call_operand.vmem [shape: bf16[512,256], index: 1, kind: input, shape index: {}]   ;;  %s1020_s0 = inlined_call_operand.vmem [shape: bf16[16,512], index: 0, kind: input, shape index: {}]   ;;  %s1021_s2 = inlined_call_operand.vmem [shape: f32[1,256], index: 2, kind: input, shape index: {}]   ;;  %s1022_s3 = inlined_call_operand.vmem [shape: f32[1,256], index: 3, kind: input, shape index: {}]   ;;  %s1023_s4 = inlined_call_operand.vmem [shape: bf16[16,256], index: 4, kind: output, shape index: {}]  }
   0x1   :  { %v676_v0 = vld [vmem:[%s1019_s1 + $0x4] ss:$8 sps:$4 sm:$0xff]   ;;  %v680_v2 = vld [vmem:[%s1019_s1] ss:$8 sps:$4 sm:$0xff]   ;;  %v682_v4 = vld [vmem:[%s1019_s1 + $0x14] ss:$8 sps:$4 sm:$0xff]  }
   0x2   :  { %v678_v1 = vld [vmem:[%s1019_s1 + $0x104] ss:$8 sps:$4 sm:$0xff]   ;;  %443 = vmatprep.subr.bf16.mxu1 %v676_v0  ;;  %v681_v3 = vld [vmem:[%s1019_s1 + $0x100] ss:$8 sps:$4 sm:$0xff]   ;;  %v684_v5 = vld [vmem:[%s1019_s1 + $0x114] ss:$8 sps:$4 sm:$0xff]  }
   0x3   :  { %486 = vmatprep.subr.bf16.mxu0 %v678_v1  ;;  %444 = vmatpush1.bf16.msra.mxu1 %v680_v2  ;;  %v686_v6 = vld [vmem:[%s1019_s1 + $0x10] ss:$8 sps:$4 sm:$0xff]   ;;  %v688_v8 = vld [vmem:[%s1019_s1 + $0x24] ss:$8 sps:$4 sm:$0xff]   ;;  %v692_v10 = vld [vmem:[%s1019_s1 + $0x20] ss:$8 sps:$4 sm:$0xff]  }
   0x4   :  { %487 = vmatpush1.bf16.msra.mxu0 %v681_v3  ;;  %445 = vmatprep.subr.bf16.mxu1 %v682_v4  ;;  %v687_v7 = vld [vmem:[%s1019_s1 + $0x110] ss:$8 sps:$4 sm:$0xff]   ;;  %v690_v9 = vld [vmem:[%s1019_s1 + $0x124] ss:$8 sps:$4 sm:$0xff]   ;;  %v693_v11 = vld [vmem:[%s1019_s1 + $0x120] ss:$8 sps:$4 sm:$0xff]   ;;  %v546_v4 = vlaneseq }
   0x5   :  { %488 = vmatprep.subr.bf16.mxu0 %v684_v5  ;;  %v694_v12 = vld [vmem:[%s1019_s1 + $0x34] ss:$8 sps:$4 sm:$0xff]   ;;  %v698_v14 = vld [vmem:[%s1019_s1 + $0x30] ss:$8 sps:$4 sm:$0xff]   ;;  %v700_v16 = vld [vmem:[%s1019_s1 + $0x44] ss:$8 sps:$4 sm:$0xff]  }
   0x6   :  { %v696_v13 = vld [vmem:[%s1019_s1 + $0x134] ss:$8 sps:$4 sm:$0xff]   ;;  %v699_v15 = vld [vmem:[%s1019_s1 + $0x130] ss:$8 sps:$4 sm:$0xff]   ;;  %v702_v17 = vld [vmem:[%s1019_s1 + $0x144] ss:$8 sps:$4 sm:$0xff]  }
   0x7   :  { %446 = vmatpush1.bf16.msra.mxu1 %v686_v6  ;;  %v704_v18 = vld [vmem:[%s1019_s1 + $0x40] ss:$8 sps:$4 sm:$0xff]   ;;  %v706_v20 = vld [vmem:[%s1019_s1 + $0x54] ss:$8 sps:$4 sm:$0xff]   ;;  %v710_v22 = vld [vmem:[%s1019_s1 + $0x50] ss:$8 sps:$4 sm:$0xff]  }
   0x8   :  { %489 = vmatpush1.bf16.msra.mxu0 %v687_v7  ;;  %447 = vmatprep.subr.bf16.mxu1 %v688_v8  ;;  %v705_v19 = vld [vmem:[%s1019_s1 + $0x140] ss:$8 sps:$4 sm:$0xff]   ;;  %v708_v21 = vld [vmem:[%s1019_s1 + $0x154] ss:$8 sps:$4 sm:$0xff]   ;;  %v711_v23 = vld [vmem:[%s1019_s1 + $0x150] ss:$8 sps:$4 sm:$0xff]  }
   0x9   :  { %490 = vmatprep.subr.bf16.mxu0 %v690_v9  ;;  %v712_v24 = vld [vmem:[%s1019_s1 + $0x64] ss:$8 sps:$4 sm:$0xff]   ;;  %v716_v26 = vld [vmem:[%s1019_s1 + $0x60] ss:$8 sps:$4 sm:$0xff]   ;;  %v718_v28 = vld [vmem:[%s1019_s1 + $0x74] ss:$8 sps:$4 sm:$0xff]  }
   0xa   :  { %v714_v25 = vld [vmem:[%s1019_s1 + $0x164] ss:$8 sps:$4 sm:$0xff]   ;;  %v717_v27 = vld [vmem:[%s1019_s1 + $0x160] ss:$8 sps:$4 sm:$0xff]   ;;  %v720_v29 = vld [vmem:[%s1019_s1 + $0x174] ss:$8 sps:$4 sm:$0xff]  }
   0xb   :  { %448 = vmatpush1.bf16.msra.mxu1 %v692_v10  ;;  %v722_v30 = vld [vmem:[%s1019_s1 + $0x70] ss:$8 sps:$4 sm:$0xff]   ;;  %v724_v32 = vld [vmem:[%s1019_s1 + $0x84] ss:$8 sps:$4 sm:$0xff]   ;;  %v728_v34 = vld [vmem:[%s1019_s1 + $0x80] ss:$8 sps:$4 sm:$0xff]  }
   0xc   :  { %491 = vmatpush1.bf16.msra.mxu0 %v693_v11  ;;  %449 = vmatprep.subr.bf16.mxu1 %v694_v12  ;;  %v723_v31 = vld [vmem:[%s1019_s1 + $0x170] ss:$8 sps:$4 sm:$0xff]   ;;  %v726_v33 = vld [vmem:[%s1019_s1 + $0x184] ss:$8 sps:$4 sm:$0xff]   ;;  %v729_v35 = vld [vmem:[%s1019_s1 + $0x180] ss:$8 sps:$4 sm:$0xff]  }
   0xd   :  { %492 = vmatprep.subr.bf16.mxu0 %v696_v13  ;;  %v730_v36 = vld [vmem:[%s1019_s1 + $0x94] ss:$8 sps:$4 sm:$0xff]   ;;  %v734_v38 = vld [vmem:[%s1019_s1 + $0x90] ss:$8 sps:$4 sm:$0xff]   ;;  %v736_v40 = vld [vmem:[%s1019_s1 + $0xa4] ss:$8 sps:$4 sm:$0xff]  }
   0xe   :  { %v732_v37 = vld [vmem:[%s1019_s1 + $0x194] ss:$8 sps:$4 sm:$0xff]   ;;  %v735_v39 = vld [vmem:[%s1019_s1 + $0x190] ss:$8 sps:$4 sm:$0xff]   ;;  %v738_v41 = vld [vmem:[%s1019_s1 + $0x1a4] ss:$8 sps:$4 sm:$0xff]  }
   0xf   :  { %450 = vmatpush1.bf16.msra.mxu1 %v698_v14  ;;  %v740_v42 = vld [vmem:[%s1019_s1 + $0xa0] ss:$8 sps:$4 sm:$0xff]   ;;  %v742_v44 = vld [vmem:[%s1019_s1 + $0xb4] ss:$8 sps:$4 sm:$0xff]   ;;  %v746_v46 = vld [vmem:[%s1019_s1 + $0xb0] ss:$8 sps:$4 sm:$0xff]  }
  0x10   :  { %493 = vmatpush1.bf16.msra.mxu0 %v699_v15  ;;  %451 = vmatprep.subr.bf16.mxu1 %v700_v16  ;;  %v741_v43 = vld [vmem:[%s1019_s1 + $0x1a0] ss:$8 sps:$4 sm:$0xff]   ;;  %v744_v45 = vld [vmem:[%s1019_s1 + $0x1b4] ss:$8 sps:$4 sm:$0xff]   ;;  %v747_v48 = vld [vmem:[%s1019_s1 + $0x1b0] ss:$8 sps:$4 sm:$0xff]  }
  0x11   :  { %494 = vmatprep.subr.bf16.mxu0 %v702_v17  ;;  %v774_v47 = vld [vmem:[%s1020_s0 + $0x4] ss:$16 sps:$4 sm:$0xff]   ;;  %v777_v51 = vld [vmem:[%s1020_s0 + $0xc] ss:$16 sps:$4 sm:$0xff]   ;;  %v752_v52 = vld [vmem:[%s1019_s1 + $0xc0] ss:$8 sps:$4 sm:$0xff]  }
  0x12   :  { %v748_v49 = vld [vmem:[%s1019_s1 + $0xc4] ss:$8 sps:$4 sm:$0xff]   ;;  %475 = vmatprep.mubr.bf16.mxu1 %v774_v47  ;;  %518 = vmatprep.mubr.bf16.mxu0 %v777_v51  ;;  %v753_v53 = vld [vmem:[%s1019_s1 + $0x1c0] ss:$8 sps:$4 sm:$0xff]   ;;  %v754_v54 = vld [vmem:[%s1019_s1 + $0xd4] ss:$8 sps:$4 sm:$0xff]  }
  0x13   :  { %452 = vmatpush1.bf16.msra.mxu1 %v704_v18  ;;  %v750_v50 = vld [vmem:[%s1019_s1 + $0x1c4] ss:$8 sps:$4 sm:$0xff]   ;;  %v756_v55 = vld [vmem:[%s1019_s1 + $0x1d4] ss:$8 sps:$4 sm:$0xff]   ;;  %v758_v56 = vld [vmem:[%s1019_s1 + $0xd0] ss:$8 sps:$4 sm:$0xff]  }
  0x14   :  { %495 = vmatpush1.bf16.msra.mxu0 %v705_v19  ;;  %453 = vmatprep.subr.bf16.mxu1 %v706_v20  ;;  %v759_v57 = vld [vmem:[%s1019_s1 + $0x1d0] ss:$8 sps:$4 sm:$0xff]   ;;  %v760_v58 = vld [vmem:[%s1019_s1 + $0xe4] ss:$8 sps:$4 sm:$0xff]   ;;  %v764_v60 = vld [vmem:[%s1019_s1 + $0xe0] ss:$8 sps:$4 sm:$0xff]  }
  0x15   :  { %496 = vmatprep.subr.bf16.mxu0 %v708_v21  ;;  %v762_v59 = vld [vmem:[%s1019_s1 + $0x1e4] ss:$8 sps:$4 sm:$0xff]   ;;  %v765_v61 = vld [vmem:[%s1019_s1 + $0x1e0] ss:$8 sps:$4 sm:$0xff]   ;;  %v766_v62 = vld [vmem:[%s1019_s1 + $0xf4] ss:$8 sps:$4 sm:$0xff]  }
  0x16   :  { %v768_v63 = vld [vmem:[%s1019_s1 + $0x1f4] ss:$8 sps:$4 sm:$0xff]   ;;  %v770_v0 = vld [vmem:[%s1019_s1 + $0xf0] ss:$8 sps:$4 sm:$0xff]   ;;  %v547_v5 = vshrl.u32 %v546_v4, 7 }
  0x17   :  { %454 = vmatpush1.bf16.msra.mxu1 %v710_v22  ;;  %v771_v1 = vld [vmem:[%s1019_s1 + $0x1f0] ss:$8 sps:$4 sm:$0xff]   ;;  %v544_v7 = vld [vmem:[%s1021_s2] sm:$0x3] }
  0x18   :  { %497 = vmatpush1.bf16.msra.mxu0 %v711_v23  ;;  %455 = vmatprep.subr.bf16.mxu1 %v712_v24  ;;  %v772_v2 = vld [vmem:[%s1020_s0] ss:$16 sps:$4 sm:$0xff]   ;;  %v775_v3 = vld [vmem:[%s1020_s0 + $0x8] ss:$16 sps:$4 sm:$0xff]   ;;  %v548_v6 = vsub.s32 0, %v547_v5  ;;  %v552_v8 = vsub.s32 1, %v547_v5 }
  0x19   :  { %498 = vmatprep.subr.bf16.mxu0 %v714_v25  ;;  %v560_v9 = vld [vmem:[%s1022_s3] sm:$0x3] }
  0x1a   :  { %v549_v10 = vrot.slane %v544_v7, %v548_v6  ;;  %v553_v13 = vrot.slane %v544_v7, %v552_v8  ;;  %v565_v15 = vrot.slane %v560_v9, %v548_v6  ;;  %v569_v19 = vrot.slane %v560_v9, %v552_v8 }
  0x1b   :  { %456 = vmatpush1.bf16.msra.mxu1 %v716_v26 }
  0x1c   :  { %499 = vmatpush1.bf16.msra.mxu0 %v717_v27  ;;  %457 = vmatprep.subr.bf16.mxu1 %v718_v28 }
  0x1d   :  { %500 = vmatprep.subr.bf16.mxu0 %v720_v29 }
  0x1f   :  { %458 = vmatpush1.bf16.msra.mxu1 %v722_v30 }
  0x20   :  { %501 = vmatpush1.bf16.msra.mxu0 %v723_v31  ;;  %459 = vmatprep.subr.bf16.mxu1 %v724_v32 }
  0x21   :  { %502 = vmatprep.subr.bf16.mxu0 %v726_v33 }
  0x23   :  { %460 = vmatpush1.bf16.msra.mxu1 %v728_v34 }
  0x24   :  { %503 = vmatpush1.bf16.msra.mxu0 %v729_v35  ;;  %461 = vmatprep.subr.bf16.mxu1 %v730_v36 }
  0x25   :  { %504 = vmatprep.subr.bf16.mxu0 %v732_v37 }
  0x27   :  { %462 = vmatpush1.bf16.msra.mxu1 %v734_v38 }
  0x28   :  { %505 = vmatpush1.bf16.msra.mxu0 %v735_v39  ;;  %463 = vmatprep.subr.bf16.mxu1 %v736_v40 }
  0x29   :  { %506 = vmatprep.subr.bf16.mxu0 %v738_v41 }
  0x2b   :  { %464 = vmatpush1.bf16.msra.mxu1 %v740_v42 }
  0x2c   :  { %507 = vmatpush1.bf16.msra.mxu0 %v741_v43  ;;  %465 = vmatprep.subr.bf16.mxu1 %v742_v44 }
  0x2d   :  { %508 = vmatprep.subr.bf16.mxu0 %v744_v45 }
  0x2f   :  { %466 = vmatpush1.bf16.msra.mxu1 %v746_v46 }
  0x30   :  { %509 = vmatpush1.bf16.msra.mxu0 %v747_v48  ;;  %467 = vmatprep.subr.bf16.mxu1 %v748_v49 }
  0x31   :  { %510 = vmatprep.subr.bf16.mxu0 %v750_v50 }
  0x33   :  { %468 = vmatpush1.bf16.msra.mxu1 %v752_v52 }
  0x34   :  { %511 = vmatpush1.bf16.msra.mxu0 %v753_v53  ;;  %469 = vmatprep.subr.bf16.mxu1 %v754_v54 }
  0x35   :  { %512 = vmatprep.subr.bf16.mxu0 %v756_v55 }
  0x37   :  { %470 = vmatpush1.bf16.msra.mxu1 %v758_v56 }
  0x38   :  { %513 = vmatpush1.bf16.msra.mxu0 %v759_v57  ;;  %471 = vmatprep.subr.bf16.mxu1 %v760_v58 }
  0x39   :  { %514 = vmatprep.subr.bf16.mxu0 %v762_v59 }
  0x3b   :  { %472 = vmatpush1.bf16.msra.mxu1 %v764_v60 }
  0x3c   :  { %515 = vmatpush1.bf16.msra.mxu0 %v765_v61  ;;  %473 = vmatprep.subr.bf16.mxu1 %v766_v62 }
  0x3d   :  { %516 = vmatprep.subr.bf16.mxu0 %v768_v63 }
  0x3f   :  { %474 = vmatpush1.bf16.msra.mxu1 %v770_v0 }
  0x40   :  { %517 = vmatpush1.bf16.msra.mxu0 %v771_v1 }
  0x42   :  { %476 = vmatmul.mubr.bf16.vlgmr.msra.gmra.mrb[0].mxu1 %v772_v2 }
  0x43   :  { %519 = vmatmul.mubr.bf16.vlgmr.msra.gmra.mrb[0].mxu0 %v775_v3 }
 0x115   :  { %v477_v11 = vpop.f32.mrb[0].mxu1 }
 0x116   :  { %v520_v12 = vpop.f32.mrb[0].mxu0  ;;  %v479_v16 = vpop.f32.mrb[1].mxu1 }
 0x117   :  { %v521_v14 = vadd.f32 %v520_v12, %v477_v11  ;;  %v522_v17 = vpop.f32.mrb[1].mxu0  ;;  %v481_v20 = vpop.f32.mrb[2].mxu1 }
 0x118   :  { %v523_v18 = vadd.f32 %v522_v17, %v479_v16  ;;  %v524_v21 = vpop.f32.mrb[2].mxu0  ;;  %v483_v24 = vpop.f32.mrb[3].mxu1 }
 0x119   :  { %v556_v22 = vmul.f32 %v549_v10, %v521_v14  ;;  %v525_v23 = vadd.f32 %v524_v21, %v481_v20  ;;  %v526_v25 = vpop.f32.mrb[3].mxu0 }
 0x11a   :  { %v557_v26 = vmul.f32 %v553_v13, %v523_v18  ;;  %v527_v27 = vadd.f32 %v526_v25, %v483_v24 }
 0x11b   :  { %v572_v28 = vadd.f32 %v565_v15, %v556_v22  ;;  %v558_v29 = vmul.f32 %v549_v10, %v525_v23 }
 0x11c   :  { %v573_v30 = vadd.f32 %v569_v19, %v557_v26  ;;  %v559_v31 = vmul.f32 %v553_v13, %v527_v27 }
 0x11d   :  { %v576_v32 = vmax.f32 %v572_v28, 0.0  ;;  %v574_v33 = vadd.f32 %v565_v15, %v558_v29 }
 0x11e   :  { %v577_v34 = vmax.f32 %v573_v30, 0.0  ;;  %v575_v35 = vadd.f32 %v569_v19, %v559_v31 }
 0x11f   :  { %v578_v36 = vmax.f32 %v574_v33, 0.0 }
 0x120   :  { %v670_v37 = vpack.c.bf16 %v577_v34, %v576_v32  ;;  %v579_v38 = vmax.f32 %v575_v35, 0.0 }
 0x122   :  { %592 = vst [vmem:[%s1023_s4] sm:$0xff] %v670_v37  ;;  %v671_v39 = vpack.c.bf16 %v579_v38, %v578_v36 }
 0x124   :  { %593 = vst [vmem:[%s1023_s4 + $0x8] sm:$0xff] %v671_v39 }

// kernel: deeplabv3plus_forward.23
= control target key start
LH: loop header
LB: loop body
LE: loop exit
PB: predicated region body
PF: predicated region fallthrough
CT: control target
= control target key end

     0   :  { %s1558_s15 = smov 0   ;;  %s1560_s16 = smov 0   ;;  %s1726_s0 = inlined_call_operand.vmem [shape: bf16[16,1280], index: 0, kind: input, shape index: {}]   ;;  %s1727_s1 = inlined_call_operand.vmem [shape: bf16[1280,256], index: 1, kind: input, shape index: {}]   ;;  %s1728_s2 = inlined_call_operand.vmem [shape: f32[1,256], index: 2, kind: input, shape index: {}]   ;;  %s1729_s3 = inlined_call_operand.vmem [shape: f32[1,256], index: 3, kind: input, shape index: {}]   ;;  %s1730_s4 = inlined_call_operand.vmem [shape: bf16[16,256], index: 4, kind: output, shape index: {}]  }
   0x1   :  { %s1562_s17 = smov 0   ;;  %s1564_s18 = smov 0  }
   0x2   :  { %s1566_s19 = smov 0  }
   0x3 LB: > { %s26_s20 = sadd.s32 1, %s1525_s18  ;;  %p49_p1 = scmp.ne.s32.totalorder %s1517_s16, %s1513_s15  ;;  %s1529_s19 = sphi %s1566_s19, %s14_s19   ;;  %s1525_s18 = sphi %s1564_s18, %s1734_s18   ;;  %s1521_s17 = sphi %s1562_s17, %s1733_s17   ;;  %s1517_s16 = sphi %s1560_s16, %s1732_s16   ;;  %s1513_s15 = sphi %s1558_s15, %s1731_s15  }
   0x4   : > { %p27_p0 = scmp.ge.s32.totalorder %s26_s20, 2  ;;  %p50_p2 = scmp.eq.s32.totalorder %s1529_s19, 0 }
   0x5   : > { %s42_s22 = sadd.s32 1, %s1517_s16  ;;  %p1206_p5 = scmp.ge.s32.totalorder %s1529_s19, 2 }
   0x6   : > { %s1736_s20 = smov (%p27_p0, %s26_s20), 0  ;;  %p51_p3 = por %p50_p2, %p49_p1 }
   0x7   : > { %s38_s21 = ssub.s32 %s1525_s18, %s1736_s20  ;;  %206 = sbr.rel (%p1206_p5) target bundleno = 22 (0x16), region = 28 }
   0x8   : > { %p40_p4 = scmp.eq.s32.totalorder %s38_s21, 0 }
   0xa   : > { %s1593_s23 = scalar_select %p40_p4, %s1517_s16, %s42_s22  }
   0xe   : > { %209 = sbr.rel (!%p51_p3) target bundleno = 22 (0x16), region = 32  ;;  %s211_s24 = sand.u32 (%p51_p3), 1, %s1517_s16  }
   0xf   : > { %s1308_s25 = smul.u32 (%p51_p3), 20, %s1525_s18 }
  0x10   : > { %s1320_s26 = smul.u32 (%p51_p3), 40, %s211_s24 }
  0x11   : > { %s219_s29 = scalar_lea.vmem (%p51_p3), %s1726_s0, %s1308_s25 }
  0x12   : > { %v234_v0 = vld [vmem:[%s219_s29] sm:$0xff] (%p51_p3)  ;;  %v236_v1 = vld [vmem:[%s219_s29 + $0x8] sm:$0xff] (%p51_p3)  ;;  %s213_s30 = scalar_lea.vmem (%p51_p3), [#allocation3], %s1320_s26  ;;  %v240_v3 = vld [vmem:[%s219_s29 + $0x30] sm:$0xff] (%p51_p3) }
  0x13   : > { %v238_v2 = vld [vmem:[%s219_s29 + $0x28] sm:$0xff] (%p51_p3)  ;;  %235 = vst [vmem:[%s213_s30] sm:$0xff] (%p51_p3), %v234_v0  ;;  %237 = vst [vmem:[%s213_s30 + $0x8] sm:$0xff] (%p51_p3), %v236_v1  ;;  %v1208_v4 = vld [vmem:[%s219_s29 + $0x10] sm:$0xf] (%p51_p3) }
  0x14   : > { %239 = vst [vmem:[%s213_s30 + $0x14] sm:$0xff] (%p51_p3), %v238_v2  ;;  %v1210_v5 = vld [vmem:[%s219_s29 + $0x38] sm:$0xf] (%p51_p3)  ;;  %241 = vst [vmem:[%s213_s30 + $0x1c] sm:$0xff] (%p51_p3), %v240_v3 }
  0x15   : > { %1209 = vst [vmem:[%s213_s30 + $0x10] sm:$0xf] %v1208_v4  ;;  %1211 = vst [vmem:[%s213_s30 + $0x24] sm:$0xf] %v1210_v5 }
  0x16 PF: > { %p1212_p6 = scmp.ge.s32.totalorder %s1529_s19, 1  ;;  %p257_p7 = scmp.lt.s32.totalorder %s1529_s19, 3 }
  0x18   : > { %p258_p8 = pnand %p1212_p6, %p257_p7 }
  0x19   : > { %s264_s5 = sand.u32 (!%p258_p8), 1, %s1513_s15   ;;  %p1213_p9 = scmp.ne.s32.totalorder (!%p258_p8), %s1521_s17, 0 }
  0x1a   : > { %261 = sbr.rel (%p258_p8) target bundleno = 378 (0x17a), region = 58 }
  0x1b   : > { %s1321_s6 = smul.u32 (!%p258_p8), 40, %s264_s5 }
  0x1d   : > { %s1604_s7 = scalar_lea.vmem (!%p258_p8), [#allocation3], %s1321_s6 }
  0x21   : > { %341 = sbr.rel (%p1213_p9) target bundleno = 40 (0x28), region = 66  ;;  %v1531_v6 = vmov (!%p1213_p9), 0.0  }
  0x22   : > { %342 = vst [vmem:[#allocation2] sm:$0xff] (!%p1213_p9), %v1531_v6  ;;  %343 = vst [vmem:[#allocation2 + $0x8] sm:$0xff] (!%p1213_p9), %v1531_v6 }
  0x23   : > { %344 = vst [vmem:[#allocation2 + $0x10] sm:$0xff] (!%p1213_p9), %v1531_v6  ;;  %345 = vst [vmem:[#allocation2 + $0x18] sm:$0xff] (!%p1213_p9), %v1531_v6 }
  0x28 PF: > { %s346_s8 = smul.u32 640, %s1521_s17  ;;  %v1441_v7 = vld [vmem:[%s1604_s7 + $0xc] ss:$20 sps:$4 sm:$0xff]   ;;  %v1486_v8 = vld [vmem:[%s1604_s7 + $0x4] ss:$20 sps:$4 sm:$0xff]   ;;  %p1301_p10 = scmp.ne.s32.totalorder %s1521_s17, 1 }
  0x29   : > { %943 = vmatprep.mubr.bf16.mxu0 %v1441_v7  ;;  %900 = vmatprep.mubr.bf16.mxu1 %v1486_v8  ;;  %v1439_v5 = vld [vmem:[%s1604_s7 + $0x8] ss:$20 sps:$4 sm:$0xff]  }
  0x2a   : > { %s357_s9 = sshra.s32 %s346_s8, 3 }
  0x2b   : > { %s1309_s10 = sshll.u32 %s357_s9, 3 }
  0x2c   : > { %s1613_s13 = scalar_lea.vmem %s1727_s1, %s1309_s10 }
  0x2d   : > { %v1364_v9 = vld [vmem:[%s1613_s13 + $0x104] ss:$8 sps:$4 sm:$0xff]   ;;  %v1366_v10 = vld [vmem:[%s1613_s13 + $0x100] ss:$8 sps:$4 sm:$0xff]   ;;  %v1367_v11 = vld [vmem:[%s1613_s13 + $0x114] ss:$8 sps:$4 sm:$0xff]  }
  0x2e   : > { %911 = vmatprep.subr.bf16.mxu0 %v1364_v9  ;;  %v1369_v12 = vld [vmem:[%s1613_s13 + $0x110] ss:$8 sps:$4 sm:$0xff]   ;;  %v1370_v13 = vld [vmem:[%s1613_s13 + $0x124] ss:$8 sps:$4 sm:$0xff]   ;;  %v1372_v14 = vld [vmem:[%s1613_s13 + $0x120] ss:$8 sps:$4 sm:$0xff]  }
  0x2f   : > { %912 = vmatpush1.bf16.msra.mxu0 %v1366_v10  ;;  %v1373_v15 = vld [vmem:[%s1613_s13 + $0x134] ss:$8 sps:$4 sm:$0xff]   ;;  %v1375_v16 = vld [vmem:[%s1613_s13 + $0x130] ss:$8 sps:$4 sm:$0xff]   ;;  %v1387_v17 = vld [vmem:[%s1613_s13 + $0x4] ss:$8 sps:$4 sm:$0xff]  }
  0x30   : > { %913 = vmatprep.subr.bf16.mxu0 %v1367_v11  ;;  %v1390_v18 = vld [vmem:[%s1613_s13] ss:$8 sps:$4 sm:$0xff]   ;;  %v1376_v19 = vld [vmem:[%s1613_s13 + $0x144] ss:$8 sps:$4 sm:$0xff]   ;;  %868 = vmatprep.subr.bf16.mxu1 %v1387_v17  ;;  %v1393_v20 = vld [vmem:[%s1613_s13 + $0x14] ss:$8 sps:$4 sm:$0xff]  }
  0x31   : > { %869 = vmatpush1.bf16.msra.mxu1 %v1390_v18  ;;  %v1396_v21 = vld [vmem:[%s1613_s13 + $0x10] ss:$8 sps:$4 sm:$0xff]   ;;  %v1378_v22 = vld [vmem:[%s1613_s13 + $0x140] ss:$8 sps:$4 sm:$0xff]   ;;  %v1379_v23 = vld [vmem:[%s1613_s13 + $0x154] ss:$8 sps:$4 sm:$0xff]  }
  0x32   : > { %870 = vmatprep.subr.bf16.mxu1 %v1393_v20  ;;  %v1399_v24 = vld [vmem:[%s1613_s13 + $0x24] ss:$8 sps:$4 sm:$0xff]   ;;  %v1402_v25 = vld [vmem:[%s1613_s13 + $0x20] ss:$8 sps:$4 sm:$0xff]   ;;  %v1381_v26 = vld [vmem:[%s1613_s13 + $0x150] ss:$8 sps:$4 sm:$0xff]  }
  0x33   : > { %914 = vmatpush1.bf16.msra.mxu0 %v1369_v12  ;;  %v1405_v27 = vld [vmem:[%s1613_s13 + $0x34] ss:$8 sps:$4 sm:$0xff]   ;;  %v1382_v28 = vld [vmem:[%s1613_s13 + $0x164] ss:$8 sps:$4 sm:$0xff]   ;;  %v1384_v29 = vld [vmem:[%s1613_s13 + $0x160] ss:$8 sps:$4 sm:$0xff]  }
  0x34   : > { %915 = vmatprep.subr.bf16.mxu0 %v1370_v13  ;;  %v1408_v30 = vld [vmem:[%s1613_s13 + $0x30] ss:$8 sps:$4 sm:$0xff]   ;;  %v1411_v31 = vld [vmem:[%s1613_s13 + $0x44] ss:$8 sps:$4 sm:$0xff]   ;;  %v1385_v32 = vld [vmem:[%s1613_s13 + $0x174] ss:$8 sps:$4 sm:$0xff]  }
  0x35   : > { %871 = vmatpush1.bf16.msra.mxu1 %v1396_v21  ;;  %v1414_v33 = vld [vmem:[%s1613_s13 + $0x40] ss:$8 sps:$4 sm:$0xff]   ;;  %v1389_v34 = vld [vmem:[%s1613_s13 + $0x170] ss:$8 sps:$4 sm:$0xff]   ;;  %v1417_v35 = vld [vmem:[%s1613_s13 + $0x54] ss:$8 sps:$4 sm:$0xff]  }
  0x36   : > { %872 = vmatprep.subr.bf16.mxu1 %v1399_v24  ;;  %v1391_v36 = vld [vmem:[%s1613_s13 + $0x184] ss:$8 sps:$4 sm:$0xff]   ;;  %v1395_v37 = vld [vmem:[%s1613_s13 + $0x180] ss:$8 sps:$4 sm:$0xff]   ;;  %v1420_v38 = vld [vmem:[%s1613_s13 + $0x50] ss:$8 sps:$4 sm:$0xff]  }
  0x37   : > { %916 = vmatpush1.bf16.msra.mxu0 %v1372_v14  ;;  %v1423_v39 = vld [vmem:[%s1613_s13 + $0x64] ss:$8 sps:$4 sm:$0xff]   ;;  %v1397_v40 = vld [vmem:[%s1613_s13 + $0x194] ss:$8 sps:$4 sm:$0xff]   ;;  %v1426_v41 = vld [vmem:[%s1613_s13 + $0x60] ss:$8 sps:$4 sm:$0xff]  }
  0x38   : > { %917 = vmatprep.subr.bf16.mxu0 %v1373_v15  ;;  %v1401_v42 = vld [vmem:[%s1613_s13 + $0x190] ss:$8 sps:$4 sm:$0xff]   ;;  %v1429_v43 = vld [vmem:[%s1613_s13 + $0x74] ss:$8 sps:$4 sm:$0xff]   ;;  %v1403_v44 = vld [vmem:[%s1613_s13 + $0x1a4] ss:$8 sps:$4 sm:$0xff]  }
  0x39   : > { %873 = vmatpush1.bf16.msra.mxu1 %v1402_v25  ;;  %v1432_v45 = vld [vmem:[%s1613_s13 + $0x70] ss:$8 sps:$4 sm:$0xff]   ;;  %v1407_v46 = vld [vmem:[%s1613_s13 + $0x1a0] ss:$8 sps:$4 sm:$0xff]   ;;  %v1435_v47 = vld [vmem:[%s1613_s13 + $0x84] ss:$8 sps:$4 sm:$0xff]  }
  0x3a   : > { %874 = vmatprep.subr.bf16.mxu1 %v1405_v27  ;;  %v1409_v48 = vld [vmem:[%s1613_s13 + $0x1b4] ss:$8 sps:$4 sm:$0xff]   ;;  %v1438_v49 = vld [vmem:[%s1613_s13 + $0x80] ss:$8 sps:$4 sm:$0xff]   ;;  %v1413_v50 = vld [vmem:[%s1613_s13 + $0x1b0] ss:$8 sps:$4 sm:$0xff]  }
  0x3b   : > { %918 = vmatpush1.bf16.msra.mxu0 %v1375_v16  ;;  %v1445_v51 = vld [vmem:[%s1613_s13 + $0x94] ss:$8 sps:$4 sm:$0xff]   ;;  %v1415_v52 = vld [vmem:[%s1613_s13 + $0x1c4] ss:$8 sps:$4 sm:$0xff]   ;;  %v1447_v53 = vld [vmem:[%s1613_s13 + $0x90] ss:$8 sps:$4 sm:$0xff]  }
  0x3c   : > { %919 = vmatprep.subr.bf16.mxu0 %v1376_v19  ;;  %v1419_v54 = vld [vmem:[%s1613_s13 + $0x1c0] ss:$8 sps:$4 sm:$0xff]   ;;  %v1451_v55 = vld [vmem:[%s1613_s13 + $0xa4] ss:$8 sps:$4 sm:$0xff]   ;;  %v1421_v56 = vld [vmem:[%s1613_s13 + $0x1d4] ss:$8 sps:$4 sm:$0xff]  }
  0x3d   : > { %875 = vmatpush1.bf16.msra.mxu1 %v1408_v30  ;;  %v1453_v57 = vld [vmem:[%s1613_s13 + $0xa0] ss:$8 sps:$4 sm:$0xff]   ;;  %v1425_v58 = vld [vmem:[%s1613_s13 + $0x1d0] ss:$8 sps:$4 sm:$0xff]   ;;  %v1457_v59 = vld [vmem:[%s1613_s13 + $0xb4] ss:$8 sps:$4 sm:$0xff]  }
  0x3e   : > { %876 = vmatprep.subr.bf16.mxu1 %v1411_v31  ;;  %v1427_v60 = vld [vmem:[%s1613_s13 + $0x1e4] ss:$8 sps:$4 sm:$0xff]   ;;  %v1459_v61 = vld [vmem:[%s1613_s13 + $0xb0] ss:$8 sps:$4 sm:$0xff]   ;;  %v1431_v62 = vld [vmem:[%s1613_s13 + $0x1e0] ss:$8 sps:$4 sm:$0xff]  }
  0x3f   : > { %920 = vmatpush1.bf16.msra.mxu0 %v1378_v22  ;;  %v1463_v63 = vld [vmem:[%s1613_s13 + $0xc4] ss:$8 sps:$4 sm:$0xff]   ;;  %v1433_v0 = vld [vmem:[%s1613_s13 + $0x1f4] ss:$8 sps:$4 sm:$0xff]   ;;  %v1465_v1 = vld [vmem:[%s1613_s13 + $0xc0] ss:$8 sps:$4 sm:$0xff]  }
  0x40   : > { %921 = vmatprep.subr.bf16.mxu0 %v1379_v23  ;;  %v1437_v2 = vld [vmem:[%s1613_s13 + $0x1f0] ss:$8 sps:$4 sm:$0xff]   ;;  %v1469_v3 = vld [vmem:[%s1613_s13 + $0xd4] ss:$8 sps:$4 sm:$0xff]   ;;  %v1444_v4 = vld [vmem:[%s1613_s13 + $0x204] ss:$8 sps:$4 sm:$0xff]  }
  0x41   : > { %877 = vmatpush1.bf16.msra.mxu1 %v1414_v33  ;;  %v1471_v6 = vld [vmem:[%s1613_s13 + $0xd0] ss:$8 sps:$4 sm:$0xff]   ;;  %v1442_v7 = vld [vmem:[%s1613_s13 + $0x200] ss:$8 sps:$4 sm:$0xff]   ;;  %v1475_v8 = vld [vmem:[%s1613_s13 + $0xe4] ss:$8 sps:$4 sm:$0xff]  }
  0x42   : > { %878 = vmatprep.subr.bf16.mxu1 %v1417_v35  ;;  %v1450_v9 = vld [vmem:[%s1613_s13 + $0x214] ss:$8 sps:$4 sm:$0xff]   ;;  %v1477_v10 = vld [vmem:[%s1613_s13 + $0xe0] ss:$8 sps:$4 sm:$0xff]   ;;  %v1448_v11 = vld [vmem:[%s1613_s13 + $0x210] ss:$8 sps:$4 sm:$0xff]  }
  0x43   : > { %922 = vmatpush1.bf16.msra.mxu0 %v1381_v26  ;;  %v1481_v12 = vld [vmem:[%s1613_s13 + $0xf4] ss:$8 sps:$4 sm:$0xff]   ;;  %v1456_v13 = vld [vmem:[%s1613_s13 + $0x224] ss:$8 sps:$4 sm:$0xff]   ;;  %v1532_v14 = vmov 0  }
  0x44   : > { %923 = vmatprep.subr.bf16.mxu0 %v1382_v28  ;;  %v1483_v15 = vld [vmem:[%s1613_s13 + $0xf0] ss:$8 sps:$4 sm:$0xff]   ;;  %v1454_v16 = vld [vmem:[%s1613_s13 + $0x220] ss:$8 sps:$4 sm:$0xff]   ;;  %v1462_v17 = vld [vmem:[%s1613_s13 + $0x234] ss:$8 sps:$4 sm:$0xff]  }
  0x45   : > { %879 = vmatpush1.bf16.msra.mxu1 %v1420_v38  ;;  %v1484_v18 = vld [vmem:[%s1604_s7] ss:$20 sps:$4 sm:$0xff]   ;;  %v1460_v19 = vld [vmem:[%s1613_s13 + $0x230] ss:$8 sps:$4 sm:$0xff]   ;;  %v1468_v20 = vld [vmem:[%s1613_s13 + $0x244] ss:$8 sps:$4 sm:$0xff]  }
  0x46   : > { %880 = vmatprep.subr.bf16.mxu1 %v1423_v39  ;;  %v1466_v21 = vld [vmem:[%s1613_s13 + $0x240] ss:$8 sps:$4 sm:$0xff]   ;;  %v1474_v22 = vld [vmem:[%s1613_s13 + $0x254] ss:$8 sps:$4 sm:$0xff]   ;;  %v1472_v23 = vld [vmem:[%s1613_s13 + $0x250] ss:$8 sps:$4 sm:$0xff]  }
  0x47   : > { %924 = vmatpush1.bf16.msra.mxu0 %v1384_v29  ;;  %v1480_v24 = vld [vmem:[%s1613_s13 + $0x264] ss:$8 sps:$4 sm:$0xff]   ;;  %v1478_v25 = vld [vmem:[%s1613_s13 + $0x260] ss:$8 sps:$4 sm:$0xff]   ;;  %v1489_v26 = vld [vmem:[%s1613_s13 + $0x274] ss:$8 sps:$4 sm:$0xff]  }
  0x48   : > { %925 = vmatprep.subr.bf16.mxu0 %v1385_v32  ;;  %v1487_v27 = vld [vmem:[%s1613_s13 + $0x270] ss:$8 sps:$4 sm:$0xff]   ;;  %v347_v33 = vld [vmem:[#allocation2] sm:$0xff] }
  0x49   : > { %881 = vmatpush1.bf16.msra.mxu1 %v1426_v41  ;;  %v1490_v28 = vld [vmem:[%s1604_s7 + $0x10] ss:$20 sps:$4 sm:$0xff]  }
  0x4a   : > { %882 = vmatprep.subr.bf16.mxu1 %v1429_v43  ;;  %v349_v39 = vld [vmem:[#allocation2 + $0x10] sm:$0xff]  ;;  %v350_v43 = vld [vmem:[#allocation2 + $0x18] sm:$0xff] }
  0x4b   : > { %926 = vmatpush1.bf16.msra.mxu0 %v1389_v34 }
  0x4c   : > { %927 = vmatprep.subr.bf16.mxu0 %v1391_v36  ;;  %v348_v36 = vld [vmem:[#allocation2 + $0x8] sm:$0xff] }
  0x4d   : > { %883 = vmatpush1.bf16.msra.mxu1 %v1432_v45 }
  0x4e   : > { %884 = vmatprep.subr.bf16.mxu1 %v1435_v47 }
  0x4f   : > { %928 = vmatpush1.bf16.msra.mxu0 %v1395_v37 }
  0x50   : > { %929 = vmatprep.subr.bf16.mxu0 %v1397_v40 }
  0x51   : > { %885 = vmatpush1.bf16.msra.mxu1 %v1438_v49  ;;  %v1015_v49 = vlaneseq (!%p1301_p10) }
  0x52   : > { %886 = vmatprep.subr.bf16.mxu1 %v1445_v51  ;;  %v1013_v51 = vld [vmem:[%s1728_s2] sm:$0x3] (!%p1301_p10) }
  0x53   : > { %930 = vmatpush1.bf16.msra.mxu0 %v1401_v42 }
  0x54   : > { %931 = vmatprep.subr.bf16.mxu0 %v1403_v44 }
  0x55   : > { %887 = vmatpush1.bf16.msra.mxu1 %v1447_v53 }
  0x56   : > { %888 = vmatprep.subr.bf16.mxu1 %v1451_v55 }
  0x57   : > { %932 = vmatpush1.bf16.msra.mxu0 %v1407_v46 }
  0x58   : > { %933 = vmatprep.subr.bf16.mxu0 %v1409_v48 }
  0x59   : > { %889 = vmatpush1.bf16.msra.mxu1 %v1453_v57 }
  0x5a   : > { %890 = vmatprep.subr.bf16.mxu1 %v1457_v59 }
  0x5b   : > { %934 = vmatpush1.bf16.msra.mxu0 %v1413_v50  ;;  %v1016_v50 = vshrl.u32 (!%p1301_p10), %v1015_v49, 7 }
  0x5c   : > { %935 = vmatprep.subr.bf16.mxu0 %v1415_v52  ;;  %v1029_v52 = vld [vmem:[%s1729_s3] sm:$0x3] (!%p1301_p10) }
  0x5d   : > { %891 = vmatpush1.bf16.msra.mxu1 %v1459_v61  ;;  %v1021_v55 = vsub.s32 (!%p1301_p10), 1, %v1016_v50 }
  0x5e   : > { %892 = vmatprep.subr.bf16.mxu1 %v1463_v63 }
  0x5f   : > { %936 = vmatpush1.bf16.msra.mxu0 %v1419_v54  ;;  %v1017_v54 = vsub.s32 (!%p1301_p10), 0, %v1016_v50 }
  0x60   : > { %937 = vmatprep.subr.bf16.mxu0 %v1421_v56 }
  0x61   : > { %893 = vmatpush1.bf16.msra.mxu1 %v1465_v1  ;;  %v1018_v59 = vrot.slane (!%p1301_p10), %v1013_v51, %v1017_v54  ;;  %v1034_v61 = vrot.slane (!%p1301_p10), %v1029_v52, %v1017_v54 }
  0x62   : > { %894 = vmatprep.subr.bf16.mxu1 %v1469_v3 }
  0x63   : > { %938 = vmatpush1.bf16.msra.mxu0 %v1425_v58 }
  0x64   : > { %939 = vmatprep.subr.bf16.mxu0 %v1427_v60  ;;  %v1022_v60 = vrot.slane (!%p1301_p10), %v1013_v51, %v1021_v55 }
  0x65   : > { %895 = vmatpush1.bf16.msra.mxu1 %v1471_v6 }
  0x66   : > { %896 = vmatprep.subr.bf16.mxu1 %v1475_v8 }
  0x67   : > { %940 = vmatpush1.bf16.msra.mxu0 %v1431_v62  ;;  %v1038_v62 = vrot.slane (!%p1301_p10), %v1029_v52, %v1021_v55 }
  0x68   : > { %941 = vmatprep.subr.bf16.mxu0 %v1433_v0 }
  0x69   : > { %897 = vmatpush1.bf16.msra.mxu1 %v1477_v10 }
  0x6a   : > { %898 = vmatprep.subr.bf16.mxu1 %v1481_v12 }
  0x6b   : > { %942 = vmatpush1.bf16.msra.mxu0 %v1437_v2 }
  0x6c   : > { %954 = vmatprep.subr.bf16.mxu0 %v1444_v4 }
  0x6d   : > { %899 = vmatpush1.bf16.msra.mxu1 %v1483_v15 }
  0x6e   : > { %944 = vmatmul.mubr.bf16.vlgmr.msra.gmra.mrb[0].mxu0 %v1439_v5 }
  0x6f   : > { %955 = vmatpush1.bf16.msra.mxu0 %v1442_v7  ;;  %986 = vmatprep.mubr.bf16.mxu0 %v1532_v14 }
  0x70   : > { %956 = vmatprep.subr.bf16.mxu0 %v1450_v9  ;;  %901 = vmatmul.mubr.bf16.vlgmr.msra.gmra.mrb[0].mxu1 %v1484_v18 }
  0x73   : > { %957 = vmatpush1.bf16.msra.mxu0 %v1448_v11 }
  0x74   : > { %958 = vmatprep.subr.bf16.mxu0 %v1456_v13 }
  0x77   : > { %959 = vmatpush1.bf16.msra.mxu0 %v1454_v16 }
  0x78   : > { %960 = vmatprep.subr.bf16.mxu0 %v1462_v17 }
  0x7b   : > { %961 = vmatpush1.bf16.msra.mxu0 %v1460_v19 }
  0x7c   : > { %962 = vmatprep.subr.bf16.mxu0 %v1468_v20 }
  0x7f   : > { %963 = vmatpush1.bf16.msra.mxu0 %v1466_v21 }
  0x80   : > { %964 = vmatprep.subr.bf16.mxu0 %v1474_v22 }
  0x83   : > { %965 = vmatpush1.bf16.msra.mxu0 %v1472_v23 }
  0x84   : > { %966 = vmatprep.subr.bf16.mxu0 %v1480_v24 }
  0x87   : > { %967 = vmatpush1.bf16.msra.mxu0 %v1478_v25 }
  0x88   : > { %968 = vmatprep.subr.bf16.mxu0 %v1489_v26 }
  0x8b   : > { %969 = vmatpush1.bf16.msra.mxu0 %v1487_v27 }
  0x8e   : > { %987 = vmatmul.mubr.bf16.vlgmr.msra.gmra.mrb[0].mxu0 %v1490_v28 }
 0x143   : > { %v902_v29 = vpop.f32.mrb[0].mxu1 }
 0x144   : > { %v904_v30 = vpop.f32.mrb[1].mxu1 }
 0x145   : > { %v906_v31 = vpop.f32.mrb[2].mxu1 }
 0x146   : > { %v908_v32 = vpop.f32.mrb[3].mxu1 }
 0x161   : > { %v988_v34 = vpop.f32.mrb[0].mxu0 }
 0x162   : > { %v1312_v35 = vadd.f32 %v988_v34, %v902_v29  ;;  %v990_v37 = vpop.f32.mrb[1].mxu0 }
 0x163   : > { %v1313_v38 = vadd.f32 %v990_v37, %v904_v30  ;;  %v992_v40 = vpop.f32.mrb[2].mxu0  ;;  %1008 = sbr.rel (%p1301_p10) target bundleno = 378 (0x17a), region = 70 }
 0x164   : > { %v997_v41 = vadd.f32 %v1312_v35, %v347_v33  ;;  %v1314_v42 = vadd.f32 %v992_v40, %v906_v31  ;;  %v994_v44 = vpop.f32.mrb[3].mxu0 }
 0x165   : > { %v998_v45 = vadd.f32 %v1313_v38, %v348_v36  ;;  %v1315_v46 = vadd.f32 %v994_v44, %v908_v32 }
 0x166   : > { %1001 = vst [vmem:[#allocation2] sm:$0xff] %v997_v41  ;;  %v999_v47 = vadd.f32 %v1314_v42, %v349_v39 }
 0x167   : > { %1002 = vst [vmem:[#allocation2 + $0x8] sm:$0xff] %v998_v45  ;;  %v1000_v48 = vadd.f32 %v1315_v46, %v350_v43 }
 0x168   : > { %1003 = vst [vmem:[#allocation2 + $0x10] sm:$0xff] %v999_v47 }
 0x169   : > { %1004 = vst [vmem:[#allocation2 + $0x18] sm:$0xff] %v1000_v48 }
 0x16d   : > { %v1009_v53 = vld [vmem:[#allocation2] sm:$0xff] }
 0x16e   : > { %v1010_v56 = vld [vmem:[#allocation2 + $0x8] sm:$0xff]  ;;  %v1025_v63 = vmul.f32 %v1018_v59, %v1009_v53 }
 0x16f   : > { %v1011_v57 = vld [vmem:[#allocation2 + $0x10] sm:$0xff]  ;;  %v1026_v0 = vmul.f32 %v1022_v60, %v1010_v56 }
 0x170   : > { %v1012_v58 = vld [vmem:[#allocation2 + $0x18] sm:$0xff]  ;;  %v1027_v1 = vmul.f32 %v1018_v59, %v1011_v57  ;;  %v1041_v3 = vadd.f32 %v1034_v61, %v1025_v63 }
 0x171   : > { %v1028_v2 = vmul.f32 %v1022_v60, %v1012_v58  ;;  %v1042_v4 = vadd.f32 %v1038_v62, %v1026_v0 }
 0x172   : > { %v1043_v5 = vadd.f32 %v1034_v61, %v1027_v1  ;;  %v1045_v7 = vmax.f32 %v1041_v3, 0.0 }
 0x173   : > { %v1044_v6 = vadd.f32 %v1038_v62, %v1028_v2  ;;  %v1046_v8 = vmax.f32 %v1042_v4, 0.0 }
 0x174   : > { %v1047_v9 = vmax.f32 %v1043_v5, 0.0 }
 0x175   : > { %v1048_v10 = vmax.f32 %v1044_v6, 0.0  ;;  %v1310_v11 = vpack.c.bf16 %v1046_v8, %v1045_v7 }
 0x177   : > { %v1311_v12 = vpack.c.bf16 %v1048_v10, %v1047_v9  ;;  %1061 = vst [vmem:[%s1730_s4] sm:$0xff] %v1310_v11 }
 0x179   : > { %1062 = vst [vmem:[%s1730_s4 + $0x8] sm:$0xff] %v1311_v12 }
 0x17a PF: > { %s14_s19 = sadd.s32 1, %s1529_s19   ;;  %s1731_s15 = smov %s1517_s16 }
 0x17b   : > { %p11_p11 = scmp.ge.s32.totalorder %s14_s19, 4   ;;  %s1732_s16 = smov %s1593_s23 }
 0x17c   : > { %s1733_s17 = smov %s1525_s18  ;;  %s1734_s18 = smov %s1736_s20 }
 0x17d   :  { %13 = sbr.rel (!%p11_p11) target bundleno = 3 (0x3), region = 121 }

// kernel: deeplabv3plus_forward.24
= control target key start
LH: loop header
LB: loop body
LE: loop exit
PB: predicated region body
PF: predicated region fallthrough
CT: control target
= control target key end

     0   :  { %s747_s1 = inlined_call_operand.vmem [shape: bf16[128,128], index: 1, kind: input, shape index: {}]   ;;  %s748_s0 = inlined_call_operand.vmem [shape: bf16[128,128], index: 0, kind: input, shape index: {}]   ;;  %s749_s2 = inlined_call_operand.vmem [shape: f32[1,128], index: 2, kind: input, shape index: {}]   ;;  %s750_s3 = inlined_call_operand.vmem [shape: f32[1,128], index: 3, kind: input, shape index: {}]   ;;  %s751_s4 = inlined_call_operand.vmem [shape: bf16[128,128], index: 4, kind: output, shape index: {}]  }
   0x1   :  { %v628_v0 = vld [vmem:[%s747_s1] sm:$0xff]   ;;  %v629_v1 = vld [vmem:[%s747_s1 + $0x8] sm:$0xff]   ;;  %v630_v2 = vld [vmem:[%s747_s1 + $0x10] sm:$0xff]  }
   0x2   :  { %580 = vmatprep.subr.bf16.mxu0 %v628_v0  ;;  %612 = vmatprep.subr.bf16.mxu1 %v628_v0  ;;  %v631_v3 = vld [vmem:[%s747_s1 + $0x18] sm:$0xff]   ;;  %v636_v4 = vld [vmem:[%s748_s0] sm:$0xff]   ;;  %v633_v7 = vld [vmem:[%s747_s1 + $0x28] sm:$0xff]  }
   0x3   :  { %581 = vmatpush3.bf16.msra.mxu0 %v628_v0  ;;  %620 = vmatpush3.bf16.msra.mxu1 %v628_v0  ;;  %v637_v5 = vld [vmem:[%s748_s0 + $0x20] sm:$0xff]   ;;  %v634_v8 = vld [vmem:[%s747_s1 + $0x30] sm:$0xff]   ;;  %v635_v9 = vld [vmem:[%s747_s1 + $0x38] sm:$0xff]  }
   0x4   :  { %582 = vmatprep.subr.bf16.mxu0 %v629_v1  ;;  %613 = vmatprep.subr.bf16.mxu1 %v629_v1  ;;  %v632_v6 = vld [vmem:[%s747_s1 + $0x20] sm:$0xff]   ;;  %v638_v10 = vld [vmem:[%s748_s0 + $0x8] sm:$0xff]   ;;  %v640_v12 = vld [vmem:[%s748_s0 + $0x10] sm:$0xff]  }
   0x5   :  { %596 = vmatprep.mubr.bf16.mxu0 %v636_v4  ;;  %604 = vmatprep.mubr.bf16.mxu1 %v637_v5  ;;  %v639_v11 = vld [vmem:[%s748_s0 + $0x28] sm:$0xff]   ;;  %v641_v13 = vld [vmem:[%s748_s0 + $0x30] sm:$0xff]   ;;  %v642_v14 = vld [vmem:[%s748_s0 + $0x18] sm:$0xff]  }
   0x6   :  { %v643_v15 = vld [vmem:[%s748_s0 + $0x38] sm:$0xff]   ;;  %v483_v16 = vld [vmem:[%s749_s2] ss:$0 sm:$0xff] }
   0x7   :  { %583 = vmatpush3.bf16.msra.mxu0 %v629_v1  ;;  %621 = vmatpush3.bf16.msra.mxu1 %v629_v1  ;;  %v484_v23 = vld [vmem:[%s750_s3] ss:$0 sm:$0xff] }
   0x8   :  { %584 = vmatprep.subr.bf16.mxu0 %v630_v2  ;;  %614 = vmatprep.subr.bf16.mxu1 %v630_v2 }
   0xb   :  { %585 = vmatpush3.bf16.msra.mxu0 %v630_v2  ;;  %622 = vmatpush3.bf16.msra.mxu1 %v630_v2 }
   0xc   :  { %586 = vmatprep.subr.bf16.mxu0 %v631_v3  ;;  %615 = vmatprep.subr.bf16.mxu1 %v631_v3 }
   0xf   :  { %587 = vmatpush3.bf16.msra.mxu0 %v631_v3  ;;  %623 = vmatpush3.bf16.msra.mxu1 %v631_v3 }
  0x10   :  { %588 = vmatprep.subr.bf16.mxu0 %v632_v6  ;;  %616 = vmatprep.subr.bf16.mxu1 %v632_v6 }
  0x13   :  { %589 = vmatpush3.bf16.msra.mxu0 %v632_v6  ;;  %624 = vmatpush3.bf16.msra.mxu1 %v632_v6 }
  0x14   :  { %590 = vmatprep.subr.bf16.mxu0 %v633_v7  ;;  %617 = vmatprep.subr.bf16.mxu1 %v633_v7 }
  0x17   :  { %591 = vmatpush3.bf16.msra.mxu0 %v633_v7  ;;  %625 = vmatpush3.bf16.msra.mxu1 %v633_v7 }
  0x18   :  { %592 = vmatprep.subr.bf16.mxu0 %v634_v8  ;;  %618 = vmatprep.subr.bf16.mxu1 %v634_v8 }
  0x1b   :  { %593 = vmatpush3.bf16.msra.mxu0 %v634_v8  ;;  %626 = vmatpush3.bf16.msra.mxu1 %v634_v8 }
  0x1c   :  { %594 = vmatprep.subr.bf16.mxu0 %v635_v9  ;;  %619 = vmatprep.subr.bf16.mxu1 %v635_v9 }
  0x1f   :  { %595 = vmatpush3.bf16.msra.mxu0 %v635_v9  ;;  %627 = vmatpush3.bf16.msra.mxu1 %v635_v9 }
  0x22   :  { %597 = vmatmul.mubr.bf16.vlgmr.msra.gmra.mrb[0].mxu0 %v638_v10  ;;  %605 = vmatmul.mubr.bf16.vlgmr.msra.gmra.mrb[0].mxu1 %v639_v11 }
  0x23   :  { %600 = vmatprep.mubr.bf16.mxu0 %v640_v12  ;;  %608 = vmatprep.mubr.bf16.mxu1 %v641_v13 }
  0x2a   :  { %601 = vmatmul.mubr.bf16.gmra.mrb[4].mxu0 %v642_v14  ;;  %609 = vmatmul.mubr.bf16.gmra.mrb[4].mxu1 %v643_v15 }
  0xf5   :  { %v598_v17 = vpop.f32.mrb[0].mxu0  ;;  %v606_v18 = vpop.f32.mrb[0].mxu1 }
  0xf6   :  { %v344_v19 = vmul.f32 %v598_v17, %v483_v16  ;;  %v352_v20 = vmul.f32 %v606_v18, %v483_v16  ;;  %v221_v21 = vpop.f32.mrb[1].mxu0  ;;  %v253_v22 = vpop.f32.mrb[1].mxu1 }
  0xf7   :  { %v342_v24 = vmul.f32 %v483_v16, %v221_v21  ;;  %v350_v25 = vmul.f32 %v483_v16, %v253_v22  ;;  %v599_v26 = vpop.f32.mrb[2].mxu0  ;;  %v607_v27 = vpop.f32.mrb[2].mxu1 }
  0xf8   :  { %v345_v28 = vmul.f32 %v599_v26, %v483_v16  ;;  %v353_v29 = vmul.f32 %v607_v27, %v483_v16  ;;  %v224_v30 = vpop.f32.mrb[3].mxu0  ;;  %v256_v31 = vpop.f32.mrb[3].mxu1  ;;  %v367_v34 = vadd.f32 %v484_v23, %v344_v19  ;;  %v375_v35 = vadd.f32 %v484_v23, %v352_v20 }
  0xf9   :  { %v343_v32 = vmul.f32 %v483_v16, %v224_v30  ;;  %v351_v33 = vmul.f32 %v483_v16, %v256_v31  ;;  %v365_v38 = vadd.f32 %v484_v23, %v342_v24  ;;  %v373_v39 = vadd.f32 %v484_v23, %v350_v25 }
  0xfa   :  { %v368_v36 = vadd.f32 %v484_v23, %v345_v28  ;;  %v376_v37 = vadd.f32 %v484_v23, %v353_v29 }
  0xfb   :  { %v366_v40 = vadd.f32 %v484_v23, %v343_v32  ;;  %v374_v41 = vadd.f32 %v484_v23, %v351_v33 }
  0xfc   :  { %v525_v42 = vpack.c.bf16 %v368_v36, %v367_v34  ;;  %v545_v43 = vpack.c.bf16 %v376_v37, %v375_v35 }
  0xfd   :  { %v520_v44 = vpack.c.bf16 %v366_v40, %v365_v38  ;;  %v540_v45 = vpack.c.bf16 %v374_v41, %v373_v39  ;;  %v602_v46 = vpop.f32.mrb[4].mxu0  ;;  %v610_v47 = vpop.f32.mrb[4].mxu1 }
  0xfe   :  { %557 = vst [vmem:[%s751_s4 + $0x8] sm:$0xff] %v525_v42   ;;  %561 = vst [vmem:[%s751_s4 + $0x28] sm:$0xff] %v545_v43   ;;  %v348_v48 = vmul.f32 %v602_v46, %v483_v16  ;;  %v356_v49 = vmul.f32 %v610_v47, %v483_v16  ;;  %v237_v50 = vpop.f32.mrb[5].mxu0  ;;  %v269_v51 = vpop.f32.mrb[5].mxu1 }
  0xff   :  { %521 = vst [vmem:[%s751_s4] sm:$0xff] %v520_v44   ;;  %560 = vst [vmem:[%s751_s4 + $0x20] sm:$0xff] %v540_v45   ;;  %v346_v52 = vmul.f32 %v483_v16, %v237_v50  ;;  %v354_v53 = vmul.f32 %v483_v16, %v269_v51  ;;  %v603_v54 = vpop.f32.mrb[6].mxu0  ;;  %v611_v55 = vpop.f32.mrb[6].mxu1 }
 0x100   :  { %v349_v56 = vmul.f32 %v603_v54, %v483_v16  ;;  %v357_v57 = vmul.f32 %v611_v55, %v483_v16  ;;  %v240_v58 = vpop.f32.mrb[7].mxu0  ;;  %v272_v59 = vpop.f32.mrb[7].mxu1  ;;  %v371_v62 = vadd.f32 %v484_v23, %v348_v48  ;;  %v379_v63 = vadd.f32 %v484_v23, %v356_v49 }
 0x101   :  { %v347_v60 = vmul.f32 %v483_v16, %v240_v58  ;;  %v355_v61 = vmul.f32 %v483_v16, %v272_v59  ;;  %v369_v2 = vadd.f32 %v484_v23, %v346_v52  ;;  %v377_v3 = vadd.f32 %v484_v23, %v354_v53 }
 0x102   :  { %v372_v0 = vadd.f32 %v484_v23, %v349_v56  ;;  %v380_v1 = vadd.f32 %v484_v23, %v357_v57 }
 0x103   :  { %v370_v4 = vadd.f32 %v484_v23, %v347_v60  ;;  %v378_v5 = vadd.f32 %v484_v23, %v355_v61 }
 0x104   :  { %v535_v6 = vpack.c.bf16 %v372_v0, %v371_v62  ;;  %v555_v7 = vpack.c.bf16 %v380_v1, %v379_v63 }
 0x105   :  { %v530_v8 = vpack.c.bf16 %v370_v4, %v369_v2  ;;  %v550_v9 = vpack.c.bf16 %v378_v5, %v377_v3 }
 0x106   :  { %559 = vst [vmem:[%s751_s4 + $0x18] sm:$0xff] %v535_v6   ;;  %563 = vst [vmem:[%s751_s4 + $0x38] sm:$0xff] %v555_v7  }
 0x107   :  { %558 = vst [vmem:[%s751_s4 + $0x10] sm:$0xff] %v530_v8   ;;  %562 = vst [vmem:[%s751_s4 + $0x30] sm:$0xff] %v550_v9  }

// kernel: deeplabv3plus_forward.25
= control target key start
LH: loop header
LB: loop body
LE: loop exit
PB: predicated region body
PF: predicated region fallthrough
CT: control target
= control target key end

     0   :  { %s2009_s15 = smov 0   ;;  %s2011_s16 = smov 0   ;;  %s2375_s0 = inlined_call_operand.vmem [shape: bf16[128,3456], index: 0, kind: input, shape index: {}]   ;;  %s2376_s1 = inlined_call_operand.vmem [shape: bf16[3456,256], index: 1, kind: input, shape index: {}]   ;;  %s2377_s2 = inlined_call_operand.vmem [shape: f32[1,256], index: 2, kind: input, shape index: {}]   ;;  %s2378_s3 = inlined_call_operand.vmem [shape: f32[1,256], index: 3, kind: input, shape index: {}]   ;;  %s2379_s4 = inlined_call_operand.vmem [shape: bf16[128,256], index: 4, kind: output, shape index: {}]  }
   0x1   :  { %s2013_s17 = smov 0   ;;  %s2015_s18 = smov 0  }
   0x2   :  { %s2017_s19 = smov 0  }
   0x3 LB: > { %s26_s20 = sadd.s32 1, %s1976_s18  ;;  %p49_p1 = scmp.ne.s32.totalorder %s1968_s16, %s1964_s15  ;;  %s1980_s19 = sphi %s2017_s19, %s14_s19   ;;  %s1976_s18 = sphi %s2015_s18, %s2383_s18   ;;  %s1972_s17 = sphi %s2013_s17, %s2382_s17   ;;  %s1968_s16 = sphi %s2011_s16, %s2381_s16   ;;  %s1964_s15 = sphi %s2009_s15, %s2380_s15  }
   0x4   : > { %p27_p0 = scmp.ge.s32.totalorder %s26_s20, 9  ;;  %p50_p2 = scmp.eq.s32.totalorder %s1980_s19, 0 }
   0x5   : > { %s42_s22 = sadd.s32 1, %s1968_s16  ;;  %p1613_p5 = scmp.ge.s32.totalorder %s1980_s19, 9 }
   0x6   : > { %s2385_s20 = smov (%p27_p0, %s26_s20), 0  ;;  %p51_p3 = por %p50_p2, %p49_p1 }
   0x7   : > { %s38_s21 = ssub.s32 %s1976_s18, %s2385_s20  ;;  %206 = sbr.rel (%p1613_p5) target bundleno = 37 (0x25), region = 28 }
   0x8   : > { %p40_p4 = scmp.eq.s32.totalorder %s38_s21, 0 }
   0xa   : > { %s2044_s23 = scalar_select %p40_p4, %s1968_s16, %s42_s22  }
   0xe   : > { %209 = sbr.rel (!%p51_p3) target bundleno = 37 (0x25), region = 32  ;;  %s211_s24 = sand.u32 (%p51_p3), 1, %s1968_s16  }
   0xf   : > { %s1744_s25 = smul.u32 (%p51_p3), 12, %s1976_s18 }
  0x10   : > { %s1794_s26 = smul.u32 (%p51_p3), 192, %s211_s24 }
  0x11   : > { %s2052_s29 = scalar_lea.vmem (%p51_p3), %s2375_s0, %s1744_s25 }
  0x12   : > { %v234_v0 = vld [vmem:[%s2052_s29] sm:$0xff] (%p51_p3)  ;;  %v236_v1 = vld [vmem:[%s2052_s29 + $0x6c] sm:$0xff] (%p51_p3)  ;;  %v238_v2 = vld [vmem:[%s2052_s29 + $0xd8] sm:$0xff] (%p51_p3)  ;;  %s2057_s30 = scalar_lea.vmem (%p51_p3), [#allocation3], %s1794_s26 }
  0x13   : > { %235 = vst [vmem:[%s2057_s30] sm:$0xff] (%p51_p3), %v234_v0  ;;  %237 = vst [vmem:[%s2057_s30 + $0xc] sm:$0xff] (%p51_p3), %v236_v1  ;;  %v240_v3 = vld [vmem:[%s2052_s29 + $0x144] sm:$0xff] (%p51_p3)  ;;  %v242_v4 = vld [vmem:[%s2052_s29 + $0x1b0] sm:$0xff] (%p51_p3) }
  0x14   : > { %239 = vst [vmem:[%s2057_s30 + $0x18] sm:$0xff] (%p51_p3), %v238_v2  ;;  %v244_v5 = vld [vmem:[%s2052_s29 + $0x21c] sm:$0xff] (%p51_p3)  ;;  %241 = vst [vmem:[%s2057_s30 + $0x24] sm:$0xff] (%p51_p3), %v240_v3  ;;  %v246_v6 = vld [vmem:[%s2052_s29 + $0x288] sm:$0xff] (%p51_p3) }
  0x15   : > { %243 = vst [vmem:[%s2057_s30 + $0x30] sm:$0xff] %v242_v4  ;;  %245 = vst [vmem:[%s2057_s30 + $0x3c] sm:$0xff] %v244_v5  ;;  %v248_v7 = vld [vmem:[%s2052_s29 + $0x2f4] sm:$0xff]  ;;  %v250_v8 = vld [vmem:[%s2052_s29 + $0x360] sm:$0xff] }
  0x16   : > { %247 = vst [vmem:[%s2057_s30 + $0x48] sm:$0xff] %v246_v6  ;;  %249 = vst [vmem:[%s2057_s30 + $0x54] sm:$0xff] %v248_v7  ;;  %v252_v9 = vld [vmem:[%s2052_s29 + $0x3cc] sm:$0xff]  ;;  %v254_v10 = vld [vmem:[%s2052_s29 + $0x438] sm:$0xff] }
  0x17   : > { %251 = vst [vmem:[%s2057_s30 + $0x60] sm:$0xff] %v250_v8  ;;  %v256_v11 = vld [vmem:[%s2052_s29 + $0x4a4] sm:$0xff]  ;;  %253 = vst [vmem:[%s2057_s30 + $0x6c] sm:$0xff] %v252_v9  ;;  %v258_v12 = vld [vmem:[%s2052_s29 + $0x510] sm:$0xff] }
  0x18   : > { %255 = vst [vmem:[%s2057_s30 + $0x78] sm:$0xff] %v254_v10  ;;  %257 = vst [vmem:[%s2057_s30 + $0x84] sm:$0xff] %v256_v11  ;;  %v260_v13 = vld [vmem:[%s2052_s29 + $0x57c] sm:$0xff]  ;;  %v262_v14 = vld [vmem:[%s2052_s29 + $0x5e8] sm:$0xff] }
  0x19   : > { %259 = vst [vmem:[%s2057_s30 + $0x90] sm:$0xff] %v258_v12  ;;  %261 = vst [vmem:[%s2057_s30 + $0x9c] sm:$0xff] %v260_v13  ;;  %v264_v15 = vld [vmem:[%s2052_s29 + $0x654] sm:$0xff]  ;;  %v1615_v16 = vld [vmem:[%s2052_s29 + $0x8] sm:$0xf] }
  0x1a   : > { %263 = vst [vmem:[%s2057_s30 + $0xa8] sm:$0xff] %v262_v14  ;;  %v1617_v17 = vld [vmem:[%s2052_s29 + $0x74] sm:$0xf]  ;;  %265 = vst [vmem:[%s2057_s30 + $0xb4] sm:$0xff] %v264_v15  ;;  %v1619_v18 = vld [vmem:[%s2052_s29 + $0xe0] sm:$0xf] }
  0x1b   : > { %1616 = vst [vmem:[%s2057_s30 + $0x8] sm:$0xf] %v1615_v16  ;;  %1618 = vst [vmem:[%s2057_s30 + $0x14] sm:$0xf] %v1617_v17  ;;  %v1621_v19 = vld [vmem:[%s2052_s29 + $0x14c] sm:$0xf] }
  0x1c   : > { %v1623_v20 = vld [vmem:[%s2052_s29 + $0x1b8] sm:$0xf]  ;;  %1620 = vst [vmem:[%s2057_s30 + $0x20] sm:$0xf] %v1619_v18  ;;  %1622 = vst [vmem:[%s2057_s30 + $0x2c] sm:$0xf] %v1621_v19 }
  0x1d   : > { %1624 = vst [vmem:[%s2057_s30 + $0x38] sm:$0xf] %v1623_v20  ;;  %v1625_v21 = vld [vmem:[%s2052_s29 + $0x224] sm:$0xf]  ;;  %v1627_v22 = vld [vmem:[%s2052_s29 + $0x290] sm:$0xf] }
  0x1e   : > { %v1629_v23 = vld [vmem:[%s2052_s29 + $0x2fc] sm:$0xf]  ;;  %1626 = vst [vmem:[%s2057_s30 + $0x44] sm:$0xf] %v1625_v21  ;;  %1628 = vst [vmem:[%s2057_s30 + $0x50] sm:$0xf] %v1627_v22 }
  0x1f   : > { %1630 = vst [vmem:[%s2057_s30 + $0x5c] sm:$0xf] %v1629_v23  ;;  %v1631_v24 = vld [vmem:[%s2052_s29 + $0x368] sm:$0xf]  ;;  %v1633_v25 = vld [vmem:[%s2052_s29 + $0x3d4] sm:$0xf] }
  0x20   : > { %v1635_v26 = vld [vmem:[%s2052_s29 + $0x440] sm:$0xf]  ;;  %1632 = vst [vmem:[%s2057_s30 + $0x68] sm:$0xf] %v1631_v24  ;;  %1634 = vst [vmem:[%s2057_s30 + $0x74] sm:$0xf] %v1633_v25 }
  0x21   : > { %1636 = vst [vmem:[%s2057_s30 + $0x80] sm:$0xf] %v1635_v26  ;;  %v1637_v27 = vld [vmem:[%s2052_s29 + $0x4ac] sm:$0xf]  ;;  %v1639_v28 = vld [vmem:[%s2052_s29 + $0x518] sm:$0xf] }
  0x22   : > { %v1641_v29 = vld [vmem:[%s2052_s29 + $0x584] sm:$0xf]  ;;  %1638 = vst [vmem:[%s2057_s30 + $0x8c] sm:$0xf] %v1637_v27  ;;  %1640 = vst [vmem:[%s2057_s30 + $0x98] sm:$0xf] %v1639_v28 }
  0x23   : > { %1642 = vst [vmem:[%s2057_s30 + $0xa4] sm:$0xf] %v1641_v29  ;;  %v1643_v30 = vld [vmem:[%s2052_s29 + $0x5f0] sm:$0xf]  ;;  %v1645_v31 = vld [vmem:[%s2052_s29 + $0x65c] sm:$0xf] }
  0x24   : > { %1644 = vst [vmem:[%s2057_s30 + $0xb0] sm:$0xf] %v1643_v30  ;;  %1646 = vst [vmem:[%s2057_s30 + $0xbc] sm:$0xf] %v1645_v31 }
  0x25 PF: > { %p1647_p6 = scmp.ge.s32.totalorder %s1980_s19, 1  ;;  %p309_p7 = scmp.lt.s32.totalorder %s1980_s19, 10 }
  0x27   : > { %p310_p8 = pnand %p1647_p6, %p309_p7 }
  0x28   : > { %s316_s5 = sand.u32 (!%p310_p8), 1, %s1964_s15   ;;  %p1648_p9 = scmp.ne.s32.totalorder (!%p310_p8), %s1972_s17, 0 }
  0x29   : > { %313 = sbr.rel (%p310_p8) target bundleno = 437 (0x1b5), region = 58 }
  0x2a   : > { %s1795_s6 = smul.u32 (!%p310_p8), 192, %s316_s5 }
  0x2c   : > { %s2123_s7 = scalar_lea.vmem (!%p310_p8), [#allocation3], %s1795_s6 }
  0x30   : > { %393 = sbr.rel (%p1648_p9) target bundleno = 65 (0x41), region = 66  ;;  %v1982_v32 = vmov (!%p1648_p9), 0.0  }
  0x31   : > { %394 = vst [vmem:[#allocation2] sm:$0xff] (!%p1648_p9), %v1982_v32  ;;  %395 = vst [vmem:[#allocation2 + $0x8] sm:$0xff] (!%p1648_p9), %v1982_v32 }
  0x32   : > { %396 = vst [vmem:[#allocation2 + $0x10] sm:$0xff] (!%p1648_p9), %v1982_v32  ;;  %397 = vst [vmem:[#allocation2 + $0x18] sm:$0xff] (!%p1648_p9), %v1982_v32 }
  0x33   : > { %398 = vst [vmem:[#allocation2 + $0x20] sm:$0xff] (!%p1648_p9), %v1982_v32  ;;  %399 = vst [vmem:[#allocation2 + $0x28] sm:$0xff] (!%p1648_p9), %v1982_v32 }
  0x34   : > { %400 = vst [vmem:[#allocation2 + $0x30] sm:$0xff] (!%p1648_p9), %v1982_v32  ;;  %401 = vst [vmem:[#allocation2 + $0x38] sm:$0xff] (!%p1648_p9), %v1982_v32 }
  0x35   : > { %402 = vst [vmem:[#allocation2 + $0x40] sm:$0xff] (!%p1648_p9), %v1982_v32  ;;  %403 = vst [vmem:[#allocation2 + $0x48] sm:$0xff] (!%p1648_p9), %v1982_v32 }
  0x36   : > { %404 = vst [vmem:[#allocation2 + $0x50] sm:$0xff] (!%p1648_p9), %v1982_v32  ;;  %405 = vst [vmem:[#allocation2 + $0x58] sm:$0xff] (!%p1648_p9), %v1982_v32 }
  0x37   : > { %406 = vst [vmem:[#allocation2 + $0x60] sm:$0xff] %v1982_v32  ;;  %407 = vst [vmem:[#allocation2 + $0x68] sm:$0xff] %v1982_v32 }
  0x38   : > { %408 = vst [vmem:[#allocation2 + $0x70] sm:$0xff] %v1982_v32  ;;  %409 = vst [vmem:[#allocation2 + $0x78] sm:$0xff] %v1982_v32 }
  0x39   : > { %410 = vst [vmem:[#allocation2 + $0x80] sm:$0xff] %v1982_v32  ;;  %411 = vst [vmem:[#allocation2 + $0x88] sm:$0xff] %v1982_v32 }
  0x3a   : > { %412 = vst [vmem:[#allocation2 + $0x90] sm:$0xff] %v1982_v32  ;;  %413 = vst [vmem:[#allocation2 + $0x98] sm:$0xff] %v1982_v32 }
  0x3b   : > { %414 = vst [vmem:[#allocation2 + $0xa0] sm:$0xff] %v1982_v32  ;;  %415 = vst [vmem:[#allocation2 + $0xa8] sm:$0xff] %v1982_v32 }
  0x3c   : > { %416 = vst [vmem:[#allocation2 + $0xb0] sm:$0xff] %v1982_v32  ;;  %417 = vst [vmem:[#allocation2 + $0xb8] sm:$0xff] %v1982_v32 }
  0x3d   : > { %418 = vst [vmem:[#allocation2 + $0xc0] sm:$0xff] %v1982_v32  ;;  %419 = vst [vmem:[#allocation2 + $0xc8] sm:$0xff] %v1982_v32 }
  0x3e   : > { %420 = vst [vmem:[#allocation2 + $0xd0] sm:$0xff] %v1982_v32  ;;  %421 = vst [vmem:[#allocation2 + $0xd8] sm:$0xff] %v1982_v32 }
  0x3f   : > { %422 = vst [vmem:[#allocation2 + $0xe0] sm:$0xff] %v1982_v32  ;;  %423 = vst [vmem:[#allocation2 + $0xe8] sm:$0xff] %v1982_v32 }
  0x40   : > { %424 = vst [vmem:[#allocation2 + $0xf0] sm:$0xff] %v1982_v32  ;;  %425 = vst [vmem:[#allocation2 + $0xf8] sm:$0xff] %v1982_v32 }
  0x41 PF: > { %s426_s8 = smul.u32 384, %s1972_s17  ;;  %v1983_v33 = vmov 0   ;;  %v1913_v34 = vld [vmem:[%s2123_s7 + $0x4] ss:$12 sps:$4 sm:$0xff]   ;;  %v1910_v10 = vld [vmem:[%s2123_s7 + $0x8] ss:$12 sps:$4 sm:$0xff]  }
  0x42   : > { %1057 = vmatprep.mubr.bf16.mxu0 %v1983_v33  ;;  %944 = vmatprep.mubr.bf16.mxu1 %v1913_v34  ;;  %v1914_v15 = vld [vmem:[%s2123_s7 + $0x20] ss:$12 sps:$4 sm:$0xff]   ;;  %v1918_v20 = vld [vmem:[%s2123_s7 + $0x38] ss:$12 sps:$4 sm:$0xff]   ;;  %v1915_v23 = vld [vmem:[%s2123_s7 + $0x1c] ss:$12 sps:$4 sm:$0xff]  }
  0x43   : > { %s491_s9 = sshra.s32 %s426_s8, 3  ;;  %v1911_v22 = vld [vmem:[%s2123_s7] ss:$12 sps:$4 sm:$0xff]   ;;  %v1922_v24 = vld [vmem:[%s2123_s7 + $0x50] ss:$12 sps:$4 sm:$0xff]   ;;  %p1723_p10 = scmp.ne.s32.totalorder %s1972_s17, 8 }
  0x44   : > { %s1745_s10 = sshll.u32 %s491_s9, 3  ;;  %v1917_v25 = vld [vmem:[%s2123_s7 + $0x18] ss:$12 sps:$4 sm:$0xff]   ;;  %v1919_v26 = vld [vmem:[%s2123_s7 + $0x34] ss:$12 sps:$4 sm:$0xff]  }
  0x45   : > { %s2132_s13 = scalar_lea.vmem %s2376_s1, %s1745_s10  ;;  %v1926_v27 = vld [vmem:[%s2123_s7 + $0x68] ss:$12 sps:$4 sm:$0xff]   ;;  %v1921_v28 = vld [vmem:[%s2123_s7 + $0x30] ss:$12 sps:$4 sm:$0xff]   ;;  %v1923_v29 = vld [vmem:[%s2123_s7 + $0x4c] ss:$12 sps:$4 sm:$0xff]  }
  0x46   : > { %v1838_v35 = vld [vmem:[%s2132_s13 + $0x4] ss:$8 sps:$4 sm:$0xff]   ;;  %v1840_v36 = vld [vmem:[%s2132_s13] ss:$8 sps:$4 sm:$0xff]   ;;  %v1841_v37 = vld [vmem:[%s2132_s13 + $0x14] ss:$8 sps:$4 sm:$0xff]  }
  0x47   : > { %912 = vmatprep.subr.bf16.mxu1 %v1838_v35  ;;  %v1843_v38 = vld [vmem:[%s2132_s13 + $0x10] ss:$8 sps:$4 sm:$0xff]   ;;  %v1844_v39 = vld [vmem:[%s2132_s13 + $0x24] ss:$8 sps:$4 sm:$0xff]   ;;  %v1846_v40 = vld [vmem:[%s2132_s13 + $0x20] ss:$8 sps:$4 sm:$0xff]  }
  0x48   : > { %913 = vmatpush1.bf16.msra.mxu1 %v1840_v36  ;;  %v1847_v41 = vld [vmem:[%s2132_s13 + $0x34] ss:$8 sps:$4 sm:$0xff]   ;;  %v1849_v42 = vld [vmem:[%s2132_s13 + $0x30] ss:$8 sps:$4 sm:$0xff]   ;;  %v1862_v43 = vld [vmem:[%s2132_s13 + $0x104] ss:$8 sps:$4 sm:$0xff]  }
  0x49   : > { %914 = vmatprep.subr.bf16.mxu1 %v1841_v37  ;;  %v1864_v44 = vld [vmem:[%s2132_s13 + $0x100] ss:$8 sps:$4 sm:$0xff]   ;;  %v1850_v45 = vld [vmem:[%s2132_s13 + $0x44] ss:$8 sps:$4 sm:$0xff]   ;;  %1025 = vmatprep.subr.bf16.mxu0 %v1862_v43  ;;  %v1868_v46 = vld [vmem:[%s2132_s13 + $0x114] ss:$8 sps:$4 sm:$0xff]  }
  0x4a   : > { %1026 = vmatpush1.bf16.msra.mxu0 %v1864_v44  ;;  %v1870_v47 = vld [vmem:[%s2132_s13 + $0x110] ss:$8 sps:$4 sm:$0xff]   ;;  %v1852_v48 = vld [vmem:[%s2132_s13 + $0x40] ss:$8 sps:$4 sm:$0xff]   ;;  %v1853_v49 = vld [vmem:[%s2132_s13 + $0x54] ss:$8 sps:$4 sm:$0xff]  }
  0x4b   : > { %1027 = vmatprep.subr.bf16.mxu0 %v1868_v46  ;;  %v1874_v50 = vld [vmem:[%s2132_s13 + $0x124] ss:$8 sps:$4 sm:$0xff]   ;;  %v1876_v51 = vld [vmem:[%s2132_s13 + $0x120] ss:$8 sps:$4 sm:$0xff]   ;;  %v1855_v52 = vld [vmem:[%s2132_s13 + $0x50] ss:$8 sps:$4 sm:$0xff]  }
  0x4c   : > { %915 = vmatpush1.bf16.msra.mxu1 %v1843_v38  ;;  %v1880_v53 = vld [vmem:[%s2132_s13 + $0x134] ss:$8 sps:$4 sm:$0xff]   ;;  %v1856_v54 = vld [vmem:[%s2132_s13 + $0x64] ss:$8 sps:$4 sm:$0xff]   ;;  %v1882_v55 = vld [vmem:[%s2132_s13 + $0x130] ss:$8 sps:$4 sm:$0xff]  }
  0x4d   : > { %916 = vmatprep.subr.bf16.mxu1 %v1844_v39  ;;  %v1858_v56 = vld [vmem:[%s2132_s13 + $0x60] ss:$8 sps:$4 sm:$0xff]   ;;  %v1886_v57 = vld [vmem:[%s2132_s13 + $0x144] ss:$8 sps:$4 sm:$0xff]   ;;  %v1859_v58 = vld [vmem:[%s2132_s13 + $0x74] ss:$8 sps:$4 sm:$0xff]  }
  0x4e   : > { %1028 = vmatpush1.bf16.msra.mxu0 %v1870_v47  ;;  %v1888_v59 = vld [vmem:[%s2132_s13 + $0x140] ss:$8 sps:$4 sm:$0xff]   ;;  %v1861_v60 = vld [vmem:[%s2132_s13 + $0x70] ss:$8 sps:$4 sm:$0xff]   ;;  %v1892_v61 = vld [vmem:[%s2132_s13 + $0x154] ss:$8 sps:$4 sm:$0xff]  }
  0x4f   : > { %1029 = vmatprep.subr.bf16.mxu0 %v1874_v50  ;;  %v1865_v62 = vld [vmem:[%s2132_s13 + $0x84] ss:$8 sps:$4 sm:$0xff]   ;;  %v1894_v63 = vld [vmem:[%s2132_s13 + $0x150] ss:$8 sps:$4 sm:$0xff]   ;;  %v1867_v0 = vld [vmem:[%s2132_s13 + $0x80] ss:$8 sps:$4 sm:$0xff]  }
  0x50   : > { %917 = vmatpush1.bf16.msra.mxu1 %v1846_v40  ;;  %v1898_v1 = vld [vmem:[%s2132_s13 + $0x164] ss:$8 sps:$4 sm:$0xff]   ;;  %v1871_v2 = vld [vmem:[%s2132_s13 + $0x94] ss:$8 sps:$4 sm:$0xff]   ;;  %v1873_v3 = vld [vmem:[%s2132_s13 + $0x90] ss:$8 sps:$4 sm:$0xff]  }
  0x51   : > { %918 = vmatprep.subr.bf16.mxu1 %v1847_v41  ;;  %v1900_v4 = vld [vmem:[%s2132_s13 + $0x160] ss:$8 sps:$4 sm:$0xff]   ;;  %v1904_v5 = vld [vmem:[%s2132_s13 + $0x174] ss:$8 sps:$4 sm:$0xff]   ;;  %v1877_v6 = vld [vmem:[%s2132_s13 + $0xa4] ss:$8 sps:$4 sm:$0xff]  }
  0x52   : > { %1030 = vmatpush1.bf16.msra.mxu0 %v1876_v51  ;;  %v1906_v7 = vld [vmem:[%s2132_s13 + $0x170] ss:$8 sps:$4 sm:$0xff]   ;;  %v1879_v8 = vld [vmem:[%s2132_s13 + $0xa0] ss:$8 sps:$4 sm:$0xff]   ;;  %v1883_v9 = vld [vmem:[%s2132_s13 + $0xb4] ss:$8 sps:$4 sm:$0xff]  }
  0x53   : > { %1031 = vmatprep.subr.bf16.mxu0 %v1880_v53  ;;  %v1885_v11 = vld [vmem:[%s2132_s13 + $0xb0] ss:$8 sps:$4 sm:$0xff]   ;;  %v1889_v12 = vld [vmem:[%s2132_s13 + $0xc4] ss:$8 sps:$4 sm:$0xff]   ;;  %v1891_v13 = vld [vmem:[%s2132_s13 + $0xc0] ss:$8 sps:$4 sm:$0xff]  }
  0x54   : > { %919 = vmatpush1.bf16.msra.mxu1 %v1849_v42  ;;  %v1895_v14 = vld [vmem:[%s2132_s13 + $0xd4] ss:$8 sps:$4 sm:$0xff]   ;;  %v1897_v16 = vld [vmem:[%s2132_s13 + $0xd0] ss:$8 sps:$4 sm:$0xff]   ;;  %v1901_v17 = vld [vmem:[%s2132_s13 + $0xe4] ss:$8 sps:$4 sm:$0xff]  }
  0x55   : > { %920 = vmatprep.subr.bf16.mxu1 %v1850_v45  ;;  %v1903_v18 = vld [vmem:[%s2132_s13 + $0xe0] ss:$8 sps:$4 sm:$0xff]   ;;  %v1907_v19 = vld [vmem:[%s2132_s13 + $0xf4] ss:$8 sps:$4 sm:$0xff]   ;;  %v1909_v21 = vld [vmem:[%s2132_s13 + $0xf0] ss:$8 sps:$4 sm:$0xff]  }
  0x56   : > { %1032 = vmatpush1.bf16.msra.mxu0 %v1882_v55  ;;  %v1930_v30 = vld [vmem:[%s2123_s7 + $0x80] ss:$12 sps:$4 sm:$0xff]   ;;  %v1925_v31 = vld [vmem:[%s2123_s7 + $0x48] ss:$12 sps:$4 sm:$0xff]   ;;  %v1927_v32 = vld [vmem:[%s2123_s7 + $0x64] ss:$12 sps:$4 sm:$0xff]  }
  0x57   : > { %1033 = vmatprep.subr.bf16.mxu0 %v1886_v57  ;;  %v1934_v34 = vld [vmem:[%s2123_s7 + $0x98] ss:$12 sps:$4 sm:$0xff]   ;;  %v1929_v35 = vld [vmem:[%s2123_s7 + $0x60] ss:$12 sps:$4 sm:$0xff]   ;;  %v1931_v36 = vld [vmem:[%s2123_s7 + $0x7c] ss:$12 sps:$4 sm:$0xff]  }
  0x58   : > { %921 = vmatpush1.bf16.msra.mxu1 %v1852_v48  ;;  %v1938_v37 = vld [vmem:[%s2123_s7 + $0xb0] ss:$12 sps:$4 sm:$0xff]   ;;  %v1933_v38 = vld [vmem:[%s2123_s7 + $0x78] ss:$12 sps:$4 sm:$0xff]   ;;  %v1935_v39 = vld [vmem:[%s2123_s7 + $0x94] ss:$12 sps:$4 sm:$0xff]  }
  0x59   : > { %922 = vmatprep.subr.bf16.mxu1 %v1853_v49  ;;  %v1937_v40 = vld [vmem:[%s2123_s7 + $0x90] ss:$12 sps:$4 sm:$0xff]   ;;  %v1939_v41 = vld [vmem:[%s2123_s7 + $0xac] ss:$12 sps:$4 sm:$0xff]   ;;  %v1941_v42 = vld [vmem:[%s2123_s7 + $0xa8] ss:$12 sps:$4 sm:$0xff]  }
  0x5a   : > { %1034 = vmatpush1.bf16.msra.mxu0 %v1888_v59  ;;  %v428_v57 = vld [vmem:[#allocation2 + $0x8] sm:$0xff] }
  0x5b   : > { %1035 = vmatprep.subr.bf16.mxu0 %v1892_v61 }
  0x5c   : > { %923 = vmatpush1.bf16.msra.mxu1 %v1855_v52 }
  0x5d   : > { %924 = vmatprep.subr.bf16.mxu1 %v1856_v54  ;;  %v427_v54 = vld [vmem:[#allocation2] sm:$0xff] }
  0x5e   : > { %1036 = vmatpush1.bf16.msra.mxu0 %v1894_v63 }
  0x5f   : > { %1037 = vmatprep.subr.bf16.mxu0 %v1898_v1 }
  0x60   : > { %925 = vmatpush1.bf16.msra.mxu1 %v1858_v56 }
  0x61   : > { %926 = vmatprep.subr.bf16.mxu1 %v1859_v58 }
  0x62   : > { %1038 = vmatpush1.bf16.msra.mxu0 %v1900_v4 }
  0x63   : > { %1039 = vmatprep.subr.bf16.mxu0 %v1904_v5 }
  0x64   : > { %927 = vmatpush1.bf16.msra.mxu1 %v1861_v60  ;;  %v429_v60 = vld [vmem:[#allocation2 + $0x10] sm:$0xff] }
  0x65   : > { %928 = vmatprep.subr.bf16.mxu1 %v1865_v62 }
  0x66   : > { %1040 = vmatpush1.bf16.msra.mxu0 %v1906_v7 }
  0x68   : > { %929 = vmatpush1.bf16.msra.mxu1 %v1867_v0  ;;  %v430_v0 = vld [vmem:[#allocation2 + $0x18] sm:$0xff] }
  0x69   : > { %930 = vmatprep.subr.bf16.mxu1 %v1871_v2  ;;  %1058 = vmatmul.mubr.bf16.vlgmr.msra.gmra.mrb[0].mxu0 %v1910_v10  ;;  %v431_v10 = vld [vmem:[#allocation2 + $0x20] sm:$0xff] }
  0x6a   : > { %1067 = vmatprep.mubr.bf16.mxu0 %v1983_v33 }
  0x6c   : > { %931 = vmatpush1.bf16.msra.mxu1 %v1873_v3 }
  0x6d   : > { %932 = vmatprep.subr.bf16.mxu1 %v1877_v6 }
  0x70   : > { %933 = vmatpush1.bf16.msra.mxu1 %v1879_v8 }
  0x71   : > { %934 = vmatprep.subr.bf16.mxu1 %v1883_v9  ;;  %1068 = vmatmul.mubr.bf16.gmra.mrb[4].mxu0 %v1914_v15 }
  0x72   : > { %1077 = vmatprep.mubr.bf16.mxu0 %v1983_v33 }
  0x74   : > { %935 = vmatpush1.bf16.msra.mxu1 %v1885_v11 }
  0x75   : > { %936 = vmatprep.subr.bf16.mxu1 %v1889_v12 }
  0x78   : > { %937 = vmatpush1.bf16.msra.mxu1 %v1891_v13  ;;  %v432_v13 = vld [vmem:[#allocation2 + $0x28] sm:$0xff] }
  0x79   : > { %938 = vmatprep.subr.bf16.mxu1 %v1895_v14  ;;  %1078 = vmatmul.mubr.bf16.gmra.mrb[8].mxu0 %v1918_v20  ;;  %v434_v20 = vld [vmem:[#allocation2 + $0x38] sm:$0xff] }
  0x7a   : > { %1087 = vmatprep.mubr.bf16.mxu0 %v1983_v33 }
  0x7c   : > { %939 = vmatpush1.bf16.msra.mxu1 %v1897_v16  ;;  %v433_v16 = vld [vmem:[#allocation2 + $0x30] sm:$0xff] }
  0x7d   : > { %940 = vmatprep.subr.bf16.mxu1 %v1901_v17 }
  0x80   : > { %941 = vmatpush1.bf16.msra.mxu1 %v1903_v18 }
  0x81   : > { %942 = vmatprep.subr.bf16.mxu1 %v1907_v19  ;;  %1088 = vmatmul.mubr.bf16.gmra.mrb[12].mxu0 %v1922_v24 }
  0x82   : > { %1097 = vmatprep.mubr.bf16.mxu0 %v1983_v33 }
  0x84   : > { %943 = vmatpush1.bf16.msra.mxu1 %v1909_v21 }
  0x87   : > { %945 = vmatmul.mubr.bf16.vlgmr.msra.gmra.mrb[0].mxu1 %v1911_v22 }
  0x88   : > { %954 = vmatprep.mubr.bf16.mxu1 %v1915_v23 }
  0x89   : > { %1098 = vmatmul.mubr.bf16.gmra.mrb[16].mxu0 %v1926_v27 }
  0x8a   : > { %1107 = vmatprep.mubr.bf16.mxu0 %v1983_v33 }
  0x8f   : > { %955 = vmatmul.mubr.bf16.gmra.mrb[4].mxu1 %v1917_v25 }
  0x90   : > { %964 = vmatprep.mubr.bf16.mxu1 %v1919_v26 }
  0x91   : > { %1108 = vmatmul.mubr.bf16.gmra.mrb[20].mxu0 %v1930_v30  ;;  %v435_v30 = vld [vmem:[#allocation2 + $0x40] sm:$0xff] }
  0x92   : > { %1117 = vmatprep.mubr.bf16.mxu0 %v1983_v33 }
  0x97   : > { %965 = vmatmul.mubr.bf16.gmra.mrb[8].mxu1 %v1921_v28 }
  0x98   : > { %974 = vmatprep.mubr.bf16.mxu1 %v1923_v29 }
  0x99   : > { %1118 = vmatmul.mubr.bf16.gmra.mrb[24].mxu0 %v1934_v34  ;;  %v436_v34 = vld [vmem:[#allocation2 + $0x48] sm:$0xff] }
  0x9a   : > { %1127 = vmatprep.mubr.bf16.mxu0 %v1983_v33 }
  0x9f   : > { %975 = vmatmul.mubr.bf16.gmra.mrb[12].mxu1 %v1925_v31 }
  0xa0   : > { %984 = vmatprep.mubr.bf16.mxu1 %v1927_v32 }
  0xa1   : > { %1128 = vmatmul.mubr.bf16.gmra.mrb[28].mxu0 %v1938_v37  ;;  %v437_v37 = vld [vmem:[#allocation2 + $0x50] sm:$0xff] }
  0xa7   : > { %985 = vmatmul.mubr.bf16.gmra.mrb[16].mxu1 %v1929_v35 }
  0xa8   : > { %994 = vmatprep.mubr.bf16.mxu1 %v1931_v36 }
  0xaf   : > { %995 = vmatmul.mubr.bf16.gmra.mrb[20].mxu1 %v1933_v38 }
  0xb0   : > { %1004 = vmatprep.mubr.bf16.mxu1 %v1935_v39 }
  0xb7   : > { %1005 = vmatmul.mubr.bf16.gmra.mrb[24].mxu1 %v1937_v40 }
  0xb8   : > { %1014 = vmatprep.mubr.bf16.mxu1 %v1939_v41  ;;  %v438_v41 = vld [vmem:[#allocation2 + $0x58] sm:$0xff] }
  0xbf   : > { %1015 = vmatmul.mubr.bf16.gmra.mrb[28].mxu1 %v1941_v42 }
 0x13c   : > { %v1059_v43 = vpop.f32.mrb[0].mxu0 }
 0x13d   : > { %v1061_v44 = vpop.f32.mrb[1].mxu0 }
 0x13e   : > { %v1063_v45 = vpop.f32.mrb[2].mxu0 }
 0x13f   : > { %v1065_v46 = vpop.f32.mrb[3].mxu0 }
 0x144   : > { %v1069_v33 = vpop.f32.mrb[4].mxu0 }
 0x145   : > { %v1071_v47 = vpop.f32.mrb[5].mxu0 }
 0x146   : > { %v1073_v48 = vpop.f32.mrb[6].mxu0 }
 0x147   : > { %v1075_v49 = vpop.f32.mrb[7].mxu0 }
 0x14c   : > { %v1079_v50 = vpop.f32.mrb[8].mxu0 }
 0x14d   : > { %v1081_v51 = vpop.f32.mrb[9].mxu0 }
 0x14e   : > { %v1083_v52 = vpop.f32.mrb[10].mxu0 }
 0x14f   : > { %v2212_v53 = vpop.f32.mrb[11].mxu0 }
 0x154   : > { %v1089_v2 = vpop.f32.mrb[12].mxu0 }
 0x155   : > { %v1091_v5 = vpop.f32.mrb[13].mxu0 }
 0x156   : > { %v2214_v7 = vpop.f32.mrb[14].mxu0 }
 0x157   : > { %v2216_v9 = vpop.f32.mrb[15].mxu0 }
 0x15a   : > { %v946_v55 = vpop.f32.mrb[0].mxu1 }
 0x15b   : > { %v1060_v56 = vadd.f32 %v1059_v43, %v946_v55  ;;  %v948_v58 = vpop.f32.mrb[1].mxu1 }
 0x15c   : > { %v1062_v59 = vadd.f32 %v1061_v44, %v948_v58  ;;  %v950_v61 = vpop.f32.mrb[2].mxu1  ;;  %v1099_v22 = vpop.f32.mrb[16].mxu0 }
 0x15d   : > { %v1138_v62 = vadd.f32 %v1060_v56, %v427_v54  ;;  %v1064_v63 = vadd.f32 %v1063_v45, %v950_v61  ;;  %v952_v1 = vpop.f32.mrb[3].mxu1  ;;  %v1101_v25 = vpop.f32.mrb[17].mxu0  ;;  %v440_v54 = vld [vmem:[#allocation2 + $0x68] sm:$0xff] }
 0x15e   : > { %v1139_v3 = vadd.f32 %v1062_v59, %v428_v57  ;;  %v1066_v4 = vadd.f32 %v1065_v46, %v952_v1  ;;  %v2218_v27 = vpop.f32.mrb[18].mxu0  ;;  %v441_v57 = vld [vmem:[#allocation2 + $0x70] sm:$0xff] }
 0x15f   : > { %1170 = vst [vmem:[#allocation2] sm:$0xff] %v1138_v62  ;;  %v1140_v6 = vadd.f32 %v1064_v63, %v429_v60  ;;  %v2220_v29 = vpop.f32.mrb[19].mxu0  ;;  %v442_v60 = vld [vmem:[#allocation2 + $0x78] sm:$0xff] }
 0x160   : > { %1171 = vst [vmem:[#allocation2 + $0x8] sm:$0xff] %v1139_v3  ;;  %v1141_v8 = vadd.f32 %v1066_v4, %v430_v0 }
 0x161   : > { %1172 = vst [vmem:[#allocation2 + $0x10] sm:$0xff] %v1140_v6 }
 0x162   : > { %1173 = vst [vmem:[#allocation2 + $0x18] sm:$0xff] %v1141_v8  ;;  %v956_v11 = vpop.f32.mrb[4].mxu1 }
 0x163   : > { %v1070_v12 = vadd.f32 %v1069_v33, %v956_v11  ;;  %v958_v14 = vpop.f32.mrb[5].mxu1  ;;  %v444_v11 = vld [vmem:[#allocation2 + $0x88] sm:$0xff] }
 0x164   : > { %v1072_v15 = vadd.f32 %v1071_v47, %v958_v14  ;;  %v960_v17 = vpop.f32.mrb[6].mxu1  ;;  %v1109_v43 = vpop.f32.mrb[20].mxu0 }
 0x165   : > { %v1142_v18 = vadd.f32 %v1070_v12, %v431_v10  ;;  %v1074_v19 = vadd.f32 %v1073_v48, %v960_v17  ;;  %v962_v21 = vpop.f32.mrb[7].mxu1  ;;  %v1111_v46 = vpop.f32.mrb[21].mxu0 }
 0x166   : > { %v1143_v23 = vadd.f32 %v1072_v15, %v432_v13  ;;  %v1076_v24 = vadd.f32 %v1075_v49, %v962_v21  ;;  %v2223_v47 = vpop.f32.mrb[22].mxu0  ;;  %v445_v13 = vld [vmem:[#allocation2 + $0x90] sm:$0xff] }
 0x167   : > { %1174 = vst [vmem:[#allocation2 + $0x20] sm:$0xff] %v1142_v18  ;;  %v1144_v26 = vadd.f32 %v1074_v19, %v433_v16  ;;  %v2225_v49 = vpop.f32.mrb[23].mxu0  ;;  %v446_v16 = vld [vmem:[#allocation2 + $0x98] sm:$0xff] }
 0x168   : > { %1175 = vst [vmem:[#allocation2 + $0x28] sm:$0xff] %v1143_v23  ;;  %v1145_v28 = vadd.f32 %v1076_v24, %v434_v20 }
 0x169   : > { %1176 = vst [vmem:[#allocation2 + $0x30] sm:$0xff] %v1144_v26 }
 0x16a   : > { %1177 = vst [vmem:[#allocation2 + $0x38] sm:$0xff] %v1145_v28  ;;  %v966_v31 = vpop.f32.mrb[8].mxu1 }
 0x16b   : > { %v1080_v32 = vadd.f32 %v1079_v50, %v966_v31  ;;  %v968_v35 = vpop.f32.mrb[9].mxu1  ;;  %v439_v50 = vld [vmem:[#allocation2 + $0x60] sm:$0xff]  ;;  %v448_v31 = vld [vmem:[#allocation2 + $0xa8] sm:$0xff] }
 0x16c   : > { %v1082_v36 = vadd.f32 %v1081_v51, %v968_v35  ;;  %v970_v38 = vpop.f32.mrb[10].mxu1  ;;  %v1119_v62 = vpop.f32.mrb[24].mxu0 }
 0x16d   : > { %v1146_v39 = vadd.f32 %v1080_v32, %v435_v30  ;;  %v1084_v40 = vadd.f32 %v1083_v52, %v970_v38  ;;  %v972_v42 = vpop.f32.mrb[11].mxu1  ;;  %v1121_v1 = vpop.f32.mrb[25].mxu0 }
 0x16e   : > { %v1147_v44 = vadd.f32 %v1082_v36, %v436_v34  ;;  %v1086_v45 = vadd.f32 %v2212_v53, %v972_v42  ;;  %v1123_v4 = vpop.f32.mrb[26].mxu0  ;;  %v449_v34 = vld [vmem:[#allocation2 + $0xb0] sm:$0xff] }
 0x16f   : > { %1178 = vst [vmem:[#allocation2 + $0x40] sm:$0xff] %v1146_v39  ;;  %v1148_v33 = vadd.f32 %v1084_v40, %v437_v37  ;;  %v1125_v6 = vpop.f32.mrb[27].mxu0  ;;  %v450_v37 = vld [vmem:[#allocation2 + $0xb8] sm:$0xff] }
 0x170   : > { %1179 = vst [vmem:[#allocation2 + $0x48] sm:$0xff] %v1147_v44  ;;  %v1149_v48 = vadd.f32 %v1086_v45, %v438_v41 }
 0x171   : > { %1180 = vst [vmem:[#allocation2 + $0x50] sm:$0xff] %v1148_v33 }
 0x172   : > { %1181 = vst [vmem:[#allocation2 + $0x58] sm:$0xff] %v1149_v48  ;;  %v976_v51 = vpop.f32.mrb[12].mxu1 }
 0x173   : > { %v1090_v52 = vadd.f32 %v1089_v2, %v976_v51  ;;  %v978_v55 = vpop.f32.mrb[13].mxu1 }
 0x174   : > { %v1092_v56 = vadd.f32 %v1091_v5, %v978_v55  ;;  %v980_v58 = vpop.f32.mrb[14].mxu1  ;;  %v443_v5 = vld [vmem:[#allocation2 + $0x80] sm:$0xff]  ;;  %v1129_v18 = vpop.f32.mrb[28].mxu0 }
 0x175   : > { %v1150_v53 = vadd.f32 %v1090_v52, %v439_v50  ;;  %v1094_v59 = vadd.f32 %v2214_v7, %v980_v58  ;;  %v982_v61 = vpop.f32.mrb[15].mxu1  ;;  %v1131_v21 = vpop.f32.mrb[29].mxu0  ;;  %v453_v50 = vld [vmem:[#allocation2 + $0xd0] sm:$0xff] }
 0x176   : > { %v1151_v63 = vadd.f32 %v1092_v56, %v440_v54  ;;  %v1096_v0 = vadd.f32 %v2216_v9, %v982_v61  ;;  %v1133_v24 = vpop.f32.mrb[30].mxu0  ;;  %v454_v54 = vld [vmem:[#allocation2 + $0xd8] sm:$0xff]  ;;  %v456_v61 = vld [vmem:[#allocation2 + $0xe8] sm:$0xff] }
 0x177   : > { %1182 = vst [vmem:[#allocation2 + $0x60] sm:$0xff] %v1150_v53  ;;  %v1152_v3 = vadd.f32 %v1094_v59, %v441_v57  ;;  %v1135_v26 = vpop.f32.mrb[31].mxu0  ;;  %v455_v53 = vld [vmem:[#allocation2 + $0xe0] sm:$0xff] }
 0x178   : > { %1183 = vst [vmem:[#allocation2 + $0x68] sm:$0xff] %v1151_v63  ;;  %v1153_v2 = vadd.f32 %v1096_v0, %v442_v60  ;;  %v457_v0 = vld [vmem:[#allocation2 + $0xf0] sm:$0xff] }
 0x179   : > { %1184 = vst [vmem:[#allocation2 + $0x70] sm:$0xff] %v1152_v3 }
 0x17a   : > { %1185 = vst [vmem:[#allocation2 + $0x78] sm:$0xff] %v1153_v2  ;;  %v986_v8 = vpop.f32.mrb[16].mxu1  ;;  %v458_v2 = vld [vmem:[#allocation2 + $0xf8] sm:$0xff] }
 0x17b   : > { %v1100_v10 = vadd.f32 %v1099_v22, %v986_v8  ;;  %v988_v7 = vpop.f32.mrb[17].mxu1 }
 0x17c   : > { %v1102_v12 = vadd.f32 %v1101_v25, %v988_v7  ;;  %v990_v14 = vpop.f32.mrb[18].mxu1  ;;  %v447_v25 = vld [vmem:[#allocation2 + $0xa0] sm:$0xff]  ;;  %v1240_v7 = vlaneseq (!%p1723_p10) }
 0x17d   : > { %v1154_v15 = vadd.f32 %v1100_v10, %v443_v5  ;;  %v1104_v9 = vadd.f32 %v2218_v27, %v990_v14  ;;  %v992_v17 = vpop.f32.mrb[19].mxu1  ;;  %v1282_v14 = vld [vmem:[%s2378_s3] sm:$0x3] (!%p1723_p10) }
 0x17e   : > { %v1155_v19 = vadd.f32 %v1102_v12, %v444_v11  ;;  %v1106_v20 = vadd.f32 %v2220_v29, %v992_v17  ;;  %v1241_v12 = vshrl.u32 (!%p1723_p10), %v1240_v7, 7 }
 0x17f   : > { %1186 = vst [vmem:[#allocation2 + $0x80] sm:$0xff] %v1154_v15  ;;  %v1156_v23 = vadd.f32 %v1104_v9, %v445_v13  ;;  %v1238_v13 = vld [vmem:[%s2377_s2] sm:$0x3] (!%p1723_p10)  ;;  %v1207_v9 = vld [vmem:[#allocation2 + $0x8] sm:$0xff] (!%p1723_p10) }
 0x180   : > { %1187 = vst [vmem:[#allocation2 + $0x88] sm:$0xff] %v1155_v19  ;;  %v1157_v22 = vadd.f32 %v1106_v20, %v446_v16  ;;  %v1206_v15 = vld [vmem:[#allocation2] sm:$0xff] (!%p1723_p10)  ;;  %v1242_v16 = vsub.s32 (!%p1723_p10), 0, %v1241_v12  ;;  %v1246_v17 = vsub.s32 (!%p1723_p10), 1, %v1241_v12  ;;  %v1209_v19 = vld [vmem:[#allocation2 + $0x18] sm:$0xff] (!%p1723_p10) }
 0x181   : > { %1188 = vst [vmem:[#allocation2 + $0x90] sm:$0xff] %v1156_v23  ;;  %v1210_v20 = vld [vmem:[#allocation2 + $0x20] sm:$0xff] (!%p1723_p10) }
 0x182   : > { %1189 = vst [vmem:[#allocation2 + $0x98] sm:$0xff] %v1157_v22  ;;  %v996_v28 = vpop.f32.mrb[20].mxu1  ;;  %v2242_v23 = vrot.slane (!%p1723_p10), %v1238_v13, %v1246_v17  ;;  %v2246_v22 = vrot.slane (!%p1723_p10), %v1282_v14, %v1246_v17 }
 0x183   : > { %v1110_v30 = vadd.f32 %v1109_v43, %v996_v28  ;;  %v998_v27 = vpop.f32.mrb[21].mxu1  ;;  %v451_v43 = vld [vmem:[#allocation2 + $0xc0] sm:$0xff]  ;;  %v1213_v28 = vld [vmem:[#allocation2 + $0x38] sm:$0xff] (!%p1723_p10) }
 0x184   : > { %v1112_v32 = vadd.f32 %v1111_v46, %v998_v27  ;;  %v1000_v35 = vpop.f32.mrb[22].mxu1  ;;  %v452_v46 = vld [vmem:[#allocation2 + $0xc8] sm:$0xff] }
 0x185   : > { %v1158_v36 = vadd.f32 %v1110_v30, %v447_v25  ;;  %v1114_v29 = vadd.f32 %v2223_v47, %v1000_v35  ;;  %v1002_v38 = vpop.f32.mrb[23].mxu1  ;;  %v1212_v25 = vld [vmem:[#allocation2 + $0x30] sm:$0xff] (!%p1723_p10) }
 0x186   : > { %v1159_v39 = vadd.f32 %v1112_v32, %v448_v31  ;;  %v1116_v40 = vadd.f32 %v2225_v49, %v1002_v38  ;;  %v1251_v31 = vmul.f32 (!%p1723_p10), %v2242_v23, %v1207_v9  ;;  %v1253_v32 = vmul.f32 (!%p1723_p10), %v2242_v23, %v1209_v19 }
 0x187   : > { %1190 = vst [vmem:[#allocation2 + $0xa0] sm:$0xff] %v1158_v36  ;;  %v1160_v41 = vadd.f32 %v1114_v29, %v449_v34  ;;  %v1257_v29 = vmul.f32 (!%p1723_p10), %v2242_v23, %v1213_v28  ;;  %v1223_v17 = vld [vmem:[#allocation2 + $0x88] sm:$0xff] (!%p1723_p10) }
 0x188   : > { %1191 = vst [vmem:[#allocation2 + $0xa8] sm:$0xff] %v1159_v39  ;;  %v1161_v42 = vadd.f32 %v1116_v40, %v450_v37  ;;  %v1295_v38 = vadd.f32 (!%p1723_p10), %v2246_v22, %v1251_v31  ;;  %v1297_v40 = vadd.f32 (!%p1723_p10), %v2246_v22, %v1253_v32 }
 0x189   : > { %1192 = vst [vmem:[#allocation2 + $0xb0] sm:$0xff] %v1160_v41  ;;  %v1225_v28 = vld [vmem:[#allocation2 + $0x98] sm:$0xff] (!%p1723_p10) }
 0x18a   : > { %1193 = vst [vmem:[#allocation2 + $0xb8] sm:$0xff] %v1161_v42  ;;  %v1006_v44 = vpop.f32.mrb[24].mxu1 }
 0x18b   : > { %v1120_v45 = vadd.f32 %v1119_v62, %v1006_v44  ;;  %v1008_v33 = vpop.f32.mrb[25].mxu1  ;;  %v1301_v44 = vadd.f32 (!%p1723_p10), %v2246_v22, %v1257_v29 }
 0x18c   : > { %v1122_v48 = vadd.f32 %v1121_v1, %v1008_v33  ;;  %v1010_v51 = vpop.f32.mrb[26].mxu1 }
 0x18d   : > { %v1162_v47 = vadd.f32 %v1120_v45, %v451_v43  ;;  %v1124_v52 = vadd.f32 %v1123_v4, %v1010_v51  ;;  %v1012_v55 = vpop.f32.mrb[27].mxu1  ;;  %v1214_v45 = vld [vmem:[#allocation2 + $0x40] sm:$0xff] (!%p1723_p10)  ;;  %v1329_v51 = vmax.f32 (!%p1723_p10), %v1297_v40, 0.0 }
 0x18e   : > { %v1163_v56 = vadd.f32 %v1122_v48, %v452_v46  ;;  %v1126_v49 = vadd.f32 %v1125_v6, %v1012_v55  ;;  %v1215_v46 = vld [vmem:[#allocation2 + $0x48] sm:$0xff] (!%p1723_p10)  ;;  %v1327_v48 = vmax.f32 (!%p1723_p10), %v1295_v38, 0.0  ;;  %v1267_v38 = vmul.f32 (!%p1723_p10), %v2242_v23, %v1223_v17 }
 0x18f   : > { %1194 = vst [vmem:[#allocation2 + $0xc0] sm:$0xff] %v1162_v47  ;;  %v1164_v57 = vadd.f32 %v1124_v52, %v453_v50  ;;  %v1216_v47 = vld [vmem:[#allocation2 + $0x50] sm:$0xff] (!%p1723_p10)  ;;  %v1217_v52 = vld [vmem:[#allocation2 + $0x58] sm:$0xff] (!%p1723_p10) }
 0x190   : > { %1195 = vst [vmem:[#allocation2 + $0xc8] sm:$0xff] %v1163_v56  ;;  %v1165_v58 = vadd.f32 %v1126_v49, %v454_v54  ;;  %v1333_v49 = vmax.f32 (!%p1723_p10), %v1301_v44, 0.0 }
 0x191   : > { %1196 = vst [vmem:[#allocation2 + $0xd0] sm:$0xff] %v1164_v57  ;;  %v1218_v57 = vld [vmem:[#allocation2 + $0x60] sm:$0xff] (!%p1723_p10)  ;;  %v1229_v44 = vld [vmem:[#allocation2 + $0xb8] sm:$0xff] (!%p1723_p10) }
 0x192   : > { %1197 = vst [vmem:[#allocation2 + $0xd8] sm:$0xff] %v1165_v58  ;;  %v1016_v59 = vpop.f32.mrb[28].mxu1  ;;  %v1219_v58 = vld [vmem:[#allocation2 + $0x68] sm:$0xff] (!%p1723_p10) }
 0x193   : > { %v1130_v60 = vadd.f32 %v1129_v18, %v1016_v59  ;;  %v1018_v62 = vpop.f32.mrb[29].mxu1  ;;  %v1208_v18 = vld [vmem:[#allocation2 + $0x10] sm:$0xff] (!%p1723_p10) }
 0x194   : > { %v1132_v63 = vadd.f32 %v1131_v21, %v1018_v62  ;;  %v1020_v1 = vpop.f32.mrb[30].mxu1  ;;  %1205 = sbr.rel (%p1723_p10) target bundleno = 437 (0x1b5), region = 70  ;;  %v2240_v21 = vrot.slane (!%p1723_p10), %v1238_v13, %v1242_v16  ;;  %v1220_v62 = vld [vmem:[#allocation2 + $0x70] sm:$0xff] (!%p1723_p10)  ;;  %v1222_v13 = vld [vmem:[#allocation2 + $0x80] sm:$0xff] (!%p1723_p10) }
 0x195   : > { %v1166_v3 = vadd.f32 %v1130_v60, %v455_v53  ;;  %v1134_v4 = vadd.f32 %v1133_v24, %v1020_v1  ;;  %v1022_v5 = vpop.f32.mrb[31].mxu1  ;;  %v2244_v24 = vrot.slane (!%p1723_p10), %v1282_v14, %v1242_v16 }
 0x196   : > { %v1167_v8 = vadd.f32 %v1132_v63, %v456_v61  ;;  %v1136_v6 = vadd.f32 %v1135_v26, %v1022_v5  ;;  %v1211_v26 = vld [vmem:[#allocation2 + $0x28] sm:$0xff] (!%p1723_p10)  ;;  %v1250_v30 = vmul.f32 (!%p1723_p10), %v2240_v21, %v1206_v15  ;;  %v1252_v27 = vmul.f32 (!%p1723_p10), %v2240_v21, %v1208_v18  ;;  %v1221_v63 = vld [vmem:[#allocation2 + $0x78] sm:$0xff] (!%p1723_p10) }
 0x197   : > { %1198 = vst [vmem:[#allocation2 + $0xe0] sm:$0xff] %v1166_v3  ;;  %v1168_v10 = vadd.f32 %v1134_v4, %v457_v0  ;;  %v1254_v34 = vmul.f32 (!%p1723_p10), %v2240_v21, %v1210_v20  ;;  %v1255_v35 = vmul.f32 (!%p1723_p10), %v2242_v23, %v1211_v26  ;;  %v1256_v36 = vmul.f32 (!%p1723_p10), %v2240_v21, %v1212_v25  ;;  %v1224_v25 = vld [vmem:[#allocation2 + $0x90] sm:$0xff] (!%p1723_p10) }
 0x198   : > { %1199 = vst [vmem:[#allocation2 + $0xe8] sm:$0xff] %v1167_v8  ;;  %v1169_v11 = vadd.f32 %v1136_v6, %v458_v2  ;;  %v1294_v37 = vadd.f32 (!%p1723_p10), %v2244_v24, %v1250_v30  ;;  %v1296_v39 = vadd.f32 (!%p1723_p10), %v2244_v24, %v1252_v27  ;;  %v1258_v60 = vmul.f32 (!%p1723_p10), %v2240_v21, %v1214_v45 }
 0x199   : > { %1200 = vst [vmem:[#allocation2 + $0xf0] sm:$0xff] %v1168_v10  ;;  %v1298_v41 = vadd.f32 (!%p1723_p10), %v2244_v24, %v1254_v34  ;;  %v1299_v42 = vadd.f32 (!%p1723_p10), %v2246_v22, %v1255_v35  ;;  %v1300_v43 = vadd.f32 (!%p1723_p10), %v2244_v24, %v1256_v36  ;;  %v1259_v61 = vmul.f32 (!%p1723_p10), %v2242_v23, %v1215_v46  ;;  %v1226_v34 = vld [vmem:[#allocation2 + $0xa0] sm:$0xff] (!%p1723_p10)  ;;  %v1227_v35 = vld [vmem:[#allocation2 + $0xa8] sm:$0xff] (!%p1723_p10) }
 0x19a   : > { %1201 = vst [vmem:[#allocation2 + $0xf8] sm:$0xff] %v1169_v11  ;;  %v1326_v33 = vmax.f32 (!%p1723_p10), %v1294_v37, 0.0  ;;  %v1328_v50 = vmax.f32 (!%p1723_p10), %v1296_v39, 0.0  ;;  %v1260_v3 = vmul.f32 (!%p1723_p10), %v2240_v21, %v1216_v47  ;;  %v1261_v4 = vmul.f32 (!%p1723_p10), %v2242_v23, %v1217_v52  ;;  %v1228_v39 = vld [vmem:[#allocation2 + $0xb0] sm:$0xff] (!%p1723_p10) }
 0x19b   : > { %v1330_v54 = vmax.f32 %v1298_v41, 0.0  ;;  %v1331_v55 = vmax.f32 %v1299_v42, 0.0  ;;  %v1332_v56 = vmax.f32 %v1300_v43, 0.0  ;;  %v1302_v2 = vadd.f32 %v2244_v24, %v1258_v60 }
 0x19c   : > { %v1746_v53 = vpack.c.bf16 %v1327_v48, %v1326_v33  ;;  %v1747_v59 = vpack.c.bf16 %v1329_v51, %v1328_v50  ;;  %v1303_v5 = vadd.f32 %v2246_v22, %v1259_v61  ;;  %v1262_v8 = vmul.f32 %v2240_v21, %v1218_v57  ;;  %v1230_v50 = vld [vmem:[#allocation2 + $0xc0] sm:$0xff] }
 0x19d   : > { %v1748_v0 = vpack.c.bf16 %v1331_v55, %v1330_v54  ;;  %v1749_v1 = vpack.c.bf16 %v1333_v49, %v1332_v56  ;;  %v1263_v6 = vmul.f32 %v2242_v23, %v1219_v58  ;;  %v1304_v10 = vadd.f32 %v2244_v24, %v1260_v3  ;;  %v1231_v58 = vld [vmem:[#allocation2 + $0xc8] sm:$0xff] }
 0x19e   : > { %1454 = vst [vmem:[%s2379_s4] sm:$0xff] %v1746_v53  ;;  %1455 = vst [vmem:[%s2379_s4 + $0x8] sm:$0xff] %v1747_v59  ;;  %v1305_v11 = vadd.f32 %v2246_v22, %v1261_v4  ;;  %v1264_v7 = vmul.f32 %v2240_v21, %v1220_v62  ;;  %v1265_v12 = vmul.f32 %v2242_v23, %v1221_v63  ;;  %v1334_v14 = vmax.f32 %v1302_v2, 0.0  ;;  %v1232_v62 = vld [vmem:[#allocation2 + $0xd0] sm:$0xff]  ;;  %v1233_v63 = vld [vmem:[#allocation2 + $0xd8] sm:$0xff] }
 0x19f   : > { %1456 = vst [vmem:[%s2379_s4 + $0x10] sm:$0xff] %v1748_v0  ;;  %1457 = vst [vmem:[%s2379_s4 + $0x18] sm:$0xff] %v1749_v1  ;;  %v1335_v15 = vmax.f32 %v1303_v5, 0.0  ;;  %v1306_v9 = vadd.f32 %v2244_v24, %v1262_v8  ;;  %v1307_v16 = vadd.f32 %v2246_v22, %v1263_v6  ;;  %v1336_v18 = vmax.f32 %v1304_v10, 0.0  ;;  %v1234_v2 = vld [vmem:[#allocation2 + $0xe0] sm:$0xff]  ;;  %v1235_v5 = vld [vmem:[#allocation2 + $0xe8] sm:$0xff] }
 0x1a0   : > { %v1337_v19 = vmax.f32 %v1305_v11, 0.0  ;;  %v1308_v20 = vadd.f32 %v2244_v24, %v1264_v7  ;;  %v1309_v26 = vadd.f32 %v2246_v22, %v1265_v12  ;;  %v1266_v32 = vmul.f32 %v2240_v21, %v1222_v13  ;;  %v1236_v7 = vld [vmem:[#allocation2 + $0xf0] sm:$0xff] }
 0x1a1   : > { %v1750_v30 = vpack.c.bf16 %v1335_v15, %v1334_v14  ;;  %v1338_v31 = vmax.f32 %v1306_v9, 0.0  ;;  %v1339_v27 = vmax.f32 %v1307_v16, 0.0  ;;  %v1268_v42 = vmul.f32 %v2240_v21, %v1224_v25  ;;  %v1237_v9 = vld [vmem:[#allocation2 + $0xf8] sm:$0xff] }
 0x1a2   : > { %v1751_v36 = vpack.c.bf16 %v1337_v19, %v1336_v18  ;;  %v1340_v29 = vmax.f32 %v1308_v20, 0.0  ;;  %v1341_v37 = vmax.f32 %v1309_v26, 0.0  ;;  %v1310_v41 = vadd.f32 %v2244_v24, %v1266_v32 }
 0x1a3   : > { %1458 = vst [vmem:[%s2379_s4 + $0x20] sm:$0xff] %v1750_v30  ;;  %v1752_v40 = vpack.c.bf16 %v1339_v27, %v1338_v31  ;;  %v1269_v43 = vmul.f32 %v2242_v23, %v1225_v28  ;;  %v1311_v46 = vadd.f32 %v2246_v22, %v1267_v38  ;;  %v1270_v33 = vmul.f32 %v2240_v21, %v1226_v34 }
 0x1a4   : > { %1459 = vst [vmem:[%s2379_s4 + $0x28] sm:$0xff] %v1751_v36  ;;  %v1753_v45 = vpack.c.bf16 %v1341_v37, %v1340_v29  ;;  %v1271_v48 = vmul.f32 %v2242_v23, %v1227_v35  ;;  %v1342_v51 = vmax.f32 %v1310_v41, 0.0  ;;  %v1312_v47 = vadd.f32 %v2244_v24, %v1268_v42 }
 0x1a5   : > { %1460 = vst [vmem:[%s2379_s4 + $0x30] sm:$0xff] %v1752_v40  ;;  %v1313_v52 = vadd.f32 %v2246_v22, %v1269_v43  ;;  %v1272_v54 = vmul.f32 %v2240_v21, %v1228_v39  ;;  %v1343_v55 = vmax.f32 %v1311_v46, 0.0  ;;  %v1314_v56 = vadd.f32 %v2244_v24, %v1270_v33 }
 0x1a6   : > { %1461 = vst [vmem:[%s2379_s4 + $0x38] sm:$0xff] %v1753_v45  ;;  %v1315_v49 = vadd.f32 %v2246_v22, %v1271_v48  ;;  %v1273_v57 = vmul.f32 %v2242_v23, %v1229_v44  ;;  %v1344_v53 = vmax.f32 %v1312_v47, 0.0  ;;  %v1274_v61 = vmul.f32 %v2240_v21, %v1230_v50 }
 0x1a7   : > { %v1345_v59 = vmax.f32 %v1313_v52, 0.0  ;;  %v1316_v60 = vadd.f32 %v2244_v24, %v1272_v54  ;;  %v1754_v0 = vpack.c.bf16 %v1343_v55, %v1342_v51  ;;  %v1346_v1 = vmax.f32 %v1314_v56, 0.0 }
 0x1a8   : > { %v1347_v3 = vmax.f32 %v1315_v49, 0.0  ;;  %v1317_v4 = vadd.f32 %v2246_v22, %v1273_v57  ;;  %v1275_v10 = vmul.f32 %v2242_v23, %v1231_v58  ;;  %v1318_v11 = vadd.f32 %v2244_v24, %v1274_v61 }
 0x1a9   : > { %v1755_v8 = vpack.c.bf16 %v1345_v59, %v1344_v53  ;;  %v1348_v6 = vmax.f32 %v1316_v60, 0.0  ;;  %1462 = vst [vmem:[%s2379_s4 + $0x40] sm:$0xff] %v1754_v0  ;;  %v1276_v14 = vmul.f32 %v2240_v21, %v1232_v62  ;;  %v1277_v15 = vmul.f32 %v2242_v23, %v1233_v63 }
 0x1aa   : > { %v1756_v12 = vpack.c.bf16 %v1347_v3, %v1346_v1  ;;  %v1349_v13 = vmax.f32 %v1317_v4, 0.0  ;;  %v1319_v16 = vadd.f32 %v2246_v22, %v1275_v10  ;;  %v1350_v17 = vmax.f32 %v1318_v11, 0.0 }
 0x1ab   : > { %1463 = vst [vmem:[%s2379_s4 + $0x48] sm:$0xff] %v1755_v8  ;;  %v1278_v18 = vmul.f32 %v2240_v21, %v1234_v2  ;;  %v1279_v19 = vmul.f32 %v2242_v23, %v1235_v5  ;;  %v1320_v26 = vadd.f32 %v2244_v24, %v1276_v14  ;;  %v1321_v25 = vadd.f32 %v2246_v22, %v1277_v15 }
 0x1ac   : > { %1464 = vst [vmem:[%s2379_s4 + $0x50] sm:$0xff] %v1756_v12  ;;  %v1757_v20 = vpack.c.bf16 %v1349_v13, %v1348_v6  ;;  %v1280_v28 = vmul.f32 %v2240_v21, %v1236_v7  ;;  %v1351_v30 = vmax.f32 %v1319_v16, 0.0  ;;  %v1281_v32 = vmul.f32 %v2242_v23, %v1237_v9 }
 0x1ad   : > { %v1322_v31 = vadd.f32 %v2244_v24, %v1278_v18  ;;  %v1323_v27 = vadd.f32 %v2246_v22, %v1279_v19  ;;  %v1352_v34 = vmax.f32 %v1320_v26, 0.0  ;;  %v1353_v35 = vmax.f32 %v1321_v25, 0.0 }
 0x1ae   : > { %1465 = vst [vmem:[%s2379_s4 + $0x58] sm:$0xff] %v1757_v20  ;;  %v1324_v36 = vadd.f32 %v2244_v24, %v1280_v28  ;;  %v1758_v29 = vpack.c.bf16 %v1351_v30, %v1350_v17  ;;  %v1325_v21 = vadd.f32 %v2246_v22, %v1281_v32 }
 0x1af   : > { %v1354_v37 = vmax.f32 %v1322_v31, 0.0  ;;  %v1355_v38 = vmax.f32 %v1323_v27, 0.0  ;;  %v1759_v39 = vpack.c.bf16 %v1353_v35, %v1352_v34 }
 0x1b0   : > { %v1356_v40 = vmax.f32 %v1324_v36, 0.0  ;;  %1466 = vst [vmem:[%s2379_s4 + $0x60] sm:$0xff] %v1758_v29  ;;  %v1357_v41 = vmax.f32 %v1325_v21, 0.0 }
 0x1b1   : > { %v1760_v23 = vpack.c.bf16 %v1355_v38, %v1354_v37  ;;  %1467 = vst [vmem:[%s2379_s4 + $0x68] sm:$0xff] %v1759_v39 }
 0x1b2   : > { %v1761_v24 = vpack.c.bf16 %v1357_v41, %v1356_v40 }
 0x1b3   : > { %1468 = vst [vmem:[%s2379_s4 + $0x70] sm:$0xff] %v1760_v23 }
 0x1b4   : > { %1469 = vst [vmem:[%s2379_s4 + $0x78] sm:$0xff] %v1761_v24 }
 0x1b5 PF: > { %s14_s19 = sadd.s32 1, %s1980_s19   ;;  %s2380_s15 = smov %s1968_s16 }
 0x1b6   : > { %p11_p11 = scmp.ge.s32.totalorder %s14_s19, 11   ;;  %s2381_s16 = smov %s2044_s23 }
 0x1b7   : > { %s2382_s17 = smov %s1976_s18  ;;  %s2383_s18 = smov %s2385_s20 }
 0x1b8   :  { %13 = sbr.rel (!%p11_p11) target bundleno = 3 (0x3), region = 121 }

// kernel: deeplabv3plus_forward.27
= control target key start
LH: loop header
LB: loop body
LE: loop exit
PB: predicated region body
PF: predicated region fallthrough
CT: control target
= control target key end

     0   :  { %s864_s1 = inlined_call_operand.vmem [shape: bf16[256,128], index: 1, kind: input, shape index: {}]   ;;  %s865_s0 = inlined_call_operand.vmem [shape: bf16[128,256], index: 0, kind: input, shape index: {}]   ;;  %s866_s2 = inlined_call_operand.vmem [shape: f32[1,128], index: 2, kind: input, shape index: {}]   ;;  %s867_s3 = inlined_call_operand.vmem [shape: f32[1,128], index: 3, kind: input, shape index: {}]   ;;  %s868_s4 = inlined_call_operand.vmem [shape: f32[128,128], index: 4, kind: output, shape index: {}]  }
   0x1   :  { %v613_v0 = vld [vmem:[%s864_s1 + $0x40] sm:$0xff]   ;;  %v615_v2 = vld [vmem:[%s864_s1 + $0x48] sm:$0xff]   ;;  %v617_v4 = vld [vmem:[%s864_s1 + $0x50] sm:$0xff]  }
   0x2   :  { %v614_v1 = vld [vmem:[%s864_s1] sm:$0xff]   ;;  %533 = vmatprep.subr.bf16.mxu0 %v613_v0  ;;  %597 = vmatprep.subr.bf16.mxu1 %v613_v0  ;;  %v616_v3 = vld [vmem:[%s864_s1 + $0x8] sm:$0xff]   ;;  %v618_v5 = vld [vmem:[%s864_s1 + $0x10] sm:$0xff]  }
   0x3   :  { %534 = vmatpush3.bf16.msra.mxu0 %v614_v1  ;;  %605 = vmatpush3.bf16.msra.mxu1 %v614_v1  ;;  %v619_v6 = vld [vmem:[%s864_s1 + $0x58] sm:$0xff]   ;;  %v621_v8 = vld [vmem:[%s864_s1 + $0x60] sm:$0xff]   ;;  %v623_v10 = vld [vmem:[%s864_s1 + $0x68] sm:$0xff]  }
   0x4   :  { %535 = vmatprep.subr.bf16.mxu0 %v615_v2  ;;  %598 = vmatprep.subr.bf16.mxu1 %v615_v2  ;;  %v620_v7 = vld [vmem:[%s864_s1 + $0x18] sm:$0xff]   ;;  %v622_v9 = vld [vmem:[%s864_s1 + $0x20] sm:$0xff]   ;;  %v624_v13 = vld [vmem:[%s864_s1 + $0x28] sm:$0xff]  }
   0x5   :  { %v631_v11 = vld [vmem:[%s865_s0 + $0x4] ss:$8 sps:$4 sm:$0xff]   ;;  %v625_v14 = vld [vmem:[%s864_s1 + $0x70] sm:$0xff]   ;;  %v627_v16 = vld [vmem:[%s864_s1 + $0x78] sm:$0xff]  }
   0x6   :  { %v634_v12 = vld [vmem:[%s865_s0 + $0x44] ss:$8 sps:$4 sm:$0xff]   ;;  %315 = vmatprep.mubr.bf16.mxu0 %v631_v11  ;;  %v626_v15 = vld [vmem:[%s864_s1 + $0x30] sm:$0xff]   ;;  %v628_v17 = vld [vmem:[%s864_s1 + $0x38] sm:$0xff]  }
   0x7   :  { %536 = vmatpush3.bf16.msra.mxu0 %v616_v3  ;;  %606 = vmatpush3.bf16.msra.mxu1 %v616_v3  ;;  %v629_v18 = vld [vmem:[%s865_s0] ss:$8 sps:$4 sm:$0xff]   ;;  %v635_v20 = vld [vmem:[%s865_s0 + $0x14] ss:$8 sps:$4 sm:$0xff]   ;;  %v639_v22 = vld [vmem:[%s865_s0 + $0x10] ss:$8 sps:$4 sm:$0xff]  }
   0x8   :  { %537 = vmatprep.subr.bf16.mxu0 %v617_v4  ;;  %599 = vmatprep.subr.bf16.mxu1 %v617_v4  ;;  %v632_v19 = vld [vmem:[%s865_s0 + $0x40] ss:$8 sps:$4 sm:$0xff]   ;;  %v637_v21 = vld [vmem:[%s865_s0 + $0x54] ss:$8 sps:$4 sm:$0xff]   ;;  %v640_v23 = vld [vmem:[%s865_s0 + $0x50] ss:$8 sps:$4 sm:$0xff]  }
   0x9   :  { %347 = vmatprep.mubr.bf16.mxu1 %v634_v12  ;;  %v641_v24 = vld [vmem:[%s865_s0 + $0x24] ss:$8 sps:$4 sm:$0xff]   ;;  %v645_v26 = vld [vmem:[%s865_s0 + $0x20] ss:$8 sps:$4 sm:$0xff]   ;;  %v647_v28 = vld [vmem:[%s865_s0 + $0x34] ss:$8 sps:$4 sm:$0xff]  }
   0xa   :  { %v643_v25 = vld [vmem:[%s865_s0 + $0x64] ss:$8 sps:$4 sm:$0xff]   ;;  %v646_v27 = vld [vmem:[%s865_s0 + $0x60] ss:$8 sps:$4 sm:$0xff]   ;;  %v649_v29 = vld [vmem:[%s865_s0 + $0x74] ss:$8 sps:$4 sm:$0xff]  }
   0xb   :  { %538 = vmatpush3.bf16.msra.mxu0 %v618_v5  ;;  %607 = vmatpush3.bf16.msra.mxu1 %v618_v5  ;;  %v651_v30 = vld [vmem:[%s865_s0 + $0x30] ss:$8 sps:$4 sm:$0xff]   ;;  %v777_v35 = vld [vmem:[%s866_s2] ss:$0 sm:$0xff] }
   0xc   :  { %539 = vmatprep.subr.bf16.mxu0 %v619_v6  ;;  %600 = vmatprep.subr.bf16.mxu1 %v619_v6  ;;  %v652_v31 = vld [vmem:[%s865_s0 + $0x70] ss:$8 sps:$4 sm:$0xff]   ;;  %v782_v41 = vld [vmem:[%s867_s3] ss:$0 sm:$0xff] }
   0xf   :  { %540 = vmatpush3.bf16.msra.mxu0 %v620_v7  ;;  %608 = vmatpush3.bf16.msra.mxu1 %v620_v7 }
  0x10   :  { %541 = vmatprep.subr.bf16.mxu0 %v621_v8  ;;  %601 = vmatprep.subr.bf16.mxu1 %v621_v8 }
  0x13   :  { %542 = vmatpush3.bf16.msra.mxu0 %v622_v9  ;;  %609 = vmatpush3.bf16.msra.mxu1 %v622_v9 }
  0x14   :  { %543 = vmatprep.subr.bf16.mxu0 %v623_v10  ;;  %602 = vmatprep.subr.bf16.mxu1 %v623_v10 }
  0x17   :  { %544 = vmatpush3.bf16.msra.mxu0 %v624_v13  ;;  %610 = vmatpush3.bf16.msra.mxu1 %v624_v13 }
  0x18   :  { %545 = vmatprep.subr.bf16.mxu0 %v625_v14  ;;  %603 = vmatprep.subr.bf16.mxu1 %v625_v14 }
  0x1b   :  { %546 = vmatpush3.bf16.msra.mxu0 %v626_v15  ;;  %611 = vmatpush3.bf16.msra.mxu1 %v626_v15 }
  0x1c   :  { %547 = vmatprep.subr.bf16.mxu0 %v627_v16  ;;  %604 = vmatprep.subr.bf16.mxu1 %v627_v16 }
  0x1f   :  { %548 = vmatpush3.bf16.msra.mxu0 %v628_v17  ;;  %612 = vmatpush3.bf16.msra.mxu1 %v628_v17 }
  0x22   :  { %316 = vmatmul.mubr.bf16.vlgmr.msra.gmra.mrb[0].mxu0 %v629_v18  ;;  %348 = vmatmul.mubr.bf16.vlgmr.msra.gmra.mrb[0].mxu1 %v632_v19 }
  0x23   :  { %323 = vmatprep.mubr.bf16.mxu0 %v635_v20  ;;  %355 = vmatprep.mubr.bf16.mxu1 %v637_v21 }
  0x2a   :  { %324 = vmatmul.mubr.bf16.gmra.mrb[4].mxu0 %v639_v22  ;;  %356 = vmatmul.mubr.bf16.gmra.mrb[4].mxu1 %v640_v23 }
  0x2b   :  { %331 = vmatprep.mubr.bf16.mxu0 %v641_v24  ;;  %363 = vmatprep.mubr.bf16.mxu1 %v643_v25 }
  0x32   :  { %332 = vmatmul.mubr.bf16.gmra.mrb[8].mxu0 %v645_v26  ;;  %364 = vmatmul.mubr.bf16.gmra.mrb[8].mxu1 %v646_v27 }
  0x33   :  { %339 = vmatprep.mubr.bf16.mxu0 %v647_v28  ;;  %371 = vmatprep.mubr.bf16.mxu1 %v649_v29 }
  0x3a   :  { %340 = vmatmul.mubr.bf16.gmra.mrb[12].mxu0 %v651_v30  ;;  %372 = vmatmul.mubr.bf16.gmra.mrb[12].mxu1 %v652_v31 }
  0xf5   :  { %v549_v32 = vpop.f32.mrb[0].mxu0  ;;  %v573_v33 = vpop.f32.mrb[0].mxu1 }
  0xf6   :  { %v550_v34 = vpop.f32.mrb[1].mxu0  ;;  %v574_v36 = vpop.f32.mrb[1].mxu1 }
  0xf7   :  { %v551_v37 = vadd.f32 %v550_v34, %v549_v32  ;;  %v575_v38 = vadd.f32 %v574_v36, %v573_v33  ;;  %v552_v39 = vpop.f32.mrb[2].mxu0  ;;  %v576_v40 = vpop.f32.mrb[2].mxu1 }
  0xf8   :  { %v553_v42 = vpop.f32.mrb[3].mxu0  ;;  %v577_v43 = vpop.f32.mrb[3].mxu1 }
  0xf9   :  { %v438_v44 = vmul.f32 %v551_v37, %v777_v35  ;;  %v446_v45 = vmul.f32 %v575_v38, %v777_v35  ;;  %v554_v46 = vadd.f32 %v553_v42, %v552_v39  ;;  %v578_v47 = vadd.f32 %v577_v43, %v576_v40 }
  0xfb   :  { %v461_v48 = vadd.f32 %v782_v41, %v438_v44  ;;  %v469_v49 = vadd.f32 %v782_v41, %v446_v45  ;;  %v439_v50 = vmul.f32 %v554_v46, %v777_v35  ;;  %v447_v51 = vmul.f32 %v578_v47, %v777_v35 }
  0xfd   :  { %477 = vst [vmem:[%s868_s4] sm:$0xff] %v461_v48  ;;  %485 = vst [vmem:[%s868_s4 + $0x40] sm:$0xff] %v469_v49  ;;  %v462_v52 = vadd.f32 %v782_v41, %v439_v50  ;;  %v470_v53 = vadd.f32 %v782_v41, %v447_v51  ;;  %v555_v54 = vpop.f32.mrb[4].mxu0  ;;  %v579_v55 = vpop.f32.mrb[4].mxu1 }
  0xfe   :  { %v556_v56 = vpop.f32.mrb[5].mxu0  ;;  %v580_v57 = vpop.f32.mrb[5].mxu1 }
  0xff   :  { %478 = vst [vmem:[%s868_s4 + $0x8] sm:$0xff] %v462_v52  ;;  %486 = vst [vmem:[%s868_s4 + $0x48] sm:$0xff] %v470_v53  ;;  %v557_v58 = vadd.f32 %v556_v56, %v555_v54  ;;  %v581_v59 = vadd.f32 %v580_v57, %v579_v55  ;;  %v558_v60 = vpop.f32.mrb[6].mxu0  ;;  %v582_v61 = vpop.f32.mrb[6].mxu1 }
 0x100   :  { %v559_v62 = vpop.f32.mrb[7].mxu0  ;;  %v583_v63 = vpop.f32.mrb[7].mxu1 }
 0x101   :  { %v440_v0 = vmul.f32 %v557_v58, %v777_v35  ;;  %v448_v1 = vmul.f32 %v581_v59, %v777_v35  ;;  %v560_v2 = vadd.f32 %v559_v62, %v558_v60  ;;  %v584_v3 = vadd.f32 %v583_v63, %v582_v61 }
 0x103   :  { %v463_v4 = vadd.f32 %v782_v41, %v440_v0  ;;  %v471_v5 = vadd.f32 %v782_v41, %v448_v1  ;;  %v441_v6 = vmul.f32 %v560_v2, %v777_v35  ;;  %v449_v7 = vmul.f32 %v584_v3, %v777_v35 }
 0x105   :  { %479 = vst [vmem:[%s868_s4 + $0x10] sm:$0xff] %v463_v4  ;;  %487 = vst [vmem:[%s868_s4 + $0x50] sm:$0xff] %v471_v5  ;;  %v464_v8 = vadd.f32 %v782_v41, %v441_v6  ;;  %v472_v9 = vadd.f32 %v782_v41, %v449_v7  ;;  %v561_v10 = vpop.f32.mrb[8].mxu0  ;;  %v585_v11 = vpop.f32.mrb[8].mxu1 }
 0x106   :  { %v562_v12 = vpop.f32.mrb[9].mxu0  ;;  %v586_v13 = vpop.f32.mrb[9].mxu1 }
 0x107   :  { %480 = vst [vmem:[%s868_s4 + $0x18] sm:$0xff] %v464_v8  ;;  %488 = vst [vmem:[%s868_s4 + $0x58] sm:$0xff] %v472_v9  ;;  %v563_v14 = vadd.f32 %v562_v12, %v561_v10  ;;  %v587_v15 = vadd.f32 %v586_v13, %v585_v11  ;;  %v564_v16 = vpop.f32.mrb[10].mxu0  ;;  %v588_v17 = vpop.f32.mrb[10].mxu1 }
 0x108   :  { %v565_v18 = vpop.f32.mrb[11].mxu0  ;;  %v589_v19 = vpop.f32.mrb[11].mxu1 }
 0x109   :  { %v442_v20 = vmul.f32 %v563_v14, %v777_v35  ;;  %v450_v21 = vmul.f32 %v587_v15, %v777_v35  ;;  %v566_v22 = vadd.f32 %v565_v18, %v564_v16  ;;  %v590_v23 = vadd.f32 %v589_v19, %v588_v17 }
 0x10b   :  { %v465_v24 = vadd.f32 %v782_v41, %v442_v20  ;;  %v473_v25 = vadd.f32 %v782_v41, %v450_v21  ;;  %v443_v26 = vmul.f32 %v566_v22, %v777_v35  ;;  %v451_v27 = vmul.f32 %v590_v23, %v777_v35 }
 0x10d   :  { %481 = vst [vmem:[%s868_s4 + $0x20] sm:$0xff] %v465_v24  ;;  %489 = vst [vmem:[%s868_s4 + $0x60] sm:$0xff] %v473_v25  ;;  %v466_v28 = vadd.f32 %v782_v41, %v443_v26  ;;  %v474_v29 = vadd.f32 %v782_v41, %v451_v27  ;;  %v567_v30 = vpop.f32.mrb[12].mxu0  ;;  %v591_v31 = vpop.f32.mrb[12].mxu1 }
 0x10e   :  { %v568_v32 = vpop.f32.mrb[13].mxu0  ;;  %v592_v33 = vpop.f32.mrb[13].mxu1 }
 0x10f   :  { %482 = vst [vmem:[%s868_s4 + $0x28] sm:$0xff] %v466_v28  ;;  %490 = vst [vmem:[%s868_s4 + $0x68] sm:$0xff] %v474_v29  ;;  %v569_v34 = vadd.f32 %v568_v32, %v567_v30  ;;  %v593_v36 = vadd.f32 %v592_v33, %v591_v31  ;;  %v570_v37 = vpop.f32.mrb[14].mxu0  ;;  %v594_v38 = vpop.f32.mrb[14].mxu1 }
 0x110   :  { %v571_v39 = vpop.f32.mrb[15].mxu0  ;;  %v595_v40 = vpop.f32.mrb[15].mxu1 }
 0x111   :  { %v444_v42 = vmul.f32 %v569_v34, %v777_v35  ;;  %v452_v43 = vmul.f32 %v593_v36, %v777_v35  ;;  %v572_v44 = vadd.f32 %v571_v39, %v570_v37  ;;  %v596_v45 = vadd.f32 %v595_v40, %v594_v38 }
 0x113   :  { %v467_v46 = vadd.f32 %v782_v41, %v444_v42  ;;  %v475_v47 = vadd.f32 %v782_v41, %v452_v43  ;;  %v445_v48 = vmul.f32 %v572_v44, %v777_v35  ;;  %v453_v49 = vmul.f32 %v596_v45, %v777_v35 }
 0x115   :  { %483 = vst [vmem:[%s868_s4 + $0x30] sm:$0xff] %v467_v46  ;;  %491 = vst [vmem:[%s868_s4 + $0x70] sm:$0xff] %v475_v47  ;;  %v468_v50 = vadd.f32 %v782_v41, %v445_v48  ;;  %v476_v51 = vadd.f32 %v782_v41, %v453_v49 }
 0x117   :  { %484 = vst [vmem:[%s868_s4 + $0x38] sm:$0xff] %v468_v50  ;;  %492 = vst [vmem:[%s868_s4 + $0x78] sm:$0xff] %v476_v51 }

// kernel: deeplabv3plus_forward.26
= control target key start
LH: loop header
LB: loop body
LE: loop exit
PB: predicated region body
PF: predicated region fallthrough
CT: control target
= control target key end

     0   :  { %s2770_s15 = smov 0   ;;  %s2772_s16 = smov 0   ;;  %s3298_s0 = inlined_call_operand.vmem [shape: bf16[128,2304], index: 0, kind: input, shape index: {}]   ;;  %s3299_s1 = inlined_call_operand.vmem [shape: bf16[2304,256], index: 1, kind: input, shape index: {}]   ;;  %s3300_s2 = inlined_call_operand.vmem [shape: f32[1,256], index: 2, kind: input, shape index: {}]   ;;  %s3301_s3 = inlined_call_operand.vmem [shape: f32[1,256], index: 3, kind: input, shape index: {}]   ;;  %s3302_s4 = inlined_call_operand.vmem [shape: bf16[128,256], index: 4, kind: output, shape index: {}]  }
   0x1   :  { %s2774_s17 = smov 0   ;;  %s2776_s18 = smov 0  }
   0x2   :  { %s2778_s19 = smov 0  }
   0x3 LB: > { %s26_s20 = sadd.s32 1, %s2738_s18  ;;  %p49_p1 = scmp.ne.s32.totalorder %s2730_s16, %s2726_s15  ;;  %s2742_s19 = sphi %s2778_s19, %s14_s19   ;;  %s2738_s18 = sphi %s2776_s18, %s3306_s18   ;;  %s2734_s17 = sphi %s2774_s17, %s3305_s17   ;;  %s2730_s16 = sphi %s2772_s16, %s3304_s16   ;;  %s2726_s15 = sphi %s2770_s15, %s3303_s15  }
   0x4   : > { %p27_p0 = scmp.ge.s32.totalorder %s26_s20, 3  ;;  %p50_p2 = scmp.eq.s32.totalorder %s2742_s19, 0 }
   0x5   : > { %s42_s22 = sadd.s32 1, %s2730_s16  ;;  %p2160_p5 = scmp.ge.s32.totalorder %s2742_s19, 3 }
   0x6   : > { %s3308_s20 = smov (%p27_p0, %s26_s20), 0  ;;  %p51_p3 = por %p50_p2, %p49_p1 }
   0x7   : > { %s38_s21 = ssub.s32 %s2738_s18, %s3308_s20  ;;  %206 = sbr.rel (%p2160_p5) target bundleno = 43 (0x2b), region = 28 }
   0x8   : > { %p40_p4 = scmp.eq.s32.totalorder %s38_s21, 0 }
   0xa   : > { %s2805_s23 = scalar_select %p40_p4, %s2730_s16, %s42_s22  }
   0xe   : > { %209 = sbr.rel (!%p51_p3) target bundleno = 43 (0x2b), region = 32  ;;  %s211_s24 = sand.u32 (%p51_p3), 1, %s2730_s16  }
   0xf   : > { %s2331_s25 = smul.u32 (%p51_p3), 24, %s2738_s18 }
  0x10   : > { %s2445_s26 = smul.u32 (%p51_p3), 384, %s211_s24 }
  0x11   : > { %s2813_s29 = scalar_lea.vmem (%p51_p3), %s3298_s0, %s2331_s25 }
  0x12   : > { %v232_v0 = vld [vmem:[%s2813_s29] sm:$0xff] (%p51_p3)  ;;  %v234_v1 = vld [vmem:[%s2813_s29 + $0x8] sm:$0xff] (%p51_p3)  ;;  %v236_v2 = vld [vmem:[%s2813_s29 + $0x10] sm:$0xff] (%p51_p3)  ;;  %s2818_s30 = scalar_lea.vmem (%p51_p3), [#allocation3], %s2445_s26 }
  0x13   : > { %233 = vst [vmem:[%s2818_s30] sm:$0xff] (%p51_p3), %v232_v0  ;;  %235 = vst [vmem:[%s2818_s30 + $0x8] sm:$0xff] (%p51_p3), %v234_v1  ;;  %v238_v3 = vld [vmem:[%s2813_s29 + $0x48] sm:$0xff] (%p51_p3)  ;;  %v240_v4 = vld [vmem:[%s2813_s29 + $0x50] sm:$0xff] (%p51_p3) }
  0x14   : > { %237 = vst [vmem:[%s2818_s30 + $0x10] sm:$0xff] (%p51_p3), %v236_v2  ;;  %v242_v5 = vld [vmem:[%s2813_s29 + $0x58] sm:$0xff] (%p51_p3)  ;;  %239 = vst [vmem:[%s2818_s30 + $0x18] sm:$0xff] (%p51_p3), %v238_v3  ;;  %v244_v6 = vld [vmem:[%s2813_s29 + $0x90] sm:$0xff] (%p51_p3) }
  0x15   : > { %241 = vst [vmem:[%s2818_s30 + $0x20] sm:$0xff] %v240_v4  ;;  %243 = vst [vmem:[%s2818_s30 + $0x28] sm:$0xff] %v242_v5  ;;  %v246_v7 = vld [vmem:[%s2813_s29 + $0x98] sm:$0xff]  ;;  %v248_v8 = vld [vmem:[%s2813_s29 + $0xa0] sm:$0xff] }
  0x16   : > { %245 = vst [vmem:[%s2818_s30 + $0x30] sm:$0xff] %v244_v6  ;;  %247 = vst [vmem:[%s2818_s30 + $0x38] sm:$0xff] %v246_v7  ;;  %v250_v9 = vld [vmem:[%s2813_s29 + $0xd8] sm:$0xff]  ;;  %v252_v10 = vld [vmem:[%s2813_s29 + $0xe0] sm:$0xff] }
  0x17   : > { %249 = vst [vmem:[%s2818_s30 + $0x40] sm:$0xff] %v248_v8  ;;  %v254_v11 = vld [vmem:[%s2813_s29 + $0xe8] sm:$0xff]  ;;  %251 = vst [vmem:[%s2818_s30 + $0x48] sm:$0xff] %v250_v9  ;;  %v256_v12 = vld [vmem:[%s2813_s29 + $0x120] sm:$0xff] }
  0x18   : > { %253 = vst [vmem:[%s2818_s30 + $0x50] sm:$0xff] %v252_v10  ;;  %255 = vst [vmem:[%s2818_s30 + $0x58] sm:$0xff] %v254_v11  ;;  %v258_v13 = vld [vmem:[%s2813_s29 + $0x128] sm:$0xff]  ;;  %v260_v14 = vld [vmem:[%s2813_s29 + $0x130] sm:$0xff] }
  0x19   : > { %257 = vst [vmem:[%s2818_s30 + $0x60] sm:$0xff] %v256_v12  ;;  %259 = vst [vmem:[%s2818_s30 + $0x68] sm:$0xff] %v258_v13  ;;  %v262_v15 = vld [vmem:[%s2813_s29 + $0x168] sm:$0xff]  ;;  %v264_v16 = vld [vmem:[%s2813_s29 + $0x170] sm:$0xff] }
  0x1a   : > { %261 = vst [vmem:[%s2818_s30 + $0x70] sm:$0xff] %v260_v14  ;;  %v266_v17 = vld [vmem:[%s2813_s29 + $0x178] sm:$0xff]  ;;  %263 = vst [vmem:[%s2818_s30 + $0x78] sm:$0xff] %v262_v15  ;;  %v268_v18 = vld [vmem:[%s2813_s29 + $0x1b0] sm:$0xff] }
  0x1b   : > { %265 = vst [vmem:[%s2818_s30 + $0x80] sm:$0xff] %v264_v16  ;;  %267 = vst [vmem:[%s2818_s30 + $0x88] sm:$0xff] %v266_v17  ;;  %v270_v19 = vld [vmem:[%s2813_s29 + $0x1b8] sm:$0xff]  ;;  %v272_v20 = vld [vmem:[%s2813_s29 + $0x1c0] sm:$0xff] }
  0x1c   : > { %269 = vst [vmem:[%s2818_s30 + $0x90] sm:$0xff] %v268_v18  ;;  %271 = vst [vmem:[%s2818_s30 + $0x98] sm:$0xff] %v270_v19  ;;  %v274_v21 = vld [vmem:[%s2813_s29 + $0x1f8] sm:$0xff]  ;;  %v276_v22 = vld [vmem:[%s2813_s29 + $0x200] sm:$0xff] }
  0x1d   : > { %273 = vst [vmem:[%s2818_s30 + $0xa0] sm:$0xff] %v272_v20  ;;  %v278_v23 = vld [vmem:[%s2813_s29 + $0x208] sm:$0xff]  ;;  %275 = vst [vmem:[%s2818_s30 + $0xa8] sm:$0xff] %v274_v21  ;;  %v280_v24 = vld [vmem:[%s2813_s29 + $0x240] sm:$0xff] }
  0x1e   : > { %277 = vst [vmem:[%s2818_s30 + $0xb0] sm:$0xff] %v276_v22  ;;  %279 = vst [vmem:[%s2818_s30 + $0xb8] sm:$0xff] %v278_v23  ;;  %v282_v25 = vld [vmem:[%s2813_s29 + $0x248] sm:$0xff]  ;;  %v284_v26 = vld [vmem:[%s2813_s29 + $0x250] sm:$0xff] }
  0x1f   : > { %281 = vst [vmem:[%s2818_s30 + $0xc0] sm:$0xff] %v280_v24  ;;  %283 = vst [vmem:[%s2818_s30 + $0xc8] sm:$0xff] %v282_v25  ;;  %v286_v27 = vld [vmem:[%s2813_s29 + $0x288] sm:$0xff]  ;;  %v288_v28 = vld [vmem:[%s2813_s29 + $0x290] sm:$0xff] }
  0x20   : > { %285 = vst [vmem:[%s2818_s30 + $0xd0] sm:$0xff] %v284_v26  ;;  %v290_v29 = vld [vmem:[%s2813_s29 + $0x298] sm:$0xff]  ;;  %287 = vst [vmem:[%s2818_s30 + $0xd8] sm:$0xff] %v286_v27  ;;  %v292_v30 = vld [vmem:[%s2813_s29 + $0x2d0] sm:$0xff] }
  0x21   : > { %289 = vst [vmem:[%s2818_s30 + $0xe0] sm:$0xff] %v288_v28  ;;  %291 = vst [vmem:[%s2818_s30 + $0xe8] sm:$0xff] %v290_v29  ;;  %v294_v31 = vld [vmem:[%s2813_s29 + $0x2d8] sm:$0xff]  ;;  %v296_v32 = vld [vmem:[%s2813_s29 + $0x2e0] sm:$0xff] }
  0x22   : > { %293 = vst [vmem:[%s2818_s30 + $0xf0] sm:$0xff] %v292_v30  ;;  %295 = vst [vmem:[%s2818_s30 + $0xf8] sm:$0xff] %v294_v31  ;;  %v298_v33 = vld [vmem:[%s2813_s29 + $0x318] sm:$0xff]  ;;  %v300_v34 = vld [vmem:[%s2813_s29 + $0x320] sm:$0xff] }
  0x23   : > { %297 = vst [vmem:[%s2818_s30 + $0x100] sm:$0xff] %v296_v32  ;;  %v302_v35 = vld [vmem:[%s2813_s29 + $0x328] sm:$0xff]  ;;  %299 = vst [vmem:[%s2818_s30 + $0x108] sm:$0xff] %v298_v33  ;;  %v304_v36 = vld [vmem:[%s2813_s29 + $0x360] sm:$0xff] }
  0x24   : > { %301 = vst [vmem:[%s2818_s30 + $0x110] sm:$0xff] %v300_v34  ;;  %303 = vst [vmem:[%s2818_s30 + $0x118] sm:$0xff] %v302_v35  ;;  %v306_v37 = vld [vmem:[%s2813_s29 + $0x368] sm:$0xff]  ;;  %v308_v38 = vld [vmem:[%s2813_s29 + $0x370] sm:$0xff] }
  0x25   : > { %305 = vst [vmem:[%s2818_s30 + $0x120] sm:$0xff] %v304_v36  ;;  %307 = vst [vmem:[%s2818_s30 + $0x128] sm:$0xff] %v306_v37  ;;  %v310_v39 = vld [vmem:[%s2813_s29 + $0x3a8] sm:$0xff]  ;;  %v312_v40 = vld [vmem:[%s2813_s29 + $0x3b0] sm:$0xff] }
  0x26   : > { %309 = vst [vmem:[%s2818_s30 + $0x130] sm:$0xff] %v308_v38  ;;  %v314_v41 = vld [vmem:[%s2813_s29 + $0x3b8] sm:$0xff]  ;;  %311 = vst [vmem:[%s2818_s30 + $0x138] sm:$0xff] %v310_v39  ;;  %v316_v42 = vld [vmem:[%s2813_s29 + $0x3f0] sm:$0xff] }
  0x27   : > { %313 = vst [vmem:[%s2818_s30 + $0x140] sm:$0xff] %v312_v40  ;;  %315 = vst [vmem:[%s2818_s30 + $0x148] sm:$0xff] %v314_v41  ;;  %v318_v43 = vld [vmem:[%s2813_s29 + $0x3f8] sm:$0xff]  ;;  %v320_v44 = vld [vmem:[%s2813_s29 + $0x400] sm:$0xff] }
  0x28   : > { %317 = vst [vmem:[%s2818_s30 + $0x150] sm:$0xff] %v316_v42  ;;  %319 = vst [vmem:[%s2818_s30 + $0x158] sm:$0xff] %v318_v43  ;;  %v322_v45 = vld [vmem:[%s2813_s29 + $0x438] sm:$0xff]  ;;  %v324_v46 = vld [vmem:[%s2813_s29 + $0x440] sm:$0xff] }
  0x29   : > { %321 = vst [vmem:[%s2818_s30 + $0x160] sm:$0xff] %v320_v44  ;;  %v326_v47 = vld [vmem:[%s2813_s29 + $0x448] sm:$0xff]  ;;  %323 = vst [vmem:[%s2818_s30 + $0x168] sm:$0xff] %v322_v45 }
  0x2a   : > { %325 = vst [vmem:[%s2818_s30 + $0x170] sm:$0xff] %v324_v46  ;;  %327 = vst [vmem:[%s2818_s30 + $0x178] sm:$0xff] %v326_v47 }
  0x2b PF: > { %p2162_p6 = scmp.ge.s32.totalorder %s2742_s19, 1  ;;  %p332_p7 = scmp.lt.s32.totalorder %s2742_s19, 4 }
  0x2d   : > { %p333_p8 = pnand %p2162_p6, %p332_p7 }
  0x2e   : > { %s339_s5 = sand.u32 (!%p333_p8), 1, %s2726_s15   ;;  %p2163_p9 = scmp.ne.s32.totalorder (!%p333_p8), %s2734_s17, 0 }
  0x2f   : > { %336 = sbr.rel (%p333_p8) target bundleno = 484 (0x1e4), region = 55 }
  0x30   : > { %s2446_s6 = smul.u32 (!%p333_p8), 384, %s339_s5 }
  0x32   : > { %s2916_s7 = scalar_lea.vmem (!%p333_p8), [#allocation3], %s2446_s6 }
  0x36   : > { %415 = sbr.rel (%p2163_p9) target bundleno = 71 (0x47), region = 63  ;;  %v2744_v48 = vmov (!%p2163_p9), 0.0  }
  0x37   : > { %416 = vst [vmem:[#allocation2] sm:$0xff] (!%p2163_p9), %v2744_v48  ;;  %417 = vst [vmem:[#allocation2 + $0x8] sm:$0xff] (!%p2163_p9), %v2744_v48 }
  0x38   : > { %418 = vst [vmem:[#allocation2 + $0x10] sm:$0xff] (!%p2163_p9), %v2744_v48  ;;  %419 = vst [vmem:[#allocation2 + $0x18] sm:$0xff] (!%p2163_p9), %v2744_v48 }
  0x39   : > { %420 = vst [vmem:[#allocation2 + $0x20] sm:$0xff] (!%p2163_p9), %v2744_v48  ;;  %421 = vst [vmem:[#allocation2 + $0x28] sm:$0xff] (!%p2163_p9), %v2744_v48 }
  0x3a   : > { %422 = vst [vmem:[#allocation2 + $0x30] sm:$0xff] (!%p2163_p9), %v2744_v48  ;;  %423 = vst [vmem:[#allocation2 + $0x38] sm:$0xff] (!%p2163_p9), %v2744_v48 }
  0x3b   : > { %424 = vst [vmem:[#allocation2 + $0x40] sm:$0xff] (!%p2163_p9), %v2744_v48  ;;  %425 = vst [vmem:[#allocation2 + $0x48] sm:$0xff] (!%p2163_p9), %v2744_v48 }
  0x3c   : > { %426 = vst [vmem:[#allocation2 + $0x50] sm:$0xff] (!%p2163_p9), %v2744_v48  ;;  %427 = vst [vmem:[#allocation2 + $0x58] sm:$0xff] (!%p2163_p9), %v2744_v48 }
  0x3d   : > { %428 = vst [vmem:[#allocation2 + $0x60] sm:$0xff] %v2744_v48  ;;  %429 = vst [vmem:[#allocation2 + $0x68] sm:$0xff] %v2744_v48 }
  0x3e   : > { %430 = vst [vmem:[#allocation2 + $0x70] sm:$0xff] %v2744_v48  ;;  %431 = vst [vmem:[#allocation2 + $0x78] sm:$0xff] %v2744_v48 }
  0x3f   : > { %432 = vst [vmem:[#allocation2 + $0x80] sm:$0xff] %v2744_v48  ;;  %433 = vst [vmem:[#allocation2 + $0x88] sm:$0xff] %v2744_v48 }
  0x40   : > { %434 = vst [vmem:[#allocation2 + $0x90] sm:$0xff] %v2744_v48  ;;  %435 = vst [vmem:[#allocation2 + $0x98] sm:$0xff] %v2744_v48 }
  0x41   : > { %436 = vst [vmem:[#allocation2 + $0xa0] sm:$0xff] %v2744_v48  ;;  %437 = vst [vmem:[#allocation2 + $0xa8] sm:$0xff] %v2744_v48 }
  0x42   : > { %438 = vst [vmem:[#allocation2 + $0xb0] sm:$0xff] %v2744_v48  ;;  %439 = vst [vmem:[#allocation2 + $0xb8] sm:$0xff] %v2744_v48 }
  0x43   : > { %440 = vst [vmem:[#allocation2 + $0xc0] sm:$0xff] %v2744_v48  ;;  %441 = vst [vmem:[#allocation2 + $0xc8] sm:$0xff] %v2744_v48 }
  0x44   : > { %442 = vst [vmem:[#allocation2 + $0xd0] sm:$0xff] %v2744_v48  ;;  %443 = vst [vmem:[#allocation2 + $0xd8] sm:$0xff] %v2744_v48 }
  0x45   : > { %444 = vst [vmem:[#allocation2 + $0xe0] sm:$0xff] %v2744_v48  ;;  %445 = vst [vmem:[#allocation2 + $0xe8] sm:$0xff] %v2744_v48 }
  0x46   : > { %446 = vst [vmem:[#allocation2 + $0xf0] sm:$0xff] %v2744_v48  ;;  %447 = vst [vmem:[#allocation2 + $0xf8] sm:$0xff] %v2744_v48 }
  0x47 PF: > { %s448_s8 = smul.u32 768, %s2734_s17  ;;  %v2586_v49 = vld [vmem:[%s2916_s7 + $0x4] ss:$24 sps:$4 sm:$0xff]   ;;  %p2310_p10 = scmp.ne.s32.totalorder %s2734_s17, 2 }
  0x48   : > { %v2589_v50 = vld [vmem:[%s2916_s7 + $0xc] ss:$24 sps:$4 sm:$0xff]   ;;  %1382 = vmatprep.mubr.bf16.mxu1 %v2586_v49 }
  0x49   : > { %s529_s9 = sshra.s32 %s448_s8, 3  ;;  %1495 = vmatprep.mubr.bf16.mxu0 %v2589_v50 }
  0x4a   : > { %s2332_s10 = sshll.u32 %s529_s9, 3 }
  0x4b   : > { %s2925_s13 = scalar_lea.vmem %s3299_s1, %s2332_s10 }
  0x4c   : > { %v2488_v51 = vld [vmem:[%s2925_s13 + $0x4] ss:$8 sps:$4 sm:$0xff]   ;;  %v2492_v53 = vld [vmem:[%s2925_s13] ss:$8 sps:$4 sm:$0xff]   ;;  %v2494_v55 = vld [vmem:[%s2925_s13 + $0x14] ss:$8 sps:$4 sm:$0xff]  }
  0x4d   : > { %v2490_v52 = vld [vmem:[%s2925_s13 + $0x104] ss:$8 sps:$4 sm:$0xff]   ;;  %1350 = vmatprep.subr.bf16.mxu1 %v2488_v51  ;;  %v2493_v54 = vld [vmem:[%s2925_s13 + $0x100] ss:$8 sps:$4 sm:$0xff]   ;;  %v2496_v56 = vld [vmem:[%s2925_s13 + $0x114] ss:$8 sps:$4 sm:$0xff]  }
  0x4e   : > { %1463 = vmatprep.subr.bf16.mxu0 %v2490_v52  ;;  %1351 = vmatpush1.bf16.msra.mxu1 %v2492_v53  ;;  %v2498_v57 = vld [vmem:[%s2925_s13 + $0x10] ss:$8 sps:$4 sm:$0xff]   ;;  %v2500_v59 = vld [vmem:[%s2925_s13 + $0x24] ss:$8 sps:$4 sm:$0xff]   ;;  %v2504_v61 = vld [vmem:[%s2925_s13 + $0x20] ss:$8 sps:$4 sm:$0xff]  }
  0x4f   : > { %1464 = vmatpush1.bf16.msra.mxu0 %v2493_v54  ;;  %1352 = vmatprep.subr.bf16.mxu1 %v2494_v55  ;;  %v2499_v58 = vld [vmem:[%s2925_s13 + $0x110] ss:$8 sps:$4 sm:$0xff]   ;;  %v2502_v60 = vld [vmem:[%s2925_s13 + $0x124] ss:$8 sps:$4 sm:$0xff]   ;;  %v2505_v62 = vld [vmem:[%s2925_s13 + $0x120] ss:$8 sps:$4 sm:$0xff]  }
  0x50   : > { %1465 = vmatprep.subr.bf16.mxu0 %v2496_v56  ;;  %v2506_v63 = vld [vmem:[%s2925_s13 + $0x34] ss:$8 sps:$4 sm:$0xff]   ;;  %v2510_v1 = vld [vmem:[%s2925_s13 + $0x30] ss:$8 sps:$4 sm:$0xff]   ;;  %v2512_v3 = vld [vmem:[%s2925_s13 + $0x44] ss:$8 sps:$4 sm:$0xff]  }
  0x51   : > { %v2508_v0 = vld [vmem:[%s2925_s13 + $0x134] ss:$8 sps:$4 sm:$0xff]   ;;  %v2511_v2 = vld [vmem:[%s2925_s13 + $0x130] ss:$8 sps:$4 sm:$0xff]   ;;  %v2514_v4 = vld [vmem:[%s2925_s13 + $0x144] ss:$8 sps:$4 sm:$0xff]  }
  0x52   : > { %1353 = vmatpush1.bf16.msra.mxu1 %v2498_v57  ;;  %v2516_v5 = vld [vmem:[%s2925_s13 + $0x40] ss:$8 sps:$4 sm:$0xff]   ;;  %v2518_v7 = vld [vmem:[%s2925_s13 + $0x54] ss:$8 sps:$4 sm:$0xff]   ;;  %v2522_v9 = vld [vmem:[%s2925_s13 + $0x50] ss:$8 sps:$4 sm:$0xff]  }
  0x53   : > { %1466 = vmatpush1.bf16.msra.mxu0 %v2499_v58  ;;  %1354 = vmatprep.subr.bf16.mxu1 %v2500_v59  ;;  %v2517_v6 = vld [vmem:[%s2925_s13 + $0x140] ss:$8 sps:$4 sm:$0xff]   ;;  %v2520_v8 = vld [vmem:[%s2925_s13 + $0x154] ss:$8 sps:$4 sm:$0xff]   ;;  %v2523_v10 = vld [vmem:[%s2925_s13 + $0x150] ss:$8 sps:$4 sm:$0xff]  }
  0x54   : > { %1467 = vmatprep.subr.bf16.mxu0 %v2502_v60  ;;  %v2524_v11 = vld [vmem:[%s2925_s13 + $0x64] ss:$8 sps:$4 sm:$0xff]   ;;  %v2528_v13 = vld [vmem:[%s2925_s13 + $0x60] ss:$8 sps:$4 sm:$0xff]   ;;  %v2530_v15 = vld [vmem:[%s2925_s13 + $0x74] ss:$8 sps:$4 sm:$0xff]  }
  0x55   : > { %v2526_v12 = vld [vmem:[%s2925_s13 + $0x164] ss:$8 sps:$4 sm:$0xff]   ;;  %v2529_v14 = vld [vmem:[%s2925_s13 + $0x160] ss:$8 sps:$4 sm:$0xff]   ;;  %v2532_v16 = vld [vmem:[%s2925_s13 + $0x174] ss:$8 sps:$4 sm:$0xff]  }
  0x56   : > { %1355 = vmatpush1.bf16.msra.mxu1 %v2504_v61  ;;  %v2534_v17 = vld [vmem:[%s2925_s13 + $0x70] ss:$8 sps:$4 sm:$0xff]   ;;  %v2536_v19 = vld [vmem:[%s2925_s13 + $0x84] ss:$8 sps:$4 sm:$0xff]   ;;  %v2540_v21 = vld [vmem:[%s2925_s13 + $0x80] ss:$8 sps:$4 sm:$0xff]  }
  0x57   : > { %1468 = vmatpush1.bf16.msra.mxu0 %v2505_v62  ;;  %1356 = vmatprep.subr.bf16.mxu1 %v2506_v63  ;;  %v2535_v18 = vld [vmem:[%s2925_s13 + $0x170] ss:$8 sps:$4 sm:$0xff]   ;;  %v2538_v20 = vld [vmem:[%s2925_s13 + $0x184] ss:$8 sps:$4 sm:$0xff]   ;;  %v2541_v22 = vld [vmem:[%s2925_s13 + $0x180] ss:$8 sps:$4 sm:$0xff]  }
  0x58   : > { %1469 = vmatprep.subr.bf16.mxu0 %v2508_v0  ;;  %v2542_v23 = vld [vmem:[%s2925_s13 + $0x94] ss:$8 sps:$4 sm:$0xff]   ;;  %v2546_v25 = vld [vmem:[%s2925_s13 + $0x90] ss:$8 sps:$4 sm:$0xff]   ;;  %v2548_v27 = vld [vmem:[%s2925_s13 + $0xa4] ss:$8 sps:$4 sm:$0xff]  }
  0x59   : > { %v2544_v24 = vld [vmem:[%s2925_s13 + $0x194] ss:$8 sps:$4 sm:$0xff]   ;;  %v2547_v26 = vld [vmem:[%s2925_s13 + $0x190] ss:$8 sps:$4 sm:$0xff]   ;;  %v2550_v28 = vld [vmem:[%s2925_s13 + $0x1a4] ss:$8 sps:$4 sm:$0xff]  }
  0x5a   : > { %1357 = vmatpush1.bf16.msra.mxu1 %v2510_v1  ;;  %v2552_v29 = vld [vmem:[%s2925_s13 + $0xa0] ss:$8 sps:$4 sm:$0xff]   ;;  %v2554_v31 = vld [vmem:[%s2925_s13 + $0xb4] ss:$8 sps:$4 sm:$0xff]   ;;  %v2558_v33 = vld [vmem:[%s2925_s13 + $0xb0] ss:$8 sps:$4 sm:$0xff]  }
  0x5b   : > { %1470 = vmatpush1.bf16.msra.mxu0 %v2511_v2  ;;  %1358 = vmatprep.subr.bf16.mxu1 %v2512_v3  ;;  %v2553_v30 = vld [vmem:[%s2925_s13 + $0x1a0] ss:$8 sps:$4 sm:$0xff]   ;;  %v2556_v32 = vld [vmem:[%s2925_s13 + $0x1b4] ss:$8 sps:$4 sm:$0xff]   ;;  %v2559_v34 = vld [vmem:[%s2925_s13 + $0x1b0] ss:$8 sps:$4 sm:$0xff]  }
  0x5c   : > { %1471 = vmatprep.subr.bf16.mxu0 %v2514_v4  ;;  %v2560_v35 = vld [vmem:[%s2925_s13 + $0xc4] ss:$8 sps:$4 sm:$0xff]   ;;  %v2564_v37 = vld [vmem:[%s2925_s13 + $0xc0] ss:$8 sps:$4 sm:$0xff]   ;;  %v2566_v39 = vld [vmem:[%s2925_s13 + $0xd4] ss:$8 sps:$4 sm:$0xff]  }
  0x5d   : > { %v2562_v36 = vld [vmem:[%s2925_s13 + $0x1c4] ss:$8 sps:$4 sm:$0xff]   ;;  %v2565_v38 = vld [vmem:[%s2925_s13 + $0x1c0] ss:$8 sps:$4 sm:$0xff]   ;;  %v2568_v40 = vld [vmem:[%s2925_s13 + $0x1d4] ss:$8 sps:$4 sm:$0xff]  }
  0x5e   : > { %1359 = vmatpush1.bf16.msra.mxu1 %v2516_v5  ;;  %v2570_v41 = vld [vmem:[%s2925_s13 + $0xd0] ss:$8 sps:$4 sm:$0xff]   ;;  %v2572_v43 = vld [vmem:[%s2925_s13 + $0xe4] ss:$8 sps:$4 sm:$0xff]   ;;  %v2576_v45 = vld [vmem:[%s2925_s13 + $0xe0] ss:$8 sps:$4 sm:$0xff]  }
  0x5f   : > { %1472 = vmatpush1.bf16.msra.mxu0 %v2517_v6  ;;  %1360 = vmatprep.subr.bf16.mxu1 %v2518_v7  ;;  %v2571_v42 = vld [vmem:[%s2925_s13 + $0x1d0] ss:$8 sps:$4 sm:$0xff]   ;;  %v2574_v44 = vld [vmem:[%s2925_s13 + $0x1e4] ss:$8 sps:$4 sm:$0xff]   ;;  %v2577_v46 = vld [vmem:[%s2925_s13 + $0x1e0] ss:$8 sps:$4 sm:$0xff]  }
  0x60   : > { %1473 = vmatprep.subr.bf16.mxu0 %v2520_v8  ;;  %v2578_v47 = vld [vmem:[%s2925_s13 + $0xf4] ss:$8 sps:$4 sm:$0xff]   ;;  %v2582_v49 = vld [vmem:[%s2925_s13 + $0xf0] ss:$8 sps:$4 sm:$0xff]   ;;  %v2592_v51 = vld [vmem:[%s2925_s13 + $0x204] ss:$8 sps:$4 sm:$0xff]  }
  0x61   : > { %v2580_v48 = vld [vmem:[%s2925_s13 + $0x1f4] ss:$8 sps:$4 sm:$0xff]   ;;  %v2583_v50 = vld [vmem:[%s2925_s13 + $0x1f0] ss:$8 sps:$4 sm:$0xff]   ;;  %v2587_v53 = vld [vmem:[%s2916_s7 + $0x8] ss:$24 sps:$4 sm:$0xff]  }
  0x62   : > { %1361 = vmatpush1.bf16.msra.mxu1 %v2522_v9  ;;  %v2584_v52 = vld [vmem:[%s2916_s7] ss:$24 sps:$4 sm:$0xff]   ;;  %v2595_v55 = vld [vmem:[%s2925_s13 + $0x214] ss:$8 sps:$4 sm:$0xff]   ;;  %v2604_v59 = vld [vmem:[%s2925_s13 + $0x224] ss:$8 sps:$4 sm:$0xff]  }
  0x63   : > { %1474 = vmatpush1.bf16.msra.mxu0 %v2523_v10  ;;  %1362 = vmatprep.subr.bf16.mxu1 %v2524_v11  ;;  %v2590_v54 = vld [vmem:[%s2925_s13 + $0x200] ss:$8 sps:$4 sm:$0xff]   ;;  %v2596_v56 = vld [vmem:[%s2916_s7 + $0x34] ss:$24 sps:$4 sm:$0xff]   ;;  %v2593_v58 = vld [vmem:[%s2925_s13 + $0x210] ss:$8 sps:$4 sm:$0xff]  }
  0x64   : > { %1475 = vmatprep.subr.bf16.mxu0 %v2526_v12  ;;  %v2598_v57 = vld [vmem:[%s2916_s7 + $0x3c] ss:$24 sps:$4 sm:$0xff]   ;;  %v2600_v60 = vld [vmem:[%s2916_s7 + $0x30] ss:$24 sps:$4 sm:$0xff]   ;;  %v2610_v1 = vld [vmem:[%s2916_s7 + $0x6c] ss:$24 sps:$4 sm:$0xff]  }
  0x65   : > { %v2601_v61 = vld [vmem:[%s2916_s7 + $0x38] ss:$24 sps:$4 sm:$0xff]   ;;  %v2602_v62 = vld [vmem:[%s2925_s13 + $0x220] ss:$8 sps:$4 sm:$0xff]   ;;  %v2607_v63 = vld [vmem:[%s2925_s13 + $0x234] ss:$8 sps:$4 sm:$0xff]  }
  0x66   : > { %1363 = vmatpush1.bf16.msra.mxu1 %v2528_v13  ;;  %v2608_v0 = vld [vmem:[%s2916_s7 + $0x64] ss:$24 sps:$4 sm:$0xff]   ;;  %v2605_v2 = vld [vmem:[%s2925_s13 + $0x230] ss:$8 sps:$4 sm:$0xff]   ;;  %v2613_v5 = vld [vmem:[%s2916_s7 + $0x68] ss:$24 sps:$4 sm:$0xff]  }
  0x67   : > { %1476 = vmatpush1.bf16.msra.mxu0 %v2529_v14  ;;  %1364 = vmatprep.subr.bf16.mxu1 %v2530_v15  ;;  %v2616_v3 = vld [vmem:[%s2925_s13 + $0x244] ss:$8 sps:$4 sm:$0xff]   ;;  %v2612_v4 = vld [vmem:[%s2916_s7 + $0x60] ss:$24 sps:$4 sm:$0xff]   ;;  %v2619_v7 = vld [vmem:[%s2925_s13 + $0x254] ss:$8 sps:$4 sm:$0xff]  }
  0x68   : > { %1477 = vmatprep.subr.bf16.mxu0 %v2532_v16  ;;  %v2614_v6 = vld [vmem:[%s2925_s13 + $0x240] ss:$8 sps:$4 sm:$0xff]   ;;  %v2620_v8 = vld [vmem:[%s2916_s7 + $0x94] ss:$24 sps:$4 sm:$0xff]   ;;  %v2617_v10 = vld [vmem:[%s2925_s13 + $0x250] ss:$8 sps:$4 sm:$0xff]  }
  0x69   : > { %v2622_v9 = vld [vmem:[%s2916_s7 + $0x9c] ss:$24 sps:$4 sm:$0xff]   ;;  %v2628_v11 = vld [vmem:[%s2925_s13 + $0x264] ss:$8 sps:$4 sm:$0xff]   ;;  %v2624_v12 = vld [vmem:[%s2916_s7 + $0x90] ss:$24 sps:$4 sm:$0xff]  }
  0x6a   : > { %1365 = vmatpush1.bf16.msra.mxu1 %v2534_v17  ;;  %v2625_v13 = vld [vmem:[%s2916_s7 + $0x98] ss:$24 sps:$4 sm:$0xff]   ;;  %v2626_v14 = vld [vmem:[%s2925_s13 + $0x260] ss:$8 sps:$4 sm:$0xff]   ;;  %v2631_v15 = vld [vmem:[%s2925_s13 + $0x274] ss:$8 sps:$4 sm:$0xff]  }
  0x6b   : > { %1478 = vmatpush1.bf16.msra.mxu0 %v2535_v18  ;;  %1366 = vmatprep.subr.bf16.mxu1 %v2536_v19  ;;  %v2632_v16 = vld [vmem:[%s2916_s7 + $0xc4] ss:$24 sps:$4 sm:$0xff]   ;;  %v2629_v18 = vld [vmem:[%s2925_s13 + $0x270] ss:$8 sps:$4 sm:$0xff]  }
  0x6c   : > { %1479 = vmatprep.subr.bf16.mxu0 %v2538_v20  ;;  %v2634_v17 = vld [vmem:[%s2916_s7 + $0xcc] ss:$24 sps:$4 sm:$0xff]   ;;  %v2636_v20 = vld [vmem:[%s2916_s7 + $0xc0] ss:$24 sps:$4 sm:$0xff]  }
  0x6d   : > { %v2640_v19 = vld [vmem:[%s2925_s13 + $0x284] ss:$8 sps:$4 sm:$0xff]  }
  0x6e   : > { %1367 = vmatpush1.bf16.msra.mxu1 %v2540_v21  ;;  %v2637_v21 = vld [vmem:[%s2916_s7 + $0xc8] ss:$24 sps:$4 sm:$0xff]  }
  0x6f   : > { %1480 = vmatpush1.bf16.msra.mxu0 %v2541_v22  ;;  %1368 = vmatprep.subr.bf16.mxu1 %v2542_v23  ;;  %v2638_v22 = vld [vmem:[%s2925_s13 + $0x280] ss:$8 sps:$4 sm:$0xff]   ;;  %v2643_v23 = vld [vmem:[%s2925_s13 + $0x294] ss:$8 sps:$4 sm:$0xff]  }
  0x70   : > { %1481 = vmatprep.subr.bf16.mxu0 %v2544_v24  ;;  %v2644_v24 = vld [vmem:[%s2916_s7 + $0xf4] ss:$24 sps:$4 sm:$0xff]  }
  0x72   : > { %1369 = vmatpush1.bf16.msra.mxu1 %v2546_v25  ;;  %v2646_v25 = vld [vmem:[%s2916_s7 + $0xfc] ss:$24 sps:$4 sm:$0xff]  }
  0x73   : > { %1482 = vmatpush1.bf16.msra.mxu0 %v2547_v26  ;;  %1370 = vmatprep.subr.bf16.mxu1 %v2548_v27  ;;  %v2641_v26 = vld [vmem:[%s2925_s13 + $0x290] ss:$8 sps:$4 sm:$0xff]   ;;  %v2652_v27 = vld [vmem:[%s2925_s13 + $0x2a4] ss:$8 sps:$4 sm:$0xff]  }
  0x74   : > { %1483 = vmatprep.subr.bf16.mxu0 %v2550_v28  ;;  %v2648_v28 = vld [vmem:[%s2916_s7 + $0xf0] ss:$24 sps:$4 sm:$0xff]  }
  0x76   : > { %1371 = vmatpush1.bf16.msra.mxu1 %v2552_v29  ;;  %v2649_v29 = vld [vmem:[%s2916_s7 + $0xf8] ss:$24 sps:$4 sm:$0xff]  }
  0x77   : > { %1484 = vmatpush1.bf16.msra.mxu0 %v2553_v30  ;;  %1372 = vmatprep.subr.bf16.mxu1 %v2554_v31  ;;  %v2650_v30 = vld [vmem:[%s2925_s13 + $0x2a0] ss:$8 sps:$4 sm:$0xff]   ;;  %v2655_v31 = vld [vmem:[%s2925_s13 + $0x2b4] ss:$8 sps:$4 sm:$0xff]  }
  0x78   : > { %1485 = vmatprep.subr.bf16.mxu0 %v2556_v32  ;;  %v2656_v32 = vld [vmem:[%s2916_s7 + $0x124] ss:$24 sps:$4 sm:$0xff]  }
  0x7a   : > { %1373 = vmatpush1.bf16.msra.mxu1 %v2558_v33  ;;  %v2658_v33 = vld [vmem:[%s2916_s7 + $0x12c] ss:$24 sps:$4 sm:$0xff]  }
  0x7b   : > { %1486 = vmatpush1.bf16.msra.mxu0 %v2559_v34  ;;  %1374 = vmatprep.subr.bf16.mxu1 %v2560_v35  ;;  %v2653_v34 = vld [vmem:[%s2925_s13 + $0x2b0] ss:$8 sps:$4 sm:$0xff]   ;;  %v2664_v35 = vld [vmem:[%s2925_s13 + $0x2c4] ss:$8 sps:$4 sm:$0xff]  }
  0x7c   : > { %1487 = vmatprep.subr.bf16.mxu0 %v2562_v36  ;;  %v2660_v36 = vld [vmem:[%s2916_s7 + $0x120] ss:$24 sps:$4 sm:$0xff]  }
  0x7e   : > { %1375 = vmatpush1.bf16.msra.mxu1 %v2564_v37  ;;  %v2661_v37 = vld [vmem:[%s2916_s7 + $0x128] ss:$24 sps:$4 sm:$0xff]  }
  0x7f   : > { %1488 = vmatpush1.bf16.msra.mxu0 %v2565_v38  ;;  %1376 = vmatprep.subr.bf16.mxu1 %v2566_v39  ;;  %v2662_v38 = vld [vmem:[%s2925_s13 + $0x2c0] ss:$8 sps:$4 sm:$0xff]   ;;  %v2667_v39 = vld [vmem:[%s2925_s13 + $0x2d4] ss:$8 sps:$4 sm:$0xff]  }
  0x80   : > { %1489 = vmatprep.subr.bf16.mxu0 %v2568_v40  ;;  %v2668_v40 = vld [vmem:[%s2916_s7 + $0x154] ss:$24 sps:$4 sm:$0xff]  }
  0x82   : > { %1377 = vmatpush1.bf16.msra.mxu1 %v2570_v41  ;;  %v2670_v41 = vld [vmem:[%s2916_s7 + $0x15c] ss:$24 sps:$4 sm:$0xff]  }
  0x83   : > { %1490 = vmatpush1.bf16.msra.mxu0 %v2571_v42  ;;  %1378 = vmatprep.subr.bf16.mxu1 %v2572_v43  ;;  %v2665_v42 = vld [vmem:[%s2925_s13 + $0x2d0] ss:$8 sps:$4 sm:$0xff]   ;;  %v2676_v43 = vld [vmem:[%s2925_s13 + $0x2e4] ss:$8 sps:$4 sm:$0xff]  }
  0x84   : > { %1491 = vmatprep.subr.bf16.mxu0 %v2574_v44  ;;  %v2672_v44 = vld [vmem:[%s2916_s7 + $0x150] ss:$24 sps:$4 sm:$0xff]  }
  0x86   : > { %1379 = vmatpush1.bf16.msra.mxu1 %v2576_v45  ;;  %v2673_v45 = vld [vmem:[%s2916_s7 + $0x158] ss:$24 sps:$4 sm:$0xff]  }
  0x87   : > { %1492 = vmatpush1.bf16.msra.mxu0 %v2577_v46  ;;  %1380 = vmatprep.subr.bf16.mxu1 %v2578_v47  ;;  %v2674_v46 = vld [vmem:[%s2925_s13 + $0x2e0] ss:$8 sps:$4 sm:$0xff]   ;;  %v2679_v47 = vld [vmem:[%s2925_s13 + $0x2f4] ss:$8 sps:$4 sm:$0xff]  }
  0x88   : > { %1493 = vmatprep.subr.bf16.mxu0 %v2580_v48  ;;  %v2682_v48 = vld [vmem:[%s2916_s7 + $0x14] ss:$24 sps:$4 sm:$0xff]  }
  0x8a   : > { %1381 = vmatpush1.bf16.msra.mxu1 %v2582_v49  ;;  %v2685_v49 = vld [vmem:[%s2916_s7 + $0xd4] ss:$24 sps:$4 sm:$0xff]  }
  0x8b   : > { %1494 = vmatpush1.bf16.msra.mxu0 %v2583_v50  ;;  %2349 = vmatprep.subr.bf16.mxu1 %v2592_v51  ;;  %v2677_v50 = vld [vmem:[%s2925_s13 + $0x2f0] ss:$8 sps:$4 sm:$0xff]  }
  0x8c   : > { %1576 = vmatprep.subr.bf16.mxu0 %v2592_v51  ;;  %v2680_v51 = vld [vmem:[%s2916_s7 + $0x10] ss:$24 sps:$4 sm:$0xff]  }
  0x8d   : > { %1383 = vmatmul.mubr.bf16.vlgmr.msra.gmra.mrb[0].mxu1 %v2584_v52  ;;  %v2683_v52 = vld [vmem:[%s2916_s7 + $0xd0] ss:$24 sps:$4 sm:$0xff]  }
  0x8e   : > { %1496 = vmatmul.mubr.bf16.vlgmr.msra.gmra.mrb[0].mxu0 %v2587_v53  ;;  %2365 = vmatpush1.bf16.msra.mxu1 %v2590_v54  ;;  %v2686_v53 = vld [vmem:[%s2916_s7 + $0x44] ss:$24 sps:$4 sm:$0xff]  }
  0x8f   : > { %1577 = vmatpush1.bf16.msra.mxu0 %v2590_v54  ;;  %2350 = vmatprep.subr.bf16.mxu1 %v2595_v55  ;;  %v2688_v54 = vld [vmem:[%s2916_s7 + $0x104] ss:$24 sps:$4 sm:$0xff]  }
  0x90   : > { %1578 = vmatprep.subr.bf16.mxu0 %v2595_v55  ;;  %1392 = vmatprep.mubr.bf16.mxu1 %v2596_v56  ;;  %v2690_v55 = vld [vmem:[%s2916_s7 + $0x40] ss:$24 sps:$4 sm:$0xff]  }
  0x91   : > { %1505 = vmatprep.mubr.bf16.mxu0 %v2598_v57  ;;  %v2691_v56 = vld [vmem:[%s2916_s7 + $0x100] ss:$24 sps:$4 sm:$0xff]   ;;  %v2692_v57 = vld [vmem:[%s2916_s7 + $0x74] ss:$24 sps:$4 sm:$0xff]  }
  0x92   : > { %2366 = vmatpush1.bf16.msra.mxu1 %v2593_v58 }
  0x93   : > { %1579 = vmatpush1.bf16.msra.mxu0 %v2593_v58  ;;  %2351 = vmatprep.subr.bf16.mxu1 %v2604_v59  ;;  %v2694_v58 = vld [vmem:[%s2916_s7 + $0x134] ss:$24 sps:$4 sm:$0xff]  }
  0x94   : > { %1580 = vmatprep.subr.bf16.mxu0 %v2604_v59  ;;  %v2696_v59 = vld [vmem:[%s2916_s7 + $0x70] ss:$24 sps:$4 sm:$0xff]  }
  0x95   : > { %1393 = vmatmul.mubr.bf16.gmra.mrb[4].mxu1 %v2600_v60  ;;  %v2697_v60 = vld [vmem:[%s2916_s7 + $0x130] ss:$24 sps:$4 sm:$0xff]  }
  0x96   : > { %1506 = vmatmul.mubr.bf16.gmra.mrb[4].mxu0 %v2601_v61  ;;  %2367 = vmatpush1.bf16.msra.mxu1 %v2602_v62  ;;  %v2698_v61 = vld [vmem:[%s2916_s7 + $0xa4] ss:$24 sps:$4 sm:$0xff]  }
  0x97   : > { %1581 = vmatpush1.bf16.msra.mxu0 %v2602_v62  ;;  %2352 = vmatprep.subr.bf16.mxu1 %v2607_v63  ;;  %v2700_v62 = vld [vmem:[%s2916_s7 + $0x164] ss:$24 sps:$4 sm:$0xff]  }
  0x98   : > { %1582 = vmatprep.subr.bf16.mxu0 %v2607_v63  ;;  %1402 = vmatprep.mubr.bf16.mxu1 %v2608_v0  ;;  %v2702_v63 = vld [vmem:[%s2916_s7 + $0xa0] ss:$24 sps:$4 sm:$0xff]  }
  0x99   : > { %1515 = vmatprep.mubr.bf16.mxu0 %v2610_v1  ;;  %v2703_v0 = vld [vmem:[%s2916_s7 + $0x160] ss:$24 sps:$4 sm:$0xff]  }
  0x9a   : > { %2368 = vmatpush1.bf16.msra.mxu1 %v2605_v2 }
  0x9b   : > { %1583 = vmatpush1.bf16.msra.mxu0 %v2605_v2  ;;  %2353 = vmatprep.subr.bf16.mxu1 %v2616_v3 }
  0x9c   : > { %1584 = vmatprep.subr.bf16.mxu0 %v2616_v3 }
  0x9d   : > { %1403 = vmatmul.mubr.bf16.gmra.mrb[8].mxu1 %v2612_v4 }
  0x9e   : > { %1516 = vmatmul.mubr.bf16.gmra.mrb[8].mxu0 %v2613_v5  ;;  %2369 = vmatpush1.bf16.msra.mxu1 %v2614_v6 }
  0x9f   : > { %1585 = vmatpush1.bf16.msra.mxu0 %v2614_v6  ;;  %2354 = vmatprep.subr.bf16.mxu1 %v2619_v7 }
  0xa0   : > { %1586 = vmatprep.subr.bf16.mxu0 %v2619_v7  ;;  %1412 = vmatprep.mubr.bf16.mxu1 %v2620_v8 }
  0xa1   : > { %1525 = vmatprep.mubr.bf16.mxu0 %v2622_v9 }
  0xa2   : > { %2370 = vmatpush1.bf16.msra.mxu1 %v2617_v10 }
  0xa3   : > { %1587 = vmatpush1.bf16.msra.mxu0 %v2617_v10  ;;  %2355 = vmatprep.subr.bf16.mxu1 %v2628_v11 }
  0xa4   : > { %1588 = vmatprep.subr.bf16.mxu0 %v2628_v11 }
  0xa5   : > { %1413 = vmatmul.mubr.bf16.gmra.mrb[12].mxu1 %v2624_v12 }
  0xa6   : > { %1526 = vmatmul.mubr.bf16.gmra.mrb[12].mxu0 %v2625_v13  ;;  %2371 = vmatpush1.bf16.msra.mxu1 %v2626_v14 }
  0xa7   : > { %1589 = vmatpush1.bf16.msra.mxu0 %v2626_v14  ;;  %2356 = vmatprep.subr.bf16.mxu1 %v2631_v15 }
  0xa8   : > { %1590 = vmatprep.subr.bf16.mxu0 %v2631_v15  ;;  %1422 = vmatprep.mubr.bf16.mxu1 %v2632_v16 }
  0xa9   : > { %1535 = vmatprep.mubr.bf16.mxu0 %v2634_v17 }
  0xaa   : > { %2372 = vmatpush1.bf16.msra.mxu1 %v2629_v18 }
  0xab   : > { %1591 = vmatpush1.bf16.msra.mxu0 %v2629_v18  ;;  %2357 = vmatprep.subr.bf16.mxu1 %v2640_v19 }
  0xac   : > { %1592 = vmatprep.subr.bf16.mxu0 %v2640_v19 }
  0xad   : > { %1423 = vmatmul.mubr.bf16.gmra.mrb[16].mxu1 %v2636_v20 }
  0xae   : > { %1536 = vmatmul.mubr.bf16.gmra.mrb[16].mxu0 %v2637_v21  ;;  %2373 = vmatpush1.bf16.msra.mxu1 %v2638_v22 }
  0xaf   : > { %1593 = vmatpush1.bf16.msra.mxu0 %v2638_v22  ;;  %2358 = vmatprep.subr.bf16.mxu1 %v2643_v23 }
  0xb0   : > { %1594 = vmatprep.subr.bf16.mxu0 %v2643_v23  ;;  %1432 = vmatprep.mubr.bf16.mxu1 %v2644_v24 }
  0xb1   : > { %1545 = vmatprep.mubr.bf16.mxu0 %v2646_v25 }
  0xb2   : > { %2374 = vmatpush1.bf16.msra.mxu1 %v2641_v26 }
  0xb3   : > { %1595 = vmatpush1.bf16.msra.mxu0 %v2641_v26  ;;  %2359 = vmatprep.subr.bf16.mxu1 %v2652_v27 }
  0xb4   : > { %1596 = vmatprep.subr.bf16.mxu0 %v2652_v27 }
  0xb5   : > { %1433 = vmatmul.mubr.bf16.gmra.mrb[20].mxu1 %v2648_v28 }
  0xb6   : > { %1546 = vmatmul.mubr.bf16.gmra.mrb[20].mxu0 %v2649_v29  ;;  %2375 = vmatpush1.bf16.msra.mxu1 %v2650_v30 }
  0xb7   : > { %1597 = vmatpush1.bf16.msra.mxu0 %v2650_v30  ;;  %2360 = vmatprep.subr.bf16.mxu1 %v2655_v31 }
  0xb8   : > { %1598 = vmatprep.subr.bf16.mxu0 %v2655_v31  ;;  %1442 = vmatprep.mubr.bf16.mxu1 %v2656_v32 }
  0xb9   : > { %1555 = vmatprep.mubr.bf16.mxu0 %v2658_v33 }
  0xba   : > { %2376 = vmatpush1.bf16.msra.mxu1 %v2653_v34 }
  0xbb   : > { %1599 = vmatpush1.bf16.msra.mxu0 %v2653_v34  ;;  %2361 = vmatprep.subr.bf16.mxu1 %v2664_v35 }
  0xbc   : > { %1600 = vmatprep.subr.bf16.mxu0 %v2664_v35 }
  0xbd   : > { %1443 = vmatmul.mubr.bf16.gmra.mrb[24].mxu1 %v2660_v36 }
  0xbe   : > { %1556 = vmatmul.mubr.bf16.gmra.mrb[24].mxu0 %v2661_v37  ;;  %2377 = vmatpush1.bf16.msra.mxu1 %v2662_v38 }
  0xbf   : > { %1601 = vmatpush1.bf16.msra.mxu0 %v2662_v38  ;;  %2362 = vmatprep.subr.bf16.mxu1 %v2667_v39 }
  0xc0   : > { %1602 = vmatprep.subr.bf16.mxu0 %v2667_v39  ;;  %1452 = vmatprep.mubr.bf16.mxu1 %v2668_v40 }
  0xc1   : > { %1565 = vmatprep.mubr.bf16.mxu0 %v2670_v41 }
  0xc2   : > { %2378 = vmatpush1.bf16.msra.mxu1 %v2665_v42 }
  0xc3   : > { %1603 = vmatpush1.bf16.msra.mxu0 %v2665_v42  ;;  %2363 = vmatprep.subr.bf16.mxu1 %v2676_v43 }
  0xc4   : > { %1604 = vmatprep.subr.bf16.mxu0 %v2676_v43 }
  0xc5   : > { %1453 = vmatmul.mubr.bf16.gmra.mrb[28].mxu1 %v2672_v44 }
  0xc6   : > { %1566 = vmatmul.mubr.bf16.gmra.mrb[28].mxu0 %v2673_v45  ;;  %2379 = vmatpush1.bf16.msra.mxu1 %v2674_v46 }
  0xc7   : > { %1605 = vmatpush1.bf16.msra.mxu0 %v2674_v46  ;;  %2364 = vmatprep.subr.bf16.mxu1 %v2679_v47 }
  0xc8   : > { %1606 = vmatprep.subr.bf16.mxu0 %v2679_v47  ;;  %1608 = vmatprep.mubr.bf16.mxu0 %v2682_v48 }
  0xc9   : > { %1648 = vmatprep.mubr.bf16.mxu1 %v2685_v49 }
  0xca   : > { %2380 = vmatpush1.bf16.msra.mxu1 %v2677_v50 }
  0xcb   : > { %1607 = vmatpush1.bf16.msra.mxu0 %v2677_v50 }
  0xcd   : > { %1649 = vmatmul.mubr.bf16.vlgmr.msra.gmra.mrb[32].mxu1 %v2683_v52 }
  0xce   : > { %1609 = vmatmul.mubr.bf16.vlgmr.msra.gmra.mrb[0].mxu0 %v2680_v51  ;;  %1658 = vmatprep.mubr.bf16.mxu1 %v2688_v54 }
  0xcf   : > { %1618 = vmatprep.mubr.bf16.mxu0 %v2686_v53 }
  0xd5   : > { %1659 = vmatmul.mubr.bf16.gmra.mrb[36].mxu1 %v2691_v56 }
  0xd6   : > { %1619 = vmatmul.mubr.bf16.gmra.mrb[4].mxu0 %v2690_v55  ;;  %1668 = vmatprep.mubr.bf16.mxu1 %v2694_v58 }
  0xd7   : > { %1628 = vmatprep.mubr.bf16.mxu0 %v2692_v57 }
  0xdd   : > { %1669 = vmatmul.mubr.bf16.gmra.mrb[40].mxu1 %v2697_v60 }
  0xde   : > { %1629 = vmatmul.mubr.bf16.gmra.mrb[8].mxu0 %v2696_v59  ;;  %1678 = vmatprep.mubr.bf16.mxu1 %v2700_v62 }
  0xdf   : > { %1638 = vmatprep.mubr.bf16.mxu0 %v2698_v61 }
  0xe5   : > { %1679 = vmatmul.mubr.bf16.gmra.mrb[44].mxu1 %v2703_v0 }
  0xe6   : > { %1639 = vmatmul.mubr.bf16.gmra.mrb[12].mxu0 %v2702_v63 }
 0x160   : > { %v3069_v1 = vpop.f32.mrb[0].mxu1 }
 0x161   : > { %v3071_v2 = vpop.f32.mrb[1].mxu1 }
 0x162   : > { %v3073_v3 = vpop.f32.mrb[2].mxu1 }
 0x163   : > { %v3075_v4 = vpop.f32.mrb[3].mxu1 }
 0x168   : > { %v3077_v5 = vpop.f32.mrb[4].mxu1 }
 0x169   : > { %v3079_v6 = vpop.f32.mrb[5].mxu1 }
 0x16a   : > { %v3081_v7 = vpop.f32.mrb[6].mxu1 }
 0x16b   : > { %v3083_v8 = vpop.f32.mrb[7].mxu1 }
 0x170   : > { %v3085_v9 = vpop.f32.mrb[8].mxu1 }
 0x171   : > { %v3087_v10 = vpop.f32.mrb[9].mxu1 }
 0x172   : > { %v3089_v11 = vpop.f32.mrb[10].mxu1 }
 0x173   : > { %v3091_v12 = vpop.f32.mrb[11].mxu1 }
 0x178   : > { %v3093_v13 = vpop.f32.mrb[12].mxu1 }
 0x179   : > { %v3095_v14 = vpop.f32.mrb[13].mxu1 }
 0x17a   : > { %v3097_v15 = vpop.f32.mrb[14].mxu1 }
 0x17b   : > { %v3099_v16 = vpop.f32.mrb[15].mxu1 }
 0x180   : > { %v1424_v17 = vpop.f32.mrb[16].mxu1 }
 0x181   : > { %v1537_v18 = vpop.f32.mrb[16].mxu0  ;;  %v1426_v20 = vpop.f32.mrb[17].mxu1 }
 0x182   : > { %v1538_v19 = vadd.f32 %v1537_v18, %v1424_v17  ;;  %v1539_v21 = vpop.f32.mrb[17].mxu0  ;;  %v1428_v23 = vpop.f32.mrb[18].mxu1  ;;  %v449_v17 = vld [vmem:[#allocation2] sm:$0xff] }
 0x183   : > { %v1540_v22 = vadd.f32 %v1539_v21, %v1426_v20  ;;  %v1541_v24 = vpop.f32.mrb[18].mxu0  ;;  %v1430_v26 = vpop.f32.mrb[19].mxu1  ;;  %v465_v20 = vld [vmem:[#allocation2 + $0x80] sm:$0xff] }
 0x184   : > { %v1542_v25 = vadd.f32 %v1541_v24, %v1428_v23  ;;  %v1543_v27 = vpop.f32.mrb[19].mxu0 }
 0x185   : > { %v3101_v28 = vadd.f32 %v1543_v27, %v1430_v26  ;;  %v450_v26 = vld [vmem:[#allocation2 + $0x8] sm:$0xff] }
 0x188   : > { %v1434_v29 = vpop.f32.mrb[20].mxu1 }
 0x189   : > { %v1547_v30 = vpop.f32.mrb[20].mxu0  ;;  %v1436_v32 = vpop.f32.mrb[21].mxu1 }
 0x18a   : > { %v3103_v31 = vadd.f32 %v1547_v30, %v1434_v29  ;;  %v1549_v33 = vpop.f32.mrb[21].mxu0  ;;  %v1438_v35 = vpop.f32.mrb[22].mxu1  ;;  %v466_v29 = vld [vmem:[#allocation2 + $0x88] sm:$0xff] }
 0x18b   : > { %v3105_v34 = vadd.f32 %v1549_v33, %v1436_v32  ;;  %v1551_v36 = vpop.f32.mrb[22].mxu0  ;;  %v1440_v38 = vpop.f32.mrb[23].mxu1 }
 0x18c   : > { %v3107_v37 = vadd.f32 %v1551_v36, %v1438_v35  ;;  %v1553_v39 = vpop.f32.mrb[23].mxu0  ;;  %v451_v35 = vld [vmem:[#allocation2 + $0x10] sm:$0xff] }
 0x18d   : > { %v3109_v40 = vadd.f32 %v1553_v39, %v1440_v38  ;;  %v467_v38 = vld [vmem:[#allocation2 + $0x90] sm:$0xff] }
 0x190   : > { %v1444_v41 = vpop.f32.mrb[24].mxu1 }
 0x191   : > { %v1557_v42 = vpop.f32.mrb[24].mxu0  ;;  %v1446_v44 = vpop.f32.mrb[25].mxu1 }
 0x192   : > { %v3111_v43 = vadd.f32 %v1557_v42, %v1444_v41  ;;  %v1559_v45 = vpop.f32.mrb[25].mxu0  ;;  %v1448_v47 = vpop.f32.mrb[26].mxu1 }
 0x193   : > { %v3113_v46 = vadd.f32 %v1559_v45, %v1446_v44  ;;  %v1561_v48 = vpop.f32.mrb[26].mxu0  ;;  %v1450_v50 = vpop.f32.mrb[27].mxu1 }
 0x194   : > { %v3115_v49 = vadd.f32 %v1561_v48, %v1448_v47  ;;  %v1563_v51 = vpop.f32.mrb[27].mxu0  ;;  %v452_v47 = vld [vmem:[#allocation2 + $0x18] sm:$0xff] }
 0x195   : > { %v3117_v52 = vadd.f32 %v1563_v51, %v1450_v50 }
 0x198   : > { %v1454_v53 = vpop.f32.mrb[28].mxu1 }
 0x199   : > { %v1567_v54 = vpop.f32.mrb[28].mxu0  ;;  %v1456_v56 = vpop.f32.mrb[29].mxu1 }
 0x19a   : > { %v3119_v55 = vadd.f32 %v1567_v54, %v1454_v53  ;;  %v1569_v57 = vpop.f32.mrb[29].mxu0  ;;  %v1458_v59 = vpop.f32.mrb[30].mxu1 }
 0x19b   : > { %v3121_v58 = vadd.f32 %v1569_v57, %v1456_v56  ;;  %v1571_v60 = vpop.f32.mrb[30].mxu0  ;;  %v1460_v62 = vpop.f32.mrb[31].mxu1 }
 0x19c   : > { %v3123_v61 = vadd.f32 %v1571_v60, %v1458_v59  ;;  %v1573_v63 = vpop.f32.mrb[31].mxu0  ;;  %v469_v59 = vld [vmem:[#allocation2 + $0xa0] sm:$0xff] }
 0x19d   : > { %v3125_v0 = vadd.f32 %v1573_v63, %v1460_v62  ;;  %v454_v62 = vld [vmem:[#allocation2 + $0x28] sm:$0xff] }
 0x1a0   : > { %v1650_v21 = vpop.f32.mrb[32].mxu1 }
 0x1a1   : > { %v1610_v18 = vpop.f32.mrb[0].mxu0  ;;  %v1651_v24 = vadd.f32 %v1650_v21, %v1538_v19  ;;  %v1652_v30 = vpop.f32.mrb[33].mxu1 }
 0x1a2   : > { %v2381_v23 = vadd.f32 %v1610_v18, %v3069_v1  ;;  %v1612_v27 = vpop.f32.mrb[1].mxu0  ;;  %v1653_v33 = vadd.f32 %v1652_v30, %v1540_v22  ;;  %v1654_v39 = vpop.f32.mrb[34].mxu1  ;;  %v468_v1 = vld [vmem:[#allocation2 + $0x98] sm:$0xff] }
 0x1a3   : > { %v2382_v32 = vadd.f32 %v1612_v27, %v3071_v2  ;;  %v1614_v36 = vpop.f32.mrb[2].mxu0  ;;  %v1705_v42 = vadd.f32 %v1651_v24, %v465_v20  ;;  %v1655_v45 = vadd.f32 %v1654_v39, %v1542_v25  ;;  %v1656_v19 = vpop.f32.mrb[35].mxu1 }
 0x1a4   : > { %v1689_v41 = vadd.f32 %v2381_v23, %v449_v17  ;;  %v2383_v44 = vadd.f32 %v1614_v36, %v3073_v3  ;;  %v1616_v48 = vpop.f32.mrb[3].mxu0  ;;  %v1706_v51 = vadd.f32 %v1653_v33, %v466_v29  ;;  %v1657_v2 = vadd.f32 %v1656_v19, %v3101_v28  ;;  %v453_v3 = vld [vmem:[#allocation2 + $0x20] sm:$0xff]  ;;  %v470_v17 = vld [vmem:[#allocation2 + $0xa8] sm:$0xff]  ;;  %v455_v23 = vld [vmem:[#allocation2 + $0x30] sm:$0xff] }
 0x1a5   : > { %v1690_v50 = vadd.f32 %v2382_v32, %v450_v26  ;;  %v2384_v53 = vadd.f32 %v1616_v48, %v3075_v4  ;;  %1737 = vst [vmem:[#allocation2 + $0x80] sm:$0xff] %v1705_v42  ;;  %v1707_v54 = vadd.f32 %v1655_v45, %v467_v38  ;;  %v471_v26 = vld [vmem:[#allocation2 + $0xb0] sm:$0xff]  ;;  %v456_v33 = vld [vmem:[#allocation2 + $0x38] sm:$0xff] }
 0x1a6   : > { %1721 = vst [vmem:[#allocation2] sm:$0xff] %v1689_v41  ;;  %v1691_v22 = vadd.f32 %v2383_v44, %v451_v35  ;;  %1738 = vst [vmem:[#allocation2 + $0x88] sm:$0xff] %v1706_v51  ;;  %v1708_v57 = vadd.f32 %v1657_v2, %v468_v1  ;;  %v472_v35 = vld [vmem:[#allocation2 + $0xb8] sm:$0xff]  ;;  %v458_v1 = vld [vmem:[#allocation2 + $0x48] sm:$0xff] }
 0x1a7   : > { %1722 = vst [vmem:[#allocation2 + $0x8] sm:$0xff] %v1690_v50  ;;  %v1692_v56 = vadd.f32 %v2384_v53, %v452_v47  ;;  %1739 = vst [vmem:[#allocation2 + $0x90] sm:$0xff] %v1707_v54  ;;  %v473_v47 = vld [vmem:[#allocation2 + $0xc0] sm:$0xff]  ;;  %v474_v50 = vld [vmem:[#allocation2 + $0xc8] sm:$0xff] }
 0x1a8   : > { %1723 = vst [vmem:[#allocation2 + $0x10] sm:$0xff] %v1691_v22  ;;  %1740 = vst [vmem:[#allocation2 + $0x98] sm:$0xff] %v1708_v57  ;;  %v1660_v60 = vpop.f32.mrb[36].mxu1  ;;  %v459_v22 = vld [vmem:[#allocation2 + $0x50] sm:$0xff] }
 0x1a9   : > { %1724 = vst [vmem:[#allocation2 + $0x18] sm:$0xff] %v1692_v56  ;;  %v1620_v25 = vpop.f32.mrb[4].mxu0  ;;  %v1661_v28 = vadd.f32 %v1660_v60, %v3103_v31  ;;  %v1662_v18 = vpop.f32.mrb[37].mxu1  ;;  %v475_v56 = vld [vmem:[#allocation2 + $0xd0] sm:$0xff]  ;;  %v460_v60 = vld [vmem:[#allocation2 + $0x58] sm:$0xff] }
 0x1aa   : > { %v2385_v4 = vadd.f32 %v1620_v25, %v3077_v5  ;;  %v1622_v63 = vpop.f32.mrb[5].mxu0  ;;  %v1663_v21 = vadd.f32 %v1662_v18, %v3105_v34  ;;  %v1664_v27 = vpop.f32.mrb[38].mxu1 }
 0x1ab   : > { %v2386_v20 = vadd.f32 %v1622_v63, %v3079_v6  ;;  %v1624_v24 = vpop.f32.mrb[6].mxu0  ;;  %v1709_v30 = vadd.f32 %v1661_v28, %v469_v59  ;;  %v1665_v5 = vadd.f32 %v1664_v27, %v3107_v37  ;;  %v1666_v36 = vpop.f32.mrb[39].mxu1  ;;  %v457_v37 = vld [vmem:[#allocation2 + $0x40] sm:$0xff] }
 0x1ac   : > { %v1693_v29 = vadd.f32 %v2385_v4, %v453_v3  ;;  %v2387_v32 = vadd.f32 %v1624_v24, %v3081_v7  ;;  %v1626_v31 = vpop.f32.mrb[7].mxu0  ;;  %v1710_v39 = vadd.f32 %v1663_v21, %v470_v17  ;;  %v1667_v34 = vadd.f32 %v1666_v36, %v3109_v40  ;;  %v476_v4 = vld [vmem:[#allocation2 + $0xd8] sm:$0xff] }
 0x1ad   : > { %v1694_v38 = vadd.f32 %v2386_v20, %v454_v62  ;;  %v2388_v6 = vadd.f32 %v1626_v31, %v3083_v8  ;;  %1741 = vst [vmem:[#allocation2 + $0xa0] sm:$0xff] %v1709_v30  ;;  %v1711_v42 = vadd.f32 %v1665_v5, %v471_v26  ;;  %v462_v26 = vld [vmem:[#allocation2 + $0x68] sm:$0xff] }
 0x1ae   : > { %1725 = vst [vmem:[#allocation2 + $0x20] sm:$0xff] %v1693_v29  ;;  %v1695_v41 = vadd.f32 %v2387_v32, %v455_v23  ;;  %1742 = vst [vmem:[#allocation2 + $0xa8] sm:$0xff] %v1710_v39  ;;  %v1712_v7 = vadd.f32 %v1667_v34, %v472_v35  ;;  %v477_v23 = vld [vmem:[#allocation2 + $0xe0] sm:$0xff]  ;;  %v478_v29 = vld [vmem:[#allocation2 + $0xe8] sm:$0xff] }
 0x1af   : > { %1726 = vst [vmem:[#allocation2 + $0x28] sm:$0xff] %v1694_v38  ;;  %v1696_v44 = vadd.f32 %v2388_v6, %v456_v33  ;;  %1743 = vst [vmem:[#allocation2 + $0xb0] sm:$0xff] %v1711_v42  ;;  %v463_v33 = vld [vmem:[#allocation2 + $0x70] sm:$0xff]  ;;  %v464_v34 = vld [vmem:[#allocation2 + $0x78] sm:$0xff] }
 0x1b0   : > { %1727 = vst [vmem:[#allocation2 + $0x30] sm:$0xff] %v1695_v41  ;;  %1744 = vst [vmem:[#allocation2 + $0xb8] sm:$0xff] %v1712_v7  ;;  %v1670_v48 = vpop.f32.mrb[40].mxu1  ;;  %v479_v35 = vld [vmem:[#allocation2 + $0xf0] sm:$0xff]  ;;  %v480_v41 = vld [vmem:[#allocation2 + $0xf8] sm:$0xff] }
 0x1b1   : > { %1728 = vst [vmem:[#allocation2 + $0x38] sm:$0xff] %v1696_v44  ;;  %v1630_v45 = vpop.f32.mrb[8].mxu0  ;;  %v1671_v40 = vadd.f32 %v1670_v48, %v3111_v43  ;;  %v1672_v51 = vpop.f32.mrb[41].mxu1 }
 0x1b2   : > { %v2389_v8 = vadd.f32 %v1630_v45, %v3085_v9  ;;  %v1632_v19 = vpop.f32.mrb[9].mxu0  ;;  %v1673_v2 = vadd.f32 %v1672_v51, %v3113_v46  ;;  %v1674_v57 = vpop.f32.mrb[42].mxu1  ;;  %v1760_v51 = vld [vmem:[#allocation2 + $0x18] sm:$0xff] (!%p2310_p10) }
 0x1b3   : > { %v2390_v53 = vadd.f32 %v1632_v19, %v3087_v10  ;;  %v1634_v54 = vpop.f32.mrb[10].mxu0  ;;  %v1713_v25 = vadd.f32 %v1671_v40, %v473_v47  ;;  %v1675_v9 = vadd.f32 %v1674_v57, %v3115_v49  ;;  %v1676_v28 = vpop.f32.mrb[43].mxu1  ;;  %v461_v49 = vld [vmem:[#allocation2 + $0x60] sm:$0xff]  ;;  %v1758_v40 = vld [vmem:[#allocation2 + $0x8] sm:$0xff] (!%p2310_p10) }
 0x1b4   : > { %v1697_v3 = vadd.f32 %v2389_v8, %v457_v37  ;;  %v2391_v59 = vadd.f32 %v1634_v54, %v3089_v11  ;;  %v1636_v43 = vpop.f32.mrb[11].mxu0  ;;  %v1714_v63 = vadd.f32 %v1673_v2, %v474_v50  ;;  %v1677_v46 = vadd.f32 %v1676_v28, %v3117_v52  ;;  %v1757_v8 = vld [vmem:[#allocation2] sm:$0xff] (!%p2310_p10)  ;;  %v1759_v50 = vld [vmem:[#allocation2 + $0x10] sm:$0xff] (!%p2310_p10) }
 0x1b5   : > { %v1698_v62 = vadd.f32 %v2390_v53, %v458_v1  ;;  %v2392_v10 = vadd.f32 %v1636_v43, %v3091_v12  ;;  %1745 = vst [vmem:[#allocation2 + $0xc0] sm:$0xff] %v1713_v25  ;;  %v1715_v18 = vadd.f32 %v1675_v9, %v475_v56  ;;  %v1761_v53 = vld [vmem:[#allocation2 + $0x20] sm:$0xff] (!%p2310_p10) }
 0x1b6   : > { %1729 = vst [vmem:[#allocation2 + $0x40] sm:$0xff] %v1697_v3  ;;  %v1699_v17 = vadd.f32 %v2391_v59, %v459_v22  ;;  %1746 = vst [vmem:[#allocation2 + $0xc8] sm:$0xff] %v1714_v63  ;;  %v1716_v11 = vadd.f32 %v1677_v46, %v476_v4  ;;  %v1762_v57 = vld [vmem:[#allocation2 + $0x28] sm:$0xff] (!%p2310_p10) }
 0x1b7   : > { %1730 = vst [vmem:[#allocation2 + $0x48] sm:$0xff] %v1698_v62  ;;  %v1700_v20 = vadd.f32 %v2392_v10, %v460_v60  ;;  %1747 = vst [vmem:[#allocation2 + $0xd0] sm:$0xff] %v1715_v18  ;;  %v1763_v3 = vld [vmem:[#allocation2 + $0x30] sm:$0xff] (!%p2310_p10) }
 0x1b8   : > { %1731 = vst [vmem:[#allocation2 + $0x50] sm:$0xff] %v1699_v17  ;;  %1748 = vst [vmem:[#allocation2 + $0xd8] sm:$0xff] %v1716_v11  ;;  %v1680_v24 = vpop.f32.mrb[44].mxu1  ;;  %v1764_v25 = vld [vmem:[#allocation2 + $0x38] sm:$0xff] (!%p2310_p10) }
 0x1b9   : > { %1732 = vst [vmem:[#allocation2 + $0x58] sm:$0xff] %v1700_v20  ;;  %v1640_v21 = vpop.f32.mrb[12].mxu0  ;;  %v1681_v52 = vadd.f32 %v1680_v24, %v3119_v55  ;;  %v1682_v30 = vpop.f32.mrb[45].mxu1 }
 0x1ba   : > { %v2393_v12 = vadd.f32 %v1640_v21, %v3093_v13  ;;  %v1642_v27 = vpop.f32.mrb[13].mxu0  ;;  %v1683_v5 = vadd.f32 %v1682_v30, %v3121_v58  ;;  %v1684_v36 = vpop.f32.mrb[46].mxu1 }
 0x1bb   : > { %v2394_v32 = vadd.f32 %v1642_v27, %v3095_v14  ;;  %v1644_v31 = vpop.f32.mrb[14].mxu0  ;;  %v1717_v39 = vadd.f32 %v1681_v52, %v477_v23  ;;  %v1685_v13 = vadd.f32 %v1684_v36, %v3123_v61  ;;  %v1686_v42 = vpop.f32.mrb[47].mxu1  ;;  %1756 = sbr.rel (%p2310_p10) target bundleno = 484 (0x1e4), region = 67  ;;  %v1791_v61 = vlaneseq (!%p2310_p10) }
 0x1bc   : > { %v1701_v38 = vadd.f32 %v2393_v12, %v461_v49  ;;  %v2395_v6 = vadd.f32 %v1644_v31, %v3097_v15  ;;  %v1646_v55 = vpop.f32.mrb[15].mxu0  ;;  %v1718_v7 = vadd.f32 %v1683_v5, %v478_v29  ;;  %v1687_v58 = vadd.f32 %v1686_v42, %v3125_v0  ;;  %v1833_v0 = vld [vmem:[%s3301_s3] sm:$0x3] (!%p2310_p10) }
 0x1bd   : > { %v1702_v44 = vadd.f32 %v2394_v32, %v462_v26  ;;  %v2396_v14 = vadd.f32 %v1646_v55, %v3099_v16  ;;  %1749 = vst [vmem:[#allocation2 + $0xe0] sm:$0xff] %v1717_v39  ;;  %v1719_v45 = vadd.f32 %v1685_v13, %v479_v35  ;;  %v1792_v48 = vshrl.u32 (!%p2310_p10), %v1791_v61, 7  ;;  %v1789_v16 = vld [vmem:[%s3300_s2] sm:$0x3] (!%p2310_p10) }
 0x1be   : > { %1733 = vst [vmem:[#allocation2 + $0x60] sm:$0xff] %v1701_v38  ;;  %v1703_v37 = vadd.f32 %v2395_v6, %v463_v33  ;;  %1750 = vst [vmem:[#allocation2 + $0xe8] sm:$0xff] %v1718_v7  ;;  %v1720_v15 = vadd.f32 %v1687_v58, %v480_v41  ;;  %v1765_v23 = vld [vmem:[#allocation2 + $0x40] sm:$0xff] (!%p2310_p10)  ;;  %v1766_v24 = vld [vmem:[#allocation2 + $0x48] sm:$0xff] (!%p2310_p10) }
 0x1bf   : > { %1734 = vst [vmem:[#allocation2 + $0x68] sm:$0xff] %v1702_v44  ;;  %v1704_v47 = vadd.f32 %v2396_v14, %v464_v34  ;;  %1751 = vst [vmem:[#allocation2 + $0xf0] sm:$0xff] %v1719_v45  ;;  %v1793_v1 = vsub.s32 (!%p2310_p10), 0, %v1792_v48  ;;  %v1797_v19 = vsub.s32 (!%p2310_p10), 1, %v1792_v48  ;;  %v1767_v29 = vld [vmem:[#allocation2 + $0x50] sm:$0xff] (!%p2310_p10) }
 0x1c0   : > { %1735 = vst [vmem:[#allocation2 + $0x70] sm:$0xff] %v1703_v37  ;;  %1752 = vst [vmem:[#allocation2 + $0xf8] sm:$0xff] %v1720_v15  ;;  %v1768_v30 = vld [vmem:[#allocation2 + $0x58] sm:$0xff] (!%p2310_p10) }
 0x1c1   : > { %1736 = vst [vmem:[#allocation2 + $0x78] sm:$0xff] %v1704_v47  ;;  %v3163_v2 = vrot.slane (!%p2310_p10), %v1789_v16, %v1793_v1  ;;  %v3165_v22 = vrot.slane (!%p2310_p10), %v1789_v16, %v1797_v19  ;;  %v3167_v54 = vrot.slane (!%p2310_p10), %v1833_v0, %v1793_v1  ;;  %v3169_v56 = vrot.slane (!%p2310_p10), %v1833_v0, %v1797_v19  ;;  %v1773_v16 = vld [vmem:[#allocation2 + $0x80] sm:$0xff] (!%p2310_p10)  ;;  %v1774_v19 = vld [vmem:[#allocation2 + $0x88] sm:$0xff] (!%p2310_p10) }
 0x1c3   : > { %v1801_v59 = vmul.f32 %v3163_v2, %v1757_v8  ;;  %v1802_v9 = vmul.f32 %v3165_v22, %v1758_v40  ;;  %v1803_v60 = vmul.f32 %v3163_v2, %v1759_v50  ;;  %v1804_v43 = vmul.f32 %v3165_v22, %v1760_v51 }
 0x1c4   : > { %v1805_v4 = vmul.f32 %v3163_v2, %v1761_v53  ;;  %v1806_v28 = vmul.f32 %v3165_v22, %v1762_v57  ;;  %v1807_v62 = vmul.f32 %v3163_v2, %v1763_v3  ;;  %v1808_v63 = vmul.f32 %v3165_v22, %v1764_v25  ;;  %v1775_v3 = vld [vmem:[#allocation2 + $0x90] sm:$0xff]  ;;  %v1776_v25 = vld [vmem:[#allocation2 + $0x98] sm:$0xff] }
 0x1c5   : > { %v1845_v10 = vadd.f32 %v3167_v54, %v1801_v59  ;;  %v1846_v46 = vadd.f32 %v3169_v56, %v1802_v9  ;;  %v1847_v17 = vadd.f32 %v3167_v54, %v1803_v60  ;;  %v1848_v18 = vadd.f32 %v3169_v56, %v1804_v43  ;;  %v1769_v35 = vld [vmem:[#allocation2 + $0x60] sm:$0xff] }
 0x1c6   : > { %v1849_v20 = vadd.f32 %v3167_v54, %v1805_v4  ;;  %v1850_v11 = vadd.f32 %v3169_v56, %v1806_v28  ;;  %v1851_v49 = vadd.f32 %v3167_v54, %v1807_v62  ;;  %v1852_v21 = vadd.f32 %v3169_v56, %v1808_v63  ;;  %v1770_v36 = vld [vmem:[#allocation2 + $0x68] sm:$0xff]  ;;  %v1777_v4 = vld [vmem:[#allocation2 + $0xa0] sm:$0xff] }
 0x1c7   : > { %v1877_v12 = vmax.f32 %v1845_v10, 0.0  ;;  %v1878_v52 = vmax.f32 %v1846_v46, 0.0  ;;  %v1879_v26 = vmax.f32 %v1847_v17, 0.0  ;;  %v1880_v27 = vmax.f32 %v1848_v18, 0.0  ;;  %v1771_v34 = vld [vmem:[#allocation2 + $0x70] sm:$0xff]  ;;  %v1778_v28 = vld [vmem:[#allocation2 + $0xa8] sm:$0xff] }
 0x1c8   : > { %v1881_v32 = vmax.f32 %v1849_v20, 0.0  ;;  %v1882_v5 = vmax.f32 %v1850_v11, 0.0  ;;  %v1883_v33 = vmax.f32 %v1851_v49, 0.0  ;;  %v1884_v31 = vmax.f32 %v1852_v21, 0.0  ;;  %v1772_v55 = vld [vmem:[#allocation2 + $0x78] sm:$0xff]  ;;  %v1779_v17 = vld [vmem:[#allocation2 + $0xb0] sm:$0xff] }
 0x1c9   : > { %v2333_v38 = vpack.c.bf16 %v1878_v52, %v1877_v12  ;;  %v2334_v39 = vpack.c.bf16 %v1880_v27, %v1879_v26  ;;  %v1809_v6 = vmul.f32 %v3163_v2, %v1765_v23  ;;  %v1810_v13 = vmul.f32 %v3165_v22, %v1766_v24  ;;  %v1780_v21 = vld [vmem:[#allocation2 + $0xb8] sm:$0xff]  ;;  %v1781_v26 = vld [vmem:[#allocation2 + $0xc0] sm:$0xff] }
 0x1ca   : > { %v2335_v41 = vpack.c.bf16 %v1882_v5, %v1881_v32  ;;  %v2336_v42 = vpack.c.bf16 %v1884_v31, %v1883_v33  ;;  %v1811_v44 = vmul.f32 %v3163_v2, %v1767_v29  ;;  %v1812_v7 = vmul.f32 %v3165_v22, %v1768_v30 }
 0x1cb   : > { %2005 = vst [vmem:[%s3302_s4] sm:$0xff] %v2333_v38  ;;  %2006 = vst [vmem:[%s3302_s4 + $0x8] sm:$0xff] %v2334_v39  ;;  %v1853_v14 = vadd.f32 %v3167_v54, %v1809_v6  ;;  %v1854_v58 = vadd.f32 %v3169_v56, %v1810_v13  ;;  %v1813_v37 = vmul.f32 %v3163_v2, %v1769_v35 }
 0x1cc   : > { %v1814_v45 = vmul.f32 %v3165_v22, %v1770_v36  ;;  %2007 = vst [vmem:[%s3302_s4 + $0x10] sm:$0xff] %v2335_v41  ;;  %2008 = vst [vmem:[%s3302_s4 + $0x18] sm:$0xff] %v2336_v42  ;;  %v1855_v47 = vadd.f32 %v3167_v54, %v1811_v44  ;;  %v1856_v15 = vadd.f32 %v3169_v56, %v1812_v7  ;;  %v1782_v36 = vld [vmem:[#allocation2 + $0xc8] sm:$0xff] }
 0x1cd   : > { %v1815_v61 = vmul.f32 %v3163_v2, %v1771_v34  ;;  %v1816_v48 = vmul.f32 %v3165_v22, %v1772_v55  ;;  %v1885_v0 = vmax.f32 %v1853_v14, 0.0  ;;  %v1886_v8 = vmax.f32 %v1854_v58, 0.0  ;;  %v1783_v34 = vld [vmem:[#allocation2 + $0xd0] sm:$0xff]  ;;  %v1784_v55 = vld [vmem:[#allocation2 + $0xd8] sm:$0xff]  ;;  %v1785_v14 = vld [vmem:[#allocation2 + $0xe0] sm:$0xff] }
 0x1ce   : > { %v1857_v40 = vadd.f32 %v3167_v54, %v1813_v37  ;;  %v1858_v1 = vadd.f32 %v3169_v56, %v1814_v45  ;;  %v1887_v50 = vmax.f32 %v1855_v47, 0.0  ;;  %v1888_v51 = vmax.f32 %v1856_v15, 0.0  ;;  %v1786_v58 = vld [vmem:[#allocation2 + $0xe8] sm:$0xff] }
 0x1cf   : > { %v1859_v53 = vadd.f32 %v3167_v54, %v1815_v61  ;;  %v1860_v57 = vadd.f32 %v3169_v56, %v1816_v48  ;;  %v2337_v59 = vpack.c.bf16 %v1886_v8, %v1885_v0  ;;  %v1817_v43 = vmul.f32 %v3163_v2, %v1773_v16  ;;  %v1787_v61 = vld [vmem:[#allocation2 + $0xf0] sm:$0xff] }
 0x1d0   : > { %v1889_v9 = vmax.f32 %v1857_v40, 0.0  ;;  %v1890_v60 = vmax.f32 %v1858_v1, 0.0  ;;  %v2338_v62 = vpack.c.bf16 %v1888_v51, %v1887_v50  ;;  %v1818_v46 = vmul.f32 %v3165_v22, %v1774_v19  ;;  %v1788_v40 = vld [vmem:[#allocation2 + $0xf8] sm:$0xff] }
 0x1d1   : > { %v1891_v63 = vmax.f32 %v1859_v53, 0.0  ;;  %v1892_v10 = vmax.f32 %v1860_v57, 0.0  ;;  %2009 = vst [vmem:[%s3302_s4 + $0x20] sm:$0xff] %v2337_v59  ;;  %v1861_v20 = vadd.f32 %v3167_v54, %v1817_v43  ;;  %v1819_v11 = vmul.f32 %v3163_v2, %v1775_v3 }
 0x1d2   : > { %v2339_v18 = vpack.c.bf16 %v1890_v60, %v1889_v9  ;;  %v1820_v49 = vmul.f32 %v3165_v22, %v1776_v25  ;;  %2010 = vst [vmem:[%s3302_s4 + $0x28] sm:$0xff] %v2338_v62  ;;  %v1862_v24 = vadd.f32 %v3169_v56, %v1818_v46  ;;  %v1821_v12 = vmul.f32 %v3163_v2, %v1777_v4 }
 0x1d3   : > { %v2340_v23 = vpack.c.bf16 %v1892_v10, %v1891_v63  ;;  %v1822_v52 = vmul.f32 %v3165_v22, %v1778_v28  ;;  %v1893_v27 = vmax.f32 %v1861_v20, 0.0  ;;  %v1863_v29 = vadd.f32 %v3167_v54, %v1819_v11 }
 0x1d4   : > { %2011 = vst [vmem:[%s3302_s4 + $0x30] sm:$0xff] %v2339_v18  ;;  %v1864_v30 = vadd.f32 %v3169_v56, %v1820_v49  ;;  %v1823_v32 = vmul.f32 %v3163_v2, %v1779_v17  ;;  %v1894_v5 = vmax.f32 %v1862_v24, 0.0  ;;  %v1865_v33 = vadd.f32 %v3167_v54, %v1821_v12 }
 0x1d5   : > { %2012 = vst [vmem:[%s3302_s4 + $0x38] sm:$0xff] %v2340_v23  ;;  %v1866_v31 = vadd.f32 %v3169_v56, %v1822_v52  ;;  %v1824_v35 = vmul.f32 %v3165_v22, %v1780_v21  ;;  %v1895_v38 = vmax.f32 %v1863_v29, 0.0  ;;  %v1825_v13 = vmul.f32 %v3163_v2, %v1781_v26 }
 0x1d6   : > { %v1896_v39 = vmax.f32 %v1864_v30, 0.0  ;;  %v1867_v6 = vadd.f32 %v3167_v54, %v1823_v32  ;;  %v2341_v41 = vpack.c.bf16 %v1894_v5, %v1893_v27  ;;  %v1897_v42 = vmax.f32 %v1865_v33, 0.0 }
 0x1d7   : > { %v1898_v44 = vmax.f32 %v1866_v31, 0.0  ;;  %v1868_v7 = vadd.f32 %v3169_v56, %v1824_v35  ;;  %v1826_v47 = vmul.f32 %v3165_v22, %v1782_v36  ;;  %v1869_v15 = vadd.f32 %v3167_v54, %v1825_v13 }
 0x1d8   : > { %v2342_v37 = vpack.c.bf16 %v1896_v39, %v1895_v38  ;;  %v1899_v45 = vmax.f32 %v1867_v6, 0.0  ;;  %2013 = vst [vmem:[%s3302_s4 + $0x40] sm:$0xff] %v2341_v41  ;;  %v1827_v0 = vmul.f32 %v3163_v2, %v1783_v34  ;;  %v1828_v8 = vmul.f32 %v3165_v22, %v1784_v55 }
 0x1d9   : > { %v2343_v48 = vpack.c.bf16 %v1898_v44, %v1897_v42  ;;  %v1900_v16 = vmax.f32 %v1868_v7, 0.0  ;;  %v1870_v1 = vadd.f32 %v3169_v56, %v1826_v47  ;;  %v1901_v19 = vmax.f32 %v1869_v15, 0.0 }
 0x1da   : > { %2014 = vst [vmem:[%s3302_s4 + $0x48] sm:$0xff] %v2342_v37  ;;  %v1829_v50 = vmul.f32 %v3163_v2, %v1785_v14  ;;  %v1830_v51 = vmul.f32 %v3165_v22, %v1786_v58  ;;  %v1871_v57 = vadd.f32 %v3167_v54, %v1827_v0  ;;  %v1872_v3 = vadd.f32 %v3169_v56, %v1828_v8 }
 0x1db   : > { %2015 = vst [vmem:[%s3302_s4 + $0x50] sm:$0xff] %v2343_v48  ;;  %v2344_v53 = vpack.c.bf16 %v1900_v16, %v1899_v45  ;;  %v1831_v25 = vmul.f32 %v3163_v2, %v1787_v61  ;;  %v1902_v59 = vmax.f32 %v1870_v1, 0.0  ;;  %v1832_v43 = vmul.f32 %v3165_v22, %v1788_v40 }
 0x1dc   : > { %v1873_v9 = vadd.f32 %v3167_v54, %v1829_v50  ;;  %v1874_v60 = vadd.f32 %v3169_v56, %v1830_v51  ;;  %v1903_v4 = vmax.f32 %v1871_v57, 0.0  ;;  %v1904_v28 = vmax.f32 %v1872_v3, 0.0 }
 0x1dd   : > { %2016 = vst [vmem:[%s3302_s4 + $0x58] sm:$0xff] %v2344_v53  ;;  %v1875_v62 = vadd.f32 %v3167_v54, %v1831_v25  ;;  %v2345_v63 = vpack.c.bf16 %v1902_v59, %v1901_v19  ;;  %v1876_v2 = vadd.f32 %v3169_v56, %v1832_v43 }
 0x1de   : > { %v1905_v10 = vmax.f32 %v1873_v9, 0.0  ;;  %v1906_v46 = vmax.f32 %v1874_v60, 0.0  ;;  %v2346_v17 = vpack.c.bf16 %v1904_v28, %v1903_v4 }
 0x1df   : > { %v1907_v18 = vmax.f32 %v1875_v62, 0.0  ;;  %2017 = vst [vmem:[%s3302_s4 + $0x60] sm:$0xff] %v2345_v63  ;;  %v1908_v20 = vmax.f32 %v1876_v2, 0.0 }
 0x1e0   : > { %v2347_v22 = vpack.c.bf16 %v1906_v46, %v1905_v10  ;;  %2018 = vst [vmem:[%s3302_s4 + $0x68] sm:$0xff] %v2346_v17 }
 0x1e1   : > { %v2348_v54 = vpack.c.bf16 %v1908_v20, %v1907_v18 }
 0x1e2   : > { %2019 = vst [vmem:[%s3302_s4 + $0x70] sm:$0xff] %v2347_v22 }
 0x1e3   : > { %2020 = vst [vmem:[%s3302_s4 + $0x78] sm:$0xff] %v2348_v54 }
 0x1e4 PF: > { %s14_s19 = sadd.s32 1, %s2742_s19   ;;  %s3303_s15 = smov %s2730_s16 }
 0x1e5   : > { %p11_p11 = scmp.ge.s32.totalorder %s14_s19, 5   ;;  %s3304_s16 = smov %s2805_s23 }
 0x1e6   : > { %s3305_s17 = smov %s2738_s18  ;;  %s3306_s18 = smov %s3308_s20 }
 0x1e7   :  { %13 = sbr.rel (!%p11_p11) target bundleno = 3 (0x3), region = 112 }

</bundles_post_ra>
